<compile_context>
chip_gen: v7x
topology: tpu7x:2x2x1
jax: 0.10.0
libtpu: 0.0.40
codegen_flags: <defaults>
</compile_context>

<pallas_src>
import functools

import jax
import jax.numpy as jnp
from jax.experimental import pallas as pl
from jax.experimental.pallas import tpu as pltpu


# ---------------------------------------------------------------------------
# Fused whole-network Pallas kernel (one batch tile per grid step)
# ---------------------------------------------------------------------------
def feature_fused_kernel(x_ref, s1_ref, t1_ref, w2_ref, t2_ref, w3_ref, t3_ref,
                         w4_ref, t4_ref, w5_ref, t5_ref, wf_ref, tf_ref, o_ref,
                         *, tile_n, height, width):
    f32 = jnp.float32
    TN, H, W1 = tile_n, height, width
    R = H * TN                     # rows per width-position block, ordered (h, n)
    Wo2, Wo4 = W1 // 2, W1 // 4    # widths after conv2 / conv4 (stride-2, pad-1, kw=3)

    s1 = s1_ref[...]               # (1, 32)  conv1 weight * BN scale
    t1 = t1_ref[...]               # (1, 32)

    # -- conv1 (1x1, Cin=1) + bn1 + relu: per-channel affine, row order (w-block: (h, n)) --
    xs = [x_ref[h] for h in range(H)]                         # each (TN, W1)
    a1 = []
    for w in range(W1):
        cols = [xs[h][:, w:w + 1] * s1 + t1 for h in range(H)]   # (TN, 32) each
        a1.append(jnp.maximum(jnp.concatenate(cols, axis=0), 0.0))  # (R, 32)
    zeros32 = jnp.zeros((R, s1.shape[1]), f32)

    # -- conv2 (kw=3, stride 2, pad 1) + bn2 + relu: tap decomposition, rows (wo, h, n) ----
    z2 = None
    for k in range(3):
        taps = [a1[2 * wo - 1 + k] if 0 <= 2 * wo - 1 + k < W1 else zeros32
                for wo in range(Wo2)]
        part = jnp.dot(jnp.concatenate(taps, axis=0), w2_ref[k],
                       preferred_element_type=f32)
        z2 = part if z2 is None else z2 + part
    a2 = jnp.maximum(z2 + t2_ref[...], 0.0)                   # (Wo2*R, 64)

    # -- conv3 (1x1) + bn3 + relu ----------------------------------------------------------
    a3 = jnp.maximum(jnp.dot(a2, w3_ref[...], preferred_element_type=f32)
                     + t3_ref[...], 0.0)                      # (Wo2*R, 128)
    zeros128 = jnp.zeros((R, a3.shape[1]), f32)

    # -- conv4 (kw=3, stride 2, pad 1) + bn4 + relu: lane-aligned im2col, ONE K=384 matmul --
    p4_rows = []
    for wo in range(Wo4):
        taps = []
        for k in range(3):
            w = 2 * wo - 1 + k
            taps.append(a3[w * R:(w + 1) * R, :] if 0 <= w < Wo2 else zeros128)
        p4_rows.append(jnp.concatenate(taps, axis=1))         # (R, 384), lane-aligned
    p4 = jnp.concatenate(p4_rows, axis=0)                     # (Wo4*R, 384)
    a4 = jnp.maximum(jnp.dot(p4, w4_ref[...], preferred_element_type=f32)
                     + t4_ref[...], 0.0)                      # (Wo4*R, 256), rows (kw, kh, n)

    # -- conv5 (kernel [H, Wo4] -> 1x1 spatial) + bn5 + relu --------------------------------
    # Contiguous, 8-aligned (TN, 256) slabs per (kw, kh); lane order (kw, kh, ci) matches the
    # host-side weight flattening.  Single (TN, H*Wo4*256) @ (., 512) MXU matmul.
    slabs = [a4[kw * R + kh * TN: kw * R + (kh + 1) * TN, :]
             for kw in range(Wo4) for kh in range(H)]
    p5 = jnp.concatenate(slabs, axis=1)                       # (TN, Wo4*H*256)
    a5 = jnp.maximum(jnp.dot(p5, w5_ref[...], preferred_element_type=f32)
                     + t5_ref[...], 0.0)                      # (TN, 512) == .view(N, 512)

    # -- fc1 + bn1_fc + relu (dropout = identity at inference) -------------------------------
    o_ref[...] = jnp.maximum(jnp.dot(a5, wf_ref[...], preferred_element_type=f32)
                             + tf_ref[...], 0.0)              # (TN, 256)


# ---------------------------------------------------------------------------
# Host wrapper: BN folding (scale folded into weights), batch tiling, pallas_call
# ---------------------------------------------------------------------------
def _fold_bn(conv_bias, bn, eps=1e-5):
    gamma, beta, mean, var = bn
    s = gamma / jnp.sqrt(var + eps)
    return s, conv_bias * s + beta - mean * s


def _const_spec(a):
    zeros = (0,) * a.ndim
    return pl.BlockSpec(a.shape, lambda i, _z=zeros: _z)


def feature_forward(x_nchw, params, *, tile_n=8):
    N, Cin, H, W = x_nchw.shape
    assert Cin == 1, "Feature expects a single input channel"
    assert W % 4 == 0, "two stride-2 convs assume W divisible by 4"
    assert tile_n % 8 == 0, "tile_n must be sublane-aligned"
    Wo4 = W // 4
    c5 = params['conv5_w']                                     # (512, 256, H, Wo4)
    assert c5.shape[2] == H and c5.shape[3] == Wo4, "conv5 must reduce spatial to 1x1"

    # ---- fold BN (+ conv bias); fold the BN scale into every weight matrix ----------------
    s1b, t1 = _fold_bn(params['conv1_b'], params['bn1'])
    s1 = s1b * params['conv1_w'][:, 0, 0, 0]                   # conv1 weight folded too
    s2, t2 = _fold_bn(params['conv2_b'], params['bn2'])
    w2 = jnp.transpose(params['conv2_w'][:, :, 0, :], (2, 1, 0)) * s2[None, None, :]  # (3,32,64)
    s3, t3 = _fold_bn(params['conv3_b'], params['bn3'])
    w3 = params['conv3_w'][:, :, 0, 0].T * s3[None, :]                                # (64,128)
    s4, t4 = _fold_bn(params['conv4_b'], params['bn4'])
    w4 = jnp.transpose(params['conv4_w'][:, :, 0, :], (2, 1, 0)).reshape(3 * 128, 256)
    w4 = w4 * s4[None, :]                                                             # (384,256)
    s5, t5 = _fold_bn(params['conv5_b'], params['bn5'])
    w5 = jnp.transpose(c5, (3, 2, 1, 0)).reshape(Wo4 * H * c5.shape[1], c5.shape[0])  # (kw,kh,ci)
    w5 = w5 * s5[None, :]                                                             # (3072,512)
    sf, tf = _fold_bn(params['fc1_b'], params['bn1_fc'])
    wf = params['fc1_w'].T * sf[None, :]                                              # (512,256)

    row = lambda v: v.reshape(1, -1)

    # ---- batch pad to a multiple of the tile; feed as (H, N_pad, W) so rows are (h, n) -----
    TN = tile_n
    n_tiles = pl.cdiv(N, TN)
    N_pad = n_tiles * TN
    x3 = x_nchw[:, 0]                                          # (N, H, W)
    if N_pad != N:
        x3 = jnp.concatenate([x3, jnp.zeros((N_pad - N, H, W), x3.dtype)], axis=0)
    x_hnw = jnp.transpose(x3, (1, 0, 2))                       # (H, N_pad, W)

    weight_args = (row(s1), row(t1), w2, row(t2), w3, row(t3),
                   w4, row(t4), w5, row(t5), wf, row(tf))

    kernel = functools.partial(feature_fused_kernel, tile_n=TN, height=H, width=W)
    out = pl.pallas_call(
        kernel,
        out_shape=jax.ShapeDtypeStruct((N_pad, wf.shape[1]), jnp.float32),
        grid=(n_tiles,),
        in_specs=[pl.BlockSpec((H, TN, W), lambda i: (0, i, 0))]
                 + [_const_spec(a) for a in weight_args],
        out_specs=pl.BlockSpec((TN, wf.shape[1]), lambda i: (i, 0)),
        compiler_params=pltpu.CompilerParams(
            dimension_semantics=("parallel",),
            vmem_limit_bytes=48 * 1024 * 1024,
        ),
    )(x_hnw, *weight_args)
    return out[:N]


# ---------------------------------------------------------------------------
# Deterministic parameter init (shapes from Feature.__init__, NW / sensor_num=3)
# ---------------------------------------------------------------------------
def init_params(key, H):
    keys = iter(jax.random.split(key, 40))

    def conv_w(cout, cin, kh, kw):
        return 0.1 * jax.random.normal(next(keys), (cout, cin, kh, kw), jnp.float32)

    def vec(c):
        return 0.1 * jax.random.normal(next(keys), (c,), jnp.float32)

    def bn(c):
        gamma = 1.0 + 0.1 * jax.random.normal(next(keys), (c,), jnp.float32)
        beta = 0.1 * jax.random.normal(next(keys), (c,), jnp.float32)
        mean = 0.1 * jax.random.normal(next(keys), (c,), jnp.float32)
        var = 0.5 + jax.random.uniform(next(keys), (c,), jnp.float32)
        return (gamma, beta, mean, var)

    return dict(
        conv1_w=conv_w(32, 1, 1, 1), conv1_b=vec(32), bn1=bn(32),
        conv2_w=conv_w(64, 32, 1, 3), conv2_b=vec(64), bn2=bn(64),
        conv3_w=conv_w(128, 64, 1, 1), conv3_b=vec(128), bn3=bn(128),
        conv4_w=conv_w(256, 128, 1, 3), conv4_b=vec(256), bn4=bn(256),
        conv5_w=conv_w(512, 256, H, 3), conv5_b=vec(512), bn5=bn(512),
        fc1_w=0.1 * jax.random.normal(next(keys), (256, 512), jnp.float32),
        fc1_b=vec(256), bn1_fc=bn(256),
    )


# ---------------------------------------------------------------------------
# Pure-JAX reference (lax.conv, f32-exact) for correctness check
# ---------------------------------------------------------------------------
def _ref_forward(x_nchw, params):
    hp = jax.lax.Precision.HIGHEST

    def conv(x, w, b, stride, pad):
        y = jax.lax.conv_general_dilated(
            x, w, window_strides=(1, stride), padding=((0, 0), (pad, pad)),
            dimension_numbers=('NCHW', 'OIHW', 'NCHW'), precision=hp)
        return y + b[None, :, None, None]

    def bn2d(x, p):
        gamma, beta, mean, var = p
        s = gamma / jnp.sqrt(var + 1e-5)
        return x * s[None, :, None, None] + (beta - mean * s)[None, :, None, None]

    x = jax.nn.relu(bn2d(conv(x_nchw, params['conv1_w'], params['conv1_b'], 1, 0), params['bn1']))
    x = jax.nn.relu(bn2d(conv(x, params['conv2_w'], params['conv2_b'], 2, 1), params['bn2']))
    x = jax.nn.relu(bn2d(conv(x, params['conv3_w'], params['conv3_b'], 1, 0), params['bn3']))
    x = jax.nn.relu(bn2d(conv(x, params['conv4_w'], params['conv4_b'], 2, 1), params['bn4']))
    x = jax.nn.relu(bn2d(conv(x, params['conv5_w'], params['conv5_b'], 1, 0), params['bn5']))
    x = x.reshape(x.shape[0], 512)
    z = jnp.dot(x, params['fc1_w'].T, precision=hp) + params['fc1_b']
    gamma, beta, mean, var = params['bn1_fc']
    s = gamma / jnp.sqrt(var + 1e-5)
    return jax.nn.relu(z * s + (beta - mean * s))


if __name__ == "__main__":
    key = jax.random.PRNGKey(0)
    k_x, k_p = jax.random.split(key)

    # NW dataset, sensor_num=3 -> conv5 kernel [4, 3]; W=12 so the two stride-2 convs
    # give W=3 and conv5's output spatial size is 1x1.
    N, H, W = 2, 4, 12
    x = jax.random.normal(k_x, (N, 1, H, W), jnp.float32)      # NCHW, C=1
    params = init_params(k_p, H)

    fwd = jax.jit(feature_forward)
    out = jax.block_until_ready(fwd(x, params))

    ref = _ref_forward(x, params)
    assert out.shape == (N, 256)
    assert jnp.allclose(out, ref, atol=1e-3, rtol=1e-3), "mismatch vs JAX reference"

    print("KERNEL_OK")
</pallas_src>

<mosaic_0001>
module attributes {stable_mosaic.version = 11 : i64} {
  func.func @feature_fused_kernel(%arg0: i32, %arg1: memref<4x8x12xf32, #tpu.memory_space<vmem>>, %arg2: memref<1x32xf32, #tpu.memory_space<vmem>>, %arg3: memref<1x32xf32, #tpu.memory_space<vmem>>, %arg4: memref<3x32x64xf32, #tpu.memory_space<vmem>>, %arg5: memref<1x64xf32, #tpu.memory_space<vmem>>, %arg6: memref<64x128xf32, #tpu.memory_space<vmem>>, %arg7: memref<1x128xf32, #tpu.memory_space<vmem>>, %arg8: memref<384x256xf32, #tpu.memory_space<vmem>>, %arg9: memref<1x256xf32, #tpu.memory_space<vmem>>, %arg10: memref<3072x512xf32, #tpu.memory_space<vmem>>, %arg11: memref<1x512xf32, #tpu.memory_space<vmem>>, %arg12: memref<512x256xf32, #tpu.memory_space<vmem>>, %arg13: memref<1x256xf32, #tpu.memory_space<vmem>>, %arg14: memref<8x256xf32, #tpu.memory_space<vmem>>) attributes {dimension_semantics = [#tpu.dimension_semantics<parallel>], iteration_bounds = array<i64: 1>, scalar_prefetch = 0 : i64, scratch_operands = 0 : i64, tpu.core_type = #tpu.core_type<tc>, window_params = [{transform_indices = @transform_0, window_bounds = array<i64: 4, 8, 12>}, {pipeline_mode = #tpu.pipeline_mode<synchronous>, transform_indices = @transform_1, window_bounds = array<i64: 1, 32>}, {pipeline_mode = #tpu.pipeline_mode<synchronous>, transform_indices = @transform_2, window_bounds = array<i64: 1, 32>}, {pipeline_mode = #tpu.pipeline_mode<synchronous>, transform_indices = @transform_3, window_bounds = array<i64: 3, 32, 64>}, {pipeline_mode = #tpu.pipeline_mode<synchronous>, transform_indices = @transform_4, window_bounds = array<i64: 1, 64>}, {pipeline_mode = #tpu.pipeline_mode<synchronous>, transform_indices = @transform_5, window_bounds = array<i64: 64, 128>}, {pipeline_mode = #tpu.pipeline_mode<synchronous>, transform_indices = @transform_6, window_bounds = array<i64: 1, 128>}, {pipeline_mode = #tpu.pipeline_mode<synchronous>, transform_indices = @transform_7, window_bounds = array<i64: 384, 256>}, {pipeline_mode = #tpu.pipeline_mode<synchronous>, transform_indices = @transform_8, window_bounds = array<i64: 1, 256>}, {pipeline_mode = #tpu.pipeline_mode<synchronous>, transform_indices = @transform_9, window_bounds = array<i64: 3072, 512>}, {pipeline_mode = #tpu.pipeline_mode<synchronous>, transform_indices = @transform_10, window_bounds = array<i64: 1, 512>}, {pipeline_mode = #tpu.pipeline_mode<synchronous>, transform_indices = @transform_11, window_bounds = array<i64: 512, 256>}, {pipeline_mode = #tpu.pipeline_mode<synchronous>, transform_indices = @transform_12, window_bounds = array<i64: 1, 256>}, {transform_indices = @transform_13, window_bounds = array<i64: 8, 256>}]} {
    %c0 = arith.constant 0 : index
    %c0_0 = arith.constant 0 : index
    %0 = vector.load %arg2[%c0, %c0_0] : memref<1x32xf32, #tpu.memory_space<vmem>>, vector<1x32xf32>
    %c0_1 = arith.constant 0 : index
    %c0_2 = arith.constant 0 : index
    %1 = vector.load %arg3[%c0_1, %c0_2] : memref<1x32xf32, #tpu.memory_space<vmem>>, vector<1x32xf32>
    %c0_3 = arith.constant 0 : index
    %c0_4 = arith.constant 0 : index
    %c0_5 = arith.constant 0 : index
    %2 = vector.load %arg1[%c0_3, %c0_4, %c0_5] : memref<4x8x12xf32, #tpu.memory_space<vmem>>, vector<1x8x12xf32>
    %3 = vector.shape_cast %2 : vector<1x8x12xf32> to vector<8x12xf32>
    %c1 = arith.constant 1 : index
    %c0_6 = arith.constant 0 : index
    %c0_7 = arith.constant 0 : index
    %4 = vector.load %arg1[%c1, %c0_6, %c0_7] : memref<4x8x12xf32, #tpu.memory_space<vmem>>, vector<1x8x12xf32>
    %5 = vector.shape_cast %4 : vector<1x8x12xf32> to vector<8x12xf32>
    %c2 = arith.constant 2 : index
    %c0_8 = arith.constant 0 : index
    %c0_9 = arith.constant 0 : index
    %6 = vector.load %arg1[%c2, %c0_8, %c0_9] : memref<4x8x12xf32, #tpu.memory_space<vmem>>, vector<1x8x12xf32>
    %7 = vector.shape_cast %6 : vector<1x8x12xf32> to vector<8x12xf32>
    %c3 = arith.constant 3 : index
    %c0_10 = arith.constant 0 : index
    %c0_11 = arith.constant 0 : index
    %8 = vector.load %arg1[%c3, %c0_10, %c0_11] : memref<4x8x12xf32, #tpu.memory_space<vmem>>, vector<1x8x12xf32>
    %9 = vector.shape_cast %8 : vector<1x8x12xf32> to vector<8x12xf32>
    %10 = vector.extract_strided_slice %3 {offsets = [0, 0], sizes = [8, 1], strides = [1, 1]} : vector<8x12xf32> to vector<8x1xf32>
    %11 = vector.broadcast %10 : vector<8x1xf32> to vector<8x32xf32>
    %12 = vector.broadcast %0 : vector<1x32xf32> to vector<8x32xf32>
    %13 = arith.mulf %11, %12 : vector<8x32xf32>
    %14 = vector.broadcast %1 : vector<1x32xf32> to vector<8x32xf32>
    %15 = arith.addf %13, %14 : vector<8x32xf32>
    %16 = vector.extract_strided_slice %5 {offsets = [0, 0], sizes = [8, 1], strides = [1, 1]} : vector<8x12xf32> to vector<8x1xf32>
    %17 = vector.broadcast %16 : vector<8x1xf32> to vector<8x32xf32>
    %18 = vector.broadcast %0 : vector<1x32xf32> to vector<8x32xf32>
    %19 = arith.mulf %17, %18 : vector<8x32xf32>
    %20 = vector.broadcast %1 : vector<1x32xf32> to vector<8x32xf32>
    %21 = arith.addf %19, %20 : vector<8x32xf32>
    %22 = vector.extract_strided_slice %7 {offsets = [0, 0], sizes = [8, 1], strides = [1, 1]} : vector<8x12xf32> to vector<8x1xf32>
    %23 = vector.broadcast %22 : vector<8x1xf32> to vector<8x32xf32>
    %24 = vector.broadcast %0 : vector<1x32xf32> to vector<8x32xf32>
    %25 = arith.mulf %23, %24 : vector<8x32xf32>
    %26 = vector.broadcast %1 : vector<1x32xf32> to vector<8x32xf32>
    %27 = arith.addf %25, %26 : vector<8x32xf32>
    %28 = vector.extract_strided_slice %9 {offsets = [0, 0], sizes = [8, 1], strides = [1, 1]} : vector<8x12xf32> to vector<8x1xf32>
    %29 = vector.broadcast %28 : vector<8x1xf32> to vector<8x32xf32>
    %30 = vector.broadcast %0 : vector<1x32xf32> to vector<8x32xf32>
    %31 = arith.mulf %29, %30 : vector<8x32xf32>
    %32 = vector.broadcast %1 : vector<1x32xf32> to vector<8x32xf32>
    %33 = arith.addf %31, %32 : vector<8x32xf32>
    %34 = tpu.concatenate %15, %21, %27, %33 in 0 : vector<8x32xf32>, vector<8x32xf32>, vector<8x32xf32>, vector<8x32xf32> -> vector<32x32xf32>
    %cst = arith.constant 0.000000e+00 : f32
    %35 = vector.broadcast %cst : f32 to vector<32x32xf32>
    %36 = arith.maximumf %34, %35 : vector<32x32xf32>
    %37 = vector.extract_strided_slice %3 {offsets = [0, 1], sizes = [8, 1], strides = [1, 1]} : vector<8x12xf32> to vector<8x1xf32>
    %38 = vector.broadcast %37 : vector<8x1xf32> to vector<8x32xf32>
    %39 = vector.broadcast %0 : vector<1x32xf32> to vector<8x32xf32>
    %40 = arith.mulf %38, %39 : vector<8x32xf32>
    %41 = vector.broadcast %1 : vector<1x32xf32> to vector<8x32xf32>
    %42 = arith.addf %40, %41 : vector<8x32xf32>
    %43 = vector.extract_strided_slice %5 {offsets = [0, 1], sizes = [8, 1], strides = [1, 1]} : vector<8x12xf32> to vector<8x1xf32>
    %44 = vector.broadcast %43 : vector<8x1xf32> to vector<8x32xf32>
    %45 = vector.broadcast %0 : vector<1x32xf32> to vector<8x32xf32>
    %46 = arith.mulf %44, %45 : vector<8x32xf32>
    %47 = vector.broadcast %1 : vector<1x32xf32> to vector<8x32xf32>
    %48 = arith.addf %46, %47 : vector<8x32xf32>
    %49 = vector.extract_strided_slice %7 {offsets = [0, 1], sizes = [8, 1], strides = [1, 1]} : vector<8x12xf32> to vector<8x1xf32>
    %50 = vector.broadcast %49 : vector<8x1xf32> to vector<8x32xf32>
    %51 = vector.broadcast %0 : vector<1x32xf32> to vector<8x32xf32>
    %52 = arith.mulf %50, %51 : vector<8x32xf32>
    %53 = vector.broadcast %1 : vector<1x32xf32> to vector<8x32xf32>
    %54 = arith.addf %52, %53 : vector<8x32xf32>
    %55 = vector.extract_strided_slice %9 {offsets = [0, 1], sizes = [8, 1], strides = [1, 1]} : vector<8x12xf32> to vector<8x1xf32>
    %56 = vector.broadcast %55 : vector<8x1xf32> to vector<8x32xf32>
    %57 = vector.broadcast %0 : vector<1x32xf32> to vector<8x32xf32>
    %58 = arith.mulf %56, %57 : vector<8x32xf32>
    %59 = vector.broadcast %1 : vector<1x32xf32> to vector<8x32xf32>
    %60 = arith.addf %58, %59 : vector<8x32xf32>
    %61 = tpu.concatenate %42, %48, %54, %60 in 0 : vector<8x32xf32>, vector<8x32xf32>, vector<8x32xf32>, vector<8x32xf32> -> vector<32x32xf32>
    %cst_12 = arith.constant 0.000000e+00 : f32
    %62 = vector.broadcast %cst_12 : f32 to vector<32x32xf32>
    %63 = arith.maximumf %61, %62 : vector<32x32xf32>
    %64 = vector.extract_strided_slice %3 {offsets = [0, 2], sizes = [8, 1], strides = [1, 1]} : vector<8x12xf32> to vector<8x1xf32>
    %65 = vector.broadcast %64 : vector<8x1xf32> to vector<8x32xf32>
    %66 = vector.broadcast %0 : vector<1x32xf32> to vector<8x32xf32>
    %67 = arith.mulf %65, %66 : vector<8x32xf32>
    %68 = vector.broadcast %1 : vector<1x32xf32> to vector<8x32xf32>
    %69 = arith.addf %67, %68 : vector<8x32xf32>
    %70 = vector.extract_strided_slice %5 {offsets = [0, 2], sizes = [8, 1], strides = [1, 1]} : vector<8x12xf32> to vector<8x1xf32>
    %71 = vector.broadcast %70 : vector<8x1xf32> to vector<8x32xf32>
    %72 = vector.broadcast %0 : vector<1x32xf32> to vector<8x32xf32>
    %73 = arith.mulf %71, %72 : vector<8x32xf32>
    %74 = vector.broadcast %1 : vector<1x32xf32> to vector<8x32xf32>
    %75 = arith.addf %73, %74 : vector<8x32xf32>
    %76 = vector.extract_strided_slice %7 {offsets = [0, 2], sizes = [8, 1], strides = [1, 1]} : vector<8x12xf32> to vector<8x1xf32>
    %77 = vector.broadcast %76 : vector<8x1xf32> to vector<8x32xf32>
    %78 = vector.broadcast %0 : vector<1x32xf32> to vector<8x32xf32>
    %79 = arith.mulf %77, %78 : vector<8x32xf32>
    %80 = vector.broadcast %1 : vector<1x32xf32> to vector<8x32xf32>
    %81 = arith.addf %79, %80 : vector<8x32xf32>
    %82 = vector.extract_strided_slice %9 {offsets = [0, 2], sizes = [8, 1], strides = [1, 1]} : vector<8x12xf32> to vector<8x1xf32>
    %83 = vector.broadcast %82 : vector<8x1xf32> to vector<8x32xf32>
    %84 = vector.broadcast %0 : vector<1x32xf32> to vector<8x32xf32>
    %85 = arith.mulf %83, %84 : vector<8x32xf32>
    %86 = vector.broadcast %1 : vector<1x32xf32> to vector<8x32xf32>
    %87 = arith.addf %85, %86 : vector<8x32xf32>
    %88 = tpu.concatenate %69, %75, %81, %87 in 0 : vector<8x32xf32>, vector<8x32xf32>, vector<8x32xf32>, vector<8x32xf32> -> vector<32x32xf32>
    %cst_13 = arith.constant 0.000000e+00 : f32
    %89 = vector.broadcast %cst_13 : f32 to vector<32x32xf32>
    %90 = arith.maximumf %88, %89 : vector<32x32xf32>
    %91 = vector.extract_strided_slice %3 {offsets = [0, 3], sizes = [8, 1], strides = [1, 1]} : vector<8x12xf32> to vector<8x1xf32>
    %92 = vector.broadcast %91 : vector<8x1xf32> to vector<8x32xf32>
    %93 = vector.broadcast %0 : vector<1x32xf32> to vector<8x32xf32>
    %94 = arith.mulf %92, %93 : vector<8x32xf32>
    %95 = vector.broadcast %1 : vector<1x32xf32> to vector<8x32xf32>
    %96 = arith.addf %94, %95 : vector<8x32xf32>
    %97 = vector.extract_strided_slice %5 {offsets = [0, 3], sizes = [8, 1], strides = [1, 1]} : vector<8x12xf32> to vector<8x1xf32>
    %98 = vector.broadcast %97 : vector<8x1xf32> to vector<8x32xf32>
    %99 = vector.broadcast %0 : vector<1x32xf32> to vector<8x32xf32>
    %100 = arith.mulf %98, %99 : vector<8x32xf32>
    %101 = vector.broadcast %1 : vector<1x32xf32> to vector<8x32xf32>
    %102 = arith.addf %100, %101 : vector<8x32xf32>
    %103 = vector.extract_strided_slice %7 {offsets = [0, 3], sizes = [8, 1], strides = [1, 1]} : vector<8x12xf32> to vector<8x1xf32>
    %104 = vector.broadcast %103 : vector<8x1xf32> to vector<8x32xf32>
    %105 = vector.broadcast %0 : vector<1x32xf32> to vector<8x32xf32>
    %106 = arith.mulf %104, %105 : vector<8x32xf32>
    %107 = vector.broadcast %1 : vector<1x32xf32> to vector<8x32xf32>
    %108 = arith.addf %106, %107 : vector<8x32xf32>
    %109 = vector.extract_strided_slice %9 {offsets = [0, 3], sizes = [8, 1], strides = [1, 1]} : vector<8x12xf32> to vector<8x1xf32>
    %110 = vector.broadcast %109 : vector<8x1xf32> to vector<8x32xf32>
    %111 = vector.broadcast %0 : vector<1x32xf32> to vector<8x32xf32>
    %112 = arith.mulf %110, %111 : vector<8x32xf32>
    %113 = vector.broadcast %1 : vector<1x32xf32> to vector<8x32xf32>
    %114 = arith.addf %112, %113 : vector<8x32xf32>
    %115 = tpu.concatenate %96, %102, %108, %114 in 0 : vector<8x32xf32>, vector<8x32xf32>, vector<8x32xf32>, vector<8x32xf32> -> vector<32x32xf32>
    %cst_14 = arith.constant 0.000000e+00 : f32
    %116 = vector.broadcast %cst_14 : f32 to vector<32x32xf32>
    %117 = arith.maximumf %115, %116 : vector<32x32xf32>
    %118 = vector.extract_strided_slice %3 {offsets = [0, 4], sizes = [8, 1], strides = [1, 1]} : vector<8x12xf32> to vector<8x1xf32>
    %119 = vector.broadcast %118 : vector<8x1xf32> to vector<8x32xf32>
    %120 = vector.broadcast %0 : vector<1x32xf32> to vector<8x32xf32>
    %121 = arith.mulf %119, %120 : vector<8x32xf32>
    %122 = vector.broadcast %1 : vector<1x32xf32> to vector<8x32xf32>
    %123 = arith.addf %121, %122 : vector<8x32xf32>
    %124 = vector.extract_strided_slice %5 {offsets = [0, 4], sizes = [8, 1], strides = [1, 1]} : vector<8x12xf32> to vector<8x1xf32>
    %125 = vector.broadcast %124 : vector<8x1xf32> to vector<8x32xf32>
    %126 = vector.broadcast %0 : vector<1x32xf32> to vector<8x32xf32>
    %127 = arith.mulf %125, %126 : vector<8x32xf32>
    %128 = vector.broadcast %1 : vector<1x32xf32> to vector<8x32xf32>
    %129 = arith.addf %127, %128 : vector<8x32xf32>
    %130 = vector.extract_strided_slice %7 {offsets = [0, 4], sizes = [8, 1], strides = [1, 1]} : vector<8x12xf32> to vector<8x1xf32>
    %131 = vector.broadcast %130 : vector<8x1xf32> to vector<8x32xf32>
    %132 = vector.broadcast %0 : vector<1x32xf32> to vector<8x32xf32>
    %133 = arith.mulf %131, %132 : vector<8x32xf32>
    %134 = vector.broadcast %1 : vector<1x32xf32> to vector<8x32xf32>
    %135 = arith.addf %133, %134 : vector<8x32xf32>
    %136 = vector.extract_strided_slice %9 {offsets = [0, 4], sizes = [8, 1], strides = [1, 1]} : vector<8x12xf32> to vector<8x1xf32>
    %137 = vector.broadcast %136 : vector<8x1xf32> to vector<8x32xf32>
    %138 = vector.broadcast %0 : vector<1x32xf32> to vector<8x32xf32>
    %139 = arith.mulf %137, %138 : vector<8x32xf32>
    %140 = vector.broadcast %1 : vector<1x32xf32> to vector<8x32xf32>
    %141 = arith.addf %139, %140 : vector<8x32xf32>
    %142 = tpu.concatenate %123, %129, %135, %141 in 0 : vector<8x32xf32>, vector<8x32xf32>, vector<8x32xf32>, vector<8x32xf32> -> vector<32x32xf32>
    %cst_15 = arith.constant 0.000000e+00 : f32
    %143 = vector.broadcast %cst_15 : f32 to vector<32x32xf32>
    %144 = arith.maximumf %142, %143 : vector<32x32xf32>
    %145 = vector.extract_strided_slice %3 {offsets = [0, 5], sizes = [8, 1], strides = [1, 1]} : vector<8x12xf32> to vector<8x1xf32>
    %146 = vector.broadcast %145 : vector<8x1xf32> to vector<8x32xf32>
    %147 = vector.broadcast %0 : vector<1x32xf32> to vector<8x32xf32>
    %148 = arith.mulf %146, %147 : vector<8x32xf32>
    %149 = vector.broadcast %1 : vector<1x32xf32> to vector<8x32xf32>
    %150 = arith.addf %148, %149 : vector<8x32xf32>
    %151 = vector.extract_strided_slice %5 {offsets = [0, 5], sizes = [8, 1], strides = [1, 1]} : vector<8x12xf32> to vector<8x1xf32>
    %152 = vector.broadcast %151 : vector<8x1xf32> to vector<8x32xf32>
    %153 = vector.broadcast %0 : vector<1x32xf32> to vector<8x32xf32>
    %154 = arith.mulf %152, %153 : vector<8x32xf32>
    %155 = vector.broadcast %1 : vector<1x32xf32> to vector<8x32xf32>
    %156 = arith.addf %154, %155 : vector<8x32xf32>
    %157 = vector.extract_strided_slice %7 {offsets = [0, 5], sizes = [8, 1], strides = [1, 1]} : vector<8x12xf32> to vector<8x1xf32>
    %158 = vector.broadcast %157 : vector<8x1xf32> to vector<8x32xf32>
    %159 = vector.broadcast %0 : vector<1x32xf32> to vector<8x32xf32>
    %160 = arith.mulf %158, %159 : vector<8x32xf32>
    %161 = vector.broadcast %1 : vector<1x32xf32> to vector<8x32xf32>
    %162 = arith.addf %160, %161 : vector<8x32xf32>
    %163 = vector.extract_strided_slice %9 {offsets = [0, 5], sizes = [8, 1], strides = [1, 1]} : vector<8x12xf32> to vector<8x1xf32>
    %164 = vector.broadcast %163 : vector<8x1xf32> to vector<8x32xf32>
    %165 = vector.broadcast %0 : vector<1x32xf32> to vector<8x32xf32>
    %166 = arith.mulf %164, %165 : vector<8x32xf32>
    %167 = vector.broadcast %1 : vector<1x32xf32> to vector<8x32xf32>
    %168 = arith.addf %166, %167 : vector<8x32xf32>
    %169 = tpu.concatenate %150, %156, %162, %168 in 0 : vector<8x32xf32>, vector<8x32xf32>, vector<8x32xf32>, vector<8x32xf32> -> vector<32x32xf32>
    %cst_16 = arith.constant 0.000000e+00 : f32
    %170 = vector.broadcast %cst_16 : f32 to vector<32x32xf32>
    %171 = arith.maximumf %169, %170 : vector<32x32xf32>
    %172 = vector.extract_strided_slice %3 {offsets = [0, 6], sizes = [8, 1], strides = [1, 1]} : vector<8x12xf32> to vector<8x1xf32>
    %173 = vector.broadcast %172 : vector<8x1xf32> to vector<8x32xf32>
    %174 = vector.broadcast %0 : vector<1x32xf32> to vector<8x32xf32>
    %175 = arith.mulf %173, %174 : vector<8x32xf32>
    %176 = vector.broadcast %1 : vector<1x32xf32> to vector<8x32xf32>
    %177 = arith.addf %175, %176 : vector<8x32xf32>
    %178 = vector.extract_strided_slice %5 {offsets = [0, 6], sizes = [8, 1], strides = [1, 1]} : vector<8x12xf32> to vector<8x1xf32>
    %179 = vector.broadcast %178 : vector<8x1xf32> to vector<8x32xf32>
    %180 = vector.broadcast %0 : vector<1x32xf32> to vector<8x32xf32>
    %181 = arith.mulf %179, %180 : vector<8x32xf32>
    %182 = vector.broadcast %1 : vector<1x32xf32> to vector<8x32xf32>
    %183 = arith.addf %181, %182 : vector<8x32xf32>
    %184 = vector.extract_strided_slice %7 {offsets = [0, 6], sizes = [8, 1], strides = [1, 1]} : vector<8x12xf32> to vector<8x1xf32>
    %185 = vector.broadcast %184 : vector<8x1xf32> to vector<8x32xf32>
    %186 = vector.broadcast %0 : vector<1x32xf32> to vector<8x32xf32>
    %187 = arith.mulf %185, %186 : vector<8x32xf32>
    %188 = vector.broadcast %1 : vector<1x32xf32> to vector<8x32xf32>
    %189 = arith.addf %187, %188 : vector<8x32xf32>
    %190 = vector.extract_strided_slice %9 {offsets = [0, 6], sizes = [8, 1], strides = [1, 1]} : vector<8x12xf32> to vector<8x1xf32>
    %191 = vector.broadcast %190 : vector<8x1xf32> to vector<8x32xf32>
    %192 = vector.broadcast %0 : vector<1x32xf32> to vector<8x32xf32>
    %193 = arith.mulf %191, %192 : vector<8x32xf32>
    %194 = vector.broadcast %1 : vector<1x32xf32> to vector<8x32xf32>
    %195 = arith.addf %193, %194 : vector<8x32xf32>
    %196 = tpu.concatenate %177, %183, %189, %195 in 0 : vector<8x32xf32>, vector<8x32xf32>, vector<8x32xf32>, vector<8x32xf32> -> vector<32x32xf32>
    %cst_17 = arith.constant 0.000000e+00 : f32
    %197 = vector.broadcast %cst_17 : f32 to vector<32x32xf32>
    %198 = arith.maximumf %196, %197 : vector<32x32xf32>
    %199 = vector.extract_strided_slice %3 {offsets = [0, 7], sizes = [8, 1], strides = [1, 1]} : vector<8x12xf32> to vector<8x1xf32>
    %200 = vector.broadcast %199 : vector<8x1xf32> to vector<8x32xf32>
    %201 = vector.broadcast %0 : vector<1x32xf32> to vector<8x32xf32>
    %202 = arith.mulf %200, %201 : vector<8x32xf32>
    %203 = vector.broadcast %1 : vector<1x32xf32> to vector<8x32xf32>
    %204 = arith.addf %202, %203 : vector<8x32xf32>
    %205 = vector.extract_strided_slice %5 {offsets = [0, 7], sizes = [8, 1], strides = [1, 1]} : vector<8x12xf32> to vector<8x1xf32>
    %206 = vector.broadcast %205 : vector<8x1xf32> to vector<8x32xf32>
    %207 = vector.broadcast %0 : vector<1x32xf32> to vector<8x32xf32>
    %208 = arith.mulf %206, %207 : vector<8x32xf32>
    %209 = vector.broadcast %1 : vector<1x32xf32> to vector<8x32xf32>
    %210 = arith.addf %208, %209 : vector<8x32xf32>
    %211 = vector.extract_strided_slice %7 {offsets = [0, 7], sizes = [8, 1], strides = [1, 1]} : vector<8x12xf32> to vector<8x1xf32>
    %212 = vector.broadcast %211 : vector<8x1xf32> to vector<8x32xf32>
    %213 = vector.broadcast %0 : vector<1x32xf32> to vector<8x32xf32>
    %214 = arith.mulf %212, %213 : vector<8x32xf32>
    %215 = vector.broadcast %1 : vector<1x32xf32> to vector<8x32xf32>
    %216 = arith.addf %214, %215 : vector<8x32xf32>
    %217 = vector.extract_strided_slice %9 {offsets = [0, 7], sizes = [8, 1], strides = [1, 1]} : vector<8x12xf32> to vector<8x1xf32>
    %218 = vector.broadcast %217 : vector<8x1xf32> to vector<8x32xf32>
    %219 = vector.broadcast %0 : vector<1x32xf32> to vector<8x32xf32>
    %220 = arith.mulf %218, %219 : vector<8x32xf32>
    %221 = vector.broadcast %1 : vector<1x32xf32> to vector<8x32xf32>
    %222 = arith.addf %220, %221 : vector<8x32xf32>
    %223 = tpu.concatenate %204, %210, %216, %222 in 0 : vector<8x32xf32>, vector<8x32xf32>, vector<8x32xf32>, vector<8x32xf32> -> vector<32x32xf32>
    %cst_18 = arith.constant 0.000000e+00 : f32
    %224 = vector.broadcast %cst_18 : f32 to vector<32x32xf32>
    %225 = arith.maximumf %223, %224 : vector<32x32xf32>
    %226 = vector.extract_strided_slice %3 {offsets = [0, 8], sizes = [8, 1], strides = [1, 1]} : vector<8x12xf32> to vector<8x1xf32>
    %227 = vector.broadcast %226 : vector<8x1xf32> to vector<8x32xf32>
    %228 = vector.broadcast %0 : vector<1x32xf32> to vector<8x32xf32>
    %229 = arith.mulf %227, %228 : vector<8x32xf32>
    %230 = vector.broadcast %1 : vector<1x32xf32> to vector<8x32xf32>
    %231 = arith.addf %229, %230 : vector<8x32xf32>
    %232 = vector.extract_strided_slice %5 {offsets = [0, 8], sizes = [8, 1], strides = [1, 1]} : vector<8x12xf32> to vector<8x1xf32>
    %233 = vector.broadcast %232 : vector<8x1xf32> to vector<8x32xf32>
    %234 = vector.broadcast %0 : vector<1x32xf32> to vector<8x32xf32>
    %235 = arith.mulf %233, %234 : vector<8x32xf32>
    %236 = vector.broadcast %1 : vector<1x32xf32> to vector<8x32xf32>
    %237 = arith.addf %235, %236 : vector<8x32xf32>
    %238 = vector.extract_strided_slice %7 {offsets = [0, 8], sizes = [8, 1], strides = [1, 1]} : vector<8x12xf32> to vector<8x1xf32>
    %239 = vector.broadcast %238 : vector<8x1xf32> to vector<8x32xf32>
    %240 = vector.broadcast %0 : vector<1x32xf32> to vector<8x32xf32>
    %241 = arith.mulf %239, %240 : vector<8x32xf32>
    %242 = vector.broadcast %1 : vector<1x32xf32> to vector<8x32xf32>
    %243 = arith.addf %241, %242 : vector<8x32xf32>
    %244 = vector.extract_strided_slice %9 {offsets = [0, 8], sizes = [8, 1], strides = [1, 1]} : vector<8x12xf32> to vector<8x1xf32>
    %245 = vector.broadcast %244 : vector<8x1xf32> to vector<8x32xf32>
    %246 = vector.broadcast %0 : vector<1x32xf32> to vector<8x32xf32>
    %247 = arith.mulf %245, %246 : vector<8x32xf32>
    %248 = vector.broadcast %1 : vector<1x32xf32> to vector<8x32xf32>
    %249 = arith.addf %247, %248 : vector<8x32xf32>
    %250 = tpu.concatenate %231, %237, %243, %249 in 0 : vector<8x32xf32>, vector<8x32xf32>, vector<8x32xf32>, vector<8x32xf32> -> vector<32x32xf32>
    %cst_19 = arith.constant 0.000000e+00 : f32
    %251 = vector.broadcast %cst_19 : f32 to vector<32x32xf32>
    %252 = arith.maximumf %250, %251 : vector<32x32xf32>
    %253 = vector.extract_strided_slice %3 {offsets = [0, 9], sizes = [8, 1], strides = [1, 1]} : vector<8x12xf32> to vector<8x1xf32>
    %254 = vector.broadcast %253 : vector<8x1xf32> to vector<8x32xf32>
    %255 = vector.broadcast %0 : vector<1x32xf32> to vector<8x32xf32>
    %256 = arith.mulf %254, %255 : vector<8x32xf32>
    %257 = vector.broadcast %1 : vector<1x32xf32> to vector<8x32xf32>
    %258 = arith.addf %256, %257 : vector<8x32xf32>
    %259 = vector.extract_strided_slice %5 {offsets = [0, 9], sizes = [8, 1], strides = [1, 1]} : vector<8x12xf32> to vector<8x1xf32>
    %260 = vector.broadcast %259 : vector<8x1xf32> to vector<8x32xf32>
    %261 = vector.broadcast %0 : vector<1x32xf32> to vector<8x32xf32>
    %262 = arith.mulf %260, %261 : vector<8x32xf32>
    %263 = vector.broadcast %1 : vector<1x32xf32> to vector<8x32xf32>
    %264 = arith.addf %262, %263 : vector<8x32xf32>
    %265 = vector.extract_strided_slice %7 {offsets = [0, 9], sizes = [8, 1], strides = [1, 1]} : vector<8x12xf32> to vector<8x1xf32>
    %266 = vector.broadcast %265 : vector<8x1xf32> to vector<8x32xf32>
    %267 = vector.broadcast %0 : vector<1x32xf32> to vector<8x32xf32>
    %268 = arith.mulf %266, %267 : vector<8x32xf32>
    %269 = vector.broadcast %1 : vector<1x32xf32> to vector<8x32xf32>
    %270 = arith.addf %268, %269 : vector<8x32xf32>
    %271 = vector.extract_strided_slice %9 {offsets = [0, 9], sizes = [8, 1], strides = [1, 1]} : vector<8x12xf32> to vector<8x1xf32>
    %272 = vector.broadcast %271 : vector<8x1xf32> to vector<8x32xf32>
    %273 = vector.broadcast %0 : vector<1x32xf32> to vector<8x32xf32>
    %274 = arith.mulf %272, %273 : vector<8x32xf32>
    %275 = vector.broadcast %1 : vector<1x32xf32> to vector<8x32xf32>
    %276 = arith.addf %274, %275 : vector<8x32xf32>
    %277 = tpu.concatenate %258, %264, %270, %276 in 0 : vector<8x32xf32>, vector<8x32xf32>, vector<8x32xf32>, vector<8x32xf32> -> vector<32x32xf32>
    %cst_20 = arith.constant 0.000000e+00 : f32
    %278 = vector.broadcast %cst_20 : f32 to vector<32x32xf32>
    %279 = arith.maximumf %277, %278 : vector<32x32xf32>
    %280 = vector.extract_strided_slice %3 {offsets = [0, 10], sizes = [8, 1], strides = [1, 1]} : vector<8x12xf32> to vector<8x1xf32>
    %281 = vector.broadcast %280 : vector<8x1xf32> to vector<8x32xf32>
    %282 = vector.broadcast %0 : vector<1x32xf32> to vector<8x32xf32>
    %283 = arith.mulf %281, %282 : vector<8x32xf32>
    %284 = vector.broadcast %1 : vector<1x32xf32> to vector<8x32xf32>
    %285 = arith.addf %283, %284 : vector<8x32xf32>
    %286 = vector.extract_strided_slice %5 {offsets = [0, 10], sizes = [8, 1], strides = [1, 1]} : vector<8x12xf32> to vector<8x1xf32>
    %287 = vector.broadcast %286 : vector<8x1xf32> to vector<8x32xf32>
    %288 = vector.broadcast %0 : vector<1x32xf32> to vector<8x32xf32>
    %289 = arith.mulf %287, %288 : vector<8x32xf32>
    %290 = vector.broadcast %1 : vector<1x32xf32> to vector<8x32xf32>
    %291 = arith.addf %289, %290 : vector<8x32xf32>
    %292 = vector.extract_strided_slice %7 {offsets = [0, 10], sizes = [8, 1], strides = [1, 1]} : vector<8x12xf32> to vector<8x1xf32>
    %293 = vector.broadcast %292 : vector<8x1xf32> to vector<8x32xf32>
    %294 = vector.broadcast %0 : vector<1x32xf32> to vector<8x32xf32>
    %295 = arith.mulf %293, %294 : vector<8x32xf32>
    %296 = vector.broadcast %1 : vector<1x32xf32> to vector<8x32xf32>
    %297 = arith.addf %295, %296 : vector<8x32xf32>
    %298 = vector.extract_strided_slice %9 {offsets = [0, 10], sizes = [8, 1], strides = [1, 1]} : vector<8x12xf32> to vector<8x1xf32>
    %299 = vector.broadcast %298 : vector<8x1xf32> to vector<8x32xf32>
    %300 = vector.broadcast %0 : vector<1x32xf32> to vector<8x32xf32>
    %301 = arith.mulf %299, %300 : vector<8x32xf32>
    %302 = vector.broadcast %1 : vector<1x32xf32> to vector<8x32xf32>
    %303 = arith.addf %301, %302 : vector<8x32xf32>
    %304 = tpu.concatenate %285, %291, %297, %303 in 0 : vector<8x32xf32>, vector<8x32xf32>, vector<8x32xf32>, vector<8x32xf32> -> vector<32x32xf32>
    %cst_21 = arith.constant 0.000000e+00 : f32
    %305 = vector.broadcast %cst_21 : f32 to vector<32x32xf32>
    %306 = arith.maximumf %304, %305 : vector<32x32xf32>
    %307 = vector.extract_strided_slice %3 {offsets = [0, 11], sizes = [8, 1], strides = [1, 1]} : vector<8x12xf32> to vector<8x1xf32>
    %308 = vector.broadcast %307 : vector<8x1xf32> to vector<8x32xf32>
    %309 = vector.broadcast %0 : vector<1x32xf32> to vector<8x32xf32>
    %310 = arith.mulf %308, %309 : vector<8x32xf32>
    %311 = vector.broadcast %1 : vector<1x32xf32> to vector<8x32xf32>
    %312 = arith.addf %310, %311 : vector<8x32xf32>
    %313 = vector.extract_strided_slice %5 {offsets = [0, 11], sizes = [8, 1], strides = [1, 1]} : vector<8x12xf32> to vector<8x1xf32>
    %314 = vector.broadcast %313 : vector<8x1xf32> to vector<8x32xf32>
    %315 = vector.broadcast %0 : vector<1x32xf32> to vector<8x32xf32>
    %316 = arith.mulf %314, %315 : vector<8x32xf32>
    %317 = vector.broadcast %1 : vector<1x32xf32> to vector<8x32xf32>
    %318 = arith.addf %316, %317 : vector<8x32xf32>
    %319 = vector.extract_strided_slice %7 {offsets = [0, 11], sizes = [8, 1], strides = [1, 1]} : vector<8x12xf32> to vector<8x1xf32>
    %320 = vector.broadcast %319 : vector<8x1xf32> to vector<8x32xf32>
    %321 = vector.broadcast %0 : vector<1x32xf32> to vector<8x32xf32>
    %322 = arith.mulf %320, %321 : vector<8x32xf32>
    %323 = vector.broadcast %1 : vector<1x32xf32> to vector<8x32xf32>
    %324 = arith.addf %322, %323 : vector<8x32xf32>
    %325 = vector.extract_strided_slice %9 {offsets = [0, 11], sizes = [8, 1], strides = [1, 1]} : vector<8x12xf32> to vector<8x1xf32>
    %326 = vector.broadcast %325 : vector<8x1xf32> to vector<8x32xf32>
    %327 = vector.broadcast %0 : vector<1x32xf32> to vector<8x32xf32>
    %328 = arith.mulf %326, %327 : vector<8x32xf32>
    %329 = vector.broadcast %1 : vector<1x32xf32> to vector<8x32xf32>
    %330 = arith.addf %328, %329 : vector<8x32xf32>
    %331 = tpu.concatenate %312, %318, %324, %330 in 0 : vector<8x32xf32>, vector<8x32xf32>, vector<8x32xf32>, vector<8x32xf32> -> vector<32x32xf32>
    %cst_22 = arith.constant 0.000000e+00 : f32
    %332 = vector.broadcast %cst_22 : f32 to vector<32x32xf32>
    %333 = arith.maximumf %331, %332 : vector<32x32xf32>
    %cst_23 = arith.constant 0.000000e+00 : f32
    %334 = vector.broadcast %cst_23 : f32 to vector<32x32xf32>
    %335 = tpu.concatenate %334, %63, %117, %171, %225, %279 in 0 : vector<32x32xf32>, vector<32x32xf32>, vector<32x32xf32>, vector<32x32xf32>, vector<32x32xf32>, vector<32x32xf32> -> vector<192x32xf32>
    %c0_24 = arith.constant 0 : index
    %c0_25 = arith.constant 0 : index
    %c0_26 = arith.constant 0 : index
    %336 = vector.load %arg4[%c0_24, %c0_25, %c0_26] : memref<3x32x64xf32, #tpu.memory_space<vmem>>, vector<1x32x64xf32>
    %337 = vector.shape_cast %336 : vector<1x32x64xf32> to vector<32x64xf32>
    %cst_27 = arith.constant dense<0.000000e+00> : vector<192x64xf32>
    %338 = tpu.matmul %335, %337, %cst_27 {dimension_numbers = #tpu.dot_dimension_numbers<[1], [0], [0], [1], [0, 0, 1, 1], [], []>} : vector<192x32xf32>, vector<32x64xf32>, vector<192x64xf32> -> vector<192x64xf32>
    %339 = tpu.concatenate %36, %90, %144, %198, %252, %306 in 0 : vector<32x32xf32>, vector<32x32xf32>, vector<32x32xf32>, vector<32x32xf32>, vector<32x32xf32>, vector<32x32xf32> -> vector<192x32xf32>
    %c1_28 = arith.constant 1 : index
    %c0_29 = arith.constant 0 : index
    %c0_30 = arith.constant 0 : index
    %340 = vector.load %arg4[%c1_28, %c0_29, %c0_30] : memref<3x32x64xf32, #tpu.memory_space<vmem>>, vector<1x32x64xf32>
    %341 = vector.shape_cast %340 : vector<1x32x64xf32> to vector<32x64xf32>
    %cst_31 = arith.constant dense<0.000000e+00> : vector<192x64xf32>
    %342 = tpu.matmul %339, %341, %cst_31 {dimension_numbers = #tpu.dot_dimension_numbers<[1], [0], [0], [1], [0, 0, 1, 1], [], []>} : vector<192x32xf32>, vector<32x64xf32>, vector<192x64xf32> -> vector<192x64xf32>
    %343 = arith.addf %338, %342 : vector<192x64xf32>
    %344 = tpu.concatenate %63, %117, %171, %225, %279, %333 in 0 : vector<32x32xf32>, vector<32x32xf32>, vector<32x32xf32>, vector<32x32xf32>, vector<32x32xf32>, vector<32x32xf32> -> vector<192x32xf32>
    %c2_32 = arith.constant 2 : index
    %c0_33 = arith.constant 0 : index
    %c0_34 = arith.constant 0 : index
    %345 = vector.load %arg4[%c2_32, %c0_33, %c0_34] : memref<3x32x64xf32, #tpu.memory_space<vmem>>, vector<1x32x64xf32>
    %346 = vector.shape_cast %345 : vector<1x32x64xf32> to vector<32x64xf32>
    %cst_35 = arith.constant dense<0.000000e+00> : vector<192x64xf32>
    %347 = tpu.matmul %344, %346, %cst_35 {dimension_numbers = #tpu.dot_dimension_numbers<[1], [0], [0], [1], [0, 0, 1, 1], [], []>} : vector<192x32xf32>, vector<32x64xf32>, vector<192x64xf32> -> vector<192x64xf32>
    %348 = arith.addf %343, %347 : vector<192x64xf32>
    %c0_36 = arith.constant 0 : index
    %c0_37 = arith.constant 0 : index
    %349 = vector.load %arg5[%c0_36, %c0_37] : memref<1x64xf32, #tpu.memory_space<vmem>>, vector<1x64xf32>
    %350 = vector.broadcast %349 : vector<1x64xf32> to vector<192x64xf32>
    %351 = arith.addf %348, %350 : vector<192x64xf32>
    %cst_38 = arith.constant 0.000000e+00 : f32
    %352 = vector.broadcast %cst_38 : f32 to vector<192x64xf32>
    %353 = arith.maximumf %351, %352 : vector<192x64xf32>
    %c0_39 = arith.constant 0 : index
    %c0_40 = arith.constant 0 : index
    %354 = vector.load %arg6[%c0_39, %c0_40] : memref<64x128xf32, #tpu.memory_space<vmem>>, vector<64x128xf32>
    %cst_41 = arith.constant dense<0.000000e+00> : vector<192x128xf32>
    %355 = tpu.matmul %353, %354, %cst_41 {dimension_numbers = #tpu.dot_dimension_numbers<[1], [0], [0], [1], [0, 0, 1, 1], [], []>} : vector<192x64xf32>, vector<64x128xf32>, vector<192x128xf32> -> vector<192x128xf32>
    %c0_42 = arith.constant 0 : index
    %c0_43 = arith.constant 0 : index
    %356 = vector.load %arg7[%c0_42, %c0_43] : memref<1x128xf32, #tpu.memory_space<vmem>>, vector<1x128xf32>
    %357 = vector.broadcast %356 : vector<1x128xf32> to vector<192x128xf32>
    %358 = arith.addf %355, %357 : vector<192x128xf32>
    %cst_44 = arith.constant 0.000000e+00 : f32
    %359 = vector.broadcast %cst_44 : f32 to vector<192x128xf32>
    %360 = arith.maximumf %358, %359 : vector<192x128xf32>
    %cst_45 = arith.constant 0.000000e+00 : f32
    %361 = vector.broadcast %cst_45 : f32 to vector<32x128xf32>
    %362 = vector.extract_strided_slice %360 {offsets = [0, 0], sizes = [32, 128], strides = [1, 1]} : vector<192x128xf32> to vector<32x128xf32>
    %363 = vector.extract_strided_slice %360 {offsets = [32, 0], sizes = [32, 128], strides = [1, 1]} : vector<192x128xf32> to vector<32x128xf32>
    %364 = tpu.concatenate %361, %362, %363 in 1 : vector<32x128xf32>, vector<32x128xf32>, vector<32x128xf32> -> vector<32x384xf32>
    %365 = vector.extract_strided_slice %360 {offsets = [32, 0], sizes = [32, 128], strides = [1, 1]} : vector<192x128xf32> to vector<32x128xf32>
    %366 = vector.extract_strided_slice %360 {offsets = [64, 0], sizes = [32, 128], strides = [1, 1]} : vector<192x128xf32> to vector<32x128xf32>
    %367 = vector.extract_strided_slice %360 {offsets = [96, 0], sizes = [32, 128], strides = [1, 1]} : vector<192x128xf32> to vector<32x128xf32>
    %368 = tpu.concatenate %365, %366, %367 in 1 : vector<32x128xf32>, vector<32x128xf32>, vector<32x128xf32> -> vector<32x384xf32>
    %369 = vector.extract_strided_slice %360 {offsets = [96, 0], sizes = [32, 128], strides = [1, 1]} : vector<192x128xf32> to vector<32x128xf32>
    %370 = vector.extract_strided_slice %360 {offsets = [128, 0], sizes = [32, 128], strides = [1, 1]} : vector<192x128xf32> to vector<32x128xf32>
    %371 = vector.extract_strided_slice %360 {offsets = [160, 0], sizes = [32, 128], strides = [1, 1]} : vector<192x128xf32> to vector<32x128xf32>
    %372 = tpu.concatenate %369, %370, %371 in 1 : vector<32x128xf32>, vector<32x128xf32>, vector<32x128xf32> -> vector<32x384xf32>
    %373 = tpu.concatenate %364, %368, %372 in 0 : vector<32x384xf32>, vector<32x384xf32>, vector<32x384xf32> -> vector<96x384xf32>
    %c0_46 = arith.constant 0 : index
    %c0_47 = arith.constant 0 : index
    %374 = vector.load %arg8[%c0_46, %c0_47] : memref<384x256xf32, #tpu.memory_space<vmem>>, vector<384x256xf32>
    %cst_48 = arith.constant dense<0.000000e+00> : vector<96x256xf32>
    %375 = tpu.matmul %373, %374, %cst_48 {dimension_numbers = #tpu.dot_dimension_numbers<[1], [0], [0], [1], [0, 0, 1, 1], [], []>} : vector<96x384xf32>, vector<384x256xf32>, vector<96x256xf32> -> vector<96x256xf32>
    %c0_49 = arith.constant 0 : index
    %c0_50 = arith.constant 0 : index
    %376 = vector.load %arg9[%c0_49, %c0_50] : memref<1x256xf32, #tpu.memory_space<vmem>>, vector<1x256xf32>
    %377 = vector.broadcast %376 : vector<1x256xf32> to vector<96x256xf32>
    %378 = arith.addf %375, %377 : vector<96x256xf32>
    %cst_51 = arith.constant 0.000000e+00 : f32
    %379 = vector.broadcast %cst_51 : f32 to vector<96x256xf32>
    %380 = arith.maximumf %378, %379 : vector<96x256xf32>
    %381 = vector.extract_strided_slice %380 {offsets = [0, 0], sizes = [8, 256], strides = [1, 1]} : vector<96x256xf32> to vector<8x256xf32>
    %382 = vector.extract_strided_slice %380 {offsets = [8, 0], sizes = [8, 256], strides = [1, 1]} : vector<96x256xf32> to vector<8x256xf32>
    %383 = vector.extract_strided_slice %380 {offsets = [16, 0], sizes = [8, 256], strides = [1, 1]} : vector<96x256xf32> to vector<8x256xf32>
    %384 = vector.extract_strided_slice %380 {offsets = [24, 0], sizes = [8, 256], strides = [1, 1]} : vector<96x256xf32> to vector<8x256xf32>
    %385 = vector.extract_strided_slice %380 {offsets = [32, 0], sizes = [8, 256], strides = [1, 1]} : vector<96x256xf32> to vector<8x256xf32>
    %386 = vector.extract_strided_slice %380 {offsets = [40, 0], sizes = [8, 256], strides = [1, 1]} : vector<96x256xf32> to vector<8x256xf32>
    %387 = vector.extract_strided_slice %380 {offsets = [48, 0], sizes = [8, 256], strides = [1, 1]} : vector<96x256xf32> to vector<8x256xf32>
    %388 = vector.extract_strided_slice %380 {offsets = [56, 0], sizes = [8, 256], strides = [1, 1]} : vector<96x256xf32> to vector<8x256xf32>
    %389 = vector.extract_strided_slice %380 {offsets = [64, 0], sizes = [8, 256], strides = [1, 1]} : vector<96x256xf32> to vector<8x256xf32>
    %390 = vector.extract_strided_slice %380 {offsets = [72, 0], sizes = [8, 256], strides = [1, 1]} : vector<96x256xf32> to vector<8x256xf32>
    %391 = vector.extract_strided_slice %380 {offsets = [80, 0], sizes = [8, 256], strides = [1, 1]} : vector<96x256xf32> to vector<8x256xf32>
    %392 = vector.extract_strided_slice %380 {offsets = [88, 0], sizes = [8, 256], strides = [1, 1]} : vector<96x256xf32> to vector<8x256xf32>
    %393 = tpu.concatenate %381, %382, %383, %384, %385, %386, %387, %388, %389, %390, %391, %392 in 1 : vector<8x256xf32>, vector<8x256xf32>, vector<8x256xf32>, vector<8x256xf32>, vector<8x256xf32>, vector<8x256xf32>, vector<8x256xf32>, vector<8x256xf32>, vector<8x256xf32>, vector<8x256xf32>, vector<8x256xf32>, vector<8x256xf32> -> vector<8x3072xf32>
    %c0_52 = arith.constant 0 : index
    %c0_53 = arith.constant 0 : index
    %394 = vector.load %arg10[%c0_52, %c0_53] : memref<3072x512xf32, #tpu.memory_space<vmem>>, vector<3072x512xf32>
    %cst_54 = arith.constant dense<0.000000e+00> : vector<8x512xf32>
    %395 = tpu.matmul %393, %394, %cst_54 {dimension_numbers = #tpu.dot_dimension_numbers<[1], [0], [0], [1], [0, 0, 1, 1], [], []>} : vector<8x3072xf32>, vector<3072x512xf32>, vector<8x512xf32> -> vector<8x512xf32>
    %c0_55 = arith.constant 0 : index
    %c0_56 = arith.constant 0 : index
    %396 = vector.load %arg11[%c0_55, %c0_56] : memref<1x512xf32, #tpu.memory_space<vmem>>, vector<1x512xf32>
    %397 = vector.broadcast %396 : vector<1x512xf32> to vector<8x512xf32>
    %398 = arith.addf %395, %397 : vector<8x512xf32>
    %cst_57 = arith.constant 0.000000e+00 : f32
    %399 = vector.broadcast %cst_57 : f32 to vector<8x512xf32>
    %400 = arith.maximumf %398, %399 : vector<8x512xf32>
    %c0_58 = arith.constant 0 : index
    %c0_59 = arith.constant 0 : index
    %401 = vector.load %arg12[%c0_58, %c0_59] : memref<512x256xf32, #tpu.memory_space<vmem>>, vector<512x256xf32>
    %cst_60 = arith.constant dense<0.000000e+00> : vector<8x256xf32>
    %402 = tpu.matmul %400, %401, %cst_60 {dimension_numbers = #tpu.dot_dimension_numbers<[1], [0], [0], [1], [0, 0, 1, 1], [], []>} : vector<8x512xf32>, vector<512x256xf32>, vector<8x256xf32> -> vector<8x256xf32>
    %c0_61 = arith.constant 0 : index
    %c0_62 = arith.constant 0 : index
    %403 = vector.load %arg13[%c0_61, %c0_62] : memref<1x256xf32, #tpu.memory_space<vmem>>, vector<1x256xf32>
    %404 = vector.broadcast %403 : vector<1x256xf32> to vector<8x256xf32>
    %405 = arith.addf %402, %404 : vector<8x256xf32>
    %cst_63 = arith.constant 0.000000e+00 : f32
    %406 = vector.broadcast %cst_63 : f32 to vector<8x256xf32>
    %407 = arith.maximumf %405, %406 : vector<8x256xf32>
    %c0_64 = arith.constant 0 : index
    %c0_65 = arith.constant 0 : index
    %408 = vector.load %arg14[%c0_64, %c0_65] : memref<8x256xf32, #tpu.memory_space<vmem>>, vector<8x256xf32>
    tpu.vector_store %arg14[%c0_64, %c0_65], %407 {strides = array<i32>} : memref<8x256xf32, #tpu.memory_space<vmem>>, vector<8x256xf32>,
    return
  }
  func.func @transform_0(%arg0: i32) -> (i32, i32, i32) {
    %c0_i32 = arith.constant 0 : i32
    %c0_i32_0 = arith.constant 0 : i32
    %c0_i32_1 = arith.constant 0 : i32
    return %c0_i32, %arg0, %c0_i32_0 : i32, i32, i32
  }
  func.func @transform_1(%arg0: i32) -> (i32, i32) {
    %c0_i32 = arith.constant 0 : i32
    %c0_i32_0 = arith.constant 0 : i32
    %c0_i32_1 = arith.constant 0 : i32
    return %c0_i32, %c0_i32_0 : i32, i32
  }
  func.func @transform_2(%arg0: i32) -> (i32, i32) {
    %c0_i32 = arith.constant 0 : i32
    %c0_i32_0 = arith.constant 0 : i32
    %c0_i32_1 = arith.constant 0 : i32
    return %c0_i32, %c0_i32_0 : i32, i32
  }
  func.func @transform_3(%arg0: i32) -> (i32, i32, i32) {
    %c0_i32 = arith.constant 0 : i32
    %c0_i32_0 = arith.constant 0 : i32
    %c0_i32_1 = arith.constant 0 : i32
    %c0_i32_2 = arith.constant 0 : i32
    return %c0_i32, %c0_i32_0, %c0_i32_1 : i32, i32, i32
  }
  func.func @transform_4(%arg0: i32) -> (i32, i32) {
    %c0_i32 = arith.constant 0 : i32
    %c0_i32_0 = arith.constant 0 : i32
    %c0_i32_1 = arith.constant 0 : i32
    return %c0_i32, %c0_i32_0 : i32, i32
  }
  func.func @transform_5(%arg0: i32) -> (i32, i32) {
    %c0_i32 = arith.constant 0 : i32
    %c0_i32_0 = arith.constant 0 : i32
    %c0_i32_1 = arith.constant 0 : i32
    return %c0_i32, %c0_i32_0 : i32, i32
  }
  func.func @transform_6(%arg0: i32) -> (i32, i32) {
    %c0_i32 = arith.constant 0 : i32
    %c0_i32_0 = arith.constant 0 : i32
    %c0_i32_1 = arith.constant 0 : i32
    return %c0_i32, %c0_i32_0 : i32, i32
  }
  func.func @transform_7(%arg0: i32) -> (i32, i32) {
    %c0_i32 = arith.constant 0 : i32
    %c0_i32_0 = arith.constant 0 : i32
    %c0_i32_1 = arith.constant 0 : i32
    return %c0_i32, %c0_i32_0 : i32, i32
  }
  func.func @transform_8(%arg0: i32) -> (i32, i32) {
    %c0_i32 = arith.constant 0 : i32
    %c0_i32_0 = arith.constant 0 : i32
    %c0_i32_1 = arith.constant 0 : i32
    return %c0_i32, %c0_i32_0 : i32, i32
  }
  func.func @transform_9(%arg0: i32) -> (i32, i32) {
    %c0_i32 = arith.constant 0 : i32
    %c0_i32_0 = arith.constant 0 : i32
    %c0_i32_1 = arith.constant 0 : i32
    return %c0_i32, %c0_i32_0 : i32, i32
  }
  func.func @transform_10(%arg0: i32) -> (i32, i32) {
    %c0_i32 = arith.constant 0 : i32
    %c0_i32_0 = arith.constant 0 : i32
    %c0_i32_1 = arith.constant 0 : i32
    return %c0_i32, %c0_i32_0 : i32, i32
  }
  func.func @transform_11(%arg0: i32) -> (i32, i32) {
    %c0_i32 = arith.constant 0 : i32
    %c0_i32_0 = arith.constant 0 : i32
    %c0_i32_1 = arith.constant 0 : i32
    return %c0_i32, %c0_i32_0 : i32, i32
  }
  func.func @transform_12(%arg0: i32) -> (i32, i32) {
    %c0_i32 = arith.constant 0 : i32
    %c0_i32_0 = arith.constant 0 : i32
    %c0_i32_1 = arith.constant 0 : i32
    return %c0_i32, %c0_i32_0 : i32, i32
  }
  func.func @transform_13(%arg0: i32) -> (i32, i32) {
    %c0_i32 = arith.constant 0 : i32
    %c0_i32_0 = arith.constant 0 : i32
    return %arg0, %c0_i32 : i32, i32
  }
}

</mosaic_0001>

<bundles_post_ra>
// kernel: feature_forward.1
= control target key start
LH: loop header
LB: loop body
LE: loop exit
PB: predicated region body
PF: predicated region fallthrough
CT: control target
= control target key end

     0   :  { %v7854_v0 = vmov 1   ;;  %v7855_v10 = vmov 0.0   ;;  %v7856_v12 = vmov 3   ;;  %v7857_v13 = vmov 5   ;;  %s13973_s0 = inlined_call_operand.vmem [shape: f32[4,8,12], index: 0, kind: input, shape index: {}]   ;;  %s13974_s3 = inlined_call_operand.vmem [shape: f32[3,32,64], index: 3, kind: input, shape index: {}]   ;;  %s13975_s1 = inlined_call_operand.vmem [shape: f32[1,32], index: 1, kind: input, shape index: {}]   ;;  %s13976_s2 = inlined_call_operand.vmem [shape: f32[1,32], index: 2, kind: input, shape index: {}]   ;;  %s13977_s5 = inlined_call_operand.vmem [shape: f32[64,128], index: 5, kind: input, shape index: {}]   ;;  %s13978_s7 = inlined_call_operand.vmem [shape: f32[384,256], index: 7, kind: input, shape index: {}]   ;;  %s13979_s4 = inlined_call_operand.vmem [shape: f32[1,64], index: 4, kind: input, shape index: {}]   ;;  %s13980_s9 = inlined_call_operand.vmem [shape: f32[3072,512], index: 9, kind: input, shape index: {}]   ;;  %s13981_s6 = inlined_call_operand.vmem [shape: f32[1,128], index: 6, kind: input, shape index: {}]   ;;  %s13982_s8 = inlined_call_operand.vmem [shape: f32[1,256], index: 8, kind: input, shape index: {}]   ;;  %s13983_s11 = inlined_call_operand.vmem [shape: f32[512,256], index: 11, kind: input, shape index: {}]   ;;  %s13984_s10 = inlined_call_operand.vmem [shape: f32[1,512], index: 10, kind: input, shape index: {}]   ;;  %s13985_s12 = inlined_call_operand.vmem [shape: f32[1,256], index: 12, kind: input, shape index: {}]   ;;  %s13986_s13 = inlined_call_operand.vmem [shape: f32[8,256], index: 13, kind: output, shape index: {}]  }
   0x1   :  { %7829 = vset.pattern.permute.xlu1 %v7854_v0  ;;  %7828 = vset.pattern.permute.xlu0 %v7854_v0  ;;  %v7940_v1 = vld [vmem:[%s13973_s0 + $0x10] sm:$0xff]  ;;  %v7945_v2 = vld [vmem:[%s13973_s0] sm:$0xff]  ;;  %v7952_v3 = vld [vmem:[%s13973_s0 + $0x18] sm:$0xff]  ;;  %v7858_v14 = vmov 7   ;;  %v7859_v18 = vmov 9   ;;  %v7860_v19 = vmov 0  }
   0x2   :  { %110 = vperm.xlu1 %7829, %v7940_v1   ;;  %98 = vperm.xlu0 %7828, %v7945_v2   ;;  %v7957_v4 = vld [vmem:[%s13973_s0 + $0x8] sm:$0xff]  ;;  %v405_v5 = vld [vmem:[%s13974_s3] sm:$0xff]  ;;  %v407_v7 = vld [vmem:[%s13974_s3 + $0x10] sm:$0xff]  ;;  %v7861_v20 = vmov 2   ;;  %v7862_v26 = vmov 4   ;;  %v7863_v31 = vmov 6  }
   0x3   :  { %v406_v6 = vld [vmem:[%s13974_s3 + $0x8] sm:$0xff]  ;;  %v408_v8 = vld [vmem:[%s13974_s3 + $0x18] sm:$0xff]  ;;  %5735 = vmatprep.mubr.f32.mxu0 %v7855_v10  ;;  %v5513_v15 = vld [vmem:[%s13974_s3 + $0x40] sm:$0xff]  ;;  %v7864_v32 = vmov 8   ;;  %v7865_v33 = vmov 11   ;;  %v7866_v34 = vmov 10  }
   0x4   :  { %v5875_v9 = vpack.c.bf16 %v406_v6, %v405_v5  ;;  %v5879_v11 = vpack.c.bf16 %v408_v8, %v407_v7  ;;  %v5514_v16 = vld [vmem:[%s13974_s3 + $0x48] sm:$0xff]  ;;  %v5515_v21 = vld [vmem:[%s13974_s3 + $0x50] sm:$0xff]  ;;  %v5516_v22 = vld [vmem:[%s13974_s3 + $0x58] sm:$0xff]  ;;  %vm414_vm0 = vcmask 261120   ;;  %vm1216_vm1 = vcmask 523264  }
   0x5   :  { %v5883_v17 = vpack.c.bf16 %v5514_v16, %v5513_v15  ;;  %v5465_v23 = vld [vmem:[%s13974_s3 + $0x20] sm:$0xff]  ;;  %v5887_v24 = vpack.c.bf16 %v5516_v22, %v5515_v21  ;;  %v5466_v25 = vld [vmem:[%s13974_s3 + $0x28] sm:$0xff]  ;;  %v5467_v28 = vld [vmem:[%s13974_s3 + $0x30] sm:$0xff] }
   0x6   :  { %116 = vperm.xlu1 %7829, %v7952_v3   ;;  %104 = vperm.xlu0 %7828, %v7957_v4   ;;  %v5867_v27 = vpack.c.bf16 %v5466_v25, %v5465_v23  ;;  %v5468_v29 = vld [vmem:[%s13974_s3 + $0x38] sm:$0xff]  ;;  %v8048_v35 = vld [vmem:[%s13975_s1] ss:$0 sm:$0xff]  ;;  %v1202_v45 = vld [vmem:[%s13977_s5 + $0x8] sm:$0xff] }
   0x7   :  { %5876 = vmatprep.subr.bf16.mxu0 %v5875_v9  ;;  %v5871_v30 = vpack.c.bf16 %v5468_v29, %v5467_v28  ;;  %v8054_v39 = vld [vmem:[%s13976_s2] ss:$0 sm:$0xff] }
   0x8   :  { %5878 = vmatpush3.bf16.msra.mxu0 %v5875_v9  ;;  %5868 = vmatprep.subr.bf16.mxu1 %v5867_v27  ;;  %v1201_v44 = vld [vmem:[%s13977_s5] sm:$0xff] }
   0x9   :  { %5880 = vmatprep.subr.bf16.mxu0 %v5879_v11  ;;  %5870 = vmatpush3.bf16.msra.mxu1 %v5867_v27  ;;  %v8072_v50 = vpack.c.bf16 %v1202_v45, %v1201_v44 }
   0xa   :  { %7831 = vset.pattern.permute.xlu1 %v7856_v12  ;;  %7830 = vset.pattern.permute.xlu0 %v7856_v12 }
   0xb   :  { %160 = vperm.xlu1 %7831, %v7957_v4   ;;  %154 = vperm.xlu0 %7830, %v7945_v2  }
   0xc   :  { %5882 = vmatpush3.bf16.msra.mxu0 %v5879_v11  ;;  %5872 = vmatprep.subr.bf16.mxu1 %v5871_v30 }
   0xd   :  { %5884 = vmatprep.subr.bf16.mxu0 %v5883_v17  ;;  %5874 = vmatpush3.bf16.msra.mxu1 %v5871_v30 }
   0xe   :  { %5892 = vmatprep.subr.bf16.mxu1 %v8072_v50 }
   0xf   :  { %166 = vperm.xlu1 %7831, %v7940_v1   ;;  %172 = vperm.xlu0 %7830, %v7952_v3  }
  0x10   :  { %5736 = vmatmul.mubr.f32.vlgmr.msra.gmra.mrb[0].mxu0 %v7855_v10 }
  0x11   :  { %5738 = vmatprep.mubr.f32.mxu0 %v7855_v10  ;;  %5886 = vmatpush3.bf16.msra.mxu0 %v5883_v17 }
  0x12   :  { %5888 = vmatprep.subr.bf16.mxu0 %v5887_v24 }
  0x13   :  { %7832 = vset.pattern.permute.xlu1 %v7857_v13  ;;  %7833 = vset.pattern.permute.xlu0 %v7857_v13 }
  0x14   :  { %210 = vperm.xlu1 %7832, %v7945_v2   ;;  %216 = vperm.xlu0 %7833, %v7957_v4  }
  0x15   :  { %5739 = vmatmul.mubr.f32.gmra.mrb[2].mxu0 %v7855_v10 }
  0x16   :  { %5890 = vmatpush3.bf16.msra.mxu0 %v5887_v24 }
  0x18   :  { %222 = vperm.xlu1 %7832, %v7940_v1   ;;  %7834 = vset.pattern.permute.xlu0 %v7858_v14 }
  0x19   :  { %266 = vperm.xlu0 %7834, %v7945_v2  }
  0x1c   :  { %228 = vperm.xlu1 %7832, %v7952_v3  }
  0x1d   :  { %284 = vperm.xlu0 %7834, %v7952_v3  }
  0x20   :  { %7835 = vset.pattern.permute.xlu1 %v7858_v14 }
  0x21   :  { %272 = vperm.xlu1 %7835, %v7957_v4   ;;  %7837 = vset.pattern.permute.xlu0 %v7859_v18 }
  0x22   :  { %328 = vperm.xlu0 %7837, %v7957_v4  }
  0x25   :  { %278 = vperm.xlu1 %7835, %v7940_v1  }
  0x26   :  { %7838 = vset.pattern.permute.xlu0 %v7860_v19 }
  0x27   :  { %55 = vperm.xlu0 %7838, %v7945_v2  }
  0x29   :  { %7836 = vset.pattern.permute.xlu1 %v7859_v18 }
  0x2a   :  { %322 = vperm.xlu1 %7836, %v7945_v2  }
  0x2b   :  { %88 = vperm.xlu0 %7838, %v7952_v3  }
  0x2e   :  { %334 = vperm.xlu1 %7836, %v7940_v1  }
  0x2f   :  { %7841 = vset.pattern.permute.xlu0 %v7861_v20 }
  0x30   :  { %132 = vperm.xlu0 %7841, %v7957_v4  }
  0x32   :  { %340 = vperm.xlu1 %7836, %v7952_v3  }
  0x34   :  { %7842 = vset.pattern.permute.xlu0 %v7862_v26 }
  0x35   :  { %182 = vperm.xlu0 %7842, %v7945_v2  }
  0x36   :  { %7839 = vset.pattern.permute.xlu1 %v7860_v19 }
  0x37   :  { %74 = vperm.xlu1 %7839, %v7957_v4  }
  0x39   :  { %200 = vperm.xlu0 %7842, %v7952_v3  }
  0x3b   :  { %81 = vperm.xlu1 %7839, %v7940_v1  }
  0x3d   :  { %7845 = vset.pattern.permute.xlu0 %v7863_v31 }
  0x3e   :  { %244 = vperm.xlu0 %7845, %v7957_v4  }
  0x3f   :  { %7840 = vset.pattern.permute.xlu1 %v7861_v20 }
  0x40   :  { %126 = vperm.xlu1 %7840, %v7945_v2  }
  0x42   :  { %7846 = vset.pattern.permute.xlu0 %v7864_v32 }
  0x43   :  { %294 = vperm.xlu0 %7846, %v7945_v2  }
  0x44   :  { %138 = vperm.xlu1 %7840, %v7940_v1  }
  0x47   :  { %312 = vperm.xlu0 %7846, %v7952_v3  }
  0x48   :  { %144 = vperm.xlu1 %7840, %v7952_v3  }
  0x4b   :  { %7849 = vset.pattern.permute.xlu0 %v7865_v33 }
  0x4c   :  { %7843 = vset.pattern.permute.xlu1 %v7862_v26  ;;  %378 = vperm.xlu0 %7849, %v7945_v2  }
  0x4d   :  { %188 = vperm.xlu1 %7843, %v7957_v4  }
  0x50   :  { %7851 = vset.pattern.permute.xlu0 %v7866_v34 }
  0x51   :  { %194 = vperm.xlu1 %7843, %v7940_v1   ;;  %362 = vperm.xlu0 %7851, %v7940_v1  }
  0x55   :  { %7844 = vset.pattern.permute.xlu1 %v7863_v31  ;;  %7853 = vset.pattern.permute.xlu0 %v7865_v33 }
  0x56   :  { %238 = vperm.xlu1 %7844, %v7945_v2   ;;  %396 = vperm.xlu0 %7853, %v7952_v3  }
  0x5a   :  { %250 = vperm.xlu1 %7844, %v7940_v1  }
  0x5e   :  { %256 = vperm.xlu1 %7844, %v7952_v3  }
  0x62   :  { %7847 = vset.pattern.permute.xlu1 %v7864_v32 }
  0x63   :  { %300 = vperm.xlu1 %7847, %v7957_v4  }
  0x67   :  { %306 = vperm.xlu1 %7847, %v7940_v1  }
  0x6b   :  { %7848 = vset.pattern.permute.xlu1 %v7866_v34 }
  0x6c   :  { %350 = vperm.xlu1 %7848, %v7945_v2  }
  0x70   :  { %356 = vperm.xlu1 %7848, %v7957_v4  }
  0x74   :  { %7850 = vset.pattern.permute.xlu1 %v7865_v33 }
  0x75   :  { %384 = vperm.xlu1 %7850, %v7957_v4  }
  0x79   :  { %390 = vperm.xlu1 %7850, %v7940_v1  }
  0x7d   :  { %7852 = vset.pattern.permute.xlu1 %v7866_v34 }
  0x7e   :  { %368 = vperm.xlu1 %7852, %v7952_v3  }
  0x81   :  { %v111_v36 = vpop.permute.xlu1 %110  ;;  %v99_v37 = vpop.permute.xlu0 %98 }
  0x82   :  { %v101_v38 = vmul.f32 %v8048_v35, %v99_v37  ;;  %v113_v40 = vmul.f32 %v8048_v35, %v111_v36 }
  0x84   :  { %v8058_v41 = vadd.f32 %v8054_v39, %v101_v38  ;;  %v8070_v49 = vadd.f32 %v8054_v39, %v113_v40 }
  0x85   :  { %v117_v42 = vpop.permute.xlu1 %116  ;;  %v105_v43 = vpop.permute.xlu0 %104 }
  0x86   :  { %v121_v46 = vmax.f32 %v8058_v41, 0.0  ;;  %v119_v47 = vmul.f32 %v8048_v35, %v117_v42  ;;  %v107_v48 = vmul.f32 %v8048_v35, %v105_v43  ;;  %v123_v56 = vmax.f32 %v8070_v49, 0.0  ;;  %v1205_v41 = vld [vmem:[%s13977_s5 + $0x20] sm:$0xff] }
  0x88   :  { %v8075_v51 = vadd.f32 %v8054_v39, %v107_v48  ;;  %5741 = vmatprep.mubr.msk.f32.mxu0 %vm414_vm0, %v121_v46  ;;  %v8082_v52 = vadd.f32 %v8054_v39, %v119_v47 }
  0x8a   :  { %v122_v53 = vmax.f32 %v8075_v51, 0.0  ;;  %v161_v54 = vpop.permute.xlu1 %160  ;;  %v155_v55 = vpop.permute.xlu0 %154  ;;  %v124_v60 = vmax.f32 %v8082_v52, 0.0 }
  0x8b   :  { %v163_v57 = vmul.f32 %v8048_v35, %v161_v54  ;;  %v157_v58 = vmul.f32 %v8048_v35, %v155_v55 }
  0x8c   :  { %5742 = vmatmul.mubr.msk.f32.gmra.mrb[4].mxu0 %vm414_vm0, %v122_v53 }
  0x8d   :  { %v8092_v59 = vadd.f32 %v8054_v39, %v157_v58  ;;  %5744 = vmatprep.mubr.msk.f32.mxu0 %vm414_vm0, %v123_v56  ;;  %v8099_v61 = vadd.f32 %v8054_v39, %v163_v57 }
  0x8e   :  { %v167_v62 = vpop.permute.xlu1 %166  ;;  %v173_v63 = vpop.permute.xlu0 %172 }
  0x8f   :  { %v177_v0 = vmax.f32 %v8092_v59, 0.0  ;;  %v169_v1 = vmul.f32 %v8048_v35, %v167_v62  ;;  %v175_v2 = vmul.f32 %v8048_v35, %v173_v63  ;;  %v178_v5 = vmax.f32 %v8099_v61, 0.0 }
  0x90   :  { %5745 = vmatmul.mubr.msk.f32.gmra.mrb[6].mxu0 %vm414_vm0, %v124_v60 }
  0x91   :  { %v8108_v3 = vadd.f32 %v8054_v39, %v169_v1  ;;  %v8111_v4 = vadd.f32 %v8054_v39, %v175_v2  ;;  %5747 = vmatprep.mubr.msk.f32.mxu0 %vm414_vm0, %v177_v0 }
  0x93   :  { %v179_v6 = vmax.f32 %v8108_v3, 0.0  ;;  %v211_v7 = vpop.permute.xlu1 %210  ;;  %v217_v8 = vpop.permute.xlu0 %216  ;;  %v180_v9 = vmax.f32 %v8111_v4, 0.0 }
  0x94   :  { %v213_v11 = vmul.f32 %v8048_v35, %v211_v7  ;;  %5748 = vmatmul.mubr.msk.f32.gmra.mrb[8].mxu0 %vm414_vm0, %v178_v5  ;;  %v219_v12 = vmul.f32 %v8048_v35, %v217_v8 }
  0x95   :  { %5750 = vmatprep.mubr.msk.f32.mxu0 %vm414_vm0, %v179_v6 }
  0x96   :  { %v8128_v13 = vadd.f32 %v8054_v39, %v213_v11  ;;  %v8131_v14 = vadd.f32 %v8054_v39, %v219_v12 }
  0x97   :  { %v223_v15 = vpop.permute.xlu1 %222 }
  0x98   :  { %v233_v16 = vmax.f32 %v8128_v13, 0.0  ;;  %v234_v17 = vmax.f32 %v8131_v14, 0.0  ;;  %v225_v18 = vmul.f32 %v8048_v35, %v223_v15  ;;  %5751 = vmatmul.mubr.msk.f32.gmra.mrb[10].mxu0 %vm414_vm0, %v180_v9  ;;  %v267_v19 = vpop.permute.xlu0 %266 }
  0x99   :  { %v269_v20 = vmul.f32 %v8048_v35, %v267_v19 }
  0x9a   :  { %v8141_v21 = vadd.f32 %v8054_v39, %v225_v18  ;;  %5753 = vmatprep.mubr.msk.f32.mxu0 %vm414_vm0, %v233_v16 }
  0x9b   :  { %v229_v22 = vpop.permute.xlu1 %228  ;;  %v8147_v23 = vadd.f32 %v8054_v39, %v269_v20 }
  0x9c   :  { %v235_v24 = vmax.f32 %v8141_v21, 0.0  ;;  %v231_v25 = vmul.f32 %v8048_v35, %v229_v22  ;;  %5754 = vmatmul.mubr.msk.f32.gmra.mrb[12].mxu0 %vm414_vm0, %v234_v17  ;;  %v285_v26 = vpop.permute.xlu0 %284 }
  0x9d   :  { %v289_v28 = vmax.f32 %v8147_v23, 0.0  ;;  %v287_v31 = vmul.f32 %v8048_v35, %v285_v26 }
  0x9e   :  { %v8155_v27 = vadd.f32 %v8054_v39, %v231_v25  ;;  %5756 = vmatprep.mubr.msk.f32.mxu0 %vm414_vm0, %v235_v24 }
  0x9f   :  { %v8174_v37 = vadd.f32 %v8054_v39, %v287_v31 }
  0xa0   :  { %v236_v29 = vmax.f32 %v8155_v27, 0.0  ;;  %v273_v30 = vpop.permute.xlu1 %272 }
  0xa1   :  { %v275_v32 = vmul.f32 %v8048_v35, %v273_v30  ;;  %v329_v33 = vpop.permute.xlu0 %328  ;;  %v292_v47 = vmax.f32 %v8174_v37, 0.0 }
  0xa2   :  { %5757 = vmatmul.mubr.msk.f32.gmra.mrb[14].mxu0 %vm414_vm0, %v236_v29  ;;  %v331_v42 = vmul.f32 %v8048_v35, %v329_v33  ;;  %v1204_v33 = vld [vmem:[%s13977_s5 + $0x18] sm:$0xff] }
  0xa3   :  { %v8168_v34 = vadd.f32 %v8054_v39, %v275_v32  ;;  %5759 = vmatprep.mubr.msk.f32.mxu0 %vm414_vm0, %v289_v28  ;;  %v1203_v32 = vld [vmem:[%s13977_s5 + $0x10] sm:$0xff] }
  0xa4   :  { %v279_v36 = vpop.permute.xlu1 %278  ;;  %v8189_v55 = vadd.f32 %v8054_v39, %v331_v42 }
  0xa5   :  { %v290_v38 = vmax.f32 %v8168_v34, 0.0  ;;  %v281_v40 = vmul.f32 %v8048_v35, %v279_v36 }
  0xa6   :  { %v56_v43 = vpop.permute.xlu0 %55  ;;  %v346_v1 = vmax.f32 %v8189_v55, 0.0 }
  0xa7   :  { %v8180_v44 = vadd.f32 %v8054_v39, %v281_v40  ;;  %5760 = vmatmul.mubr.msk.f32.gmra.mrb[16].mxu0 %vm414_vm0, %v290_v38  ;;  %v64_v45 = vmul.f32 %v8048_v35, %v56_v43 }
  0xa9   :  { %v291_v48 = vmax.f32 %v8180_v44, 0.0  ;;  %v323_v54 = vpop.permute.xlu1 %322  ;;  %v71_v57 = vadd.f32 %v8054_v39, %v64_v45 }
  0xaa   :  { %v325_v58 = vmul.f32 %v8048_v35, %v323_v54  ;;  %v89_v19 = vpop.permute.xlu0 %88 }
  0xab   :  { %5762 = vmatprep.mubr.msk.f32.mxu0 %vm414_vm0, %v291_v48  ;;  %v93_v62 = vmax.f32 %v71_v57, 0.0  ;;  %v91_v26 = vmul.f32 %v8048_v35, %v89_v19  ;;  %v5895_v57 = vpack.c.bf16 %v1204_v33, %v1203_v32 }
  0xac   :  { %v8197_v63 = vadd.f32 %v8054_v39, %v325_v58  ;;  %5763 = vmatmul.mubr.msk.f32.gmra.mrb[18].mxu0 %vm414_vm0, %v292_v47 }
  0xad   :  { %v335_v2 = vpop.permute.xlu1 %334  ;;  %5691 = vmatprep.mubr.msk.f32.mxu1 %vm414_vm0, %v93_v62  ;;  %v92_v42 = vadd.f32 %v8054_v39, %v91_v26 }
  0xae   :  { %v345_v7 = vmax.f32 %v8197_v63, 0.0  ;;  %v337_v8 = vmul.f32 %v8048_v35, %v335_v2 }
  0xaf   :  { %v133_v31 = vpop.permute.xlu0 %132  ;;  %v96_v51 = vmax.f32 %v92_v42, 0.0 }
  0xb0   :  { %v8207_v11 = vadd.f32 %v8054_v39, %v337_v8  ;;  %5765 = vmatprep.mubr.msk.f32.mxu0 %vm414_vm0, %v345_v7  ;;  %v135_v54 = vmul.f32 %v8048_v35, %v133_v31 }
  0xb1   :  { %v341_v12 = vpop.permute.xlu1 %340  ;;  %5766 = vmatmul.mubr.msk.f32.gmra.mrb[20].mxu0 %vm414_vm0, %v346_v1 }
  0xb2   :  { %v347_v15 = vmax.f32 %v8207_v11, 0.0  ;;  %v343_v18 = vmul.f32 %v8048_v35, %v341_v12  ;;  %v136_v8 = vadd.f32 %v8054_v39, %v135_v54 }
  0xb4   :  { %v8218_v20 = vadd.f32 %v8054_v39, %v343_v18  ;;  %5768 = vmatprep.mubr.msk.f32.mxu0 %vm414_vm0, %v347_v15  ;;  %v183_v58 = vpop.permute.xlu0 %182  ;;  %v150_v18 = vmax.f32 %v136_v8, 0.0 }
  0xb6   :  { %v348_v22 = vmax.f32 %v8218_v20, 0.0  ;;  %v75_v25 = vpop.permute.xlu1 %74 }
  0xb7   :  { %v77_v30 = vmul.f32 %v8048_v35, %v75_v25  ;;  %v185_v25 = vmul.f32 %v8048_v35, %v183_v58 }
  0xb8   :  { %5769 = vmatmul.mubr.msk.f32.gmra.mrb[22].mxu0 %vm414_vm0, %v348_v22 }
  0xb9   :  { %v78_v36 = vadd.f32 %v8054_v39, %v77_v30  ;;  %5779 = vmatprep.mubr.msk.f32.mxu0 %vm414_vm0, %v121_v46  ;;  %v1206_v46 = vld [vmem:[%s13977_s5 + $0x28] sm:$0xff]  ;;  %v186_v30 = vadd.f32 %v8054_v39, %v185_v25 }
  0xba   :  { %v82_v40 = vpop.permute.xlu1 %81  ;;  %v5899_v12 = vpack.c.bf16 %v1206_v46, %v1205_v41 }
  0xbb   :  { %v94_v43 = vmax.f32 %v78_v36, 0.0  ;;  %v84_v45 = vmul.f32 %v8048_v35, %v82_v40 }
  0xbc   :  { %5780 = vmatmul.mubr.msk.f32.vlgmr.msra.gmra.mrb[0].mxu0 %vm414_vm0, %v122_v53 }
  0xbd   :  { %v85_v62 = vadd.f32 %v8054_v39, %v84_v45  ;;  %5692 = vmatmul.mubr.msk.f32.vlgmr.msra.gmra.mrb[0].mxu1 %vm414_vm0, %v94_v43  ;;  %5782 = vmatprep.mubr.msk.f32.mxu0 %vm414_vm0, %v123_v56  ;;  %v201_v56 = vpop.permute.xlu0 %200 }
  0xbe   :  { %5894 = vmatpush3.bf16.msra.mxu1 %v8072_v50  ;;  %v203_v4 = vmul.f32 %v8048_v35, %v201_v56 }
  0xbf   :  { %v95_v53 = vmax.f32 %v85_v62, 0.0  ;;  %v127_v2 = vpop.permute.xlu1 %126  ;;  %5896 = vmatprep.subr.bf16.mxu1 %v5895_v57 }
  0xc0   :  { %v129_v49 = vmul.f32 %v8048_v35, %v127_v2  ;;  %5783 = vmatmul.mubr.msk.f32.gmra.mrb[2].mxu0 %vm414_vm0, %v124_v60  ;;  %v204_v14 = vadd.f32 %v8054_v39, %v203_v4 }
  0xc1   :  { %5694 = vmatprep.mubr.msk.f32.mxu1 %vm414_vm0, %v95_v53  ;;  %5785 = vmatprep.mubr.msk.f32.mxu0 %vm414_vm0, %v177_v0  ;;  %v245_v0 = vpop.permute.xlu0 %244 }
  0xc2   :  { %v130_v50 = vadd.f32 %v8054_v39, %v129_v49  ;;  %5695 = vmatmul.mubr.msk.f32.gmra.mrb[2].mxu1 %vm414_vm0, %v96_v51  ;;  %v247_v21 = vmul.f32 %v8048_v35, %v245_v0  ;;  %v208_v42 = vmax.f32 %v204_v14, 0.0 }
  0xc3   :  { %v139_v19 = vpop.permute.xlu1 %138  ;;  %5898 = vmatpush3.bf16.msra.mxu1 %v5895_v57 }
  0xc4   :  { %v149_v52 = vmax.f32 %v130_v50, 0.0  ;;  %v141_v60 = vmul.f32 %v8048_v35, %v139_v19  ;;  %5786 = vmatmul.mubr.msk.f32.gmra.mrb[4].mxu0 %vm414_vm0, %v178_v5  ;;  %5900 = vmatprep.subr.bf16.mxu1 %v5899_v12  ;;  %v248_v23 = vadd.f32 %v8054_v39, %v247_v21 }
  0xc5   :  { %5788 = vmatprep.mubr.msk.f32.mxu0 %vm414_vm0, %v179_v6  ;;  %v295_v5 = vpop.permute.xlu0 %294  ;;  %v205_v6 = vmax.f32 %v186_v30, 0.0 }
  0xc6   :  { %v142_v59 = vadd.f32 %v8054_v39, %v141_v60  ;;  %5697 = vmatprep.mubr.msk.f32.mxu1 %vm414_vm0, %v149_v52  ;;  %v262_v34 = vmax.f32 %v248_v23, 0.0  ;;  %v297_v44 = vmul.f32 %v8048_v35, %v295_v5 }
  0xc7   :  { %v145_v26 = vpop.permute.xlu1 %144  ;;  %5698 = vmatmul.mubr.msk.f32.gmra.mrb[4].mxu1 %vm414_vm0, %v150_v18 }
  0xc8   :  { %v151_v31 = vmax.f32 %v142_v59, 0.0  ;;  %v147_v61 = vmul.f32 %v8048_v35, %v145_v26  ;;  %5789 = vmatmul.mubr.msk.f32.gmra.mrb[6].mxu0 %vm414_vm0, %v180_v9  ;;  %5902 = vmatpush3.bf16.msra.mxu1 %v5899_v12 }
  0xc9   :  { %5791 = vmatprep.mubr.msk.f32.mxu0 %vm414_vm0, %v233_v16 }
  0xca   :  { %v148_v3 = vadd.f32 %v8054_v39, %v147_v61  ;;  %5700 = vmatprep.mubr.msk.f32.mxu1 %vm414_vm0, %v151_v31 }
  0xcc   :  { %v152_v32 = vmax.f32 %v148_v3, 0.0  ;;  %v189_v33 = vpop.permute.xlu1 %188  ;;  %5792 = vmatmul.mubr.msk.f32.gmra.mrb[8].mxu0 %vm414_vm0, %v234_v17  ;;  %v313_v17 = vpop.permute.xlu0 %312 }
  0xcd   :  { %v191_v9 = vmul.f32 %v8048_v35, %v189_v33  ;;  %5794 = vmatprep.mubr.msk.f32.mxu0 %vm414_vm0, %v235_v24  ;;  %v315_v51 = vmul.f32 %v8048_v35, %v313_v17 }
  0xce   :  { %5701 = vmatmul.mubr.msk.f32.gmra.mrb[6].mxu1 %vm414_vm0, %v152_v32 }
  0xcf   :  { %v192_v13 = vadd.f32 %v8054_v39, %v191_v9  ;;  %5703 = vmatprep.mubr.msk.f32.mxu1 %vm414_vm0, %v205_v6 }
  0xd0   :  { %v195_v16 = vpop.permute.xlu1 %194  ;;  %5795 = vmatmul.mubr.msk.f32.gmra.mrb[10].mxu0 %vm414_vm0, %v236_v29  ;;  %v379_v27 = vpop.permute.xlu0 %378 }
  0xd1   :  { %v206_v36 = vmax.f32 %v192_v13, 0.0  ;;  %v197_v40 = vmul.f32 %v8048_v35, %v195_v16  ;;  %5797 = vmatprep.mubr.msk.f32.mxu0 %vm414_vm0, %v289_v28  ;;  %v381_v28 = vmul.f32 %v8048_v35, %v379_v27  ;;  %v1207_v27 = vld [vmem:[%s13977_s5 + $0x30] sm:$0xff] }
  0xd3   :  { %v198_v24 = vadd.f32 %v8054_v39, %v197_v40  ;;  %5704 = vmatmul.mubr.msk.f32.gmra.mrb[8].mxu1 %vm414_vm0, %v206_v36 }
  0xd4   :  { %5798 = vmatmul.mubr.msk.f32.gmra.mrb[12].mxu0 %vm414_vm0, %v290_v38  ;;  %v363_v56 = vpop.permute.xlu0 %362 }
  0xd5   :  { %v207_v29 = vmax.f32 %v198_v24, 0.0  ;;  %v239_v43 = vpop.permute.xlu1 %238  ;;  %5800 = vmatprep.mubr.msk.f32.mxu0 %vm414_vm0, %v291_v48  ;;  %v382_v48 = vadd.f32 %v8054_v39, %v381_v28  ;;  %v365_v18 = vmul.f32 %v8048_v35, %v363_v56  ;;  %v1504_v56 = vld [vmem:[%s13978_s7 + $0x30] sm:$0xff] }
  0xd6   :  { %v241_v45 = vmul.f32 %v8048_v35, %v239_v43 }
  0xd7   :  { %5706 = vmatprep.mubr.msk.f32.mxu1 %vm414_vm0, %v207_v29  ;;  %v401_v63 = vmax.f32 %v382_v48, 0.0  ;;  %v366_v59 = vadd.f32 %v8054_v39, %v365_v18  ;;  %v1208_v29 = vld [vmem:[%s13977_s5 + $0x38] sm:$0xff] }
  0xd8   :  { %v242_v54 = vadd.f32 %v8054_v39, %v241_v45  ;;  %5707 = vmatmul.mubr.msk.f32.gmra.mrb[10].mxu1 %vm414_vm0, %v208_v42  ;;  %5801 = vmatmul.mubr.msk.f32.gmra.mrb[14].mxu0 %vm414_vm0, %v292_v47  ;;  %v298_v47 = vadd.f32 %v8054_v39, %v297_v44  ;;  %v397_v30 = vpop.permute.xlu0 %396  ;;  %v5903_v43 = vpack.c.bf16 %v1208_v29, %v1207_v27  ;;  %v1509_v18 = vld [vmem:[%s13978_s7 + $0x58] sm:$0xff]  ;;  %v1515_v29 = vld [vmem:[%s13978_s7 + $0x88] sm:$0xff] }
  0xd9   :  { %v251_v38 = vpop.permute.xlu1 %250  ;;  %5803 = vmatprep.mubr.msk.f32.mxu0 %vm414_vm0, %v345_v7  ;;  %v375_v61 = vmax.f32 %v366_v59, 0.0  ;;  %v399_v6 = vmul.f32 %v8048_v35, %v397_v30 }
  0xda   :  { %v261_v57 = vmax.f32 %v242_v54, 0.0  ;;  %v253_v58 = vmul.f32 %v8048_v35, %v251_v38  ;;  %v317_v55 = vmax.f32 %v298_v47, 0.0  ;;  %5904 = vmatprep.subr.bf16.mxu1 %v5903_v43  ;;  %v8396_v54 = vld [vmem:[%s13979_s4] ss:$0 sm:$0xff] }
  0xdb   :  { %v400_v9 = vadd.f32 %v8054_v39, %v399_v6  ;;  %5906 = vmatpush3.bf16.msra.mxu1 %v5903_v43  ;;  %v1508_v6 = vld [vmem:[%s13978_s7 + $0x50] sm:$0xff]  ;;  %v1517_v43 = vld [vmem:[%s13978_s7 + $0x98] sm:$0xff] }
  0xdc   :  { %v254_v62 = vadd.f32 %v8054_v39, %v253_v58  ;;  %5709 = vmatprep.mubr.msk.f32.mxu1 %vm414_vm0, %v261_v57  ;;  %5804 = vmatmul.mubr.msk.f32.gmra.mrb[16].mxu0 %vm414_vm0, %v346_v1 }
  0xdd   :  { %v257_v37 = vpop.permute.xlu1 %256  ;;  %5710 = vmatmul.mubr.msk.f32.gmra.mrb[12].mxu1 %vm414_vm0, %v262_v34  ;;  %5806 = vmatprep.mubr.msk.f32.mxu0 %vm414_vm0, %v347_v15  ;;  %v404_v17 = vmax.f32 %v400_v9, 0.0 }
  0xde   :  { %v263_v7 = vmax.f32 %v254_v62, 0.0  ;;  %v259_v41 = vmul.f32 %v8048_v35, %v257_v37  ;;  %v1498_v62 = vld [vmem:[%s13978_s7] sm:$0xff]  ;;  %v1500_v37 = vld [vmem:[%s13978_s7 + $0x10] sm:$0xff] }
  0xe0   :  { %v260_v46 = vadd.f32 %v8054_v39, %v259_v41  ;;  %5712 = vmatprep.mubr.msk.f32.mxu1 %vm414_vm0, %v263_v7  ;;  %5807 = vmatmul.mubr.msk.f32.gmra.mrb[18].mxu0 %vm414_vm0, %v348_v22  ;;  %v316_v22 = vadd.f32 %v8054_v39, %v315_v51  ;;  %v1503_v7 = vld [vmem:[%s13978_s7 + $0x28] sm:$0xff]  ;;  %v1505_v41 = vld [vmem:[%s13978_s7 + $0x38] sm:$0xff] }
  0xe1   :  { %5809 = vmatprep.mubr.msk.f32.mxu0 %vm414_vm0, %v401_v63 }
  0xe2   :  { %v264_v1 = vmax.f32 %v260_v46, 0.0  ;;  %v301_v11 = vpop.permute.xlu1 %300  ;;  %v320_v19 = vmax.f32 %v316_v22, 0.0 }
  0xe3   :  { %v303_v15 = vmul.f32 %v8048_v35, %v301_v11 }
  0xe4   :  { %5713 = vmatmul.mubr.msk.f32.gmra.mrb[14].mxu1 %vm414_vm0, %v264_v1 }
  0xe5   :  { %v304_v53 = vadd.f32 %v8054_v39, %v303_v15  ;;  %5715 = vmatprep.mubr.msk.f32.mxu1 %vm414_vm0, %v317_v55  ;;  %v5909_v15 = vpack.c.bf16 %v1500_v37, %v1498_v62  ;;  %v1521_v62 = vld [vmem:[%s13978_s7 + $0xb8] sm:$0xff] }
  0xe6   :  { %v307_v2 = vpop.permute.xlu1 %306 }
  0xe7   :  { %v318_v8 = vmax.f32 %v304_v53, 0.0  ;;  %v309_v20 = vmul.f32 %v8048_v35, %v307_v2 }
  0xe9   :  { %v310_v49 = vadd.f32 %v8054_v39, %v309_v20  ;;  %5716 = vmatmul.mubr.msk.f32.gmra.mrb[16].mxu1 %vm414_vm0, %v318_v8  ;;  %v5911_v8 = vpack.c.bf16 %v1505_v41, %v1503_v7 }
  0xeb   :  { %v319_v12 = vmax.f32 %v310_v49, 0.0  ;;  %v351_v50 = vpop.permute.xlu1 %350  ;;  %v1502_v49 = vld [vmem:[%s13978_s7 + $0x20] sm:$0xff] }
  0xec   :  { %v353_v25 = vmul.f32 %v8048_v35, %v351_v50  ;;  %v1507_v50 = vld [vmem:[%s13978_s7 + $0x48] sm:$0xff] }
  0xed   :  { %5718 = vmatprep.mubr.msk.f32.mxu1 %vm414_vm0, %v319_v12 }
  0xee   :  { %v354_v52 = vadd.f32 %v8054_v39, %v353_v25  ;;  %5719 = vmatmul.mubr.msk.f32.gmra.mrb[18].mxu1 %vm414_vm0, %v320_v19 }
  0xef   :  { %v357_v60 = vpop.permute.xlu1 %356 }
  0xf0   :  { %v373_v0 = vmax.f32 %v354_v52, 0.0  ;;  %v359_v26 = vmul.f32 %v8048_v35, %v357_v60 }
  0xf2   :  { %v360_v31 = vadd.f32 %v8054_v39, %v359_v26  ;;  %5721 = vmatprep.mubr.msk.f32.mxu1 %vm414_vm0, %v373_v0  ;;  %v5913_v0 = vpack.c.bf16 %v1504_v56, %v1502_v49 }
  0xf4   :  { %v374_v3 = vmax.f32 %v360_v31, 0.0  ;;  %v385_v5 = vpop.permute.xlu1 %384 }
  0xf5   :  { %v387_v32 = vmul.f32 %v8048_v35, %v385_v5  ;;  %v1506_v5 = vld [vmem:[%s13978_s7 + $0x40] sm:$0xff] }
  0xf6   :  { %5722 = vmatmul.mubr.msk.f32.gmra.mrb[20].mxu1 %vm414_vm0, %v374_v3 }
  0xf7   :  { %v388_v33 = vadd.f32 %v8054_v39, %v387_v32  ;;  %5724 = vmatprep.mubr.msk.f32.mxu1 %vm414_vm0, %v375_v61  ;;  %v5915_v61 = vpack.c.bf16 %v1509_v18, %v1507_v50 }
  0xf8   :  { %v391_v4 = vpop.permute.xlu1 %390 }
  0xf9   :  { %v402_v13 = vmax.f32 %v388_v33, 0.0  ;;  %v393_v16 = vmul.f32 %v8048_v35, %v391_v4  ;;  %v1511_v33 = vld [vmem:[%s13978_s7 + $0x68] sm:$0xff]  ;;  %v1513_v4 = vld [vmem:[%s13978_s7 + $0x78] sm:$0xff] }
  0xfb   :  { %v394_v14 = vadd.f32 %v8054_v39, %v393_v16  ;;  %5810 = vmatmul.mubr.msk.f32.gmra.mrb[20].mxu0 %vm414_vm0, %v402_v13 }
  0xfd   :  { %v403_v36 = vmax.f32 %v394_v14, 0.0  ;;  %v369_v40 = vpop.permute.xlu1 %368  ;;  %v5917_v14 = vpack.c.bf16 %v1508_v6, %v1506_v5 }
  0xfe   :  { %v371_v21 = vmul.f32 %v8048_v35, %v369_v40  ;;  %v1499_v35 = vld [vmem:[%s13978_s7 + $0x8] sm:$0xff]  ;;  %v5919_v40 = vpack.c.bf16 %v1513_v4, %v1511_v33 }
  0xff   :  { %5812 = vmatprep.mubr.msk.f32.mxu0 %vm414_vm0, %v403_v36 }
 0x100   :  { %v372_v24 = vadd.f32 %v8054_v39, %v371_v21  ;;  %5813 = vmatmul.mubr.msk.f32.gmra.mrb[22].mxu0 %vm414_vm0, %v404_v17  ;;  %v1501_v39 = vld [vmem:[%s13978_s7 + $0x18] sm:$0xff]  ;;  %v1510_v21 = vld [vmem:[%s13978_s7 + $0x60] sm:$0xff] }
 0x101   :  { %v5907_v23 = vpack.c.bf16 %v1501_v39, %v1499_v35 }
 0x102   :  { %v376_v42 = vmax.f32 %v372_v24, 0.0  ;;  %v1512_v24 = vld [vmem:[%s13978_s7 + $0x70] sm:$0xff] }
 0x103   :  { %5908 = vmatprep.subr.bf16.mxu1 %v5907_v23 }
 0x104   :  { %5725 = vmatmul.mubr.msk.f32.gmra.mrb[22].mxu1 %vm414_vm0, %v376_v42 }
 0x18f   :  { %v5781_v28 = vpop.f32.mrb[0].mxu0 }
 0x190   :  { %v5693_v45 = vpop.f32.mrb[0].mxu1  ;;  %v1003_v34 = vpop.f32.mrb[1].mxu0 }
 0x191   :  { %v7667_v38 = vadd.f32 %v5781_v28, %v5693_v45  ;;  %v553_v44 = vpop.f32.mrb[1].mxu1  ;;  %v5921_v45 = vpack.c.bf16 %v1512_v24, %v1510_v21  ;;  %v1528_v21 = vld [vmem:[%s13978_s7 + $0xf0] sm:$0xff] }
 0x192   :  { %v7668_v48 = vadd.f32 %v1003_v34, %v553_v44  ;;  %v1514_v44 = vld [vmem:[%s13978_s7 + $0x80] sm:$0xff] }
 0x193   :  { %v1154_v57 = vadd.f32 %v7667_v38, %v8396_v54  ;;  %v5784_v58 = vpop.f32.mrb[2].mxu0  ;;  %v5923_v38 = vpack.c.bf16 %v1517_v43, %v1515_v29  ;;  %v1533_v29 = vld [vmem:[%s13978_s7 + $0x118] sm:$0xff] }
 0x194   :  { %v1153_v47 = vadd.f32 %v7668_v48, %v8396_v54  ;;  %v1013_v63 = vpop.f32.mrb[3].mxu0  ;;  %v1516_v48 = vld [vmem:[%s13978_s7 + $0x90] sm:$0xff] }
 0x195   :  { %v5696_v46 = vpop.f32.mrb[2].mxu1  ;;  %v1178_v51 = vmax.f32 %v1154_v57, 0.0 }
 0x196   :  { %v1177_v55 = vmax.f32 %v1153_v47, 0.0  ;;  %v7669_v1 = vadd.f32 %v5784_v58, %v5696_v46  ;;  %v563_v11 = vpop.f32.mrb[3].mxu1  ;;  %v1519_v58 = vld [vmem:[%s13978_s7 + $0xa8] sm:$0xff] }
 0x197   :  { %v7670_v53 = vadd.f32 %v1013_v63, %v563_v11  ;;  %v5787_v2 = vpop.f32.mrb[4].mxu0 }
 0x198   :  { %v1156_v20 = vadd.f32 %v7669_v1, %v8396_v54  ;;  %v1023_v22 = vpop.f32.mrb[5].mxu0  ;;  %5831 = vmatprep.mubr.msk.f32.mxu1 %vm1216_vm1, %v1177_v55  ;;  %v5925_v1 = vpack.c.bf16 %v1516_v48, %v1514_v44  ;;  %v1535_v48 = vld [vmem:[%s13978_s7 + $0x128] sm:$0xff] }
 0x199   :  { %v1155_v12 = vadd.f32 %v7670_v53, %v8396_v54  ;;  %5832 = vmatmul.mubr.msk.f32.vlgmr.msra.gmra.mrb[24].mxu1 %vm1216_vm1, %v1178_v51  ;;  %v1518_v51 = vld [vmem:[%s13978_s7 + $0xa0] sm:$0xff]  ;;  %v1520_v53 = vld [vmem:[%s13978_s7 + $0xb0] sm:$0xff] }
 0x19a   :  { %v5699_v19 = vpop.f32.mrb[4].mxu1  ;;  %5910 = vmatpush1.bf16.msra.mxu1 %v5909_v15  ;;  %v1180_v26 = vmax.f32 %v1156_v20, 0.0  ;;  %v5927_v15 = vpack.c.bf16 %v1521_v62, %v1519_v58  ;;  %v1525_v20 = vld [vmem:[%s13978_s7 + $0xd8] sm:$0xff] }
 0x19b   :  { %v1179_v25 = vmax.f32 %v1155_v12, 0.0  ;;  %v7671_v52 = vadd.f32 %v5787_v2, %v5699_v19  ;;  %v573_v60 = vpop.f32.mrb[5].mxu1  ;;  %v5790_v59 = vpop.f32.mrb[6].mxu0  ;;  %5912 = vmatprep.subr.bf16.mxu1 %v5911_v8  ;;  %v1523_v8 = vld [vmem:[%s13978_s7 + $0xc8] sm:$0xff]  ;;  %v5929_v19 = vpack.c.bf16 %v1520_v53, %v1518_v51 }
 0x19c   :  { %v7672_v30 = vadd.f32 %v1023_v22, %v573_v60  ;;  %v1033_v31 = vpop.f32.mrb[7].mxu0  ;;  %v5931_v60 = vpack.c.bf16 %v1525_v20, %v1523_v8 }
 0x19d   :  { %v1158_v3 = vadd.f32 %v7671_v52, %v8396_v54  ;;  %5834 = vmatprep.mubr.msk.f32.mxu1 %vm1216_vm1, %v1179_v25 }
 0x19e   :  { %v1157_v32 = vadd.f32 %v7672_v30, %v8396_v54  ;;  %5835 = vmatmul.mubr.msk.f32.gmra.mrb[26].mxu1 %vm1216_vm1, %v1180_v26  ;;  %v1524_v26 = vld [vmem:[%s13978_s7 + $0xd0] sm:$0xff] }
 0x19f   :  { %v5793_v9 = vpop.f32.mrb[8].mxu0  ;;  %5914 = vmatpush1.bf16.msra.mxu1 %v5913_v0  ;;  %v1182_v17 = vmax.f32 %v1158_v3, 0.0  ;;  %v1522_v0 = vld [vmem:[%s13978_s7 + $0xc0] sm:$0xff]  ;;  %v1529_v3 = vld [vmem:[%s13978_s7 + $0xf8] sm:$0xff] }
 0x1a0   :  { %v1181_v13 = vmax.f32 %v1157_v32, 0.0  ;;  %v1043_v16 = vpop.f32.mrb[9].mxu0  ;;  %5916 = vmatprep.subr.bf16.mxu1 %v5915_v61  ;;  %v1527_v61 = vld [vmem:[%s13978_s7 + $0xe8] sm:$0xff] }
 0x1a1   :  { %v5702_v36 = vpop.f32.mrb[6].mxu1 }
 0x1a2   :  { %v7673_v42 = vadd.f32 %v5790_v59, %v5702_v36  ;;  %v583_v27 = vpop.f32.mrb[7].mxu1  ;;  %5837 = vmatprep.mubr.msk.f32.mxu1 %vm1216_vm1, %v1181_v13 }
 0x1a3   :  { %v7674_v35 = vadd.f32 %v1033_v31, %v583_v27  ;;  %v5796_v39 = vpop.f32.mrb[10].mxu0  ;;  %5838 = vmatmul.mubr.msk.f32.gmra.mrb[28].mxu1 %vm1216_vm1, %v1182_v17  ;;  %v1531_v27 = vld [vmem:[%s13978_s7 + $0x108] sm:$0xff] }
 0x1a4   :  { %v1160_v23 = vadd.f32 %v7673_v42, %v8396_v54  ;;  %v1053_v28 = vpop.f32.mrb[11].mxu0  ;;  %5918 = vmatpush1.bf16.msra.mxu1 %v5917_v14  ;;  %v5935_v14 = vpack.c.bf16 %v1529_v3, %v1527_v61  ;;  %v1542_v61 = vld [vmem:[%s13978_s7 + $0x160] sm:$0xff]  ;;  %v1544_v3 = vld [vmem:[%s13978_s7 + $0x170] sm:$0xff] }
 0x1a5   :  { %v1159_v34 = vadd.f32 %v7674_v35, %v8396_v54  ;;  %5920 = vmatprep.subr.bf16.mxu1 %v5919_v40  ;;  %v1526_v40 = vld [vmem:[%s13978_s7 + $0xe0] sm:$0xff] }
 0x1a6   :  { %v5705_v57 = vpop.f32.mrb[8].mxu1  ;;  %v1184_v41 = vmax.f32 %v1160_v23, 0.0  ;;  %v5937_v35 = vpack.c.bf16 %v1528_v21, %v1526_v40  ;;  %v1553_v40 = vld [vmem:[%s13978_s7 + $0x1b8] sm:$0xff] }
 0x1a7   :  { %v1183_v37 = vmax.f32 %v1159_v34, 0.0  ;;  %v7675_v47 = vadd.f32 %v5793_v9, %v5705_v57  ;;  %v593_v63 = vpop.f32.mrb[9].mxu1  ;;  %v5799_v7 = vpop.f32.mrb[12].mxu0  ;;  %v5933_v9 = vpack.c.bf16 %v1524_v26, %v1522_v0  ;;  %v1532_v34 = vld [vmem:[%s13978_s7 + $0x110] sm:$0xff]  ;;  %v1537_v57 = vld [vmem:[%s13978_s7 + $0x138] sm:$0xff] }
 0x1a8   :  { %v7676_v46 = vadd.f32 %v1043_v16, %v593_v63  ;;  %v1063_v55 = vpop.f32.mrb[13].mxu0  ;;  %5922 = vmatpush1.bf16.msra.mxu1 %v5921_v45  ;;  %v1530_v45 = vld [vmem:[%s13978_s7 + $0x100] sm:$0xff]  ;;  %v5943_v63 = vpack.c.bf16 %v1537_v57, %v1535_v48 }
 0x1a9   :  { %v1162_v11 = vadd.f32 %v7675_v47, %v8396_v54  ;;  %5840 = vmatprep.mubr.msk.f32.mxu1 %vm1216_vm1, %v1183_v37  ;;  %5924 = vmatprep.subr.bf16.mxu1 %v5923_v38  ;;  %v5941_v37 = vpack.c.bf16 %v1532_v34, %v1530_v45 }
 0x1aa   :  { %v1161_v2 = vadd.f32 %v7676_v46, %v8396_v54  ;;  %5841 = vmatmul.mubr.msk.f32.gmra.mrb[30].mxu1 %vm1216_vm1, %v1184_v41  ;;  %v1536_v41 = vld [vmem:[%s13978_s7 + $0x130] sm:$0xff] }
 0x1ab   :  { %v5708_v22 = vpop.f32.mrb[10].mxu1  ;;  %v5802_v49 = vpop.f32.mrb[14].mxu0  ;;  %v1186_v25 = vmax.f32 %v1162_v11, 0.0 }
 0x1ac   :  { %v1185_v56 = vmax.f32 %v1161_v2, 0.0  ;;  %v7677_v12 = vadd.f32 %v5796_v39, %v5708_v22  ;;  %v603_v50 = vpop.f32.mrb[11].mxu1  ;;  %v1073_v18 = vpop.f32.mrb[15].mxu0  ;;  %5926 = vmatpush1.bf16.msra.mxu1 %v5925_v1  ;;  %v1541_v1 = vld [vmem:[%s13978_s7 + $0x158] sm:$0xff] }
 0x1ad   :  { %v7678_v52 = vadd.f32 %v1053_v28, %v603_v50  ;;  %5928 = vmatprep.subr.bf16.mxu1 %v5927_v15  ;;  %v5939_v28 = vpack.c.bf16 %v1533_v29, %v1531_v27  ;;  %v1543_v50 = vld [vmem:[%s13978_s7 + $0x168] sm:$0xff]  ;;  %v1550_v27 = vld [vmem:[%s13978_s7 + $0x1a0] sm:$0xff]  ;;  %v1552_v29 = vld [vmem:[%s13978_s7 + $0x1b0] sm:$0xff] }
 0x1ae   :  { %v1164_v59 = vadd.f32 %v7677_v12, %v8396_v54  ;;  %5843 = vmatprep.mubr.msk.f32.mxu1 %vm1216_vm1, %v1185_v56  ;;  %v1540_v56 = vld [vmem:[%s13978_s7 + $0x150] sm:$0xff]  ;;  %v5961_v45 = vpack.c.bf16 %v1552_v29, %v1550_v27  ;;  %v1936_v27 = vld [vmem:[%s13980_s9 + $0x100] sm:$0xff] }
 0x1af   :  { %v1163_v30 = vadd.f32 %v7678_v52, %v8396_v54  ;;  %v5805_v31 = vpop.f32.mrb[16].mxu0  ;;  %5844 = vmatmul.mubr.msk.f32.gmra.mrb[32].mxu1 %vm1216_vm1, %v1186_v25  ;;  %v1940_v29 = vld [vmem:[%s13980_s9 + $0x120] sm:$0xff] }
 0x1b0   :  { %v5711_v5 = vpop.f32.mrb[12].mxu1  ;;  %v1083_v6 = vpop.f32.mrb[17].mxu0  ;;  %5930 = vmatpush1.bf16.msra.mxu1 %v5929_v19  ;;  %v1188_v13 = vmax.f32 %v1164_v59, 0.0 }
 0x1b1   :  { %v1187_v32 = vmax.f32 %v1163_v30, 0.0  ;;  %v7679_v33 = vadd.f32 %v5799_v7, %v5711_v5  ;;  %v613_v4 = vpop.f32.mrb[13].mxu1  ;;  %5932 = vmatprep.subr.bf16.mxu1 %v5931_v60  ;;  %v1534_v7 = vld [vmem:[%s13978_s7 + $0x120] sm:$0xff] }
 0x1b2   :  { %v7680_v16 = vadd.f32 %v1063_v55, %v613_v4  ;;  %v1539_v55 = vld [vmem:[%s13978_s7 + $0x148] sm:$0xff]  ;;  %v5945_v8 = vpack.c.bf16 %v1536_v41, %v1534_v7  ;;  %v5953_v4 = vpack.c.bf16 %v1544_v3, %v1542_v61  ;;  %v1916_v61 = vld [vmem:[%s13980_s9 + $0x60] sm:$0xff] }
 0x1b3   :  { %v1166_v17 = vadd.f32 %v7679_v33, %v8396_v54  ;;  %v5808_v36 = vpop.f32.mrb[18].mxu0  ;;  %5846 = vmatprep.mubr.msk.f32.mxu1 %vm1216_vm1, %v1187_v32  ;;  %v5947_v22 = vpack.c.bf16 %v1541_v1, %v1539_v55  ;;  %v1549_v32 = vld [vmem:[%s13978_s7 + $0x198] sm:$0xff] }
 0x1b4   :  { %v1165_v24 = vadd.f32 %v7680_v16, %v8396_v54  ;;  %v1093_v42 = vpop.f32.mrb[19].mxu0  ;;  %5847 = vmatmul.mubr.msk.f32.gmra.mrb[34].mxu1 %vm1216_vm1, %v1188_v13  ;;  %v1546_v16 = vld [vmem:[%s13978_s7 + $0x180] sm:$0xff] }
 0x1b5   :  { %5934 = vmatpush1.bf16.msra.mxu1 %v5933_v9  ;;  %v1190_v39 = vmax.f32 %v1166_v17, 0.0 }
 0x1b6   :  { %v1189_v43 = vmax.f32 %v1165_v24, 0.0  ;;  %5936 = vmatprep.subr.bf16.mxu1 %v5935_v14  ;;  %v1548_v14 = vld [vmem:[%s13978_s7 + $0x190] sm:$0xff] }
 0x1b7   :  { %v5714_v23 = vpop.f32.mrb[14].mxu1  ;;  %v5957_v24 = vpack.c.bf16 %v1548_v14, %v1546_v16  ;;  %v1933_v16 = vld [vmem:[%s13980_s9 + $0xe8] sm:$0xff] }
 0x1b8   :  { %v7681_v38 = vadd.f32 %v5802_v49, %v5714_v23  ;;  %v623_v44 = vpop.f32.mrb[15].mxu1  ;;  %5849 = vmatprep.mubr.msk.f32.mxu1 %vm1216_vm1, %v1189_v43  ;;  %v1538_v49 = vld [vmem:[%s13978_s7 + $0x140] sm:$0xff]  ;;  %v1555_v43 = vld [vmem:[%s13978_s7 + $0x1c8] sm:$0xff] }
 0x1b9   :  { %v7682_v58 = vadd.f32 %v1073_v18, %v623_v44  ;;  %5850 = vmatmul.mubr.msk.f32.gmra.mrb[36].mxu1 %vm1216_vm1, %v1190_v39  ;;  %v1545_v18 = vld [vmem:[%s13978_s7 + $0x178] sm:$0xff]  ;;  %v5949_v59 = vpack.c.bf16 %v1540_v56, %v1538_v49  ;;  %v1563_v56 = vld [vmem:[%s13978_s7 + $0x208] sm:$0xff] }
 0x1ba   :  { %v1168_v62 = vadd.f32 %v7681_v38, %v8396_v54  ;;  %5938 = vmatpush1.bf16.msra.mxu1 %v5937_v35  ;;  %v5951_v30 = vpack.c.bf16 %v1545_v18, %v1543_v50  ;;  %v1557_v35 = vld [vmem:[%s13978_s7 + $0x1d8] sm:$0xff]  ;;  %v1905_v18 = vld [vmem:[%s13980_s9 + $0x8] sm:$0xff] }
 0x1bb   :  { %v1167_v47 = vadd.f32 %v7682_v58, %v8396_v54  ;;  %5940 = vmatprep.subr.bf16.mxu1 %v5939_v28  ;;  %v5963_v38 = vpack.c.bf16 %v1557_v35, %v1555_v43  ;;  %v1945_v43 = vld [vmem:[%s13980_s9 + $0x148] sm:$0xff] }
 0x1bc   :  { %v5717_v46 = vpop.f32.mrb[16].mxu1  ;;  %v1192_v53 = vmax.f32 %v1168_v62, 0.0  ;;  %v1949_v35 = vld [vmem:[%s13980_s9 + $0x168] sm:$0xff] }
 0x1bd   :  { %v1191_v11 = vmax.f32 %v1167_v47, 0.0  ;;  %v7683_v15 = vadd.f32 %v5805_v31, %v5717_v46  ;;  %v633_v51 = vpop.f32.mrb[17].mxu1 }
 0x1be   :  { %v7684_v2 = vadd.f32 %v1083_v6, %v633_v51  ;;  %5942 = vmatpush1.bf16.msra.mxu1 %v5941_v37  ;;  %v1547_v6 = vld [vmem:[%s13978_s7 + $0x188] sm:$0xff]  ;;  %v1556_v51 = vld [vmem:[%s13978_s7 + $0x1d0] sm:$0xff] }
 0x1bf   :  { %v1170_v20 = vadd.f32 %v7683_v15, %v8396_v54  ;;  %5852 = vmatprep.mubr.msk.f32.mxu1 %vm1216_vm1, %v1191_v11  ;;  %5944 = vmatprep.subr.bf16.mxu1 %v5943_v63  ;;  %v5955_v13 = vpack.c.bf16 %v1549_v32, %v1547_v6  ;;  %v1554_v15 = vld [vmem:[%s13978_s7 + $0x1c0] sm:$0xff]  ;;  %v1925_v6 = vld [vmem:[%s13980_s9 + $0xa8] sm:$0xff] }
 0x1c0   :  { %v1169_v12 = vadd.f32 %v7684_v2, %v8396_v54  ;;  %5853 = vmatmul.mubr.msk.f32.gmra.mrb[38].mxu1 %vm1216_vm1, %v1192_v53  ;;  %v5965_v53 = vpack.c.bf16 %v1556_v51, %v1554_v15  ;;  %v1561_v2 = vld [vmem:[%s13978_s7 + $0x1f8] sm:$0xff]  ;;  %v1568_v15 = vld [vmem:[%s13978_s7 + $0x230] sm:$0xff]  ;;  %v1571_v51 = vld [vmem:[%s13978_s7 + $0x248] sm:$0xff] }
 0x1c1   :  { %v5720_v19 = vpop.f32.mrb[18].mxu1  ;;  %v1194_v0 = vmax.f32 %v1170_v20, 0.0  ;;  %v1558_v20 = vld [vmem:[%s13978_s7 + $0x1e0] sm:$0xff] }
 0x1c2   :  { %v1193_v25 = vmax.f32 %v1169_v12, 0.0  ;;  %v7685_v52 = vadd.f32 %v5808_v36, %v5720_v19  ;;  %v643_v60 = vpop.f32.mrb[19].mxu1  ;;  %5946 = vmatpush1.bf16.msra.mxu1 %v5945_v8  ;;  %v1551_v36 = vld [vmem:[%s13978_s7 + $0x1a8] sm:$0xff]  ;;  %v1565_v12 = vld [vmem:[%s13978_s7 + $0x218] sm:$0xff] }
 0x1c3   :  { %v7686_v26 = vadd.f32 %v1093_v42, %v643_v60  ;;  %5948 = vmatprep.subr.bf16.mxu1 %v5947_v22  ;;  %v5959_v42 = vpack.c.bf16 %v1553_v40, %v1551_v36  ;;  %v1560_v22 = vld [vmem:[%s13978_s7 + $0x1f0] sm:$0xff]  ;;  %v5971_v50 = vpack.c.bf16 %v1565_v12, %v1563_v56  ;;  %v1909_v19 = vld [vmem:[%s13980_s9 + $0x28] sm:$0xff]  ;;  %v1908_v60 = vld [vmem:[%s13980_s9 + $0x20] sm:$0xff] }
 0x1c4   :  { %v1172_v31 = vadd.f32 %v7685_v52, %v8396_v54  ;;  %5855 = vmatprep.mubr.msk.f32.mxu1 %vm1216_vm1, %v1193_v25  ;;  %v5969_v49 = vpack.c.bf16 %v1560_v22, %v1558_v20  ;;  %v6003_v25 = vpack.c.bf16 %v1909_v19, %v1905_v18  ;;  %v1904_v52 = vld [vmem:[%s13980_s9] sm:$0xff]  ;;  %v1937_v40 = vld [vmem:[%s13980_s9 + $0x108] sm:$0xff] }
 0x1c5   :  { %v1171_v5 = vadd.f32 %v7686_v26, %v8396_v54  ;;  %5856 = vmatmul.mubr.msk.f32.gmra.mrb[40].mxu1 %vm1216_vm1, %v1194_v0  ;;  %v1913_v0 = vld [vmem:[%s13980_s9 + $0x48] sm:$0xff]  ;;  %v1932_v36 = vld [vmem:[%s13980_s9 + $0xe0] sm:$0xff] }
 0x1c6   :  { %5950 = vmatpush1.bf16.msra.mxu1 %v5949_v59  ;;  %v1196_v9 = vmax.f32 %v1172_v31, 0.0  ;;  %v6005_v59 = vpack.c.bf16 %v1908_v60, %v1904_v52  ;;  %6004 = vmatprep.subr.bf16.mxu0 %v6003_v25  ;;  %v1917_v26 = vld [vmem:[%s13980_s9 + $0x68] sm:$0xff]  ;;  %v1912_v31 = vld [vmem:[%s13980_s9 + $0x40] sm:$0xff]  ;;  %v1572_v60 = vld [vmem:[%s13978_s7 + $0x250] sm:$0xff] }
 0x1c7   :  { %v1195_v33 = vmax.f32 %v1171_v5, 0.0  ;;  %5952 = vmatprep.subr.bf16.mxu1 %v5951_v30  ;;  %v6007_v30 = vpack.c.bf16 %v1917_v26, %v1913_v0  ;;  %v6009_v3 = vpack.c.bf16 %v1916_v61, %v1912_v31  ;;  %v1921_v5 = vld [vmem:[%s13980_s9 + $0x88] sm:$0xff]  ;;  %v1952_v22 = vld [vmem:[%s13980_s9 + $0x180] sm:$0xff]  ;;  %v1577_v31 = vld [vmem:[%s13978_s7 + $0x278] sm:$0xff] }
 0x1c8   :  { %6006 = vmatpush1.bf16.msra.mxu0 %v6005_v59  ;;  %v6011_v32 = vpack.c.bf16 %v1925_v6, %v1921_v5  ;;  %v1961_v12 = vld [vmem:[%s13980_s9 + $0x1c8] sm:$0xff]  ;;  %v1570_v52 = vld [vmem:[%s13978_s7 + $0x240] sm:$0xff] }
 0x1c9   :  { %5858 = vmatprep.mubr.msk.f32.mxu1 %vm1216_vm1, %v1195_v33  ;;  %v5723_v17 = vpop.f32.mrb[20].mxu1  ;;  %6008 = vmatprep.subr.bf16.mxu0 %v6007_v30  ;;  %v1920_v33 = vld [vmem:[%s13980_s9 + $0x80] sm:$0xff]  ;;  %v1575_v59 = vld [vmem:[%s13978_s7 + $0x268] sm:$0xff] }
 0x1ca   :  { %5859 = vmatmul.mubr.msk.f32.gmra.mrb[42].mxu1 %vm1216_vm1, %v1196_v9  ;;  %v653_v21 = vpop.f32.mrb[21].mxu1  ;;  %v1964_v5 = vld [vmem:[%s13980_s9 + $0x1e0] sm:$0xff] }
 0x1cb   :  { %5954 = vmatpush1.bf16.msra.mxu1 %v5953_v4  ;;  %v1924_v4 = vld [vmem:[%s13980_s9 + $0xa0] sm:$0xff] }
 0x1cc   :  { %5956 = vmatprep.subr.bf16.mxu1 %v5955_v13  ;;  %6010 = vmatpush1.bf16.msra.mxu0 %v6009_v3  ;;  %v6013_v9 = vpack.c.bf16 %v1924_v4, %v1920_v33  ;;  %v1929_v13 = vld [vmem:[%s13980_s9 + $0xc8] sm:$0xff]  ;;  %v1960_v3 = vld [vmem:[%s13980_s9 + $0x1c0] sm:$0xff]  ;;  %v5981_v4 = vpack.c.bf16 %v1572_v60, %v1570_v52  ;;  %v1593_v60 = vld [vmem:[%s13978_s7 + $0x2f8] sm:$0xff] }
 0x1cd   :  { %6012 = vmatprep.subr.bf16.mxu0 %v6011_v32  ;;  %v6015_v14 = vpack.c.bf16 %v1933_v16, %v1929_v13  ;;  %v1969_v32 = vld [vmem:[%s13980_s9 + $0x208] sm:$0xff]  ;;  %v1574_v13 = vld [vmem:[%s13978_s7 + $0x260] sm:$0xff]  ;;  %v1576_v16 = vld [vmem:[%s13978_s7 + $0x270] sm:$0xff] }
 0x1ce   :  { %v5811_v39 = vpop.f32.mrb[20].mxu0  ;;  %v1973_v33 = vld [vmem:[%s13980_s9 + $0x228] sm:$0xff] }
 0x1cf   :  { %v7687_v23 = vadd.f32 %v5811_v39, %v5723_v17  ;;  %v1103_v28 = vpop.f32.mrb[21].mxu0  ;;  %5958 = vmatpush1.bf16.msra.mxu1 %v5957_v24  ;;  %v1928_v17 = vld [vmem:[%s13980_s9 + $0xc0] sm:$0xff]  ;;  %v1591_v52 = vld [vmem:[%s13978_s7 + $0x2e8] sm:$0xff] }
 0x1d0   :  { %v7688_v34 = vadd.f32 %v1103_v28, %v653_v21  ;;  %5960 = vmatprep.subr.bf16.mxu1 %v5959_v42  ;;  %v1941_v21 = vld [vmem:[%s13980_s9 + $0x128] sm:$0xff]  ;;  %6014 = vmatpush1.bf16.msra.mxu0 %v6013_v9  ;;  %v6017_v24 = vpack.c.bf16 %v1932_v36, %v1928_v17  ;;  %v8707_v39 = vld [vmem:[%s13981_s6] ss:$0 sm:$0xff]  ;;  %v6021_v28 = vpack.c.bf16 %v1940_v29, %v1936_v27 }
 0x1d1   :  { %v1174_v44 = vadd.f32 %v7687_v23, %v8396_v54  ;;  %6016 = vmatprep.subr.bf16.mxu0 %v6015_v14  ;;  %v6019_v42 = vpack.c.bf16 %v1941_v21, %v1937_v40  ;;  %v5983_v9 = vpack.c.bf16 %v1577_v31, %v1575_v59  ;;  %v1579_v14 = vld [vmem:[%s13978_s7 + $0x288] sm:$0xff]  ;;  %v6033_v17 = vpack.c.bf16 %v1964_v5, %v1960_v3  ;;  %v1581_v40 = vld [vmem:[%s13978_s7 + $0x298] sm:$0xff]  ;;  %v1992_v3 = vld [vmem:[%s13980_s9 + $0x2c0] sm:$0xff] }
 0x1d2   :  { %v1173_v48 = vadd.f32 %v7688_v34, %v8396_v54  ;;  %v1562_v34 = vld [vmem:[%s13978_s7 + $0x200] sm:$0xff]  ;;  %v6035_v21 = vpack.c.bf16 %v1973_v33, %v1969_v32  ;;  %v1977_v27 = vld [vmem:[%s13980_s9 + $0x248] sm:$0xff] }
 0x1d3   :  { %v5814_v57 = vpop.f32.mrb[22].mxu0  ;;  %5962 = vmatpush1.bf16.msra.mxu1 %v5961_v45  ;;  %v1198_v37 = vmax.f32 %v1174_v44, 0.0  ;;  %v1567_v44 = vld [vmem:[%s13978_s7 + $0x228] sm:$0xff]  ;;  %v1996_v5 = vld [vmem:[%s13980_s9 + $0x2e0] sm:$0xff] }
 0x1d4   :  { %v1197_v58 = vmax.f32 %v1173_v48, 0.0  ;;  %v1113_v62 = vpop.f32.mrb[23].mxu0  ;;  %5964 = vmatprep.subr.bf16.mxu1 %v5963_v38  ;;  %6018 = vmatpush1.bf16.msra.mxu0 %v6017_v24  ;;  %v1564_v38 = vld [vmem:[%s13978_s7 + $0x210] sm:$0xff]  ;;  %v6023_v48 = vpack.c.bf16 %v1949_v35, %v1945_v43  ;;  %v1968_v24 = vld [vmem:[%s13980_s9 + $0x200] sm:$0xff]  ;;  %v1981_v29 = vld [vmem:[%s13980_s9 + $0x268] sm:$0xff]  ;;  %v5985_v43 = vpack.c.bf16 %v1576_v16, %v1574_v13  ;;  %v5999_v13 = vpack.c.bf16 %v1593_v60, %v1591_v52 }
 0x1d5   :  { %6020 = vmatprep.subr.bf16.mxu0 %v6019_v42  ;;  %v1972_v42 = vld [vmem:[%s13980_s9 + $0x220] sm:$0xff] }
 0x1d6   :  { %5861 = vmatprep.mubr.msk.f32.mxu1 %vm1216_vm1, %v1197_v58  ;;  %v1590_v16 = vld [vmem:[%s13978_s7 + $0x2e0] sm:$0xff] }
 0x1d7   :  { %v5726_v47 = vpop.f32.mrb[22].mxu1  ;;  %5862 = vmatmul.mubr.msk.f32.gmra.mrb[44].mxu1 %vm1216_vm1, %v1198_v37  ;;  %v1944_v37 = vld [vmem:[%s13980_s9 + $0x140] sm:$0xff] }
 0x1d8   :  { %v7689_v63 = vadd.f32 %v5814_v57, %v5726_v47  ;;  %v663_v7 = vpop.f32.mrb[23].mxu1  ;;  %5966 = vmatpush1.bf16.msra.mxu1 %v5965_v53  ;;  %v1948_v47 = vld [vmem:[%s13980_s9 + $0x160] sm:$0xff]  ;;  %6022 = vmatpush1.bf16.msra.mxu0 %v6021_v28 }
 0x1d9   :  { %v7690_v41 = vadd.f32 %v1113_v62, %v663_v7  ;;  %v1569_v62 = vld [vmem:[%s13978_s7 + $0x238] sm:$0xff]  ;;  %v1957_v7 = vld [vmem:[%s13980_s9 + $0x1a8] sm:$0xff]  ;;  %6024 = vmatprep.subr.bf16.mxu0 %v6023_v48  ;;  %v6025_v53 = vpack.c.bf16 %v1948_v47, %v1944_v37  ;;  %v1578_v28 = vld [vmem:[%s13978_s7 + $0x280] sm:$0xff] }
 0x1da   :  { %v1176_v46 = vadd.f32 %v7689_v63, %v8396_v54  ;;  %v1953_v63 = vld [vmem:[%s13980_s9 + $0x188] sm:$0xff]  ;;  %v1585_v48 = vld [vmem:[%s13978_s7 + $0x2b8] sm:$0xff] }
 0x1db   :  { %v1175_v55 = vadd.f32 %v7690_v41, %v8396_v54  ;;  %v1559_v54 = vld [vmem:[%s13978_s7 + $0x1e8] sm:$0xff]  ;;  %v6027_v20 = vpack.c.bf16 %v1957_v7, %v1953_v63 }
 0x1dc   :  { %v1200_v11 = vmax.f32 %v1176_v46, 0.0  ;;  %v5967_v8 = vpack.c.bf16 %v1561_v2, %v1559_v54  ;;  %v5973_v46 = vpack.c.bf16 %v1564_v38, %v1562_v34  ;;  %6026 = vmatpush1.bf16.msra.mxu0 %v6025_v53  ;;  %v1583_v34 = vld [vmem:[%s13978_s7 + $0x2a8] sm:$0xff]  ;;  %v6037_v38 = vpack.c.bf16 %v1972_v42, %v1968_v24 }
 0x1dd   :  { %v1199_v1 = vmax.f32 %v1175_v55, 0.0  ;;  %6028 = vmatprep.subr.bf16.mxu0 %v6027_v20  ;;  %v1985_v37 = vld [vmem:[%s13980_s9 + $0x288] sm:$0xff]  ;;  %v5991_v7 = vpack.c.bf16 %v1585_v48, %v1583_v34 }
 0x1de   :  { %5968 = vmatprep.subr.bf16.mxu1 %v5967_v8  ;;  %v1573_v8 = vld [vmem:[%s13978_s7 + $0x258] sm:$0xff]  ;;  %v1989_v47 = vld [vmem:[%s13980_s9 + $0x2a8] sm:$0xff] }
 0x1df   :  { %5864 = vmatprep.mubr.msk.f32.mxu1 %vm1216_vm1, %v1199_v1  ;;  %5970 = vmatpush1.bf16.msra.mxu1 %v5969_v49  ;;  %v5975_v1 = vpack.c.bf16 %v1569_v62, %v1567_v44  ;;  %v1956_v49 = vld [vmem:[%s13980_s9 + $0x1a0] sm:$0xff]  ;;  %v5979_v25 = vpack.c.bf16 %v1573_v8, %v1571_v51  ;;  %v6043_v51 = vpack.c.bf16 %v1989_v47, %v1985_v37  ;;  %v2009_v34 = vld [vmem:[%s13980_s9 + $0x348] sm:$0xff] }
 0x1e0   :  { %5865 = vmatmul.mubr.msk.f32.gmra.mrb[46].mxu1 %vm1216_vm1, %v1200_v11  ;;  %5972 = vmatprep.subr.bf16.mxu1 %v5971_v50  ;;  %v1566_v11 = vld [vmem:[%s13978_s7 + $0x220] sm:$0xff]  ;;  %v1965_v50 = vld [vmem:[%s13980_s9 + $0x1e8] sm:$0xff]  ;;  %v6029_v0 = vpack.c.bf16 %v1956_v49, %v1952_v22 }
 0x1e1   :  { %v5977_v18 = vpack.c.bf16 %v1568_v15, %v1566_v11  ;;  %v6031_v61 = vpack.c.bf16 %v1965_v50, %v1961_v12  ;;  %v1980_v62 = vld [vmem:[%s13980_s9 + $0x260] sm:$0xff]  ;;  %v1587_v11 = vld [vmem:[%s13978_s7 + $0x2c8] sm:$0xff]  ;;  %v1589_v15 = vld [vmem:[%s13978_s7 + $0x2d8] sm:$0xff] }
 0x1e2   :  { %6030 = vmatpush1.bf16.msra.mxu0 %v6029_v0  ;;  %v1988_v8 = vld [vmem:[%s13980_s9 + $0x2a0] sm:$0xff]  ;;  %v1997_v12 = vld [vmem:[%s13980_s9 + $0x2e8] sm:$0xff]  ;;  %v5995_v50 = vpack.c.bf16 %v1589_v15, %v1587_v11 }
 0x1e3   :  { %6032 = vmatprep.subr.bf16.mxu0 %v6031_v61  ;;  %v2008_v47 = vld [vmem:[%s13980_s9 + $0x340] sm:$0xff] }
 0x1e4   :  { %v2016_v15 = vld [vmem:[%s13980_s9 + $0x380] sm:$0xff] }
 0x1e6   :  { %6034 = vmatpush1.bf16.msra.mxu0 %v6033_v17  ;;  %v1907_v17 = vld [vmem:[%s13980_s9 + $0x18] sm:$0xff] }
 0x1e7   :  { %6036 = vmatprep.subr.bf16.mxu0 %v6035_v21 }
 0x1ea   :  { %6038 = vmatpush1.bf16.msra.mxu0 %v6037_v38  ;;  %v2013_v38 = vld [vmem:[%s13980_s9 + $0x368] sm:$0xff] }
 0x1eb   :  { %v6055_v37 = vpack.c.bf16 %v2013_v38, %v2009_v34  ;;  %v1931_v34 = vld [vmem:[%s13980_s9 + $0xd8] sm:$0xff] }
 0x26c   :  { %v5833_v23 = vpop.f32.mrb[24].mxu1 }
 0x26d   :  { %v1355_v45 = vpop.f32.mrb[25].mxu1  ;;  %v1361_v57 = vadd.f32 %v5833_v23, %v8707_v39  ;;  %v5987_v23 = vpack.c.bf16 %v1581_v40, %v1579_v14  ;;  %v1592_v14 = vld [vmem:[%s13978_s7 + $0x2f0] sm:$0xff]  ;;  %v6049_v40 = vpack.c.bf16 %v1996_v5, %v1992_v3 }
 0x26e   :  { %v1356_v58 = vadd.f32 %v8707_v39, %v1355_v45  ;;  %v1580_v45 = vld [vmem:[%s13978_s7 + $0x290] sm:$0xff] }
 0x26f   :  { %v1475_v54 = vmax.f32 %v1361_v57, 0.0  ;;  %v6039_v57 = vpack.c.bf16 %v1981_v29, %v1977_v27  ;;  %v5989_v63 = vpack.c.bf16 %v1580_v45, %v1578_v28  ;;  %v2000_v29 = vld [vmem:[%s13980_s9 + $0x300] sm:$0xff]  ;;  %v6001_v45 = vpack.c.bf16 %v1592_v14, %v1590_v16  ;;  %v1919_v16 = vld [vmem:[%s13980_s9 + $0x78] sm:$0xff] }
 0x270   :  { %v1474_v41 = vmax.f32 %v1356_v58, 0.0  ;;  %v1976_v58 = vld [vmem:[%s13980_s9 + $0x240] sm:$0xff] }
 0x271   :  { %v5836_v55 = vpop.f32.mrb[26].mxu1  ;;  %6040 = vmatprep.subr.bf16.mxu0 %v6039_v57 }
 0x272   :  { %v1365_v2 = vpop.f32.mrb[27].mxu1  ;;  %1670 = vmatprep.mubr.f32.mxu1 %v1474_v41  ;;  %v1371_v26 = vadd.f32 %v5836_v55, %v8707_v39  ;;  %v1582_v41 = vld [vmem:[%s13978_s7 + $0x2a0] sm:$0xff]  ;;  %v6041_v55 = vpack.c.bf16 %v1980_v62, %v1976_v58 }
 0x273   :  { %v1366_v56 = vadd.f32 %v8707_v39, %v1365_v2  ;;  %1671 = vmatmul.mubr.f32.vlgmr.msra.gmra.mrb[48].mxu1 %v7855_v10  ;;  %v1984_v2 = vld [vmem:[%s13980_s9 + $0x280] sm:$0xff] }
 0x274   :  { %1676 = vmatprep.mubr.f32.mxu1 %v1475_v54  ;;  %5974 = vmatpush1.bf16.msra.mxu1 %v5973_v46  ;;  %v1477_v36 = vmax.f32 %v1371_v26, 0.0  ;;  %v1584_v46 = vld [vmem:[%s13978_s7 + $0x2b0] sm:$0xff]  ;;  %v6045_v59 = vpack.c.bf16 %v1988_v8, %v1984_v2 }
 0x275   :  { %v1476_v19 = vmax.f32 %v1366_v56, 0.0  ;;  %5976 = vmatprep.subr.bf16.mxu1 %v5975_v1  ;;  %v5993_v49 = vpack.c.bf16 %v1584_v46, %v1582_v41  ;;  %v1993_v56 = vld [vmem:[%s13980_s9 + $0x2c8] sm:$0xff]  ;;  %6042 = vmatpush1.bf16.msra.mxu0 %v6041_v55 }
 0x276   :  { %v8771_v30 = vpop.f32.mrb[28].mxu1  ;;  %6044 = vmatprep.subr.bf16.mxu0 %v6043_v51  ;;  %v6047_v61 = vpack.c.bf16 %v1997_v12, %v1993_v56  ;;  %v2017_v41 = vld [vmem:[%s13980_s9 + $0x388] sm:$0xff]  ;;  %v2020_v51 = vld [vmem:[%s13980_s9 + $0x3a0] sm:$0xff] }
 0x277   :  { %v1375_v6 = vpop.f32.mrb[29].mxu1  ;;  %1677 = vmatmul.mubr.f32.gmra.mrb[50].mxu1 %v7855_v10  ;;  %v8886_v0 = vadd.f32 %v8771_v30, %v8707_v39  ;;  %v2001_v30 = vld [vmem:[%s13980_s9 + $0x308] sm:$0xff]  ;;  %v6061_v2 = vpack.c.bf16 %v2020_v51, %v2016_v15  ;;  %v1955_v15 = vld [vmem:[%s13980_s9 + $0x198] sm:$0xff] }
 0x278   :  { %1682 = vmatprep.mubr.f32.mxu1 %v1476_v19  ;;  %5978 = vmatpush1.bf16.msra.mxu1 %v5977_v18  ;;  %v8856_v53 = vadd.f32 %v8707_v39, %v1375_v6  ;;  %v1586_v18 = vld [vmem:[%s13978_s7 + $0x2c0] sm:$0xff]  ;;  %v1588_v19 = vld [vmem:[%s13978_s7 + $0x2d0] sm:$0xff] }
 0x279   :  { %5980 = vmatprep.subr.bf16.mxu1 %v5979_v25  ;;  %v5997_v33 = vpack.c.bf16 %v1588_v19, %v1586_v18  ;;  %6046 = vmatpush1.bf16.msra.mxu0 %v6045_v59  ;;  %v1479_v21 = vmax.f32 %v8886_v0, 0.0  ;;  %v1939_v0 = vld [vmem:[%s13980_s9 + $0x118] sm:$0xff] }
 0x27a   :  { %v1478_v26 = vmax.f32 %v8856_v53, 0.0  ;;  %6048 = vmatprep.subr.bf16.mxu0 %v6047_v61  ;;  %v1935_v53 = vld [vmem:[%s13980_s9 + $0xf8] sm:$0xff] }
 0x27b   :  { %1683 = vmatmul.mubr.f32.gmra.mrb[52].mxu1 %v7855_v10 }
 0x27c   :  { %1688 = vmatprep.mubr.f32.mxu1 %v1477_v36  ;;  %5982 = vmatpush1.bf16.msra.mxu1 %v5981_v4  ;;  %v2005_v4 = vld [vmem:[%s13980_s9 + $0x328] sm:$0xff]  ;;  %v1911_v36 = vld [vmem:[%s13980_s9 + $0x38] sm:$0xff] }
 0x27d   :  { %v8814_v35 = vpop.f32.mrb[30].mxu1  ;;  %5984 = vmatprep.subr.bf16.mxu1 %v5983_v9  ;;  %v6051_v27 = vpack.c.bf16 %v2005_v4, %v2001_v30  ;;  %v6771_v48 = vpack.c.bf16 %v1911_v36, %v1907_v17  ;;  %6050 = vmatpush1.bf16.msra.mxu0 %v6049_v40  ;;  %v1906_v30 = vld [vmem:[%s13980_s9 + $0x10] sm:$0xff] }
 0x27e   :  { %v8825_v44 = vpop.f32.mrb[31].mxu1  ;;  %v8938_v58 = vadd.f32 %v8814_v35, %v8707_v39  ;;  %v2021_v35 = vld [vmem:[%s13980_s9 + $0x3a8] sm:$0xff]  ;;  %v1910_v4 = vld [vmem:[%s13980_s9 + $0x30] sm:$0xff] }
 0x27f   :  { %1689 = vmatmul.mubr.f32.gmra.mrb[54].mxu1 %v7855_v10  ;;  %v8919_v24 = vadd.f32 %v8707_v39, %v8825_v44  ;;  %6052 = vmatprep.subr.bf16.mxu0 %v6051_v27  ;;  %v6059_v11 = vpack.c.bf16 %v2021_v35, %v2017_v41  ;;  %v6773_v17 = vpack.c.bf16 %v1910_v4, %v1906_v30  ;;  %v1914_v40 = vld [vmem:[%s13980_s9 + $0x50] sm:$0xff]  ;;  %v1923_v27 = vld [vmem:[%s13980_s9 + $0x98] sm:$0xff] }
 0x280   :  { %5986 = vmatpush1.bf16.msra.mxu1 %v5985_v43  ;;  %v2004_v43 = vld [vmem:[%s13980_s9 + $0x320] sm:$0xff]  ;;  %v1481_v55 = vmax.f32 %v8938_v58, 0.0  ;;  %v1942_v41 = vld [vmem:[%s13980_s9 + $0x130] sm:$0xff]  ;;  %v1947_v35 = vld [vmem:[%s13980_s9 + $0x158] sm:$0xff] }
 0x281   :  { %5988 = vmatprep.subr.bf16.mxu1 %v5987_v23  ;;  %v6053_v57 = vpack.c.bf16 %v2004_v43, %v2000_v29  ;;  %v1480_v62 = vmax.f32 %v8919_v24, 0.0  ;;  %v1927_v29 = vld [vmem:[%s13980_s9 + $0xb8] sm:$0xff]  ;;  %v1978_v4 = vld [vmem:[%s13980_s9 + $0x250] sm:$0xff] }
 0x282   :  { %v5845_v1 = vpop.f32.mrb[32].mxu1  ;;  %v1951_v24 = vld [vmem:[%s13980_s9 + $0x178] sm:$0xff] }
 0x283   :  { %v1395_v54 = vpop.f32.mrb[33].mxu1  ;;  %v1401_v20 = vadd.f32 %v5845_v1, %v8707_v39  ;;  %6054 = vmatpush1.bf16.msra.mxu0 %v6053_v57  ;;  %v1930_v57 = vld [vmem:[%s13980_s9 + $0xd0] sm:$0xff]  ;;  %v1959_v58 = vld [vmem:[%s13980_s9 + $0x1b8] sm:$0xff] }
 0x284   :  { %v1396_v22 = vadd.f32 %v8707_v39, %v1395_v54  ;;  %5990 = vmatpush1.bf16.msra.mxu1 %v5989_v63  ;;  %v2012_v63 = vld [vmem:[%s13980_s9 + $0x360] sm:$0xff]  ;;  %6056 = vmatprep.subr.bf16.mxu0 %v6055_v37  ;;  %v1934_v37 = vld [vmem:[%s13980_s9 + $0xf0] sm:$0xff]  ;;  %v6795_v51 = vpack.c.bf16 %v1959_v58, %v1955_v15  ;;  %v2029_v15 = vld [vmem:[%s13980_s9 + $0x3e8] sm:$0xff] }
 0x285   :  { %5992 = vmatprep.subr.bf16.mxu1 %v5991_v7  ;;  %v1483_v6 = vmax.f32 %v1401_v20, 0.0  ;;  %v6057_v46 = vpack.c.bf16 %v2012_v63, %v2008_v47  ;;  %v6785_v47 = vpack.c.bf16 %v1934_v37, %v1930_v57  ;;  %v2006_v57 = vld [vmem:[%s13980_s9 + $0x330] sm:$0xff]  ;;  %v2011_v37 = vld [vmem:[%s13980_s9 + $0x358] sm:$0xff] }
 0x286   :  { %v1482_v25 = vmax.f32 %v1396_v22, 0.0  ;;  %v2027_v58 = vld [vmem:[%s13980_s9 + $0x3d8] sm:$0xff] }
 0x287   :  { %v5848_v31 = vpop.f32.mrb[34].mxu1  ;;  %6058 = vmatpush1.bf16.msra.mxu0 %v6057_v46  ;;  %v6791_v46 = vpack.c.bf16 %v1951_v24, %v1947_v35 }
 0x288   :  { %v1405_v32 = vpop.f32.mrb[35].mxu1  ;;  %1694 = vmatprep.mubr.f32.mxu1 %v1482_v25  ;;  %5994 = vmatpush1.bf16.msra.mxu1 %v5993_v49  ;;  %v1411_v23 = vadd.f32 %v5848_v31, %v8707_v39 }
 0x289   :  { %v1406_v9 = vadd.f32 %v8707_v39, %v1405_v32  ;;  %1695 = vmatmul.mubr.f32.gmra.mrb[56].mxu1 %v1478_v26  ;;  %5996 = vmatprep.subr.bf16.mxu1 %v5995_v50 }
 0x28a   :  { %1700 = vmatprep.mubr.f32.mxu1 %v1483_v6  ;;  %v1485_v7 = vmax.f32 %v1411_v23, 0.0  ;;  %6060 = vmatprep.subr.bf16.mxu0 %v6059_v11  ;;  %v6779_v23 = vpack.c.bf16 %v1927_v29, %v1923_v27  ;;  %v1950_v11 = vld [vmem:[%s13980_s9 + $0x170] sm:$0xff]  ;;  %v1999_v27 = vld [vmem:[%s13980_s9 + $0x2f8] sm:$0xff] }
 0x28b   :  { %v1484_v42 = vmax.f32 %v1406_v9, 0.0  ;;  %6062 = vmatpush1.bf16.msra.mxu0 %v6061_v2  ;;  %v1958_v2 = vld [vmem:[%s13980_s9 + $0x1b0] sm:$0xff] }
 0x28c   :  { %v5851_v28 = vpop.f32.mrb[36].mxu1  ;;  %5998 = vmatpush1.bf16.msra.mxu1 %v5997_v33 }
 0x28d   :  { %v1415_v44 = vpop.f32.mrb[37].mxu1  ;;  %1701 = vmatmul.mubr.f32.gmra.mrb[58].mxu1 %v1479_v21  ;;  %6000 = vmatprep.subr.bf16.mxu1 %v5999_v13  ;;  %v8970_v50 = vadd.f32 %v5851_v28, %v8707_v39  ;;  %v1915_v13 = vld [vmem:[%s13980_s9 + $0x58] sm:$0xff]  ;;  %v1922_v28 = vld [vmem:[%s13980_s9 + $0x90] sm:$0xff] }
 0x28e   :  { %1706 = vmatprep.mubr.f32.mxu1 %v1484_v42  ;;  %v8965_v20 = vadd.f32 %v8707_v39, %v1415_v44  ;;  %v6775_v36 = vpack.c.bf16 %v1919_v16, %v1915_v13  ;;  %v1918_v42 = vld [vmem:[%s13980_s9 + $0x70] sm:$0xff] }
 0x28f   :  { %v1487_v59 = vmax.f32 %v8970_v50, 0.0  ;;  %v6777_v43 = vpack.c.bf16 %v1918_v42, %v1914_v40  ;;  %v1975_v50 = vld [vmem:[%s13980_s9 + $0x238] sm:$0xff]  ;;  %v1982_v13 = vld [vmem:[%s13980_s9 + $0x270] sm:$0xff] }
 0x290   :  { %6002 = vmatpush1.bf16.msra.mxu1 %v6001_v45  ;;  %v1486_v18 = vmax.f32 %v8965_v20, 0.0  ;;  %v1926_v45 = vld [vmem:[%s13980_s9 + $0xb0] sm:$0xff]  ;;  %v1967_v20 = vld [vmem:[%s13980_s9 + $0x1f8] sm:$0xff] }
 0x291   :  { %1707 = vmatmul.mubr.f32.gmra.mrb[60].mxu1 %v1480_v62  ;;  %6772 = vmatprep.subr.bf16.mxu1 %v6771_v48  ;;  %v6781_v44 = vpack.c.bf16 %v1926_v45, %v1922_v28  ;;  %v6783_v48 = vpack.c.bf16 %v1935_v53, %v1931_v34  ;;  %v1990_v40 = vld [vmem:[%s13980_s9 + $0x2b0] sm:$0xff]  ;;  %v1995_v42 = vld [vmem:[%s13980_s9 + $0x2d8] sm:$0xff] }
 0x292   :  { %1712 = vmatprep.mubr.f32.mxu1 %v1485_v7  ;;  %v1938_v7 = vld [vmem:[%s13980_s9 + $0x110] sm:$0xff]  ;;  %v6815_v28 = vpack.c.bf16 %v1999_v27, %v1995_v42  ;;  %v2003_v53 = vld [vmem:[%s13980_s9 + $0x318] sm:$0xff] }
 0x293   :  { %v5854_v1 = vpop.f32.mrb[38].mxu1  ;;  %v1994_v45 = vld [vmem:[%s13980_s9 + $0x2d0] sm:$0xff]  ;;  %v2047_v42 = vld [vmem:[%s13980_s9 + $0x478] sm:$0xff] }
 0x294   :  { %v1425_v54 = vpop.f32.mrb[39].mxu1  ;;  %v8984_v5 = vadd.f32 %v5854_v1, %v8707_v39  ;;  %v1946_v1 = vld [vmem:[%s13980_s9 + $0x150] sm:$0xff] }
 0x295   :  { %1713 = vmatmul.mubr.f32.gmra.mrb[62].mxu1 %v1481_v55  ;;  %v8978_v31 = vadd.f32 %v8707_v39, %v1425_v54  ;;  %v1954_v54 = vld [vmem:[%s13980_s9 + $0x190] sm:$0xff] }
 0x296   :  { %v1489_v33 = vmax.f32 %v8984_v5, 0.0  ;;  %v1987_v5 = vld [vmem:[%s13980_s9 + $0x298] sm:$0xff]  ;;  %v1998_v34 = vld [vmem:[%s13980_s9 + $0x2f0] sm:$0xff] }
 0x297   :  { %v1488_v6 = vmax.f32 %v8978_v31, 0.0  ;;  %v1979_v31 = vld [vmem:[%s13980_s9 + $0x258] sm:$0xff] }
 0x298   :  { %v5857_v8 = vpop.f32.mrb[40].mxu1 }
 0x299   :  { %v1435_v22 = vpop.f32.mrb[41].mxu1  ;;  %v1441_v49 = vadd.f32 %v5857_v8, %v8707_v39  ;;  %v1963_v8 = vld [vmem:[%s13980_s9 + $0x1d8] sm:$0xff] }
 0x29a   :  { %v1436_v56 = vadd.f32 %v8707_v39, %v1435_v22  ;;  %v6797_v22 = vpack.c.bf16 %v1958_v2, %v1954_v54  ;;  %v2024_v54 = vld [vmem:[%s13980_s9 + $0x3c0] sm:$0xff] }
 0x29b   :  { %v1491_v25 = vmax.f32 %v1441_v49, 0.0  ;;  %v6799_v49 = vpack.c.bf16 %v1967_v20, %v1963_v8  ;;  %v2028_v2 = vld [vmem:[%s13980_s9 + $0x3e0] sm:$0xff] }
 0x29c   :  { %v1490_v12 = vmax.f32 %v1436_v56, 0.0  ;;  %v1962_v56 = vld [vmem:[%s13980_s9 + $0x1d0] sm:$0xff]  ;;  %v6065_v20 = vpack.c.bf16 %v2028_v2, %v2024_v54  ;;  %v2061_v54 = vld [vmem:[%s13980_s9 + $0x4e8] sm:$0xff]  ;;  %v2059_v2 = vld [vmem:[%s13980_s9 + $0x4d8] sm:$0xff] }
 0x29d   :  { %v5860_v19 = vpop.f32.mrb[42].mxu1 }
 0x29e   :  { %v1445_v52 = vpop.f32.mrb[43].mxu1  ;;  %1718 = vmatprep.mubr.f32.mxu1 %v1490_v12  ;;  %v1451_v3 = vadd.f32 %v5860_v19, %v8707_v39  ;;  %v1966_v12 = vld [vmem:[%s13980_s9 + $0x1f0] sm:$0xff] }
 0x29f   :  { %v1446_v60 = vadd.f32 %v8707_v39, %v1445_v52  ;;  %1719 = vmatmul.mubr.f32.gmra.mrb[64].mxu1 %v1486_v18  ;;  %v6801_v19 = vpack.c.bf16 %v1966_v12, %v1962_v56  ;;  %v2033_v12 = vld [vmem:[%s13980_s9 + $0x408] sm:$0xff] }
 0x2a0   :  { %1724 = vmatprep.mubr.f32.mxu1 %v1491_v25  ;;  %v1493_v32 = vmax.f32 %v1451_v3, 0.0 }
 0x2a1   :  { %v1492_v61 = vmax.f32 %v1446_v60, 0.0  ;;  %v1970_v60 = vld [vmem:[%s13980_s9 + $0x210] sm:$0xff] }
 0x2a3   :  { %1725 = vmatmul.mubr.f32.gmra.mrb[66].mxu1 %v1487_v59 }
 0x2a4   :  { %1730 = vmatprep.mubr.f32.mxu1 %v1492_v61  ;;  %v1983_v61 = vld [vmem:[%s13980_s9 + $0x278] sm:$0xff] }
 0x2a5   :  { %v6807_v30 = vpack.c.bf16 %v1983_v61, %v1979_v31  ;;  %v1594_v61 = vld [vmem:[%s13982_s8] sm:$0x3] }
 0x2a7   :  { %1731 = vmatmul.mubr.f32.gmra.mrb[68].mxu1 %v1488_v6 }
 0x2a8   :  { %1736 = vmatprep.mubr.f32.mxu1 %v1493_v32 }
 0x2aa   :  { %v8996_v9 = vpop.f32.mrb[44].mxu1 }
 0x2ab   :  { %v9004_v14 = vpop.f32.mrb[45].mxu1  ;;  %1737 = vmatmul.mubr.f32.gmra.mrb[70].mxu1 %v1489_v33 }
 0x2ac   :  { %1807 = vmatprep.mubr.f32.mxu1 %v7855_v10  ;;  %v1456_v25 = vadd.f32 %v8707_v39, %v9004_v14 }
 0x2ae   :  { %v1494_v32 = vmax.f32 %v1456_v25, 0.0  ;;  %v2039_v25 = vld [vmem:[%s13980_s9 + $0x438] sm:$0xff] }
 0x2af   :  { %1808 = vmatmul.mubr.f32.vlgmr.msra.gmra.mrb[48].mxu1 %v1478_v26 }
 0x2b0   :  { %1813 = vmatprep.mubr.f32.mxu1 %v7855_v10  ;;  %6774 = vmatpush1.bf16.msra.mxu1 %v6773_v17 }
 0x2b1   :  { %6776 = vmatprep.subr.bf16.mxu1 %v6775_v36  ;;  %v1986_v36 = vld [vmem:[%s13980_s9 + $0x290] sm:$0xff] }
 0x2b2   :  { %v6813_v29 = vpack.c.bf16 %v1990_v40, %v1986_v36  ;;  %v2045_v36 = vld [vmem:[%s13980_s9 + $0x468] sm:$0xff]  ;;  %v2043_v40 = vld [vmem:[%s13980_s9 + $0x458] sm:$0xff] }
 0x2b3   :  { %v9036_v26 = vpop.f32.mrb[46].mxu1  ;;  %1814 = vmatmul.mubr.f32.gmra.mrb[50].mxu1 %v1479_v21  ;;  %v1943_v21 = vld [vmem:[%s13980_s9 + $0x138] sm:$0xff] }
 0x2b4   :  { %v9040_v38 = vpop.f32.mrb[47].mxu1  ;;  %1819 = vmatprep.mubr.f32.mxu1 %v7855_v10  ;;  %6778 = vmatpush1.bf16.msra.mxu1 %v6777_v43  ;;  %v6787_v63 = vpack.c.bf16 %v1943_v21, %v1939_v0  ;;  %v1471_v43 = vadd.f32 %v9036_v26, %v8707_v39 }
 0x2b5   :  { %6780 = vmatprep.subr.bf16.mxu1 %v6779_v23  ;;  %v1466_v14 = vadd.f32 %v8707_v39, %v9040_v38  ;;  %v2007_v38 = vld [vmem:[%s13980_s9 + $0x338] sm:$0xff] }
 0x2b6   :  { %v1497_v26 = vmax.f32 %v1471_v43, 0.0 }
 0x2b7   :  { %1820 = vmatmul.mubr.f32.gmra.mrb[52].mxu1 %v1480_v62  ;;  %v6789_v62 = vpack.c.bf16 %v1942_v41, %v1938_v7  ;;  %v1496_v23 = vmax.f32 %v1466_v14, 0.0  ;;  %v2019_v7 = vld [vmem:[%s13980_s9 + $0x398] sm:$0xff]  ;;  %v2041_v14 = vld [vmem:[%s13980_s9 + $0x448] sm:$0xff] }
 0x2b8   :  { %1825 = vmatprep.mubr.f32.mxu1 %v7855_v10  ;;  %6782 = vmatpush1.bf16.msra.mxu1 %v6781_v44  ;;  %v6819_v44 = vpack.c.bf16 %v2007_v38, %v2003_v53  ;;  %v2023_v41 = vld [vmem:[%s13980_s9 + $0x3b8] sm:$0xff] }
 0x2b9   :  { %6784 = vmatprep.subr.bf16.mxu1 %v6783_v48  ;;  %v2002_v48 = vld [vmem:[%s13980_s9 + $0x310] sm:$0xff]  ;;  %v6827_v24 = vpack.c.bf16 %v2023_v41, %v2019_v7 }
 0x2ba   :  { %v6821_v0 = vpack.c.bf16 %v2006_v57, %v2002_v48  ;;  %v2046_v48 = vld [vmem:[%s13980_s9 + $0x470] sm:$0xff]  ;;  %v2049_v57 = vld [vmem:[%s13980_s9 + $0x488] sm:$0xff] }
 0x2bb   :  { %1826 = vmatmul.mubr.f32.gmra.mrb[54].mxu1 %v1481_v55  ;;  %v6793_v55 = vpack.c.bf16 %v1950_v11, %v1946_v1  ;;  %v2025_v11 = vld [vmem:[%s13980_s9 + $0x3c8] sm:$0xff] }
 0x2bc   :  { %1831 = vmatprep.mubr.f32.mxu1 %v7855_v10  ;;  %6786 = vmatpush1.bf16.msra.mxu1 %v6785_v47  ;;  %v2010_v47 = vld [vmem:[%s13980_s9 + $0x350] sm:$0xff] }
 0x2bd   :  { %6788 = vmatprep.subr.bf16.mxu1 %v6787_v63  ;;  %v2014_v63 = vld [vmem:[%s13980_s9 + $0x370] sm:$0xff] }
 0x2be   :  { %v6825_v35 = vpack.c.bf16 %v2014_v63, %v2010_v47 }
 0x2bf   :  { %1832 = vmatmul.mubr.f32.gmra.mrb[56].mxu1 %v1486_v18  ;;  %v1971_v18 = vld [vmem:[%s13980_s9 + $0x218] sm:$0xff] }
 0x2c0   :  { %1837 = vmatprep.mubr.f32.mxu1 %v7855_v10  ;;  %6790 = vmatpush1.bf16.msra.mxu1 %v6789_v62  ;;  %v6803_v52 = vpack.c.bf16 %v1975_v50, %v1971_v18  ;;  %v2018_v62 = vld [vmem:[%s13980_s9 + $0x390] sm:$0xff]  ;;  %v2037_v18 = vld [vmem:[%s13980_s9 + $0x428] sm:$0xff]  ;;  %v2035_v50 = vld [vmem:[%s13980_s9 + $0x418] sm:$0xff] }
 0x2c1   :  { %6792 = vmatprep.subr.bf16.mxu1 %v6791_v46  ;;  %v2022_v46 = vld [vmem:[%s13980_s9 + $0x3b0] sm:$0xff] }
 0x2c2   :  { %v6829_v1 = vpack.c.bf16 %v2022_v46, %v2018_v62 }
 0x2c3   :  { %1838 = vmatmul.mubr.f32.gmra.mrb[58].mxu1 %v1487_v59  ;;  %v1974_v59 = vld [vmem:[%s13980_s9 + $0x230] sm:$0xff] }
 0x2c4   :  { %1843 = vmatprep.mubr.f32.mxu1 %v7855_v10  ;;  %6794 = vmatpush1.bf16.msra.mxu1 %v6793_v55  ;;  %v6805_v3 = vpack.c.bf16 %v1974_v59, %v1970_v60  ;;  %v6063_v55 = vpack.c.bf16 %v2029_v15, %v2025_v11  ;;  %v1596_v60 = vlaneseq  ;;  %v2050_v15 = vld [vmem:[%s13980_s9 + $0x490] sm:$0xff] }
 0x2c5   :  { %6796 = vmatprep.subr.bf16.mxu1 %v6795_v51  ;;  %v2031_v51 = vld [vmem:[%s13980_s9 + $0x3f8] sm:$0xff] }
 0x2c6   :  { %v6831_v8 = vpack.c.bf16 %v2031_v51, %v2027_v58  ;;  %6064 = vmatprep.subr.bf16.mxu0 %v6063_v55  ;;  %v9246_v59 = vshrl.u32 %v1596_v60, 7  ;;  %v2054_v58 = vld [vmem:[%s13980_s9 + $0x4b0] sm:$0xff]  ;;  %v2057_v55 = vld [vmem:[%s13980_s9 + $0x4c8] sm:$0xff] }
 0x2c7   :  { %1844 = vmatmul.mubr.f32.gmra.mrb[60].mxu1 %v1488_v6  ;;  %v1461_v6 = vadd.f32 %v8996_v9, %v8707_v39  ;;  %v6809_v9 = vpack.c.bf16 %v1982_v13, %v1978_v4  ;;  %v6817_v39 = vpack.c.bf16 %v1998_v34, %v1994_v45  ;;  %6066 = vmatpush1.bf16.msra.mxu0 %v6065_v20  ;;  %v2032_v4 = vld [vmem:[%s13980_s9 + $0x400] sm:$0xff]  ;;  %v2062_v60 = vld [vmem:[%s13980_s9 + $0x4f0] sm:$0xff] }
 0x2c8   :  { %1849 = vmatprep.mubr.f32.mxu1 %v7855_v10  ;;  %6798 = vmatpush1.bf16.msra.mxu1 %v6797_v22  ;;  %v2026_v22 = vld [vmem:[%s13980_s9 + $0x3d0] sm:$0xff]  ;;  %v9249_v31 = vsub.s32 0, %v9246_v59  ;;  %v2036_v13 = vld [vmem:[%s13980_s9 + $0x420] sm:$0xff] }
 0x2c9   :  { %6800 = vmatprep.subr.bf16.mxu1 %v6799_v49  ;;  %v1495_v16 = vmax.f32 %v1461_v6, 0.0  ;;  %v2030_v49 = vld [vmem:[%s13980_s9 + $0x3f0] sm:$0xff]  ;;  %v6069_v43 = vpack.c.bf16 %v2036_v13, %v2032_v4  ;;  %v2044_v45 = vld [vmem:[%s13980_s9 + $0x460] sm:$0xff]  ;;  %v2069_v4 = vld [vmem:[%s13980_s9 + $0x528] sm:$0xff] }
 0x2ca   :  { %v6833_v56 = vpack.c.bf16 %v2030_v49, %v2026_v22  ;;  %v9258_v6 = vrot.slane %v1594_v61, %v9249_v31  ;;  %v6845_v49 = vpack.c.bf16 %v2054_v58, %v2050_v15  ;;  %v2067_v13 = vld [vmem:[%s13980_s9 + $0x518] sm:$0xff]  ;;  %v2080_v58 = vld [vmem:[%s13980_s9 + $0x580] sm:$0xff] }
 0x2cb   :  { %1850 = vmatmul.mubr.f32.gmra.mrb[62].mxu1 %v1489_v33  ;;  %v1991_v33 = vld [vmem:[%s13980_s9 + $0x2b8] sm:$0xff] }
 0x2cc   :  { %1855 = vmatprep.mubr.f32.mxu1 %v7855_v10  ;;  %6802 = vmatpush1.bf16.msra.mxu1 %v6801_v19  ;;  %v6811_v17 = vpack.c.bf16 %v1991_v33, %v1987_v5  ;;  %v6067_v19 = vpack.c.bf16 %v2037_v18, %v2033_v12  ;;  %v2060_v12 = vld [vmem:[%s13980_s9 + $0x4e0] sm:$0xff] }
 0x2cd   :  { %6804 = vmatprep.subr.bf16.mxu1 %v6803_v52  ;;  %v6835_v52 = vpack.c.bf16 %v2039_v25, %v2035_v50 }
 0x2ce   :  { %6068 = vmatprep.subr.bf16.mxu0 %v6067_v19  ;;  %v6079_v19 = vpack.c.bf16 %v2061_v54, %v2057_v55  ;;  %v2084_v55 = vld [vmem:[%s13980_s9 + $0x5a0] sm:$0xff] }
 0x2cf   :  { %1856 = vmatmul.mubr.f32.gmra.mrb[64].mxu1 %v1494_v32 }
 0x2d0   :  { %1861 = vmatprep.mubr.f32.mxu1 %v7855_v10  ;;  %6806 = vmatpush1.bf16.msra.mxu1 %v6805_v3  ;;  %v9255_v3 = vsub.s32 1, %v9246_v59 }
 0x2d1   :  { %6808 = vmatprep.subr.bf16.mxu1 %v6807_v30 }
 0x2d2   :  { %v9261_v32 = vrot.slane %v1594_v61, %v9255_v3  ;;  %v2065_v61 = vld [vmem:[%s13980_s9 + $0x508] sm:$0xff] }
 0x2d3   :  { %1862 = vmatmul.mubr.f32.gmra.mrb[66].mxu1 %v1495_v16  ;;  %v2038_v16 = vld [vmem:[%s13980_s9 + $0x430] sm:$0xff] }
 0x2d4   :  { %1867 = vmatprep.mubr.f32.mxu1 %v7855_v10  ;;  %6810 = vmatpush1.bf16.msra.mxu1 %v6809_v9  ;;  %v2034_v9 = vld [vmem:[%s13980_s9 + $0x410] sm:$0xff] }
 0x2d5   :  { %6812 = vmatprep.subr.bf16.mxu1 %v6811_v17 }
 0x2d7   :  { %1868 = vmatmul.mubr.f32.gmra.mrb[68].mxu1 %v1496_v23  ;;  %v6837_v23 = vpack.c.bf16 %v2038_v16, %v2034_v9 }
 0x2d8   :  { %1873 = vmatprep.mubr.f32.mxu1 %v7855_v10  ;;  %6814 = vmatpush1.bf16.msra.mxu1 %v6813_v29  ;;  %v2015_v10 = vld [vmem:[%s13980_s9 + $0x378] sm:$0xff] }
 0x2d9   :  { %6816 = vmatprep.subr.bf16.mxu1 %v6815_v28  ;;  %v6823_v21 = vpack.c.bf16 %v2015_v10, %v2011_v37  ;;  %v2040_v28 = vld [vmem:[%s13980_s9 + $0x440] sm:$0xff]  ;;  %v2053_v10 = vld [vmem:[%s13980_s9 + $0x4a8] sm:$0xff] }
 0x2da   :  { %v6073_v7 = vpack.c.bf16 %v2044_v45, %v2040_v28  ;;  %v2077_v45 = vld [vmem:[%s13980_s9 + $0x568] sm:$0xff] }
 0x2db   :  { %1874 = vmatmul.mubr.f32.gmra.mrb[70].mxu1 %v1497_v26  ;;  %v6839_v26 = vpack.c.bf16 %v2047_v42, %v2043_v40  ;;  %v6083_v42 = vpack.c.bf16 %v2069_v4, %v2065_v61  ;;  %v2088_v4 = vld [vmem:[%s13980_s9 + $0x5c0] sm:$0xff] }
 0x2dc   :  { %6818 = vmatpush1.bf16.msra.mxu1 %v6817_v39  ;;  %v6071_v39 = vpack.c.bf16 %v2045_v36, %v2041_v14  ;;  %v2064_v14 = vld [vmem:[%s13980_s9 + $0x500] sm:$0xff] }
 0x2dd   :  { %6820 = vmatprep.subr.bf16.mxu1 %v6819_v44  ;;  %v2042_v44 = vld [vmem:[%s13980_s9 + $0x450] sm:$0xff] }
 0x2de   :  { %v6841_v41 = vpack.c.bf16 %v2046_v48, %v2042_v44  ;;  %v2072_v48 = vld [vmem:[%s13980_s9 + $0x540] sm:$0xff] }
 0x2e0   :  { %6822 = vmatpush1.bf16.msra.mxu1 %v6821_v0  ;;  %v2051_v0 = vld [vmem:[%s13980_s9 + $0x498] sm:$0xff] }
 0x2e1   :  { %6824 = vmatprep.subr.bf16.mxu1 %v6823_v21  ;;  %v2055_v21 = vld [vmem:[%s13980_s9 + $0x4b8] sm:$0xff] }
 0x2e2   :  { %v6843_v11 = vpack.c.bf16 %v2055_v21, %v2051_v0 }
 0x2e4   :  { %6826 = vmatpush1.bf16.msra.mxu1 %v6825_v35  ;;  %v2048_v35 = vld [vmem:[%s13980_s9 + $0x480] sm:$0xff] }
 0x2e5   :  { %6828 = vmatprep.subr.bf16.mxu1 %v6827_v24  ;;  %v2052_v24 = vld [vmem:[%s13980_s9 + $0x4a0] sm:$0xff] }
 0x2e6   :  { %v6077_v22 = vpack.c.bf16 %v2052_v24, %v2048_v35  ;;  %v2085_v35 = vld [vmem:[%s13980_s9 + $0x5a8] sm:$0xff]  ;;  %v2083_v24 = vld [vmem:[%s13980_s9 + $0x598] sm:$0xff] }
 0x2e8   :  { %6830 = vmatpush1.bf16.msra.mxu1 %v6829_v1  ;;  %v6075_v1 = vpack.c.bf16 %v2053_v10, %v2049_v57  ;;  %v2076_v57 = vld [vmem:[%s13980_s9 + $0x560] sm:$0xff] }
 0x2e9   :  { %6832 = vmatprep.subr.bf16.mxu1 %v6831_v8  ;;  %v2063_v8 = vld [vmem:[%s13980_s9 + $0x4f8] sm:$0xff] }
 0x2ea   :  { %v6847_v25 = vpack.c.bf16 %v2063_v8, %v2059_v2 }
 0x2ec   :  { %6834 = vmatpush1.bf16.msra.mxu1 %v6833_v56  ;;  %v2056_v56 = vld [vmem:[%s13980_s9 + $0x4c0] sm:$0xff] }
 0x2ed   :  { %6836 = vmatprep.subr.bf16.mxu1 %v6835_v52  ;;  %v2058_v52 = vld [vmem:[%s13980_s9 + $0x4d0] sm:$0xff]  ;;  %v6081_v9 = vpack.c.bf16 %v2060_v12, %v2056_v56  ;;  %v2089_v56 = vld [vmem:[%s13980_s9 + $0x5c8] sm:$0xff] }
 0x2ee   :  { %v6849_v16 = vpack.c.bf16 %v2062_v60, %v2058_v52  ;;  %v6093_v60 = vpack.c.bf16 %v2084_v55, %v2080_v58 }
 0x382   :  { %v1809_v30 = vpop.f32.mrb[48].mxu1 }
 0x383   :  { %v7691_v5 = vadd.f32 %v1809_v30, %v9258_v6  ;;  %v1811_v33 = vpop.f32.mrb[49].mxu1 }
 0x384   :  { %v7692_v17 = vadd.f32 %v1811_v33, %v9261_v32 }
 0x385   :  { %v1880_v34 = vmax.f32 %v7691_v5, 0.0  ;;  %v2071_v5 = vld [vmem:[%s13980_s9 + $0x538] sm:$0xff] }
 0x386   :  { %v1881_v27 = vmax.f32 %v7692_v17, 0.0  ;;  %v1815_v29 = vpop.f32.mrb[50].mxu1  ;;  %v2068_v17 = vld [vmem:[%s13980_s9 + $0x520] sm:$0xff] }
 0x387   :  { %v9296_v53 = vadd.f32 %v1815_v29, %v9258_v6  ;;  %v1817_v38 = vpop.f32.mrb[51].mxu1  ;;  %v2066_v29 = vld [vmem:[%s13980_s9 + $0x510] sm:$0xff] }
 0x388   :  { %v7694_v37 = vadd.f32 %v1817_v38, %v9261_v32  ;;  %3526 = vmatprep.mubr.f32.mxu0 %v1881_v27  ;;  %4378 = vmatprep.mubr.f32.mxu1 %v1881_v27  ;;  %v6851_v27 = vpack.c.bf16 %v2071_v5, %v2067_v13  ;;  %v2079_v38 = vld [vmem:[%s13980_s9 + $0x578] sm:$0xff]  ;;  %v2092_v13 = vld [vmem:[%s13980_s9 + $0x5e0] sm:$0xff] }
 0x389   :  { %3527 = vmatmul.mubr.f32.vlgmr.msra.gmra.mrb[24].mxu0 %v1880_v34  ;;  %4379 = vmatmul.mubr.f32.vlgmr.msra.gmra.mrb[72].mxu1 %v1880_v34  ;;  %v2075_v34 = vld [vmem:[%s13980_s9 + $0x558] sm:$0xff] }
 0x38a   :  { %v1883_v47 = vmax.f32 %v7694_v37, 0.0  ;;  %6070 = vmatpush1.bf16.msra.mxu0 %v6069_v43  ;;  %6838 = vmatpush1.bf16.msra.mxu1 %v6837_v23  ;;  %v1821_v63 = vpop.f32.mrb[52].mxu1  ;;  %v2070_v43 = vld [vmem:[%s13980_s9 + $0x530] sm:$0xff]  ;;  %v2073_v23 = vld [vmem:[%s13980_s9 + $0x548] sm:$0xff]  ;;  %v6855_v21 = vpack.c.bf16 %v2079_v38, %v2075_v34  ;;  %v2096_v38 = vld [vmem:[%s13980_s9 + $0x600] sm:$0xff] }
 0x38b   :  { %v9324_v62 = vadd.f32 %v1821_v63, %v9258_v6  ;;  %v1823_v46 = vpop.f32.mrb[53].mxu1  ;;  %6072 = vmatprep.subr.bf16.mxu0 %v6071_v39  ;;  %6840 = vmatprep.subr.bf16.mxu1 %v6839_v26  ;;  %v6085_v26 = vpack.c.bf16 %v2068_v17, %v2064_v14  ;;  %v6853_v44 = vpack.c.bf16 %v2070_v43, %v2066_v29  ;;  %v2078_v63 = vld [vmem:[%s13980_s9 + $0x570] sm:$0xff]  ;;  %v2099_v29 = vld [vmem:[%s13980_s9 + $0x618] sm:$0xff] }
 0x38c   :  { %v9336_v51 = vadd.f32 %v1823_v46, %v9261_v32  ;;  %3597 = vmatprep.mubr.f32.mxu0 %v1883_v47  ;;  %4449 = vmatprep.mubr.f32.mxu1 %v1883_v47  ;;  %v6087_v0 = vpack.c.bf16 %v2077_v45, %v2073_v23  ;;  %v2074_v47 = vld [vmem:[%s13980_s9 + $0x550] sm:$0xff]  ;;  %v2087_v46 = vld [vmem:[%s13980_s9 + $0x5b8] sm:$0xff]  ;;  %v6097_v45 = vpack.c.bf16 %v2092_v13, %v2088_v4  ;;  %v2112_v4 = vld [vmem:[%s13980_s9 + $0x680] sm:$0xff] }
 0x38d   :  { %v6857_v15 = vpack.c.bf16 %v2078_v63, %v2074_v47  ;;  %v2090_v14 = vld [vmem:[%s13980_s9 + $0x5d0] sm:$0xff]  ;;  %v2103_v43 = vld [vmem:[%s13980_s9 + $0x638] sm:$0xff]  ;;  %v2109_v63 = vld [vmem:[%s13980_s9 + $0x668] sm:$0xff] }
 0x38e   :  { %6074 = vmatpush1.bf16.msra.mxu0 %v6073_v7  ;;  %6842 = vmatpush1.bf16.msra.mxu1 %v6841_v41  ;;  %v1827_v20 = vpop.f32.mrb[54].mxu1  ;;  %v2081_v7 = vld [vmem:[%s13980_s9 + $0x588] sm:$0xff]  ;;  %v2094_v17 = vld [vmem:[%s13980_s9 + $0x5f0] sm:$0xff]  ;;  %v2116_v13 = vld [vmem:[%s13980_s9 + $0x6a0] sm:$0xff] }
 0x38f   :  { %v9354_v18 = vadd.f32 %v1827_v20, %v9258_v6  ;;  %v1829_v50 = vpop.f32.mrb[55].mxu1  ;;  %6076 = vmatprep.subr.bf16.mxu0 %v6075_v1  ;;  %6844 = vmatprep.subr.bf16.mxu1 %v6843_v11  ;;  %v6089_v11 = vpack.c.bf16 %v2076_v57, %v2072_v48  ;;  %v6091_v8 = vpack.c.bf16 %v2085_v35, %v2081_v7  ;;  %v2107_v7 = vld [vmem:[%s13980_s9 + $0x658] sm:$0xff] }
 0x390   :  { %v9366_v30 = vadd.f32 %v1829_v50, %v9261_v32  ;;  %v6859_v20 = vpack.c.bf16 %v2087_v46, %v2083_v24  ;;  %v2093_v50 = vld [vmem:[%s13980_s9 + $0x5e8] sm:$0xff]  ;;  %v6865_v34 = vpack.c.bf16 %v2094_v17, %v2090_v14  ;;  %v6867_v57 = vpack.c.bf16 %v2103_v43, %v2099_v29  ;;  %v2111_v35 = vld [vmem:[%s13980_s9 + $0x678] sm:$0xff]  ;;  %v2114_v17 = vld [vmem:[%s13980_s9 + $0x690] sm:$0xff] }
 0x391   :  { %v2125_v43 = vld [vmem:[%s13980_s9 + $0x6e8] sm:$0xff] }
 0x392   :  { %6078 = vmatpush1.bf16.msra.mxu0 %v6077_v22  ;;  %6846 = vmatpush1.bf16.msra.mxu1 %v6845_v49  ;;  %v1833_v33 = vpop.f32.mrb[56].mxu1  ;;  %v2082_v22 = vld [vmem:[%s13980_s9 + $0x590] sm:$0xff] }
 0x393   :  { %v9384_v36 = vadd.f32 %v1833_v33, %v9258_v6  ;;  %v1835_v40 = vpop.f32.mrb[57].mxu1  ;;  %6080 = vmatprep.subr.bf16.mxu0 %v6079_v19  ;;  %6848 = vmatprep.subr.bf16.mxu1 %v6847_v25  ;;  %v2086_v49 = vld [vmem:[%s13980_s9 + $0x5b0] sm:$0xff]  ;;  %v2091_v19 = vld [vmem:[%s13980_s9 + $0x5d8] sm:$0xff] }
 0x394   :  { %v9396_v28 = vadd.f32 %v1835_v40, %v9261_v32  ;;  %v2095_v25 = vld [vmem:[%s13980_s9 + $0x5f8] sm:$0xff]  ;;  %v6861_v61 = vpack.c.bf16 %v2086_v49, %v2082_v22  ;;  %v2097_v40 = vld [vmem:[%s13980_s9 + $0x608] sm:$0xff]  ;;  %v2110_v22 = vld [vmem:[%s13980_s9 + $0x670] sm:$0xff] }
 0x395   :  { %v2113_v49 = vld [vmem:[%s13980_s9 + $0x688] sm:$0xff] }
 0x396   :  { %6082 = vmatpush1.bf16.msra.mxu0 %v6081_v9  ;;  %6850 = vmatpush1.bf16.msra.mxu1 %v6849_v16  ;;  %v1839_v39 = vpop.f32.mrb[58].mxu1  ;;  %v6095_v9 = vpack.c.bf16 %v2093_v50, %v2089_v56  ;;  %v6863_v16 = vpack.c.bf16 %v2095_v25, %v2091_v19  ;;  %v2117_v50 = vld [vmem:[%s13980_s9 + $0x6a8] sm:$0xff]  ;;  %v2115_v19 = vld [vmem:[%s13980_s9 + $0x698] sm:$0xff] }
 0x397   :  { %v9414_v37 = vadd.f32 %v1839_v39, %v9258_v6  ;;  %v1841_v10 = vpop.f32.mrb[59].mxu1  ;;  %6084 = vmatprep.subr.bf16.mxu0 %v6083_v42  ;;  %6852 = vmatprep.subr.bf16.mxu1 %v6851_v27  ;;  %v2101_v27 = vld [vmem:[%s13980_s9 + $0x628] sm:$0xff]  ;;  %v2100_v39 = vld [vmem:[%s13980_s9 + $0x620] sm:$0xff]  ;;  %v2119_v25 = vld [vmem:[%s13980_s9 + $0x6b8] sm:$0xff] }
 0x398   :  { %v9426_v41 = vadd.f32 %v1841_v10, %v9261_v32  ;;  %v6099_v48 = vpack.c.bf16 %v2101_v27, %v2097_v40  ;;  %v2098_v10 = vld [vmem:[%s13980_s9 + $0x610] sm:$0xff]  ;;  %v6101_v46 = vpack.c.bf16 %v2100_v39, %v2096_v38  ;;  %v6875_v14 = vpack.c.bf16 %v2119_v25, %v2115_v19  ;;  %v2121_v27 = vld [vmem:[%s13980_s9 + $0x6c8] sm:$0xff]  ;;  %v2139_v19 = vld [vmem:[%s13980_s9 + $0x758] sm:$0xff] }
 0x399   :  { %v2118_v40 = vld [vmem:[%s13980_s9 + $0x6b0] sm:$0xff]  ;;  %v6109_v38 = vpack.c.bf16 %v2116_v13, %v2112_v4  ;;  %v2143_v25 = vld [vmem:[%s13980_s9 + $0x778] sm:$0xff]  ;;  %v2140_v4 = vld [vmem:[%s13980_s9 + $0x760] sm:$0xff] }
 0x39a   :  { %6086 = vmatpush1.bf16.msra.mxu0 %v6085_v26  ;;  %6854 = vmatpush1.bf16.msra.mxu1 %v6853_v44  ;;  %v1845_v1 = vpop.f32.mrb[60].mxu1  ;;  %v6877_v39 = vpack.c.bf16 %v2118_v40, %v2114_v17  ;;  %v2145_v17 = vld [vmem:[%s13980_s9 + $0x788] sm:$0xff] }
 0x39b   :  { %v9444_v54 = vadd.f32 %v1845_v1, %v9258_v6  ;;  %v1847_v2 = vpop.f32.mrb[61].mxu1  ;;  %6088 = vmatprep.subr.bf16.mxu0 %v6087_v0  ;;  %6856 = vmatprep.subr.bf16.mxu1 %v6855_v21  ;;  %v2102_v0 = vld [vmem:[%s13980_s9 + $0x630] sm:$0xff]  ;;  %v2105_v21 = vld [vmem:[%s13980_s9 + $0x648] sm:$0xff] }
 0x39c   :  { %v9456_v12 = vadd.f32 %v1847_v2, %v9261_v32  ;;  %v6869_v1 = vpack.c.bf16 %v2102_v0, %v2098_v10  ;;  %v6103_v2 = vpack.c.bf16 %v2109_v63, %v2105_v21  ;;  %v6111_v0 = vpack.c.bf16 %v2125_v43, %v2121_v27  ;;  %v2122_v63 = vld [vmem:[%s13980_s9 + $0x6d0] sm:$0xff]  ;;  %v2149_v40 = vld [vmem:[%s13980_s9 + $0x7a8] sm:$0xff]  ;;  %v2147_v27 = vld [vmem:[%s13980_s9 + $0x798] sm:$0xff] }
 0x39d   :  { %v2151_v43 = vld [vmem:[%s13980_s9 + $0x7b8] sm:$0xff] }
 0x39e   :  { %6090 = vmatpush1.bf16.msra.mxu0 %v6089_v11  ;;  %6858 = vmatpush1.bf16.msra.mxu1 %v6857_v15  ;;  %v1851_v52 = vpop.f32.mrb[62].mxu1  ;;  %v2104_v11 = vld [vmem:[%s13980_s9 + $0x640] sm:$0xff] }
 0x39f   :  { %v9474_v5 = vadd.f32 %v1851_v52, %v9258_v6  ;;  %v1853_v33 = vpop.f32.mrb[63].mxu1  ;;  %6092 = vmatprep.subr.bf16.mxu0 %v6091_v8  ;;  %6860 = vmatprep.subr.bf16.mxu1 %v6859_v20  ;;  %v2108_v15 = vld [vmem:[%s13980_s9 + $0x660] sm:$0xff]  ;;  %v6871_v8 = vpack.c.bf16 %v2111_v35, %v2107_v7  ;;  %v2106_v20 = vld [vmem:[%s13980_s9 + $0x650] sm:$0xff]  ;;  %v2129_v35 = vld [vmem:[%s13980_s9 + $0x708] sm:$0xff] }
 0x3a0   :  { %v9486_v42 = vadd.f32 %v1853_v33, %v9261_v32  ;;  %v2126_v7 = vld [vmem:[%s13980_s9 + $0x6f0] sm:$0xff] }
 0x3a2   :  { %6094 = vmatpush1.bf16.msra.mxu0 %v6093_v60  ;;  %6862 = vmatpush1.bf16.msra.mxu1 %v6861_v61  ;;  %v1857_v23 = vpop.f32.mrb[64].mxu1  ;;  %v6105_v60 = vpack.c.bf16 %v2108_v15, %v2104_v11  ;;  %v6873_v61 = vpack.c.bf16 %v2110_v22, %v2106_v20  ;;  %v6881_v15 = vpack.c.bf16 %v2126_v7, %v2122_v63  ;;  %v2130_v20 = vld [vmem:[%s13980_s9 + $0x710] sm:$0xff]  ;;  %v2155_v63 = vld [vmem:[%s13980_s9 + $0x7d8] sm:$0xff] }
 0x3a3   :  { %v9504_v26 = vadd.f32 %v1857_v23, %v9258_v6  ;;  %v1859_v44 = vpop.f32.mrb[65].mxu1  ;;  %6096 = vmatprep.subr.bf16.mxu0 %v6095_v9  ;;  %6864 = vmatprep.subr.bf16.mxu1 %v6863_v16  ;;  %v6107_v16 = vpack.c.bf16 %v2117_v50, %v2113_v49  ;;  %v2123_v23 = vld [vmem:[%s13980_s9 + $0x6d8] sm:$0xff]  ;;  %v2134_v22 = vld [vmem:[%s13980_s9 + $0x730] sm:$0xff]  ;;  %v2137_v49 = vld [vmem:[%s13980_s9 + $0x748] sm:$0xff] }
 0x3a4   :  { %v9516_v47 = vadd.f32 %v1859_v44, %v9261_v32  ;;  %v2120_v44 = vld [vmem:[%s13980_s9 + $0x6c0] sm:$0xff]  ;;  %v2141_v50 = vld [vmem:[%s13980_s9 + $0x768] sm:$0xff]  ;;  %v2159_v7 = vld [vmem:[%s13980_s9 + $0x7f8] sm:$0xff] }
 0x3a5   :  { %v6119_v13 = vpack.c.bf16 %v2141_v50, %v2137_v49 }
 0x3a6   :  { %6098 = vmatpush1.bf16.msra.mxu0 %v6097_v45  ;;  %6866 = vmatpush1.bf16.msra.mxu1 %v6865_v34  ;;  %v1863_v24 = vpop.f32.mrb[66].mxu1  ;;  %v2127_v45 = vld [vmem:[%s13980_s9 + $0x6f8] sm:$0xff] }
 0x3a7   :  { %v9534_v58 = vadd.f32 %v1863_v24, %v9258_v6  ;;  %v1865_v55 = vpop.f32.mrb[67].mxu1  ;;  %6100 = vmatprep.subr.bf16.mxu0 %v6099_v48  ;;  %6868 = vmatprep.subr.bf16.mxu1 %v6867_v57  ;;  %v2124_v48 = vld [vmem:[%s13980_s9 + $0x6e0] sm:$0xff]  ;;  %v6879_v21 = vpack.c.bf16 %v2127_v45, %v2123_v23  ;;  %v2133_v24 = vld [vmem:[%s13980_s9 + $0x728] sm:$0xff] }
 0x3a8   :  { %v9546_v56 = vadd.f32 %v1865_v55, %v9261_v32  ;;  %v6113_v11 = vpack.c.bf16 %v2124_v48, %v2120_v44  ;;  %v2132_v55 = vld [vmem:[%s13980_s9 + $0x720] sm:$0xff]  ;;  %v6891_v44 = vpack.c.bf16 %v2151_v43, %v2147_v27  ;;  %v2146_v48 = vld [vmem:[%s13980_s9 + $0x790] sm:$0xff] }
 0x3a9   :  { %v2168_v43 = vld [vmem:[%s13980_s9 + $0x840] sm:$0xff] }
 0x3aa   :  { %6102 = vmatpush1.bf16.msra.mxu0 %v6101_v46  ;;  %6870 = vmatpush1.bf16.msra.mxu1 %v6869_v1  ;;  %v1869_v52 = vpop.f32.mrb[68].mxu1  ;;  %v2131_v46 = vld [vmem:[%s13980_s9 + $0x718] sm:$0xff] }
 0x3ab   :  { %v9564_v33 = vadd.f32 %v1869_v52, %v9258_v6  ;;  %v1871_v9 = vpop.f32.mrb[69].mxu1  ;;  %6104 = vmatprep.subr.bf16.mxu0 %v6103_v2  ;;  %6872 = vmatprep.subr.bf16.mxu1 %v6871_v8  ;;  %v2135_v1 = vld [vmem:[%s13980_s9 + $0x738] sm:$0xff]  ;;  %v6115_v2 = vpack.c.bf16 %v2133_v24, %v2129_v35 }
 0x3ac   :  { %v9576_v29 = vadd.f32 %v1871_v9, %v9261_v32  ;;  %v6883_v8 = vpack.c.bf16 %v2135_v1, %v2131_v46  ;;  %v6887_v9 = vpack.c.bf16 %v2143_v25, %v2139_v19  ;;  %v2152_v46 = vld [vmem:[%s13980_s9 + $0x7c0] sm:$0xff] }
 0x3ad   :  { %v2156_v1 = vld [vmem:[%s13980_s9 + $0x7e0] sm:$0xff] }
 0x3ae   :  { %6106 = vmatpush1.bf16.msra.mxu0 %v6105_v60  ;;  %6874 = vmatpush1.bf16.msra.mxu1 %v6873_v61  ;;  %v1875_v34 = vpop.f32.mrb[70].mxu1  ;;  %v6885_v60 = vpack.c.bf16 %v2134_v22, %v2130_v20  ;;  %v2136_v61 = vld [vmem:[%s13980_s9 + $0x740] sm:$0xff]  ;;  %v2163_v20 = vld [vmem:[%s13980_s9 + $0x818] sm:$0xff]  ;;  %v6129_v49 = vpack.c.bf16 %v2156_v1, %v2152_v46  ;;  %v2182_v1 = vld [vmem:[%s13980_s9 + $0x8b0] sm:$0xff] }
 0x3af   :  { %v9594_v57 = vadd.f32 %v1875_v34, %v9258_v6  ;;  %v1877_v10 = vpop.f32.mrb[71].mxu1  ;;  %6108 = vmatprep.subr.bf16.mxu0 %v6107_v16  ;;  %6876 = vmatprep.subr.bf16.mxu1 %v6875_v14  ;;  %v2138_v16 = vld [vmem:[%s13980_s9 + $0x750] sm:$0xff]  ;;  %v6121_v23 = vpack.c.bf16 %v2140_v4, %v2136_v61  ;;  %v2144_v34 = vld [vmem:[%s13980_s9 + $0x780] sm:$0xff]  ;;  %v2167_v22 = vld [vmem:[%s13980_s9 + $0x838] sm:$0xff] }
 0x3b0   :  { %v9606_v6 = vadd.f32 %v1877_v10, %v9261_v32  ;;  %v2128_v32 = vld [vmem:[%s13980_s9 + $0x700] sm:$0xff]  ;;  %v2142_v14 = vld [vmem:[%s13980_s9 + $0x770] sm:$0xff]  ;;  %v6899_v25 = vpack.c.bf16 %v2167_v22, %v2163_v20 }
 0x3b1   :  { %v6117_v52 = vpack.c.bf16 %v2132_v55, %v2128_v32  ;;  %v6889_v45 = vpack.c.bf16 %v2142_v14, %v2138_v16  ;;  %v2150_v10 = vld [vmem:[%s13980_s9 + $0x7b0] sm:$0xff]  ;;  %v2171_v16 = vld [vmem:[%s13980_s9 + $0x858] sm:$0xff]  ;;  %v2184_v22 = vld [vmem:[%s13980_s9 + $0x8c0] sm:$0xff] }
 0x3b2   :  { %6110 = vmatpush1.bf16.msra.mxu0 %v6109_v38  ;;  %6878 = vmatpush1.bf16.msra.mxu1 %v6877_v39  ;;  %v2148_v38 = vld [vmem:[%s13980_s9 + $0x7a0] sm:$0xff]  ;;  %v6123_v39 = vpack.c.bf16 %v2149_v40, %v2145_v17  ;;  %v6893_v24 = vpack.c.bf16 %v2150_v10, %v2146_v48  ;;  %v2154_v32 = vld [vmem:[%s13980_s9 + $0x7d0] sm:$0xff]  ;;  %v2175_v14 = vld [vmem:[%s13980_s9 + $0x878] sm:$0xff]  ;;  %v1882_v40 = vmax.f32 %v9296_v53, 0.0 }
 0x3b3   :  { %6112 = vmatprep.subr.bf16.mxu0 %v6111_v0  ;;  %6880 = vmatprep.subr.bf16.mxu1 %v6879_v21  ;;  %v2153_v0 = vld [vmem:[%s13980_s9 + $0x7c8] sm:$0xff]  ;;  %v6125_v35 = vpack.c.bf16 %v2148_v38, %v2144_v34  ;;  %v2158_v55 = vld [vmem:[%s13980_s9 + $0x7f0] sm:$0xff]  ;;  %v1885_v34 = vmax.f32 %v9336_v51, 0.0  ;;  %v2179_v51 = vld [vmem:[%s13980_s9 + $0x898] sm:$0xff] }
 0x3b4   :  { %v2157_v21 = vld [vmem:[%s13980_s9 + $0x7e8] sm:$0xff]  ;;  %v6897_v50 = vpack.c.bf16 %v2158_v55, %v2154_v32  ;;  %v2162_v61 = vld [vmem:[%s13980_s9 + $0x810] sm:$0xff]  ;;  %v2183_v10 = vld [vmem:[%s13980_s9 + $0x8b8] sm:$0xff] }
 0x3b5   :  { %v2166_v4 = vld [vmem:[%s13980_s9 + $0x830] sm:$0xff]  ;;  %v2181_v48 = vld [vmem:[%s13980_s9 + $0x8a8] sm:$0xff]  ;;  %v6907_v46 = vpack.c.bf16 %v2183_v10, %v2179_v51  ;;  %v2187_v32 = vld [vmem:[%s13980_s9 + $0x8d8] sm:$0xff] }
 0x3b6   :  { %6114 = vmatpush1.bf16.msra.mxu0 %v6113_v11  ;;  %6882 = vmatpush1.bf16.msra.mxu1 %v6881_v15  ;;  %v6127_v11 = vpack.c.bf16 %v2157_v21, %v2153_v0  ;;  %v6895_v15 = vpack.c.bf16 %v2159_v7, %v2155_v63  ;;  %v6901_v27 = vpack.c.bf16 %v2166_v4, %v2162_v61  ;;  %v2174_v53 = vld [vmem:[%s13980_s9 + $0x870] sm:$0xff]  ;;  %v2176_v7 = vld [vmem:[%s13980_s9 + $0x880] sm:$0xff]  ;;  %v2191_v55 = vld [vmem:[%s13980_s9 + $0x8f8] sm:$0xff] }
 0x3b7   :  { %6116 = vmatprep.subr.bf16.mxu0 %v6115_v2  ;;  %6884 = vmatprep.subr.bf16.mxu1 %v6883_v8  ;;  %v2161_v2 = vld [vmem:[%s13980_s9 + $0x808] sm:$0xff]  ;;  %v2195_v61 = vld [vmem:[%s13980_s9 + $0x918] sm:$0xff]  ;;  %v2204_v51 = vld [vmem:[%s13980_s9 + $0x960] sm:$0xff] }
 0x3b8   :  { %v2165_v8 = vld [vmem:[%s13980_s9 + $0x828] sm:$0xff]  ;;  %v2199_v4 = vld [vmem:[%s13980_s9 + $0x938] sm:$0xff]  ;;  %v2202_v10 = vld [vmem:[%s13980_s9 + $0x950] sm:$0xff] }
 0x3b9   :  { %v6131_v19 = vpack.c.bf16 %v2165_v8, %v2161_v2 }
 0x3ba   :  { %6118 = vmatpush1.bf16.msra.mxu0 %v6117_v52  ;;  %6886 = vmatpush1.bf16.msra.mxu1 %v6885_v60  ;;  %v2160_v52 = vld [vmem:[%s13980_s9 + $0x800] sm:$0xff] }
 0x3bb   :  { %6120 = vmatprep.subr.bf16.mxu0 %v6119_v13  ;;  %6888 = vmatprep.subr.bf16.mxu1 %v6887_v9  ;;  %v2164_v60 = vld [vmem:[%s13980_s9 + $0x820] sm:$0xff]  ;;  %v2169_v13 = vld [vmem:[%s13980_s9 + $0x848] sm:$0xff] }
 0x3bc   :  { %v2173_v9 = vld [vmem:[%s13980_s9 + $0x868] sm:$0xff]  ;;  %v6133_v17 = vpack.c.bf16 %v2164_v60, %v2160_v52 }
 0x3bd   :  { %v6135_v38 = vpack.c.bf16 %v2173_v9, %v2169_v13  ;;  %v2193_v52 = vld [vmem:[%s13980_s9 + $0x908] sm:$0xff] }
 0x3be   :  { %6122 = vmatpush1.bf16.msra.mxu0 %v6121_v23  ;;  %6890 = vmatpush1.bf16.msra.mxu1 %v6889_v45  ;;  %v2172_v23 = vld [vmem:[%s13980_s9 + $0x860] sm:$0xff]  ;;  %v2170_v45 = vld [vmem:[%s13980_s9 + $0x850] sm:$0xff]  ;;  %v2197_v60 = vld [vmem:[%s13980_s9 + $0x928] sm:$0xff] }
 0x3bf   :  { %6124 = vmatprep.subr.bf16.mxu0 %v6123_v39  ;;  %6892 = vmatprep.subr.bf16.mxu1 %v6891_v44  ;;  %v6903_v39 = vpack.c.bf16 %v2175_v14, %v2171_v16  ;;  %v2177_v44 = vld [vmem:[%s13980_s9 + $0x888] sm:$0xff]  ;;  %v6137_v0 = vpack.c.bf16 %v2172_v23, %v2168_v43  ;;  %v6905_v21 = vpack.c.bf16 %v2174_v53, %v2170_v45  ;;  %v2192_v14 = vld [vmem:[%s13980_s9 + $0x900] sm:$0xff]  ;;  %v2198_v43 = vld [vmem:[%s13980_s9 + $0x930] sm:$0xff] }
 0x3c0   :  { %v6139_v63 = vpack.c.bf16 %v2181_v48, %v2177_v44  ;;  %v6147_v16 = vpack.c.bf16 %v2197_v60, %v2193_v52  ;;  %v2201_v23 = vld [vmem:[%s13980_s9 + $0x948] sm:$0xff]  ;;  %v2200_v48 = vld [vmem:[%s13980_s9 + $0x940] sm:$0xff] }
 0x3c1   :  { %v2205_v45 = vld [vmem:[%s13980_s9 + $0x968] sm:$0xff]  ;;  %v2216_v60 = vld [vmem:[%s13980_s9 + $0x9c0] sm:$0xff] }
 0x3c2   :  { %6126 = vmatpush1.bf16.msra.mxu0 %v6125_v35  ;;  %6894 = vmatpush1.bf16.msra.mxu1 %v6893_v24  ;;  %v2180_v35 = vld [vmem:[%s13980_s9 + $0x8a0] sm:$0xff]  ;;  %v2178_v24 = vld [vmem:[%s13980_s9 + $0x890] sm:$0xff]  ;;  %v6151_v44 = vpack.c.bf16 %v2205_v45, %v2201_v23 }
 0x3c3   :  { %6128 = vmatprep.subr.bf16.mxu0 %v6127_v11  ;;  %6896 = vmatprep.subr.bf16.mxu1 %v6895_v15  ;;  %v2185_v11 = vld [vmem:[%s13980_s9 + $0x8c8] sm:$0xff]  ;;  %v6141_v2 = vpack.c.bf16 %v2180_v35, %v2176_v7  ;;  %v6909_v8 = vpack.c.bf16 %v2182_v1, %v2178_v24  ;;  %v2211_v35 = vld [vmem:[%s13980_s9 + $0x998] sm:$0xff]  ;;  %v2224_v45 = vld [vmem:[%s13980_s9 + $0xa00] sm:$0xff] }
 0x3c4   :  { %v2189_v15 = vld [vmem:[%s13980_s9 + $0x8e8] sm:$0xff]  ;;  %v2215_v24 = vld [vmem:[%s13980_s9 + $0x9b8] sm:$0xff] }
 0x3c5   :  { %v6143_v20 = vpack.c.bf16 %v2189_v15, %v2185_v11  ;;  %v2213_v7 = vld [vmem:[%s13980_s9 + $0x9a8] sm:$0xff]  ;;  %v2208_v15 = vld [vmem:[%s13980_s9 + $0x980] sm:$0xff] }
 0x3c6   :  { %6130 = vmatpush1.bf16.msra.mxu0 %v6129_v49  ;;  %6898 = vmatpush1.bf16.msra.mxu1 %v6897_v50  ;;  %v2188_v49 = vld [vmem:[%s13980_s9 + $0x8e0] sm:$0xff]  ;;  %v2186_v50 = vld [vmem:[%s13980_s9 + $0x8d0] sm:$0xff] }
 0x3c7   :  { %6132 = vmatprep.subr.bf16.mxu0 %v6131_v19  ;;  %6900 = vmatprep.subr.bf16.mxu1 %v6899_v25  ;;  %v6911_v19 = vpack.c.bf16 %v2191_v55, %v2187_v32  ;;  %v2190_v25 = vld [vmem:[%s13980_s9 + $0x8f0] sm:$0xff]  ;;  %v6145_v13 = vpack.c.bf16 %v2188_v49, %v2184_v22  ;;  %v2212_v32 = vld [vmem:[%s13980_s9 + $0x9a0] sm:$0xff]  ;;  %v2221_v22 = vld [vmem:[%s13980_s9 + $0x9e8] sm:$0xff] }
 0x3c8   :  { %v6913_v9 = vpack.c.bf16 %v2190_v25, %v2186_v50  ;;  %v2210_v55 = vld [vmem:[%s13980_s9 + $0x990] sm:$0xff]  ;;  %v2219_v49 = vld [vmem:[%s13980_s9 + $0x9d8] sm:$0xff] }
 0x3c9   :  { %3598 = vmatmul.mubr.f32.vlgmr.msra.gmra.mrb[24].mxu0 %v1882_v40  ;;  %4450 = vmatmul.mubr.f32.vlgmr.msra.gmra.mrb[72].mxu1 %v1882_v40  ;;  %v2194_v40 = vld [vmem:[%s13980_s9 + $0x910] sm:$0xff]  ;;  %v2223_v50 = vld [vmem:[%s13980_s9 + $0x9f8] sm:$0xff] }
 0x3ca   :  { %6134 = vmatpush1.bf16.msra.mxu0 %v6133_v17  ;;  %3668 = vmatprep.mubr.f32.mxu0 %v1885_v34  ;;  %v2196_v17 = vld [vmem:[%s13980_s9 + $0x920] sm:$0xff]  ;;  %v6917_v53 = vpack.c.bf16 %v2198_v43, %v2194_v40  ;;  %v2231_v40 = vld [vmem:[%s13980_s9 + $0xa38] sm:$0xff] }
 0x3cb   :  { %6902 = vmatpush1.bf16.msra.mxu1 %v6901_v27  ;;  %4520 = vmatprep.mubr.f32.mxu1 %v1885_v34  ;;  %v6915_v27 = vpack.c.bf16 %v2199_v4, %v2195_v61  ;;  %v2203_v34 = vld [vmem:[%s13980_s9 + $0x958] sm:$0xff]  ;;  %v2220_v61 = vld [vmem:[%s13980_s9 + $0x9e0] sm:$0xff]  ;;  %v2218_v4 = vld [vmem:[%s13980_s9 + $0x9d0] sm:$0xff] }
 0x3cc   :  { %6136 = vmatprep.subr.bf16.mxu0 %v6135_v38  ;;  %6904 = vmatprep.subr.bf16.mxu1 %v6903_v39  ;;  %v2207_v38 = vld [vmem:[%s13980_s9 + $0x978] sm:$0xff]  ;;  %v6149_v39 = vpack.c.bf16 %v2196_v17, %v2192_v14  ;;  %v2229_v14 = vld [vmem:[%s13980_s9 + $0xa28] sm:$0xff] }
 0x3cd   :  { %v2227_v17 = vld [vmem:[%s13980_s9 + $0xa18] sm:$0xff] }
 0x3ce   :  { %6138 = vmatpush1.bf16.msra.mxu0 %v6137_v0  ;;  %v6919_v0 = vpack.c.bf16 %v2207_v38, %v2203_v34  ;;  %v2228_v34 = vld [vmem:[%s13980_s9 + $0xa20] sm:$0xff]  ;;  %v2226_v38 = vld [vmem:[%s13980_s9 + $0xa10] sm:$0xff] }
 0x3cf   :  { %6906 = vmatpush1.bf16.msra.mxu1 %v6905_v21  ;;  %6140 = vmatprep.subr.bf16.mxu0 %v6139_v63  ;;  %v2206_v21 = vld [vmem:[%s13980_s9 + $0x970] sm:$0xff]  ;;  %v2209_v63 = vld [vmem:[%s13980_s9 + $0x988] sm:$0xff] }
 0x3d0   :  { %6908 = vmatprep.subr.bf16.mxu1 %v6907_v46  ;;  %v6153_v46 = vpack.c.bf16 %v2204_v51, %v2200_v48  ;;  %v6921_v1 = vpack.c.bf16 %v2206_v21, %v2202_v10  ;;  %v6155_v11 = vpack.c.bf16 %v2213_v7, %v2209_v63  ;;  %v2237_v48 = vld [vmem:[%s13980_s9 + $0xa68] sm:$0xff]  ;;  %v2235_v51 = vld [vmem:[%s13980_s9 + $0xa58] sm:$0xff]  ;;  %v2232_v7 = vld [vmem:[%s13980_s9 + $0xa40] sm:$0xff] }
 0x3d1   :  { %v2239_v10 = vld [vmem:[%s13980_s9 + $0xa78] sm:$0xff] }
 0x3d2   :  { %6142 = vmatpush1.bf16.msra.mxu0 %v6141_v2  ;;  %v6923_v2 = vpack.c.bf16 %v2215_v24, %v2211_v35  ;;  %v2236_v35 = vld [vmem:[%s13980_s9 + $0xa60] sm:$0xff]  ;;  %v2234_v24 = vld [vmem:[%s13980_s9 + $0xa50] sm:$0xff] }
 0x3d3   :  { %6910 = vmatpush1.bf16.msra.mxu1 %v6909_v8  ;;  %6144 = vmatprep.subr.bf16.mxu0 %v6143_v20  ;;  %v2214_v8 = vld [vmem:[%s13980_s9 + $0x9b0] sm:$0xff]  ;;  %v2217_v20 = vld [vmem:[%s13980_s9 + $0x9c8] sm:$0xff] }
 0x3d4   :  { %6912 = vmatprep.subr.bf16.mxu1 %v6911_v19  ;;  %v6157_v19 = vpack.c.bf16 %v2212_v32, %v2208_v15  ;;  %v6925_v25 = vpack.c.bf16 %v2214_v8, %v2210_v55  ;;  %v6159_v52 = vpack.c.bf16 %v2221_v22, %v2217_v20  ;;  %v2245_v15 = vld [vmem:[%s13980_s9 + $0xaa8] sm:$0xff]  ;;  %v2243_v32 = vld [vmem:[%s13980_s9 + $0xa98] sm:$0xff]  ;;  %v2240_v22 = vld [vmem:[%s13980_s9 + $0xa80] sm:$0xff] }
 0x3d5   :  { %v2247_v55 = vld [vmem:[%s13980_s9 + $0xab8] sm:$0xff] }
 0x3d6   :  { %6146 = vmatpush1.bf16.msra.mxu0 %v6145_v13  ;;  %v6927_v13 = vpack.c.bf16 %v2223_v50, %v2219_v49  ;;  %v2244_v49 = vld [vmem:[%s13980_s9 + $0xaa0] sm:$0xff]  ;;  %v2242_v50 = vld [vmem:[%s13980_s9 + $0xa90] sm:$0xff] }
 0x3d7   :  { %6914 = vmatpush1.bf16.msra.mxu1 %v6913_v9  ;;  %6148 = vmatprep.subr.bf16.mxu0 %v6147_v16  ;;  %v2222_v9 = vld [vmem:[%s13980_s9 + $0x9f0] sm:$0xff]  ;;  %v2225_v16 = vld [vmem:[%s13980_s9 + $0xa08] sm:$0xff] }
 0x3d8   :  { %6916 = vmatprep.subr.bf16.mxu1 %v6915_v27  ;;  %v6161_v27 = vpack.c.bf16 %v2220_v61, %v2216_v60  ;;  %v6929_v43 = vpack.c.bf16 %v2222_v9, %v2218_v4  ;;  %v6163_v23 = vpack.c.bf16 %v2229_v14, %v2225_v16  ;;  %v2253_v60 = vld [vmem:[%s13980_s9 + $0xae8] sm:$0xff]  ;;  %v2251_v61 = vld [vmem:[%s13980_s9 + $0xad8] sm:$0xff]  ;;  %v2248_v14 = vld [vmem:[%s13980_s9 + $0xac0] sm:$0xff] }
 0x3d9   :  { %v2255_v4 = vld [vmem:[%s13980_s9 + $0xaf8] sm:$0xff] }
 0x3da   :  { %6150 = vmatpush1.bf16.msra.mxu0 %v6149_v39  ;;  %v6931_v39 = vpack.c.bf16 %v2231_v40, %v2227_v17  ;;  %v2252_v17 = vld [vmem:[%s13980_s9 + $0xae0] sm:$0xff]  ;;  %v2250_v40 = vld [vmem:[%s13980_s9 + $0xad0] sm:$0xff] }
 0x3db   :  { %6918 = vmatpush1.bf16.msra.mxu1 %v6917_v53  ;;  %6152 = vmatprep.subr.bf16.mxu0 %v6151_v44  ;;  %v2230_v53 = vld [vmem:[%s13980_s9 + $0xa30] sm:$0xff]  ;;  %v2233_v44 = vld [vmem:[%s13980_s9 + $0xa48] sm:$0xff] }
 0x3dc   :  { %6920 = vmatprep.subr.bf16.mxu1 %v6919_v0  ;;  %v6165_v0 = vpack.c.bf16 %v2228_v34, %v2224_v45  ;;  %v6933_v21 = vpack.c.bf16 %v2230_v53, %v2226_v38  ;;  %v6167_v63 = vpack.c.bf16 %v2237_v48, %v2233_v44  ;;  %v2261_v45 = vld [vmem:[%s13980_s9 + $0xb28] sm:$0xff]  ;;  %v2259_v34 = vld [vmem:[%s13980_s9 + $0xb18] sm:$0xff]  ;;  %v2256_v48 = vld [vmem:[%s13980_s9 + $0xb00] sm:$0xff] }
 0x3dd   :  { %v2263_v38 = vld [vmem:[%s13980_s9 + $0xb38] sm:$0xff] }
 0x3de   :  { %6154 = vmatpush1.bf16.msra.mxu0 %v6153_v46  ;;  %v6935_v46 = vpack.c.bf16 %v2239_v10, %v2235_v51  ;;  %v2260_v51 = vld [vmem:[%s13980_s9 + $0xb20] sm:$0xff]  ;;  %v2258_v10 = vld [vmem:[%s13980_s9 + $0xb10] sm:$0xff] }
 0x3df   :  { %6922 = vmatpush1.bf16.msra.mxu1 %v6921_v1  ;;  %6156 = vmatprep.subr.bf16.mxu0 %v6155_v11  ;;  %v2238_v1 = vld [vmem:[%s13980_s9 + $0xa70] sm:$0xff]  ;;  %v2241_v11 = vld [vmem:[%s13980_s9 + $0xa88] sm:$0xff] }
 0x3e0   :  { %6924 = vmatprep.subr.bf16.mxu1 %v6923_v2  ;;  %v6169_v2 = vpack.c.bf16 %v2236_v35, %v2232_v7  ;;  %v6937_v8 = vpack.c.bf16 %v2238_v1, %v2234_v24  ;;  %v6171_v20 = vpack.c.bf16 %v2245_v15, %v2241_v11  ;;  %v2269_v7 = vld [vmem:[%s13980_s9 + $0xb68] sm:$0xff]  ;;  %v2267_v35 = vld [vmem:[%s13980_s9 + $0xb58] sm:$0xff]  ;;  %v2264_v15 = vld [vmem:[%s13980_s9 + $0xb40] sm:$0xff] }
 0x3e1   :  { %v2271_v24 = vld [vmem:[%s13980_s9 + $0xb78] sm:$0xff] }
 0x3e2   :  { %6158 = vmatpush1.bf16.msra.mxu0 %v6157_v19  ;;  %v6939_v19 = vpack.c.bf16 %v2247_v55, %v2243_v32  ;;  %v2268_v32 = vld [vmem:[%s13980_s9 + $0xb60] sm:$0xff]  ;;  %v2266_v55 = vld [vmem:[%s13980_s9 + $0xb50] sm:$0xff] }
 0x3e3   :  { %6926 = vmatpush1.bf16.msra.mxu1 %v6925_v25  ;;  %6160 = vmatprep.subr.bf16.mxu0 %v6159_v52  ;;  %v2246_v25 = vld [vmem:[%s13980_s9 + $0xab0] sm:$0xff]  ;;  %v2249_v52 = vld [vmem:[%s13980_s9 + $0xac8] sm:$0xff] }
 0x3e4   :  { %6928 = vmatprep.subr.bf16.mxu1 %v6927_v13  ;;  %v6173_v13 = vpack.c.bf16 %v2244_v49, %v2240_v22  ;;  %v6941_v9 = vpack.c.bf16 %v2246_v25, %v2242_v50  ;;  %v6175_v16 = vpack.c.bf16 %v2253_v60, %v2249_v52  ;;  %v2277_v22 = vld [vmem:[%s13980_s9 + $0xba8] sm:$0xff]  ;;  %v2275_v49 = vld [vmem:[%s13980_s9 + $0xb98] sm:$0xff]  ;;  %v2272_v60 = vld [vmem:[%s13980_s9 + $0xb80] sm:$0xff] }
 0x3e5   :  { %v2279_v50 = vld [vmem:[%s13980_s9 + $0xbb8] sm:$0xff] }
 0x3e6   :  { %6162 = vmatpush1.bf16.msra.mxu0 %v6161_v27  ;;  %v6943_v27 = vpack.c.bf16 %v2255_v4, %v2251_v61  ;;  %v2276_v61 = vld [vmem:[%s13980_s9 + $0xba0] sm:$0xff]  ;;  %v2274_v4 = vld [vmem:[%s13980_s9 + $0xb90] sm:$0xff] }
 0x3e7   :  { %6930 = vmatpush1.bf16.msra.mxu1 %v6929_v43  ;;  %6164 = vmatprep.subr.bf16.mxu0 %v6163_v23  ;;  %v2254_v43 = vld [vmem:[%s13980_s9 + $0xaf0] sm:$0xff]  ;;  %v2257_v23 = vld [vmem:[%s13980_s9 + $0xb08] sm:$0xff] }
 0x3e8   :  { %6932 = vmatprep.subr.bf16.mxu1 %v6931_v39  ;;  %v6177_v39 = vpack.c.bf16 %v2252_v17, %v2248_v14  ;;  %v6945_v53 = vpack.c.bf16 %v2254_v43, %v2250_v40  ;;  %v6179_v44 = vpack.c.bf16 %v2261_v45, %v2257_v23  ;;  %v2285_v14 = vld [vmem:[%s13980_s9 + $0xbe8] sm:$0xff]  ;;  %v2283_v17 = vld [vmem:[%s13980_s9 + $0xbd8] sm:$0xff]  ;;  %v2280_v45 = vld [vmem:[%s13980_s9 + $0xbc0] sm:$0xff] }
 0x3e9   :  { %v2287_v40 = vld [vmem:[%s13980_s9 + $0xbf8] sm:$0xff] }
 0x3ea   :  { %6166 = vmatpush1.bf16.msra.mxu0 %v6165_v0  ;;  %v6947_v0 = vpack.c.bf16 %v2263_v38, %v2259_v34  ;;  %v2284_v34 = vld [vmem:[%s13980_s9 + $0xbe0] sm:$0xff]  ;;  %v2282_v38 = vld [vmem:[%s13980_s9 + $0xbd0] sm:$0xff] }
 0x3eb   :  { %6934 = vmatpush1.bf16.msra.mxu1 %v6933_v21  ;;  %6168 = vmatprep.subr.bf16.mxu0 %v6167_v63  ;;  %v2262_v21 = vld [vmem:[%s13980_s9 + $0xb30] sm:$0xff]  ;;  %v2265_v63 = vld [vmem:[%s13980_s9 + $0xb48] sm:$0xff] }
 0x3ec   :  { %6936 = vmatprep.subr.bf16.mxu1 %v6935_v46  ;;  %v6181_v46 = vpack.c.bf16 %v2260_v51, %v2256_v48  ;;  %v6949_v1 = vpack.c.bf16 %v2262_v21, %v2258_v10  ;;  %v6183_v11 = vpack.c.bf16 %v2269_v7, %v2265_v63  ;;  %v2293_v48 = vld [vmem:[%s13980_s9 + $0xc28] sm:$0xff]  ;;  %v2291_v51 = vld [vmem:[%s13980_s9 + $0xc18] sm:$0xff]  ;;  %v2288_v7 = vld [vmem:[%s13980_s9 + $0xc00] sm:$0xff] }
 0x3ed   :  { %v2295_v10 = vld [vmem:[%s13980_s9 + $0xc38] sm:$0xff] }
 0x3ee   :  { %6170 = vmatpush1.bf16.msra.mxu0 %v6169_v2  ;;  %v6951_v2 = vpack.c.bf16 %v2271_v24, %v2267_v35  ;;  %v2292_v35 = vld [vmem:[%s13980_s9 + $0xc20] sm:$0xff]  ;;  %v6963_v24 = vpack.c.bf16 %v2295_v10, %v2291_v51  ;;  %v2314_v10 = vld [vmem:[%s13980_s9 + $0xcd0] sm:$0xff] }
 0x3ef   :  { %6938 = vmatpush1.bf16.msra.mxu1 %v6937_v8  ;;  %6172 = vmatprep.subr.bf16.mxu0 %v6171_v20  ;;  %v2270_v8 = vld [vmem:[%s13980_s9 + $0xb70] sm:$0xff]  ;;  %v2273_v20 = vld [vmem:[%s13980_s9 + $0xb88] sm:$0xff]  ;;  %v2316_v51 = vld [vmem:[%s13980_s9 + $0xce0] sm:$0xff] }
 0x3f0   :  { %6940 = vmatprep.subr.bf16.mxu1 %v6939_v19  ;;  %v6185_v19 = vpack.c.bf16 %v2268_v32, %v2264_v15  ;;  %v6953_v25 = vpack.c.bf16 %v2270_v8, %v2266_v55  ;;  %v6187_v52 = vpack.c.bf16 %v2277_v22, %v2273_v20  ;;  %v2301_v15 = vld [vmem:[%s13980_s9 + $0xc68] sm:$0xff]  ;;  %v6197_v32 = vpack.c.bf16 %v2292_v35, %v2288_v7  ;;  %v2299_v55 = vld [vmem:[%s13980_s9 + $0xc58] sm:$0xff]  ;;  %v2296_v22 = vld [vmem:[%s13980_s9 + $0xc40] sm:$0xff] }
 0x3f1   :  { %v1884_v8 = vmax.f32 %v9324_v62, 0.0  ;;  %v2302_v62 = vld [vmem:[%s13980_s9 + $0xc70] sm:$0xff]  ;;  %v2325_v7 = vld [vmem:[%s13980_s9 + $0xd28] sm:$0xff]  ;;  %v2323_v35 = vld [vmem:[%s13980_s9 + $0xd18] sm:$0xff] }
 0x3f2   :  { %6174 = vmatpush1.bf16.msra.mxu0 %v6173_v13  ;;  %v6955_v13 = vpack.c.bf16 %v2279_v50, %v2275_v49  ;;  %v2300_v49 = vld [vmem:[%s13980_s9 + $0xc60] sm:$0xff]  ;;  %v2298_v50 = vld [vmem:[%s13980_s9 + $0xc50] sm:$0xff] }
 0x3f3   :  { %6942 = vmatpush1.bf16.msra.mxu1 %v6941_v9  ;;  %6176 = vmatprep.subr.bf16.mxu0 %v6175_v16  ;;  %v2278_v9 = vld [vmem:[%s13980_s9 + $0xbb0] sm:$0xff]  ;;  %v2281_v16 = vld [vmem:[%s13980_s9 + $0xbc8] sm:$0xff] }
 0x3f4   :  { %6944 = vmatprep.subr.bf16.mxu1 %v6943_v27  ;;  %v6189_v27 = vpack.c.bf16 %v2276_v61, %v2272_v60  ;;  %v6957_v43 = vpack.c.bf16 %v2278_v9, %v2274_v4  ;;  %v6191_v23 = vpack.c.bf16 %v2285_v14, %v2281_v16  ;;  %v1887_v60 = vmax.f32 %v9366_v30, 0.0  ;;  %v2307_v4 = vld [vmem:[%s13980_s9 + $0xc98] sm:$0xff]  ;;  %v2304_v30 = vld [vmem:[%s13980_s9 + $0xc80] sm:$0xff] }
 0x3f5   :  { %v6201_v9 = vpack.c.bf16 %v2300_v49, %v2296_v22  ;;  %v6969_v16 = vpack.c.bf16 %v2302_v62, %v2298_v50  ;;  %v2333_v22 = vld [vmem:[%s13980_s9 + $0xd68] sm:$0xff]  ;;  %v2331_v49 = vld [vmem:[%s13980_s9 + $0xd58] sm:$0xff] }
 0x3f6   :  { %6178 = vmatpush1.bf16.msra.mxu0 %v6177_v39  ;;  %v6959_v39 = vpack.c.bf16 %v2287_v40, %v2283_v17  ;;  %v2308_v17 = vld [vmem:[%s13980_s9 + $0xca0] sm:$0xff]  ;;  %v2306_v40 = vld [vmem:[%s13980_s9 + $0xc90] sm:$0xff]  ;;  %v2335_v50 = vld [vmem:[%s13980_s9 + $0xd78] sm:$0xff] }
 0x3f7   :  { %6946 = vmatpush1.bf16.msra.mxu1 %v6945_v53  ;;  %6180 = vmatprep.subr.bf16.mxu0 %v6179_v44  ;;  %v2286_v53 = vld [vmem:[%s13980_s9 + $0xbf0] sm:$0xff]  ;;  %v2289_v44 = vld [vmem:[%s13980_s9 + $0xc08] sm:$0xff] }
 0x3f8   :  { %6948 = vmatprep.subr.bf16.mxu1 %v6947_v0  ;;  %v6193_v0 = vpack.c.bf16 %v2284_v34, %v2280_v45  ;;  %v6961_v21 = vpack.c.bf16 %v2286_v53, %v2282_v38  ;;  %v6195_v63 = vpack.c.bf16 %v2293_v48, %v2289_v44  ;;  %v2317_v45 = vld [vmem:[%s13980_s9 + $0xce8] sm:$0xff]  ;;  %v2315_v34 = vld [vmem:[%s13980_s9 + $0xcd8] sm:$0xff]  ;;  %v2312_v48 = vld [vmem:[%s13980_s9 + $0xcc0] sm:$0xff] }
 0x3f9   :  { %v2319_v38 = vld [vmem:[%s13980_s9 + $0xcf8] sm:$0xff] }
 0x3fa   :  { %6182 = vmatpush1.bf16.msra.mxu0 %v6181_v46  ;;  %v2290_v46 = vld [vmem:[%s13980_s9 + $0xc10] sm:$0xff] }
 0x3fb   :  { %6950 = vmatpush1.bf16.msra.mxu1 %v6949_v1  ;;  %6184 = vmatprep.subr.bf16.mxu0 %v6183_v11  ;;  %v2294_v1 = vld [vmem:[%s13980_s9 + $0xc30] sm:$0xff]  ;;  %v2297_v11 = vld [vmem:[%s13980_s9 + $0xc48] sm:$0xff] }
 0x3fc   :  { %6952 = vmatprep.subr.bf16.mxu1 %v6951_v2  ;;  %v2303_v2 = vld [vmem:[%s13980_s9 + $0xc78] sm:$0xff]  ;;  %v6965_v20 = vpack.c.bf16 %v2294_v1, %v2290_v46  ;;  %v6209_v46 = vpack.c.bf16 %v2316_v51, %v2312_v48 }
 0x3fd   :  { %v6967_v61 = vpack.c.bf16 %v2303_v2, %v2299_v55  ;;  %v2322_v55 = vld [vmem:[%s13980_s9 + $0xd10] sm:$0xff]  ;;  %v2351_v48 = vld [vmem:[%s13980_s9 + $0xdf8] sm:$0xff] }
 0x3fe   :  { %6186 = vmatpush1.bf16.msra.mxu0 %v6185_v19  ;;  %v6199_v19 = vpack.c.bf16 %v2301_v15, %v2297_v11  ;;  %v2320_v15 = vld [vmem:[%s13980_s9 + $0xd00] sm:$0xff] }
 0x3ff   :  { %6954 = vmatpush1.bf16.msra.mxu1 %v6953_v25  ;;  %6188 = vmatprep.subr.bf16.mxu0 %v6187_v52  ;;  %v2305_v25 = vld [vmem:[%s13980_s9 + $0xc88] sm:$0xff] }
 0x400   :  { %6956 = vmatprep.subr.bf16.mxu1 %v6955_v13  ;;  %v2309_v52 = vld [vmem:[%s13980_s9 + $0xca8] sm:$0xff]  ;;  %v2311_v13 = vld [vmem:[%s13980_s9 + $0xcb8] sm:$0xff] }
 0x401   :  { %v6203_v14 = vpack.c.bf16 %v2309_v52, %v2305_v25  ;;  %v2328_v52 = vld [vmem:[%s13980_s9 + $0xd40] sm:$0xff] }
 0x402   :  { %6190 = vmatpush1.bf16.msra.mxu0 %v6189_v27  ;;  %v6971_v27 = vpack.c.bf16 %v2311_v13, %v2307_v4  ;;  %v6983_v4 = vpack.c.bf16 %v2335_v50, %v2331_v49  ;;  %v2334_v13 = vld [vmem:[%s13980_s9 + $0xd70] sm:$0xff] }
 0x403   :  { %6958 = vmatpush1.bf16.msra.mxu1 %v6957_v43  ;;  %6192 = vmatprep.subr.bf16.mxu0 %v6191_v23  ;;  %v2310_v43 = vld [vmem:[%s13980_s9 + $0xcb0] sm:$0xff]  ;;  %v2313_v23 = vld [vmem:[%s13980_s9 + $0xcc8] sm:$0xff] }
 0x404   :  { %6960 = vmatprep.subr.bf16.mxu1 %v6959_v39  ;;  %v6205_v39 = vpack.c.bf16 %v2308_v17, %v2304_v30  ;;  %v6973_v53 = vpack.c.bf16 %v2310_v43, %v2306_v40  ;;  %v6207_v44 = vpack.c.bf16 %v2317_v45, %v2313_v23  ;;  %v2343_v30 = vld [vmem:[%s13980_s9 + $0xdb8] sm:$0xff]  ;;  %v2336_v43 = vld [vmem:[%s13980_s9 + $0xd80] sm:$0xff]  ;;  %v2338_v45 = vld [vmem:[%s13980_s9 + $0xd90] sm:$0xff] }
 0x405   :  { %v2340_v23 = vld [vmem:[%s13980_s9 + $0xda0] sm:$0xff]  ;;  %v2358_v50 = vld [vmem:[%s13980_s9 + $0xe30] sm:$0xff] }
 0x406   :  { %6194 = vmatpush1.bf16.msra.mxu0 %v6193_v0  ;;  %v6975_v0 = vpack.c.bf16 %v2319_v38, %v2315_v34  ;;  %v2342_v38 = vld [vmem:[%s13980_s9 + $0xdb0] sm:$0xff]  ;;  %v6221_v51 = vpack.c.bf16 %v2340_v23, %v2336_v43  ;;  %v2375_v43 = vld [vmem:[%s13980_s9 + $0xeb8] sm:$0xff] }
 0x407   :  { %6962 = vmatpush1.bf16.msra.mxu1 %v6961_v21  ;;  %6196 = vmatprep.subr.bf16.mxu0 %v6195_v63  ;;  %v2318_v21 = vld [vmem:[%s13980_s9 + $0xcf0] sm:$0xff]  ;;  %v2321_v63 = vld [vmem:[%s13980_s9 + $0xd08] sm:$0xff] }
 0x408   :  { %6964 = vmatprep.subr.bf16.mxu1 %v6963_v24  ;;  %v2327_v24 = vld [vmem:[%s13980_s9 + $0xd38] sm:$0xff]  ;;  %v6977_v1 = vpack.c.bf16 %v2318_v21, %v2314_v10  ;;  %v6211_v11 = vpack.c.bf16 %v2325_v7, %v2321_v63  ;;  %v6989_v10 = vpack.c.bf16 %v2342_v38, %v2338_v45  ;;  %v2344_v21 = vld [vmem:[%s13980_s9 + $0xdc0] sm:$0xff]  ;;  %v2346_v7 = vld [vmem:[%s13980_s9 + $0xdd0] sm:$0xff] }
 0x409   :  { %3669 = vmatmul.mubr.f32.vlgmr.msra.gmra.mrb[24].mxu0 %v1884_v8  ;;  %v6979_v2 = vpack.c.bf16 %v2327_v24, %v2323_v35  ;;  %v2348_v63 = vld [vmem:[%s13980_s9 + $0xde0] sm:$0xff]  ;;  %v2350_v24 = vld [vmem:[%s13980_s9 + $0xdf0] sm:$0xff] }
 0x40a   :  { %4521 = vmatmul.mubr.f32.vlgmr.msra.gmra.mrb[72].mxu1 %v1884_v8  ;;  %6198 = vmatpush1.bf16.msra.mxu0 %v6197_v32  ;;  %v2324_v32 = vld [vmem:[%s13980_s9 + $0xd20] sm:$0xff]  ;;  %v2326_v8 = vld [vmem:[%s13980_s9 + $0xd30] sm:$0xff] }
 0x40b   :  { %3739 = vmatprep.mubr.f32.mxu0 %v1887_v60  ;;  %6966 = vmatpush1.bf16.msra.mxu1 %v6965_v20  ;;  %v2329_v20 = vld [vmem:[%s13980_s9 + $0xd48] sm:$0xff]  ;;  %v6981_v62 = vpack.c.bf16 %v2326_v8, %v2322_v55  ;;  %v6993_v55 = vpack.c.bf16 %v2350_v24, %v2346_v7  ;;  %v2352_v8 = vld [vmem:[%s13980_s9 + $0xe00] sm:$0xff] }
 0x40c   :  { %4591 = vmatprep.mubr.f32.mxu1 %v1887_v60  ;;  %6200 = vmatprep.subr.bf16.mxu0 %v6199_v19  ;;  %v6213_v19 = vpack.c.bf16 %v2324_v32, %v2320_v15  ;;  %v6215_v25 = vpack.c.bf16 %v2333_v22, %v2329_v20  ;;  %v2332_v60 = vld [vmem:[%s13980_s9 + $0xd60] sm:$0xff]  ;;  %v2359_v15 = vld [vmem:[%s13980_s9 + $0xe38] sm:$0xff]  ;;  %v6225_v32 = vpack.c.bf16 %v2348_v63, %v2344_v21  ;;  %v2354_v22 = vld [vmem:[%s13980_s9 + $0xe10] sm:$0xff] }
 0x40d   :  { %6968 = vmatprep.subr.bf16.mxu1 %v6967_v61  ;;  %v2330_v61 = vld [vmem:[%s13980_s9 + $0xd50] sm:$0xff]  ;;  %v6217_v17 = vpack.c.bf16 %v2332_v60, %v2328_v52  ;;  %v2356_v20 = vld [vmem:[%s13980_s9 + $0xe20] sm:$0xff]  ;;  %v2367_v52 = vld [vmem:[%s13980_s9 + $0xe78] sm:$0xff] }
 0x40e   :  { %6202 = vmatpush1.bf16.msra.mxu0 %v6201_v9  ;;  %v2337_v9 = vld [vmem:[%s13980_s9 + $0xd88] sm:$0xff]  ;;  %v6985_v40 = vpack.c.bf16 %v2334_v13, %v2330_v61  ;;  %v6229_v60 = vpack.c.bf16 %v2356_v20, %v2352_v8  ;;  %v6997_v61 = vpack.c.bf16 %v2358_v50, %v2354_v22  ;;  %v2360_v13 = vld [vmem:[%s13980_s9 + $0xe40] sm:$0xff]  ;;  %v2383_v21 = vld [vmem:[%s13980_s9 + $0xef8] sm:$0xff] }
 0x40f   :  { %6970 = vmatpush1.bf16.msra.mxu1 %v6969_v16  ;;  %6204 = vmatprep.subr.bf16.mxu0 %v6203_v14  ;;  %v2341_v16 = vld [vmem:[%s13980_s9 + $0xda8] sm:$0xff]  ;;  %v2339_v14 = vld [vmem:[%s13980_s9 + $0xd98] sm:$0xff]  ;;  %v2368_v38 = vld [vmem:[%s13980_s9 + $0xe80] sm:$0xff] }
 0x410   :  { %6972 = vmatprep.subr.bf16.mxu1 %v6971_v27  ;;  %v6219_v27 = vpack.c.bf16 %v2341_v16, %v2337_v9  ;;  %v6987_v34 = vpack.c.bf16 %v2343_v30, %v2339_v14  ;;  %v2364_v9 = vld [vmem:[%s13980_s9 + $0xe60] sm:$0xff]  ;;  %v2362_v16 = vld [vmem:[%s13980_s9 + $0xe50] sm:$0xff]  ;;  %v2391_v8 = vld [vmem:[%s13980_s9 + $0xf38] sm:$0xff] }
 0x411   :  { %v2366_v30 = vld [vmem:[%s13980_s9 + $0xe70] sm:$0xff]  ;;  %v6233_v23 = vpack.c.bf16 %v2364_v9, %v2360_v13  ;;  %v2376_v24 = vld [vmem:[%s13980_s9 + $0xec0] sm:$0xff]  ;;  %v2399_v13 = vld [vmem:[%s13980_s9 + $0xf78] sm:$0xff] }
 0x412   :  { %6206 = vmatpush1.bf16.msra.mxu0 %v6205_v39  ;;  %v2345_v39 = vld [vmem:[%s13980_s9 + $0xdc8] sm:$0xff]  ;;  %v7001_v45 = vpack.c.bf16 %v2366_v30, %v2362_v16  ;;  %v2384_v50 = vld [vmem:[%s13980_s9 + $0xf00] sm:$0xff] }
 0x413   :  { %6974 = vmatpush1.bf16.msra.mxu1 %v6973_v53  ;;  %6208 = vmatprep.subr.bf16.mxu0 %v6207_v44  ;;  %v2349_v53 = vld [vmem:[%s13980_s9 + $0xde8] sm:$0xff]  ;;  %v2347_v44 = vld [vmem:[%s13980_s9 + $0xdd8] sm:$0xff]  ;;  %v2392_v30 = vld [vmem:[%s13980_s9 + $0xf40] sm:$0xff] }
 0x414   :  { %6976 = vmatprep.subr.bf16.mxu1 %v6975_v0  ;;  %v6223_v0 = vpack.c.bf16 %v2349_v53, %v2345_v39  ;;  %v6991_v35 = vpack.c.bf16 %v2351_v48, %v2347_v44  ;;  %v2372_v39 = vld [vmem:[%s13980_s9 + $0xea0] sm:$0xff]  ;;  %v2370_v53 = vld [vmem:[%s13980_s9 + $0xe90] sm:$0xff] }
 0x415   :  { %v2374_v48 = vld [vmem:[%s13980_s9 + $0xeb0] sm:$0xff]  ;;  %v6237_v63 = vpack.c.bf16 %v2372_v39, %v2368_v38  ;;  %v2407_v38 = vld [vmem:[%s13980_s9 + $0xfb8] sm:$0xff] }
 0x416   :  { %6210 = vmatpush1.bf16.msra.mxu0 %v6209_v46  ;;  %v2353_v46 = vld [vmem:[%s13980_s9 + $0xe08] sm:$0xff]  ;;  %v7005_v7 = vpack.c.bf16 %v2374_v48, %v2370_v53  ;;  %v2400_v48 = vld [vmem:[%s13980_s9 + $0xf80] sm:$0xff] }
 0x417   :  { %6978 = vmatpush1.bf16.msra.mxu1 %v6977_v1  ;;  %6212 = vmatprep.subr.bf16.mxu0 %v6211_v11  ;;  %v2357_v1 = vld [vmem:[%s13980_s9 + $0xe28] sm:$0xff]  ;;  %v2355_v11 = vld [vmem:[%s13980_s9 + $0xe18] sm:$0xff] }
 0x418   :  { %6980 = vmatprep.subr.bf16.mxu1 %v6979_v2  ;;  %v6227_v2 = vpack.c.bf16 %v2357_v1, %v2353_v46  ;;  %v6995_v49 = vpack.c.bf16 %v2359_v15, %v2355_v11  ;;  %v2380_v46 = vld [vmem:[%s13980_s9 + $0xee0] sm:$0xff]  ;;  %v2378_v1 = vld [vmem:[%s13980_s9 + $0xed0] sm:$0xff] }
 0x419   :  { %v2382_v15 = vld [vmem:[%s13980_s9 + $0xef0] sm:$0xff]  ;;  %v6241_v20 = vpack.c.bf16 %v2380_v46, %v2376_v24  ;;  %v2415_v24 = vld [vmem:[%s13980_s9 + $0xff8] sm:$0xff] }
 0x41a   :  { %6214 = vmatpush1.bf16.msra.mxu0 %v6213_v19  ;;  %v2361_v19 = vld [vmem:[%s13980_s9 + $0xe48] sm:$0xff]  ;;  %v7009_v22 = vpack.c.bf16 %v2382_v15, %v2378_v1  ;;  %v2408_v15 = vld [vmem:[%s13980_s9 + $0xfc0] sm:$0xff] }
 0x41b   :  { %6982 = vmatpush1.bf16.msra.mxu1 %v6981_v62  ;;  %6216 = vmatprep.subr.bf16.mxu0 %v6215_v25  ;;  %v2365_v62 = vld [vmem:[%s13980_s9 + $0xe68] sm:$0xff]  ;;  %v2363_v25 = vld [vmem:[%s13980_s9 + $0xe58] sm:$0xff] }
 0x41c   :  { %6984 = vmatprep.subr.bf16.mxu1 %v6983_v4  ;;  %v6231_v4 = vpack.c.bf16 %v2365_v62, %v2361_v19  ;;  %v6999_v14 = vpack.c.bf16 %v2367_v52, %v2363_v25  ;;  %v2388_v19 = vld [vmem:[%s13980_s9 + $0xf20] sm:$0xff]  ;;  %v2386_v62 = vld [vmem:[%s13980_s9 + $0xf10] sm:$0xff] }
 0x41d   :  { %v2390_v52 = vld [vmem:[%s13980_s9 + $0xf30] sm:$0xff]  ;;  %v6245_v9 = vpack.c.bf16 %v2388_v19, %v2384_v50  ;;  %v2423_v50 = vld [vmem:[%s13980_s9 + $0x1038] sm:$0xff] }
 0x41e   :  { %6218 = vmatpush1.bf16.msra.mxu0 %v6217_v17  ;;  %v2369_v17 = vld [vmem:[%s13980_s9 + $0xe88] sm:$0xff]  ;;  %v7013_v16 = vpack.c.bf16 %v2390_v52, %v2386_v62  ;;  %v2416_v52 = vld [vmem:[%s13980_s9 + $0x1000] sm:$0xff] }
 0x41f   :  { %6986 = vmatpush1.bf16.msra.mxu1 %v6985_v40  ;;  %6220 = vmatprep.subr.bf16.mxu0 %v6219_v27  ;;  %v2373_v40 = vld [vmem:[%s13980_s9 + $0xea8] sm:$0xff]  ;;  %v2371_v27 = vld [vmem:[%s13980_s9 + $0xe98] sm:$0xff] }
 0x420   :  { %6988 = vmatprep.subr.bf16.mxu1 %v6987_v34  ;;  %v6235_v34 = vpack.c.bf16 %v2373_v40, %v2369_v17  ;;  %v7003_v44 = vpack.c.bf16 %v2375_v43, %v2371_v27  ;;  %v2396_v17 = vld [vmem:[%s13980_s9 + $0xf60] sm:$0xff]  ;;  %v2394_v40 = vld [vmem:[%s13980_s9 + $0xf50] sm:$0xff] }
 0x421   :  { %v2398_v43 = vld [vmem:[%s13980_s9 + $0xf70] sm:$0xff]  ;;  %v6249_v39 = vpack.c.bf16 %v2396_v17, %v2392_v30  ;;  %v2427_v30 = vld [vmem:[%s13980_s9 + $0x1058] sm:$0xff] }
 0x422   :  { %6222 = vmatpush1.bf16.msra.mxu0 %v6221_v51  ;;  %v2377_v51 = vld [vmem:[%s13980_s9 + $0xec8] sm:$0xff]  ;;  %v7017_v53 = vpack.c.bf16 %v2398_v43, %v2394_v40  ;;  %v2431_v17 = vld [vmem:[%s13980_s9 + $0x1078] sm:$0xff]  ;;  %v1886_v40 = vmax.f32 %v9354_v18, 0.0  ;;  %v2424_v43 = vld [vmem:[%s13980_s9 + $0x1040] sm:$0xff] }
 0x423   :  { %6990 = vmatpush1.bf16.msra.mxu1 %v6989_v10  ;;  %6224 = vmatprep.subr.bf16.mxu0 %v6223_v0  ;;  %v2381_v10 = vld [vmem:[%s13980_s9 + $0xee8] sm:$0xff]  ;;  %v2379_v0 = vld [vmem:[%s13980_s9 + $0xed8] sm:$0xff]  ;;  %v2430_v18 = vld [vmem:[%s13980_s9 + $0x1070] sm:$0xff] }
 0x424   :  { %6992 = vmatprep.subr.bf16.mxu1 %v6991_v35  ;;  %v6239_v35 = vpack.c.bf16 %v2381_v10, %v2377_v51  ;;  %v7007_v11 = vpack.c.bf16 %v2383_v21, %v2379_v0  ;;  %v2404_v51 = vld [vmem:[%s13980_s9 + $0xfa0] sm:$0xff]  ;;  %v2402_v10 = vld [vmem:[%s13980_s9 + $0xf90] sm:$0xff] }
 0x425   :  { %v2406_v21 = vld [vmem:[%s13980_s9 + $0xfb0] sm:$0xff]  ;;  %v6253_v46 = vpack.c.bf16 %v2404_v51, %v2400_v48  ;;  %v2435_v48 = vld [vmem:[%s13980_s9 + $0x1098] sm:$0xff] }
 0x426   :  { %6226 = vmatpush1.bf16.msra.mxu0 %v6225_v32  ;;  %v2385_v32 = vld [vmem:[%s13980_s9 + $0xf08] sm:$0xff]  ;;  %v7021_v1 = vpack.c.bf16 %v2406_v21, %v2402_v10  ;;  %v2439_v51 = vld [vmem:[%s13980_s9 + $0x10b8] sm:$0xff] }
 0x427   :  { %6994 = vmatpush1.bf16.msra.mxu1 %v6993_v55  ;;  %6228 = vmatprep.subr.bf16.mxu0 %v6227_v2  ;;  %v2389_v55 = vld [vmem:[%s13980_s9 + $0xf28] sm:$0xff]  ;;  %v2387_v2 = vld [vmem:[%s13980_s9 + $0xf18] sm:$0xff] }
 0x428   :  { %6996 = vmatprep.subr.bf16.mxu1 %v6995_v49  ;;  %v6243_v49 = vpack.c.bf16 %v2389_v55, %v2385_v32  ;;  %v7011_v25 = vpack.c.bf16 %v2391_v8, %v2387_v2  ;;  %v2412_v32 = vld [vmem:[%s13980_s9 + $0xfe0] sm:$0xff]  ;;  %v2410_v55 = vld [vmem:[%s13980_s9 + $0xfd0] sm:$0xff] }
 0x429   :  { %v2414_v8 = vld [vmem:[%s13980_s9 + $0xff0] sm:$0xff]  ;;  %v6257_v19 = vpack.c.bf16 %v2412_v32, %v2408_v15  ;;  %v2447_v15 = vld [vmem:[%s13980_s9 + $0x10f8] sm:$0xff] }
 0x42a   :  { %6230 = vmatpush1.bf16.msra.mxu0 %v6229_v60  ;;  %v2393_v60 = vld [vmem:[%s13980_s9 + $0xf48] sm:$0xff]  ;;  %v7025_v62 = vpack.c.bf16 %v2414_v8, %v2410_v55  ;;  %v2440_v8 = vld [vmem:[%s13980_s9 + $0x10c0] sm:$0xff] }
 0x42b   :  { %6998 = vmatpush1.bf16.msra.mxu1 %v6997_v61  ;;  %6232 = vmatprep.subr.bf16.mxu0 %v6231_v4  ;;  %v2397_v61 = vld [vmem:[%s13980_s9 + $0xf68] sm:$0xff]  ;;  %v2395_v4 = vld [vmem:[%s13980_s9 + $0xf58] sm:$0xff] }
 0x42c   :  { %7000 = vmatprep.subr.bf16.mxu1 %v6999_v14  ;;  %v6247_v14 = vpack.c.bf16 %v2397_v61, %v2393_v60  ;;  %v7015_v27 = vpack.c.bf16 %v2399_v13, %v2395_v4  ;;  %v2420_v60 = vld [vmem:[%s13980_s9 + $0x1020] sm:$0xff]  ;;  %v2418_v4 = vld [vmem:[%s13980_s9 + $0x1010] sm:$0xff] }
 0x42d   :  { %v2422_v13 = vld [vmem:[%s13980_s9 + $0x1030] sm:$0xff] }
 0x42e   :  { %6234 = vmatpush1.bf16.msra.mxu0 %v6233_v23  ;;  %v2401_v23 = vld [vmem:[%s13980_s9 + $0xf88] sm:$0xff] }
 0x42f   :  { %7002 = vmatpush1.bf16.msra.mxu1 %v7001_v45  ;;  %6236 = vmatprep.subr.bf16.mxu0 %v6235_v34  ;;  %v2405_v45 = vld [vmem:[%s13980_s9 + $0xfa8] sm:$0xff]  ;;  %v2403_v34 = vld [vmem:[%s13980_s9 + $0xf98] sm:$0xff] }
 0x430   :  { %7004 = vmatprep.subr.bf16.mxu1 %v7003_v44  ;;  %v6251_v44 = vpack.c.bf16 %v2405_v45, %v2401_v23  ;;  %v7019_v0 = vpack.c.bf16 %v2407_v38, %v2403_v34  ;;  %v2428_v23 = vld [vmem:[%s13980_s9 + $0x1060] sm:$0xff]  ;;  %v2426_v45 = vld [vmem:[%s13980_s9 + $0x1050] sm:$0xff]  ;;  %v2433_v38 = vld [vmem:[%s13980_s9 + $0x1088] sm:$0xff] }
 0x431   :  { %v6265_v10 = vpack.c.bf16 %v2428_v23, %v2424_v43  ;;  %v2463_v43 = vld [vmem:[%s13980_s9 + $0x1178] sm:$0xff] }
 0x432   :  { %6238 = vmatpush1.bf16.msra.mxu0 %v6237_v63  ;;  %v2409_v63 = vld [vmem:[%s13980_s9 + $0xfc8] sm:$0xff] }
 0x433   :  { %7006 = vmatpush1.bf16.msra.mxu1 %v7005_v7  ;;  %6240 = vmatprep.subr.bf16.mxu0 %v6239_v35  ;;  %v2413_v7 = vld [vmem:[%s13980_s9 + $0xfe8] sm:$0xff]  ;;  %v2411_v35 = vld [vmem:[%s13980_s9 + $0xfd8] sm:$0xff] }
 0x434   :  { %7008 = vmatprep.subr.bf16.mxu1 %v7007_v11  ;;  %v6255_v11 = vpack.c.bf16 %v2413_v7, %v2409_v63  ;;  %v7023_v2 = vpack.c.bf16 %v2415_v24, %v2411_v35  ;;  %v2436_v63 = vld [vmem:[%s13980_s9 + $0x10a0] sm:$0xff]  ;;  %v2434_v7 = vld [vmem:[%s13980_s9 + $0x1090] sm:$0xff]  ;;  %v7035_v35 = vpack.c.bf16 %v2439_v51, %v2435_v48  ;;  %v2465_v48 = vld [vmem:[%s13980_s9 + $0x1188] sm:$0xff] }
 0x435   :  { %v2438_v24 = vld [vmem:[%s13980_s9 + $0x10b0] sm:$0xff]  ;;  %v2469_v51 = vld [vmem:[%s13980_s9 + $0x11a8] sm:$0xff] }
 0x436   :  { %6242 = vmatpush1.bf16.msra.mxu0 %v6241_v20  ;;  %v2417_v20 = vld [vmem:[%s13980_s9 + $0x1008] sm:$0xff]  ;;  %v7037_v55 = vpack.c.bf16 %v2438_v24, %v2434_v7  ;;  %v2464_v7 = vld [vmem:[%s13980_s9 + $0x1180] sm:$0xff]  ;;  %v2466_v24 = vld [vmem:[%s13980_s9 + $0x1190] sm:$0xff] }
 0x437   :  { %7010 = vmatpush1.bf16.msra.mxu1 %v7009_v22  ;;  %6244 = vmatprep.subr.bf16.mxu0 %v6243_v49  ;;  %v2421_v22 = vld [vmem:[%s13980_s9 + $0x1028] sm:$0xff]  ;;  %v2419_v49 = vld [vmem:[%s13980_s9 + $0x1018] sm:$0xff] }
 0x438   :  { %7012 = vmatprep.subr.bf16.mxu1 %v7011_v25  ;;  %v6259_v25 = vpack.c.bf16 %v2421_v22, %v2417_v20  ;;  %v7027_v61 = vpack.c.bf16 %v2423_v50, %v2419_v49  ;;  %v2444_v20 = vld [vmem:[%s13980_s9 + $0x10e0] sm:$0xff]  ;;  %v2442_v22 = vld [vmem:[%s13980_s9 + $0x10d0] sm:$0xff] }
 0x439   :  { %v2446_v50 = vld [vmem:[%s13980_s9 + $0x10f0] sm:$0xff] }
 0x43a   :  { %6246 = vmatpush1.bf16.msra.mxu0 %v6245_v9  ;;  %v2425_v9 = vld [vmem:[%s13980_s9 + $0x1048] sm:$0xff] }
 0x43b   :  { %7014 = vmatpush1.bf16.msra.mxu1 %v7013_v16  ;;  %6248 = vmatprep.subr.bf16.mxu0 %v6247_v14  ;;  %v2429_v16 = vld [vmem:[%s13980_s9 + $0x1068] sm:$0xff]  ;;  %v6261_v14 = vpack.c.bf16 %v2420_v60, %v2416_v52  ;;  %v2455_v52 = vld [vmem:[%s13980_s9 + $0x1138] sm:$0xff]  ;;  %v6273_v60 = vpack.c.bf16 %v2444_v20, %v2440_v8 }
 0x43c   :  { %7016 = vmatprep.subr.bf16.mxu1 %v7015_v27  ;;  %v7029_v27 = vpack.c.bf16 %v2422_v13, %v2418_v4  ;;  %v6263_v34 = vpack.c.bf16 %v2429_v16, %v2425_v9  ;;  %v2448_v13 = vld [vmem:[%s13980_s9 + $0x1100] sm:$0xff]  ;;  %v2450_v16 = vld [vmem:[%s13980_s9 + $0x1110] sm:$0xff] }
 0x43d   :  { %v2452_v9 = vld [vmem:[%s13980_s9 + $0x1120] sm:$0xff] }
 0x43e   :  { %6250 = vmatpush1.bf16.msra.mxu0 %v6249_v39  ;;  %v2437_v39 = vld [vmem:[%s13980_s9 + $0x10a8] sm:$0xff]  ;;  %v6277_v23 = vpack.c.bf16 %v2452_v9, %v2448_v13 }
 0x43f   :  { %7018 = vmatpush1.bf16.msra.mxu1 %v7017_v53  ;;  %6252 = vmatprep.subr.bf16.mxu0 %v6251_v44  ;;  %v1889_v53 = vmax.f32 %v9396_v28, 0.0  ;;  %v7031_v44 = vpack.c.bf16 %v2431_v17, %v2427_v30  ;;  %v6267_v21 = vpack.c.bf16 %v2437_v39, %v2433_v38  ;;  %v2432_v28 = vld [vmem:[%s13980_s9 + $0x1080] sm:$0xff]  ;;  %v2454_v30 = vld [vmem:[%s13980_s9 + $0x1130] sm:$0xff]  ;;  %v2457_v17 = vld [vmem:[%s13980_s9 + $0x1148] sm:$0xff] }
 0x440   :  { %7020 = vmatprep.subr.bf16.mxu1 %v7019_v0  ;;  %v7033_v0 = vpack.c.bf16 %v2430_v18, %v2426_v45  ;;  %v6269_v32 = vpack.c.bf16 %v2436_v63, %v2432_v28  ;;  %v7045_v45 = vpack.c.bf16 %v2454_v30, %v2450_v16  ;;  %v2456_v18 = vld [vmem:[%s13980_s9 + $0x1140] sm:$0xff]  ;;  %v2458_v39 = vld [vmem:[%s13980_s9 + $0x1150] sm:$0xff]  ;;  %v6283_v63 = vpack.c.bf16 %v2469_v51, %v2465_v48 }
 0x441   :  { %v2460_v38 = vld [vmem:[%s13980_s9 + $0x1160] sm:$0xff]  ;;  %v2482_v30 = vld [vmem:[%s13980_s9 + $0x1210] sm:$0xff] }
 0x442   :  { %6254 = vmatpush1.bf16.msra.mxu0 %v6253_v46  ;;  %v2441_v46 = vld [vmem:[%s13980_s9 + $0x10c8] sm:$0xff]  ;;  %v2480_v16 = vld [vmem:[%s13980_s9 + $0x1200] sm:$0xff]  ;;  %v2494_v51 = vld [vmem:[%s13980_s9 + $0x1270] sm:$0xff] }
 0x443   :  { %7022 = vmatpush1.bf16.msra.mxu1 %v7021_v1  ;;  %6256 = vmatprep.subr.bf16.mxu0 %v6255_v11  ;;  %v2445_v1 = vld [vmem:[%s13980_s9 + $0x10e8] sm:$0xff]  ;;  %v2443_v11 = vld [vmem:[%s13980_s9 + $0x10d8] sm:$0xff] }
 0x444   :  { %7024 = vmatprep.subr.bf16.mxu1 %v7023_v2  ;;  %v6271_v2 = vpack.c.bf16 %v2445_v1, %v2441_v46  ;;  %v7039_v49 = vpack.c.bf16 %v2447_v15, %v2443_v11  ;;  %v2470_v1 = vld [vmem:[%s13980_s9 + $0x11b0] sm:$0xff]  ;;  %v2473_v11 = vld [vmem:[%s13980_s9 + $0x11c8] sm:$0xff] }
 0x445   :  { %v2477_v15 = vld [vmem:[%s13980_s9 + $0x11e8] sm:$0xff]  ;;  %v7053_v8 = vpack.c.bf16 %v2470_v1, %v2466_v24  ;;  %v2496_v24 = vld [vmem:[%s13980_s9 + $0x1280] sm:$0xff]  ;;  %v2498_v1 = vld [vmem:[%s13980_s9 + $0x1290] sm:$0xff] }
 0x446   :  { %6258 = vmatpush1.bf16.msra.mxu0 %v6257_v19  ;;  %v2449_v19 = vld [vmem:[%s13980_s9 + $0x1108] sm:$0xff]  ;;  %v6287_v20 = vpack.c.bf16 %v2477_v15, %v2473_v11  ;;  %v2502_v15 = vld [vmem:[%s13980_s9 + $0x12b0] sm:$0xff] }
 0x447   :  { %7026 = vmatpush1.bf16.msra.mxu1 %v7025_v62  ;;  %6260 = vmatprep.subr.bf16.mxu0 %v6259_v25  ;;  %v2453_v62 = vld [vmem:[%s13980_s9 + $0x1128] sm:$0xff]  ;;  %v2451_v25 = vld [vmem:[%s13980_s9 + $0x1118] sm:$0xff] }
 0x448   :  { %7028 = vmatprep.subr.bf16.mxu1 %v7027_v61  ;;  %v7041_v61 = vpack.c.bf16 %v2446_v50, %v2442_v22  ;;  %v6275_v4 = vpack.c.bf16 %v2453_v62, %v2449_v19  ;;  %v2472_v22 = vld [vmem:[%s13980_s9 + $0x11c0] sm:$0xff]  ;;  %v2474_v50 = vld [vmem:[%s13980_s9 + $0x11d0] sm:$0xff] }
 0x449   :  { %3740 = vmatmul.mubr.f32.vlgmr.msra.gmra.mrb[24].mxu0 %v1886_v40  ;;  %v2478_v62 = vld [vmem:[%s13980_s9 + $0x11f0] sm:$0xff] }
 0x44a   :  { %4592 = vmatmul.mubr.f32.vlgmr.msra.gmra.mrb[72].mxu1 %v1886_v40  ;;  %6262 = vmatpush1.bf16.msra.mxu0 %v6261_v14  ;;  %v7043_v14 = vpack.c.bf16 %v2455_v52, %v2451_v25  ;;  %v2461_v40 = vld [vmem:[%s13980_s9 + $0x1168] sm:$0xff]  ;;  %v7057_v13 = vpack.c.bf16 %v2478_v62, %v2474_v50  ;;  %v2504_v50 = vld [vmem:[%s13980_s9 + $0x12c0] sm:$0xff]  ;;  %v2506_v62 = vld [vmem:[%s13980_s9 + $0x12d0] sm:$0xff] }
 0x44b   :  { %3810 = vmatprep.mubr.f32.mxu0 %v1889_v53  ;;  %7030 = vmatpush1.bf16.msra.mxu1 %v7029_v27  ;;  %v2459_v27 = vld [vmem:[%s13980_s9 + $0x1158] sm:$0xff]  ;;  %v2481_v25 = vld [vmem:[%s13980_s9 + $0x1208] sm:$0xff] }
 0x44c   :  { %4662 = vmatprep.mubr.f32.mxu1 %v1889_v53  ;;  %6264 = vmatprep.subr.bf16.mxu0 %v6263_v34  ;;  %v6279_v34 = vpack.c.bf16 %v2461_v40, %v2457_v17  ;;  %v7047_v53 = vpack.c.bf16 %v2463_v43, %v2459_v27  ;;  %v2485_v52 = vld [vmem:[%s13980_s9 + $0x1228] sm:$0xff]  ;;  %v2486_v40 = vld [vmem:[%s13980_s9 + $0x1230] sm:$0xff] }
 0x44d   :  { %7032 = vmatprep.subr.bf16.mxu1 %v7031_v44  ;;  %v2462_v44 = vld [vmem:[%s13980_s9 + $0x1170] sm:$0xff]  ;;  %v6291_v9 = vpack.c.bf16 %v2485_v52, %v2481_v25  ;;  %v2489_v27 = vld [vmem:[%s13980_s9 + $0x1248] sm:$0xff] }
 0x44e   :  { %6266 = vmatpush1.bf16.msra.mxu0 %v6265_v10  ;;  %v2467_v10 = vld [vmem:[%s13980_s9 + $0x1198] sm:$0xff]  ;;  %v7049_v28 = vpack.c.bf16 %v2462_v44, %v2458_v39  ;;  %v2493_v43 = vld [vmem:[%s13980_s9 + $0x1268] sm:$0xff]  ;;  %v2488_v39 = vld [vmem:[%s13980_s9 + $0x1240] sm:$0xff] }
 0x44f   :  { %7034 = vmatpush1.bf16.msra.mxu1 %v7033_v0  ;;  %6268 = vmatprep.subr.bf16.mxu0 %v6267_v21  ;;  %v2471_v0 = vld [vmem:[%s13980_s9 + $0x11b8] sm:$0xff]  ;;  %v6281_v21 = vpack.c.bf16 %v2460_v38, %v2456_v18  ;;  %v7061_v18 = vpack.c.bf16 %v2486_v40, %v2482_v30  ;;  %v6295_v38 = vpack.c.bf16 %v2493_v43, %v2489_v27  ;;  %v2490_v44 = vld [vmem:[%s13980_s9 + $0x1250] sm:$0xff]  ;;  %v2512_v30 = vld [vmem:[%s13980_s9 + $0x1300] sm:$0xff] }
 0x450   :  { %7036 = vmatprep.subr.bf16.mxu1 %v7035_v35  ;;  %v2468_v35 = vld [vmem:[%s13980_s9 + $0x11a0] sm:$0xff]  ;;  %v7051_v46 = vpack.c.bf16 %v2471_v0, %v2467_v10  ;;  %v2497_v10 = vld [vmem:[%s13980_s9 + $0x1288] sm:$0xff]  ;;  %v2510_v52 = vld [vmem:[%s13980_s9 + $0x12f0] sm:$0xff] }
 0x451   :  { %v2501_v0 = vld [vmem:[%s13980_s9 + $0x12a8] sm:$0xff]  ;;  %v2514_v40 = vld [vmem:[%s13980_s9 + $0x1310] sm:$0xff] }
 0x452   :  { %6270 = vmatpush1.bf16.msra.mxu0 %v6269_v32  ;;  %v2475_v32 = vld [vmem:[%s13980_s9 + $0x11d8] sm:$0xff]  ;;  %v2518_v43 = vld [vmem:[%s13980_s9 + $0x1330] sm:$0xff] }
 0x453   :  { %7038 = vmatpush1.bf16.msra.mxu1 %v7037_v55  ;;  %6272 = vmatprep.subr.bf16.mxu0 %v6271_v2  ;;  %v2479_v55 = vld [vmem:[%s13980_s9 + $0x11f8] sm:$0xff]  ;;  %v6285_v2 = vpack.c.bf16 %v2468_v35, %v2464_v7  ;;  %v7065_v7 = vpack.c.bf16 %v2494_v51, %v2490_v44  ;;  %v6299_v35 = vpack.c.bf16 %v2501_v0, %v2497_v10  ;;  %v2520_v44 = vld [vmem:[%s13980_s9 + $0x1340] sm:$0xff]  ;;  %v2522_v51 = vld [vmem:[%s13980_s9 + $0x1350] sm:$0xff] }
 0x454   :  { %7040 = vmatprep.subr.bf16.mxu1 %v7039_v49  ;;  %v2476_v49 = vld [vmem:[%s13980_s9 + $0x11e0] sm:$0xff]  ;;  %v7055_v19 = vpack.c.bf16 %v2479_v55, %v2475_v32  ;;  %v2505_v32 = vld [vmem:[%s13980_s9 + $0x12c8] sm:$0xff]  ;;  %v2526_v0 = vld [vmem:[%s13980_s9 + $0x1370] sm:$0xff] }
 0x455   :  { %v2509_v55 = vld [vmem:[%s13980_s9 + $0x12e8] sm:$0xff] }
 0x456   :  { %6274 = vmatpush1.bf16.msra.mxu0 %v6273_v60  ;;  %v2483_v60 = vld [vmem:[%s13980_s9 + $0x1218] sm:$0xff] }
 0x457   :  { %7042 = vmatpush1.bf16.msra.mxu1 %v7041_v61  ;;  %6276 = vmatprep.subr.bf16.mxu0 %v6275_v4  ;;  %v2487_v61 = vld [vmem:[%s13980_s9 + $0x1238] sm:$0xff]  ;;  %v6289_v4 = vpack.c.bf16 %v2476_v49, %v2472_v22  ;;  %v7069_v22 = vpack.c.bf16 %v2502_v15, %v2498_v1  ;;  %v6303_v49 = vpack.c.bf16 %v2509_v55, %v2505_v32  ;;  %v2528_v1 = vld [vmem:[%s13980_s9 + $0x1380] sm:$0xff]  ;;  %v2530_v15 = vld [vmem:[%s13980_s9 + $0x1390] sm:$0xff] }
 0x458   :  { %7044 = vmatprep.subr.bf16.mxu1 %v7043_v14  ;;  %v2484_v14 = vld [vmem:[%s13980_s9 + $0x1220] sm:$0xff]  ;;  %v7059_v17 = vpack.c.bf16 %v2487_v61, %v2483_v60  ;;  %v2513_v60 = vld [vmem:[%s13980_s9 + $0x1308] sm:$0xff]  ;;  %v2534_v55 = vld [vmem:[%s13980_s9 + $0x13b0] sm:$0xff] }
 0x459   :  { %v2517_v61 = vld [vmem:[%s13980_s9 + $0x1328] sm:$0xff] }
 0x45a   :  { %6278 = vmatpush1.bf16.msra.mxu0 %v6277_v23  ;;  %v2491_v23 = vld [vmem:[%s13980_s9 + $0x1258] sm:$0xff] }
 0x45b   :  { %7046 = vmatpush1.bf16.msra.mxu1 %v7045_v45  ;;  %6280 = vmatprep.subr.bf16.mxu0 %v6279_v34  ;;  %v2495_v45 = vld [vmem:[%s13980_s9 + $0x1278] sm:$0xff]  ;;  %v6293_v34 = vpack.c.bf16 %v2484_v14, %v2480_v16  ;;  %v7073_v16 = vpack.c.bf16 %v2510_v52, %v2506_v62  ;;  %v6307_v14 = vpack.c.bf16 %v2517_v61, %v2513_v60  ;;  %v2536_v62 = vld [vmem:[%s13980_s9 + $0x13c0] sm:$0xff]  ;;  %v2538_v52 = vld [vmem:[%s13980_s9 + $0x13d0] sm:$0xff] }
 0x45c   :  { %7048 = vmatprep.subr.bf16.mxu1 %v7047_v53  ;;  %v2492_v53 = vld [vmem:[%s13980_s9 + $0x1260] sm:$0xff]  ;;  %v7063_v48 = vpack.c.bf16 %v2495_v45, %v2491_v23  ;;  %v2521_v23 = vld [vmem:[%s13980_s9 + $0x1348] sm:$0xff]  ;;  %v2542_v61 = vld [vmem:[%s13980_s9 + $0x13f0] sm:$0xff] }
 0x45d   :  { %v2525_v45 = vld [vmem:[%s13980_s9 + $0x1368] sm:$0xff] }
 0x45e   :  { %6282 = vmatpush1.bf16.msra.mxu0 %v6281_v21  ;;  %v2499_v21 = vld [vmem:[%s13980_s9 + $0x1298] sm:$0xff] }
 0x45f   :  { %7050 = vmatpush1.bf16.msra.mxu1 %v7049_v28  ;;  %6284 = vmatprep.subr.bf16.mxu0 %v6283_v63  ;;  %v2503_v28 = vld [vmem:[%s13980_s9 + $0x12b8] sm:$0xff]  ;;  %v6297_v63 = vpack.c.bf16 %v2492_v53, %v2488_v39  ;;  %v7077_v39 = vpack.c.bf16 %v2518_v43, %v2514_v40  ;;  %v6311_v53 = vpack.c.bf16 %v2525_v45, %v2521_v23  ;;  %v2544_v40 = vld [vmem:[%s13980_s9 + $0x1400] sm:$0xff]  ;;  %v2546_v23 = vld [vmem:[%s13980_s9 + $0x1410] sm:$0xff] }
 0x460   :  { %7052 = vmatprep.subr.bf16.mxu1 %v7051_v46  ;;  %v2500_v46 = vld [vmem:[%s13980_s9 + $0x12a0] sm:$0xff]  ;;  %v7067_v11 = vpack.c.bf16 %v2503_v28, %v2499_v21  ;;  %v2529_v21 = vld [vmem:[%s13980_s9 + $0x1388] sm:$0xff]  ;;  %v2550_v45 = vld [vmem:[%s13980_s9 + $0x1430] sm:$0xff] }
 0x461   :  { %v2533_v28 = vld [vmem:[%s13980_s9 + $0x13a8] sm:$0xff] }
 0x462   :  { %6286 = vmatpush1.bf16.msra.mxu0 %v6285_v2  ;;  %v2507_v2 = vld [vmem:[%s13980_s9 + $0x12d8] sm:$0xff] }
 0x463   :  { %7054 = vmatpush1.bf16.msra.mxu1 %v7053_v8  ;;  %6288 = vmatprep.subr.bf16.mxu0 %v6287_v20  ;;  %v2511_v8 = vld [vmem:[%s13980_s9 + $0x12f8] sm:$0xff]  ;;  %v6301_v20 = vpack.c.bf16 %v2500_v46, %v2496_v24  ;;  %v7081_v24 = vpack.c.bf16 %v2526_v0, %v2522_v51  ;;  %v6315_v46 = vpack.c.bf16 %v2533_v28, %v2529_v21  ;;  %v2552_v51 = vld [vmem:[%s13980_s9 + $0x1440] sm:$0xff]  ;;  %v2554_v0 = vld [vmem:[%s13980_s9 + $0x1450] sm:$0xff] }
 0x464   :  { %7056 = vmatprep.subr.bf16.mxu1 %v7055_v19  ;;  %v2508_v19 = vld [vmem:[%s13980_s9 + $0x12e0] sm:$0xff]  ;;  %v7071_v25 = vpack.c.bf16 %v2511_v8, %v2507_v2  ;;  %v2537_v2 = vld [vmem:[%s13980_s9 + $0x13c8] sm:$0xff] }
 0x465   :  { %v2541_v8 = vld [vmem:[%s13980_s9 + $0x13e8] sm:$0xff] }
 0x466   :  { %6290 = vmatpush1.bf16.msra.mxu0 %v6289_v4  ;;  %v2515_v4 = vld [vmem:[%s13980_s9 + $0x1318] sm:$0xff]  ;;  %v2561_v28 = vld [vmem:[%s13980_s9 + $0x1488] sm:$0xff] }
 0x467   :  { %7058 = vmatpush1.bf16.msra.mxu1 %v7057_v13  ;;  %6292 = vmatprep.subr.bf16.mxu0 %v6291_v9  ;;  %v2519_v13 = vld [vmem:[%s13980_s9 + $0x1338] sm:$0xff]  ;;  %v6305_v9 = vpack.c.bf16 %v2508_v19, %v2504_v50  ;;  %v7085_v50 = vpack.c.bf16 %v2534_v55, %v2530_v15  ;;  %v6319_v19 = vpack.c.bf16 %v2541_v8, %v2537_v2  ;;  %v2562_v55 = vld [vmem:[%s13980_s9 + $0x1490] sm:$0xff] }
 0x468   :  { %7060 = vmatprep.subr.bf16.mxu1 %v7059_v17  ;;  %v2516_v17 = vld [vmem:[%s13980_s9 + $0x1320] sm:$0xff]  ;;  %v7075_v27 = vpack.c.bf16 %v2519_v13, %v2515_v4  ;;  %v2545_v4 = vld [vmem:[%s13980_s9 + $0x1408] sm:$0xff]  ;;  %v2566_v8 = vld [vmem:[%s13980_s9 + $0x14b0] sm:$0xff] }
 0x469   :  { %v2549_v13 = vld [vmem:[%s13980_s9 + $0x1428] sm:$0xff] }
 0x46a   :  { %6294 = vmatpush1.bf16.msra.mxu0 %v6293_v34  ;;  %v2523_v34 = vld [vmem:[%s13980_s9 + $0x1358] sm:$0xff] }
 0x46b   :  { %7062 = vmatpush1.bf16.msra.mxu1 %v7061_v18  ;;  %6296 = vmatprep.subr.bf16.mxu0 %v6295_v38  ;;  %v2527_v18 = vld [vmem:[%s13980_s9 + $0x1378] sm:$0xff]  ;;  %v6309_v38 = vpack.c.bf16 %v2516_v17, %v2512_v30  ;;  %v7089_v30 = vpack.c.bf16 %v2542_v61, %v2538_v52  ;;  %v6323_v17 = vpack.c.bf16 %v2549_v13, %v2545_v4  ;;  %v2568_v52 = vld [vmem:[%s13980_s9 + $0x14c0] sm:$0xff]  ;;  %v2570_v61 = vld [vmem:[%s13980_s9 + $0x14d0] sm:$0xff] }
 0x46c   :  { %7064 = vmatprep.subr.bf16.mxu1 %v7063_v48  ;;  %v2524_v48 = vld [vmem:[%s13980_s9 + $0x1360] sm:$0xff]  ;;  %v7079_v10 = vpack.c.bf16 %v2527_v18, %v2523_v34  ;;  %v2553_v34 = vld [vmem:[%s13980_s9 + $0x1448] sm:$0xff]  ;;  %v2574_v13 = vld [vmem:[%s13980_s9 + $0x14f0] sm:$0xff] }
 0x46d   :  { %v2557_v18 = vld [vmem:[%s13980_s9 + $0x1468] sm:$0xff] }
 0x46e   :  { %6298 = vmatpush1.bf16.msra.mxu0 %v6297_v63  ;;  %v2531_v63 = vld [vmem:[%s13980_s9 + $0x1398] sm:$0xff]  ;;  %v6327_v21 = vpack.c.bf16 %v2557_v18, %v2553_v34  ;;  %v2582_v18 = vld [vmem:[%s13980_s9 + $0x1530] sm:$0xff] }
 0x46f   :  { %7066 = vmatpush1.bf16.msra.mxu1 %v7065_v7  ;;  %6300 = vmatprep.subr.bf16.mxu0 %v6299_v35  ;;  %v2535_v7 = vld [vmem:[%s13980_s9 + $0x13b8] sm:$0xff]  ;;  %v6313_v35 = vpack.c.bf16 %v2524_v48, %v2520_v44  ;;  %v1888_v44 = vmax.f32 %v9384_v36, 0.0  ;;  %v7093_v48 = vpack.c.bf16 %v2550_v45, %v2546_v23  ;;  %v2558_v36 = vld [vmem:[%s13980_s9 + $0x1470] sm:$0xff]  ;;  %v2580_v23 = vld [vmem:[%s13980_s9 + $0x1520] sm:$0xff] }
 0x470   :  { %7068 = vmatprep.subr.bf16.mxu1 %v7067_v11  ;;  %v2532_v11 = vld [vmem:[%s13980_s9 + $0x13a0] sm:$0xff]  ;;  %v7083_v32 = vpack.c.bf16 %v2535_v7, %v2531_v63  ;;  %v2565_v63 = vld [vmem:[%s13980_s9 + $0x14a8] sm:$0xff]  ;;  %v1891_v7 = vmax.f32 %v9426_v41, 0.0  ;;  %v2578_v45 = vld [vmem:[%s13980_s9 + $0x1510] sm:$0xff] }
 0x471   :  { %v6331_v15 = vpack.c.bf16 %v2565_v63, %v2561_v28  ;;  %v2560_v41 = vld [vmem:[%s13980_s9 + $0x1480] sm:$0xff]  ;;  %v2590_v63 = vld [vmem:[%s13980_s9 + $0x1570] sm:$0xff] }
 0x472   :  { %6302 = vmatpush1.bf16.msra.mxu0 %v6301_v20  ;;  %v2539_v20 = vld [vmem:[%s13980_s9 + $0x13d8] sm:$0xff] }
 0x473   :  { %7070 = vmatpush1.bf16.msra.mxu1 %v7069_v22  ;;  %6304 = vmatprep.subr.bf16.mxu0 %v6303_v49  ;;  %v2543_v22 = vld [vmem:[%s13980_s9 + $0x13f8] sm:$0xff]  ;;  %v6317_v49 = vpack.c.bf16 %v2532_v11, %v2528_v1  ;;  %v7097_v11 = vpack.c.bf16 %v2558_v36, %v2554_v0  ;;  %v2584_v0 = vld [vmem:[%s13980_s9 + $0x1540] sm:$0xff]  ;;  %v2586_v36 = vld [vmem:[%s13980_s9 + $0x1550] sm:$0xff] }
 0x474   :  { %7072 = vmatprep.subr.bf16.mxu1 %v7071_v25  ;;  %v2540_v25 = vld [vmem:[%s13980_s9 + $0x13e0] sm:$0xff]  ;;  %v7087_v60 = vpack.c.bf16 %v2543_v22, %v2539_v20  ;;  %v2569_v20 = vld [vmem:[%s13980_s9 + $0x14c8] sm:$0xff] }
 0x475   :  { %v2573_v22 = vld [vmem:[%s13980_s9 + $0x14e8] sm:$0xff] }
 0x476   :  { %6306 = vmatpush1.bf16.msra.mxu0 %v6305_v9  ;;  %v2547_v9 = vld [vmem:[%s13980_s9 + $0x1418] sm:$0xff] }
 0x477   :  { %7074 = vmatpush1.bf16.msra.mxu1 %v7073_v16  ;;  %6308 = vmatprep.subr.bf16.mxu0 %v6307_v14  ;;  %v2551_v16 = vld [vmem:[%s13980_s9 + $0x1438] sm:$0xff]  ;;  %v6321_v14 = vpack.c.bf16 %v2540_v25, %v2536_v62  ;;  %v7101_v62 = vpack.c.bf16 %v2566_v8, %v2562_v55  ;;  %v6335_v25 = vpack.c.bf16 %v2573_v22, %v2569_v20  ;;  %v2594_v55 = vld [vmem:[%s13980_s9 + $0x1590] sm:$0xff]  ;;  %v2601_v20 = vld [vmem:[%s13980_s9 + $0x15c8] sm:$0xff] }
 0x478   :  { %7076 = vmatprep.subr.bf16.mxu1 %v7075_v27  ;;  %v2548_v27 = vld [vmem:[%s13980_s9 + $0x1420] sm:$0xff]  ;;  %v7091_v43 = vpack.c.bf16 %v2551_v16, %v2547_v9  ;;  %v2577_v9 = vld [vmem:[%s13980_s9 + $0x1508] sm:$0xff]  ;;  %v2598_v8 = vld [vmem:[%s13980_s9 + $0x15b0] sm:$0xff] }
 0x479   :  { %v2581_v16 = vld [vmem:[%s13980_s9 + $0x1528] sm:$0xff] }
 0x47a   :  { %6310 = vmatpush1.bf16.msra.mxu0 %v6309_v38  ;;  %v6325_v38 = vpack.c.bf16 %v2548_v27, %v2544_v40  ;;  %v7105_v40 = vpack.c.bf16 %v2574_v13, %v2570_v61  ;;  %v6339_v27 = vpack.c.bf16 %v2581_v16, %v2577_v9  ;;  %v2605_v22 = vld [vmem:[%s13980_s9 + $0x15e8] sm:$0xff]  ;;  %v2602_v61 = vld [vmem:[%s13980_s9 + $0x15d0] sm:$0xff] }
 0x47b   :  { %7078 = vmatpush1.bf16.msra.mxu1 %v7077_v39  ;;  %6312 = vmatprep.subr.bf16.mxu0 %v6311_v53  ;;  %v2555_v39 = vld [vmem:[%s13980_s9 + $0x1458] sm:$0xff]  ;;  %v2606_v13 = vld [vmem:[%s13980_s9 + $0x15f0] sm:$0xff]  ;;  %v2609_v9 = vld [vmem:[%s13980_s9 + $0x1608] sm:$0xff] }
 0x47c   :  { %7080 = vmatprep.subr.bf16.mxu1 %v7079_v10  ;;  %v2559_v53 = vld [vmem:[%s13980_s9 + $0x1478] sm:$0xff]  ;;  %v2556_v10 = vld [vmem:[%s13980_s9 + $0x1460] sm:$0xff]  ;;  %v2613_v16 = vld [vmem:[%s13980_s9 + $0x1628] sm:$0xff] }
 0x47d   :  { %v6329_v1 = vpack.c.bf16 %v2556_v10, %v2552_v51  ;;  %v7109_v51 = vpack.c.bf16 %v2582_v18, %v2578_v45  ;;  %v2610_v45 = vld [vmem:[%s13980_s9 + $0x1610] sm:$0xff] }
 0x47e   :  { %6314 = vmatpush1.bf16.msra.mxu0 %v6313_v35  ;;  %v7095_v35 = vpack.c.bf16 %v2559_v53, %v2555_v39  ;;  %v2589_v39 = vld [vmem:[%s13980_s9 + $0x1568] sm:$0xff]  ;;  %v2587_v53 = vld [vmem:[%s13980_s9 + $0x1558] sm:$0xff]  ;;  %v2614_v18 = vld [vmem:[%s13980_s9 + $0x1630] sm:$0xff] }
 0x47f   :  { %7082 = vmatpush1.bf16.msra.mxu1 %v7081_v24  ;;  %6316 = vmatprep.subr.bf16.mxu0 %v6315_v46  ;;  %v2563_v24 = vld [vmem:[%s13980_s9 + $0x1498] sm:$0xff] }
 0x480   :  { %7084 = vmatprep.subr.bf16.mxu1 %v7083_v32  ;;  %v2567_v46 = vld [vmem:[%s13980_s9 + $0x14b8] sm:$0xff]  ;;  %v2564_v32 = vld [vmem:[%s13980_s9 + $0x14a0] sm:$0xff] }
 0x481   :  { %v7099_v2 = vpack.c.bf16 %v2567_v46, %v2563_v24  ;;  %v2595_v24 = vld [vmem:[%s13980_s9 + $0x1598] sm:$0xff] }
 0x482   :  { %6318 = vmatpush1.bf16.msra.mxu0 %v6317_v49  ;;  %v2571_v49 = vld [vmem:[%s13980_s9 + $0x14d8] sm:$0xff] }
 0x483   :  { %7086 = vmatpush1.bf16.msra.mxu1 %v7085_v50  ;;  %6320 = vmatprep.subr.bf16.mxu0 %v6319_v19  ;;  %v2575_v50 = vld [vmem:[%s13980_s9 + $0x14f8] sm:$0xff]  ;;  %v6333_v19 = vpack.c.bf16 %v2564_v32, %v2560_v41  ;;  %v2592_v41 = vld [vmem:[%s13980_s9 + $0x1580] sm:$0xff] }
 0x484   :  { %7088 = vmatprep.subr.bf16.mxu1 %v7087_v60  ;;  %v2572_v60 = vld [vmem:[%s13980_s9 + $0x14e0] sm:$0xff]  ;;  %v7103_v4 = vpack.c.bf16 %v2575_v50, %v2571_v49  ;;  %v2599_v46 = vld [vmem:[%s13980_s9 + $0x15b8] sm:$0xff] }
 0x485   :  { %v2596_v32 = vld [vmem:[%s13980_s9 + $0x15a0] sm:$0xff]  ;;  %v2603_v49 = vld [vmem:[%s13980_s9 + $0x15d8] sm:$0xff] }
 0x486   :  { %6322 = vmatpush1.bf16.msra.mxu0 %v6321_v14  ;;  %v2579_v14 = vld [vmem:[%s13980_s9 + $0x1518] sm:$0xff] }
 0x487   :  { %7090 = vmatpush1.bf16.msra.mxu1 %v7089_v30  ;;  %6324 = vmatprep.subr.bf16.mxu0 %v6323_v17  ;;  %v2583_v30 = vld [vmem:[%s13980_s9 + $0x1538] sm:$0xff]  ;;  %v6337_v17 = vpack.c.bf16 %v2572_v60, %v2568_v52  ;;  %v2600_v52 = vld [vmem:[%s13980_s9 + $0x15c0] sm:$0xff] }
 0x488   :  { %7092 = vmatprep.subr.bf16.mxu1 %v7091_v43  ;;  %v2576_v43 = vld [vmem:[%s13980_s9 + $0x1500] sm:$0xff]  ;;  %v7107_v34 = vpack.c.bf16 %v2583_v30, %v2579_v14  ;;  %v2607_v50 = vld [vmem:[%s13980_s9 + $0x15f8] sm:$0xff] }
 0x489   :  { %3811 = vmatmul.mubr.f32.vlgmr.msra.gmra.mrb[24].mxu0 %v1888_v44  ;;  %v2604_v60 = vld [vmem:[%s13980_s9 + $0x15e0] sm:$0xff]  ;;  %v2611_v14 = vld [vmem:[%s13980_s9 + $0x1618] sm:$0xff] }
 0x48a   :  { %4663 = vmatmul.mubr.f32.vlgmr.msra.gmra.mrb[72].mxu1 %v1888_v44  ;;  %6326 = vmatpush1.bf16.msra.mxu0 %v6325_v38  ;;  %v2585_v38 = vld [vmem:[%s13980_s9 + $0x1548] sm:$0xff]  ;;  %v2591_v44 = vld [vmem:[%s13980_s9 + $0x1578] sm:$0xff] }
 0x48b   :  { %3881 = vmatprep.mubr.f32.mxu0 %v1891_v7  ;;  %7094 = vmatpush1.bf16.msra.mxu1 %v7093_v48  ;;  %v6341_v48 = vpack.c.bf16 %v2580_v23, %v2576_v43  ;;  %v6343_v10 = vpack.c.bf16 %v2589_v39, %v2585_v38  ;;  %v7111_v28 = vpack.c.bf16 %v2591_v44, %v2587_v53  ;;  %v2615_v30 = vld [vmem:[%s13980_s9 + $0x1638] sm:$0xff]  ;;  %v2608_v43 = vld [vmem:[%s13980_s9 + $0x1600] sm:$0xff]  ;;  %v2617_v38 = vld [vmem:[%s13980_s9 + $0x1648] sm:$0xff] }
 0x48c   :  { %4733 = vmatprep.mubr.f32.mxu1 %v1891_v7  ;;  %6328 = vmatprep.subr.bf16.mxu0 %v6327_v21  ;;  %v2588_v21 = vld [vmem:[%s13980_s9 + $0x1560] sm:$0xff]  ;;  %v2593_v7 = vld [vmem:[%s13980_s9 + $0x1588] sm:$0xff]  ;;  %v2619_v53 = vld [vmem:[%s13980_s9 + $0x1658] sm:$0xff] }
 0x48d   :  { %7096 = vmatprep.subr.bf16.mxu1 %v7095_v35  ;;  %v2597_v35 = vld [vmem:[%s13980_s9 + $0x15a8] sm:$0xff]  ;;  %v2612_v23 = vld [vmem:[%s13980_s9 + $0x1620] sm:$0xff]  ;;  %v2623_v44 = vld [vmem:[%s13980_s9 + $0x1678] sm:$0xff] }
 0x48e   :  { %6330 = vmatpush1.bf16.msra.mxu0 %v6329_v1  ;;  %v6345_v1 = vpack.c.bf16 %v2588_v21, %v2584_v0  ;;  %v2621_v39 = vld [vmem:[%s13980_s9 + $0x1668] sm:$0xff]  ;;  %v2616_v0 = vld [vmem:[%s13980_s9 + $0x1640] sm:$0xff] }
 0x48f   :  { %7098 = vmatpush1.bf16.msra.mxu1 %v7097_v11  ;;  %6332 = vmatprep.subr.bf16.mxu0 %v6331_v15  ;;  %v7113_v11 = vpack.c.bf16 %v2590_v63, %v2586_v36  ;;  %v6347_v15 = vpack.c.bf16 %v2597_v35, %v2593_v7  ;;  %v2620_v21 = vld [vmem:[%s13980_s9 + $0x1660] sm:$0xff]  ;;  %v2618_v36 = vld [vmem:[%s13980_s9 + $0x1650] sm:$0xff]  ;;  %v2625_v7 = vld [vmem:[%s13980_s9 + $0x1688] sm:$0xff] }
 0x490   :  { %7100 = vmatprep.subr.bf16.mxu1 %v7099_v2  ;;  %v7115_v2 = vpack.c.bf16 %v2599_v46, %v2595_v24  ;;  %v2622_v63 = vld [vmem:[%s13980_s9 + $0x1670] sm:$0xff]  ;;  %v2629_v35 = vld [vmem:[%s13980_s9 + $0x16a8] sm:$0xff]  ;;  %v2627_v24 = vld [vmem:[%s13980_s9 + $0x1698] sm:$0xff] }
 0x491   :  { %v2631_v46 = vld [vmem:[%s13980_s9 + $0x16b8] sm:$0xff] }
 0x492   :  { %6334 = vmatpush1.bf16.msra.mxu0 %v6333_v19  ;;  %v6349_v19 = vpack.c.bf16 %v2596_v32, %v2592_v41  ;;  %v2624_v41 = vld [vmem:[%s13980_s9 + $0x1680] sm:$0xff] }
 0x493   :  { %7102 = vmatpush1.bf16.msra.mxu1 %v7101_v62  ;;  %6336 = vmatprep.subr.bf16.mxu0 %v6335_v25  ;;  %v7117_v62 = vpack.c.bf16 %v2598_v8, %v2594_v55  ;;  %v6351_v25 = vpack.c.bf16 %v2605_v22, %v2601_v20  ;;  %v2628_v32 = vld [vmem:[%s13980_s9 + $0x16a0] sm:$0xff]  ;;  %v2626_v55 = vld [vmem:[%s13980_s9 + $0x1690] sm:$0xff]  ;;  %v2633_v20 = vld [vmem:[%s13980_s9 + $0x16c8] sm:$0xff] }
 0x494   :  { %7104 = vmatprep.subr.bf16.mxu1 %v7103_v4  ;;  %v7119_v4 = vpack.c.bf16 %v2607_v50, %v2603_v49  ;;  %v2630_v8 = vld [vmem:[%s13980_s9 + $0x16b0] sm:$0xff]  ;;  %v2637_v22 = vld [vmem:[%s13980_s9 + $0x16e8] sm:$0xff]  ;;  %v2635_v49 = vld [vmem:[%s13980_s9 + $0x16d8] sm:$0xff] }
 0x495   :  { %v2639_v50 = vld [vmem:[%s13980_s9 + $0x16f8] sm:$0xff] }
 0x496   :  { %6338 = vmatpush1.bf16.msra.mxu0 %v6337_v17  ;;  %v6353_v17 = vpack.c.bf16 %v2604_v60, %v2600_v52  ;;  %v2632_v52 = vld [vmem:[%s13980_s9 + $0x16c0] sm:$0xff] }
 0x497   :  { %7106 = vmatpush1.bf16.msra.mxu1 %v7105_v40  ;;  %6340 = vmatprep.subr.bf16.mxu0 %v6339_v27  ;;  %v7121_v40 = vpack.c.bf16 %v2606_v13, %v2602_v61  ;;  %v6355_v27 = vpack.c.bf16 %v2613_v16, %v2609_v9  ;;  %v2636_v60 = vld [vmem:[%s13980_s9 + $0x16e0] sm:$0xff]  ;;  %v2634_v61 = vld [vmem:[%s13980_s9 + $0x16d0] sm:$0xff]  ;;  %v2641_v9 = vld [vmem:[%s13980_s9 + $0x1708] sm:$0xff] }
 0x498   :  { %7108 = vmatprep.subr.bf16.mxu1 %v7107_v34  ;;  %v7123_v34 = vpack.c.bf16 %v2615_v30, %v2611_v14  ;;  %v2638_v13 = vld [vmem:[%s13980_s9 + $0x16f0] sm:$0xff]  ;;  %v2645_v16 = vld [vmem:[%s13980_s9 + $0x1728] sm:$0xff]  ;;  %v2643_v14 = vld [vmem:[%s13980_s9 + $0x1718] sm:$0xff] }
 0x499   :  { %v2647_v30 = vld [vmem:[%s13980_s9 + $0x1738] sm:$0xff] }
 0x49a   :  { %6342 = vmatpush1.bf16.msra.mxu0 %v6341_v48  ;;  %v6357_v48 = vpack.c.bf16 %v2612_v23, %v2608_v43  ;;  %v2640_v43 = vld [vmem:[%s13980_s9 + $0x1700] sm:$0xff] }
 0x49b   :  { %7110 = vmatpush1.bf16.msra.mxu1 %v7109_v51  ;;  %6344 = vmatprep.subr.bf16.mxu0 %v6343_v10  ;;  %v7125_v51 = vpack.c.bf16 %v2614_v18, %v2610_v45  ;;  %v6359_v10 = vpack.c.bf16 %v2621_v39, %v2617_v38  ;;  %v2644_v23 = vld [vmem:[%s13980_s9 + $0x1720] sm:$0xff]  ;;  %v2642_v45 = vld [vmem:[%s13980_s9 + $0x1710] sm:$0xff]  ;;  %v2649_v38 = vld [vmem:[%s13980_s9 + $0x1748] sm:$0xff] }
 0x49c   :  { %7112 = vmatprep.subr.bf16.mxu1 %v7111_v28  ;;  %v7127_v28 = vpack.c.bf16 %v2623_v44, %v2619_v53  ;;  %v2646_v18 = vld [vmem:[%s13980_s9 + $0x1730] sm:$0xff]  ;;  %v2653_v39 = vld [vmem:[%s13980_s9 + $0x1768] sm:$0xff]  ;;  %v2651_v53 = vld [vmem:[%s13980_s9 + $0x1758] sm:$0xff] }
 0x49d   :  { %v2655_v44 = vld [vmem:[%s13980_s9 + $0x1778] sm:$0xff] }
 0x49e   :  { %6346 = vmatpush1.bf16.msra.mxu0 %v6345_v1  ;;  %v6361_v1 = vpack.c.bf16 %v2620_v21, %v2616_v0  ;;  %v2648_v0 = vld [vmem:[%s13980_s9 + $0x1740] sm:$0xff] }
 0x49f   :  { %7114 = vmatpush1.bf16.msra.mxu1 %v7113_v11  ;;  %6348 = vmatprep.subr.bf16.mxu0 %v6347_v15  ;;  %v7129_v11 = vpack.c.bf16 %v2622_v63, %v2618_v36  ;;  %v6363_v15 = vpack.c.bf16 %v2629_v35, %v2625_v7  ;;  %v2652_v21 = vld [vmem:[%s13980_s9 + $0x1760] sm:$0xff]  ;;  %v2650_v36 = vld [vmem:[%s13980_s9 + $0x1750] sm:$0xff]  ;;  %v2657_v7 = vld [vmem:[%s13980_s9 + $0x1788] sm:$0xff] }
 0x4a0   :  { %7116 = vmatprep.subr.bf16.mxu1 %v7115_v2  ;;  %v7131_v2 = vpack.c.bf16 %v2631_v46, %v2627_v24  ;;  %v2654_v63 = vld [vmem:[%s13980_s9 + $0x1770] sm:$0xff]  ;;  %v2661_v35 = vld [vmem:[%s13980_s9 + $0x17a8] sm:$0xff]  ;;  %v2659_v24 = vld [vmem:[%s13980_s9 + $0x1798] sm:$0xff] }
 0x4a1   :  { %v2663_v46 = vld [vmem:[%s13980_s9 + $0x17b8] sm:$0xff] }
 0x4a2   :  { %6350 = vmatpush1.bf16.msra.mxu0 %v6349_v19  ;;  %v6365_v19 = vpack.c.bf16 %v2628_v32, %v2624_v41  ;;  %v2656_v41 = vld [vmem:[%s13980_s9 + $0x1780] sm:$0xff] }
 0x4a3   :  { %7118 = vmatpush1.bf16.msra.mxu1 %v7117_v62  ;;  %6352 = vmatprep.subr.bf16.mxu0 %v6351_v25  ;;  %v7133_v62 = vpack.c.bf16 %v2630_v8, %v2626_v55  ;;  %v6367_v25 = vpack.c.bf16 %v2637_v22, %v2633_v20  ;;  %v2660_v32 = vld [vmem:[%s13980_s9 + $0x17a0] sm:$0xff]  ;;  %v2658_v55 = vld [vmem:[%s13980_s9 + $0x1790] sm:$0xff]  ;;  %v2665_v20 = vld [vmem:[%s13980_s9 + $0x17c8] sm:$0xff] }
 0x4a4   :  { %7120 = vmatprep.subr.bf16.mxu1 %v7119_v4  ;;  %v7135_v4 = vpack.c.bf16 %v2639_v50, %v2635_v49  ;;  %v2662_v8 = vld [vmem:[%s13980_s9 + $0x17b0] sm:$0xff]  ;;  %v2669_v22 = vld [vmem:[%s13980_s9 + $0x17e8] sm:$0xff]  ;;  %v2667_v49 = vld [vmem:[%s13980_s9 + $0x17d8] sm:$0xff] }
 0x4a5   :  { %v2671_v50 = vld [vmem:[%s13980_s9 + $0x17f8] sm:$0xff] }
 0x4a6   :  { %6354 = vmatpush1.bf16.msra.mxu0 %v6353_v17  ;;  %v6369_v17 = vpack.c.bf16 %v2636_v60, %v2632_v52  ;;  %v2664_v52 = vld [vmem:[%s13980_s9 + $0x17c0] sm:$0xff] }
 0x4a7   :  { %7122 = vmatpush1.bf16.msra.mxu1 %v7121_v40  ;;  %6356 = vmatprep.subr.bf16.mxu0 %v6355_v27  ;;  %v7137_v40 = vpack.c.bf16 %v2638_v13, %v2634_v61  ;;  %v6371_v27 = vpack.c.bf16 %v2645_v16, %v2641_v9  ;;  %v2668_v60 = vld [vmem:[%s13980_s9 + $0x17e0] sm:$0xff]  ;;  %v2666_v61 = vld [vmem:[%s13980_s9 + $0x17d0] sm:$0xff]  ;;  %v2673_v9 = vld [vmem:[%s13980_s9 + $0x1808] sm:$0xff] }
 0x4a8   :  { %7124 = vmatprep.subr.bf16.mxu1 %v7123_v34  ;;  %v7139_v34 = vpack.c.bf16 %v2647_v30, %v2643_v14  ;;  %v2670_v13 = vld [vmem:[%s13980_s9 + $0x17f0] sm:$0xff]  ;;  %v2677_v16 = vld [vmem:[%s13980_s9 + $0x1828] sm:$0xff]  ;;  %v2675_v14 = vld [vmem:[%s13980_s9 + $0x1818] sm:$0xff] }
 0x4a9   :  { %v2679_v30 = vld [vmem:[%s13980_s9 + $0x1838] sm:$0xff] }
 0x4aa   :  { %6358 = vmatpush1.bf16.msra.mxu0 %v6357_v48  ;;  %v6373_v48 = vpack.c.bf16 %v2644_v23, %v2640_v43  ;;  %v2672_v43 = vld [vmem:[%s13980_s9 + $0x1800] sm:$0xff] }
 0x4ab   :  { %7126 = vmatpush1.bf16.msra.mxu1 %v7125_v51  ;;  %6360 = vmatprep.subr.bf16.mxu0 %v6359_v10  ;;  %v7141_v51 = vpack.c.bf16 %v2646_v18, %v2642_v45  ;;  %v6375_v10 = vpack.c.bf16 %v2653_v39, %v2649_v38  ;;  %v2676_v23 = vld [vmem:[%s13980_s9 + $0x1820] sm:$0xff]  ;;  %v7155_v45 = vpack.c.bf16 %v2679_v30, %v2675_v14  ;;  %v2678_v18 = vld [vmem:[%s13980_s9 + $0x1830] sm:$0xff]  ;;  %v2681_v38 = vld [vmem:[%s13980_s9 + $0x1848] sm:$0xff] }
 0x4ac   :  { %7128 = vmatprep.subr.bf16.mxu1 %v7127_v28  ;;  %v7143_v28 = vpack.c.bf16 %v2655_v44, %v2651_v53  ;;  %v2685_v39 = vld [vmem:[%s13980_s9 + $0x1868] sm:$0xff]  ;;  %v6389_v53 = vpack.c.bf16 %v2676_v23, %v2672_v43  ;;  %v2683_v44 = vld [vmem:[%s13980_s9 + $0x1858] sm:$0xff]  ;;  %v2704_v43 = vld [vmem:[%s13980_s9 + $0x1900] sm:$0xff] }
 0x4ad   :  { %v2707_v14 = vld [vmem:[%s13980_s9 + $0x1918] sm:$0xff]  ;;  %v2708_v23 = vld [vmem:[%s13980_s9 + $0x1920] sm:$0xff] }
 0x4ae   :  { %6362 = vmatpush1.bf16.msra.mxu0 %v6361_v1  ;;  %v6377_v1 = vpack.c.bf16 %v2652_v21, %v2648_v0  ;;  %v2680_v0 = vld [vmem:[%s13980_s9 + $0x1840] sm:$0xff]  ;;  %v2711_v30 = vld [vmem:[%s13980_s9 + $0x1938] sm:$0xff] }
 0x4af   :  { %7130 = vmatpush1.bf16.msra.mxu1 %v7129_v11  ;;  %6364 = vmatprep.subr.bf16.mxu0 %v6363_v15  ;;  %v7145_v11 = vpack.c.bf16 %v2654_v63, %v2650_v36  ;;  %v6379_v15 = vpack.c.bf16 %v2661_v35, %v2657_v7  ;;  %v2684_v21 = vld [vmem:[%s13980_s9 + $0x1860] sm:$0xff]  ;;  %v2682_v36 = vld [vmem:[%s13980_s9 + $0x1850] sm:$0xff]  ;;  %v2689_v63 = vld [vmem:[%s13980_s9 + $0x1888] sm:$0xff]  ;;  %v1893_v35 = vmax.f32 %v9456_v12, 0.0 }
 0x4b0   :  { %7132 = vmatprep.subr.bf16.mxu1 %v7131_v2  ;;  %v7147_v2 = vpack.c.bf16 %v2663_v46, %v2659_v24  ;;  %v2693_v7 = vld [vmem:[%s13980_s9 + $0x18a8] sm:$0xff]  ;;  %v2691_v46 = vld [vmem:[%s13980_s9 + $0x1898] sm:$0xff]  ;;  %v2688_v12 = vld [vmem:[%s13980_s9 + $0x1880] sm:$0xff] }
 0x4b2   :  { %6366 = vmatpush1.bf16.msra.mxu0 %v6365_v19  ;;  %v6381_v19 = vpack.c.bf16 %v2660_v32, %v2656_v41  ;;  %v6395_v41 = vpack.c.bf16 %v2693_v7, %v2689_v63  ;;  %v2692_v32 = vld [vmem:[%s13980_s9 + $0x18a0] sm:$0xff]  ;;  %v2721_v63 = vld [vmem:[%s13980_s9 + $0x1988] sm:$0xff] }
 0x4b3   :  { %7134 = vmatpush1.bf16.msra.mxu1 %v7133_v62  ;;  %6368 = vmatprep.subr.bf16.mxu0 %v6367_v25  ;;  %v7149_v62 = vpack.c.bf16 %v2662_v8, %v2658_v55  ;;  %v6383_v25 = vpack.c.bf16 %v2669_v22, %v2665_v20  ;;  %v2690_v55 = vld [vmem:[%s13980_s9 + $0x1890] sm:$0xff]  ;;  %v2697_v20 = vld [vmem:[%s13980_s9 + $0x18c8] sm:$0xff] }
 0x4b4   :  { %7136 = vmatprep.subr.bf16.mxu1 %v7135_v4  ;;  %v7151_v4 = vpack.c.bf16 %v2671_v50, %v2667_v49  ;;  %v2694_v8 = vld [vmem:[%s13980_s9 + $0x18b0] sm:$0xff]  ;;  %v2701_v22 = vld [vmem:[%s13980_s9 + $0x18e8] sm:$0xff]  ;;  %v2699_v49 = vld [vmem:[%s13980_s9 + $0x18d8] sm:$0xff] }
 0x4b5   :  { %v2703_v50 = vld [vmem:[%s13980_s9 + $0x18f8] sm:$0xff]  ;;  %v2725_v7 = vld [vmem:[%s13980_s9 + $0x19a8] sm:$0xff] }
 0x4b6   :  { %6370 = vmatpush1.bf16.msra.mxu0 %v6369_v17  ;;  %v6385_v17 = vpack.c.bf16 %v2668_v60, %v2664_v52  ;;  %v2696_v52 = vld [vmem:[%s13980_s9 + $0x18c0] sm:$0xff] }
 0x4b7   :  { %7138 = vmatpush1.bf16.msra.mxu1 %v7137_v40  ;;  %6372 = vmatprep.subr.bf16.mxu0 %v6371_v27  ;;  %v7153_v40 = vpack.c.bf16 %v2670_v13, %v2666_v61  ;;  %v6387_v27 = vpack.c.bf16 %v2677_v16, %v2673_v9  ;;  %v2700_v60 = vld [vmem:[%s13980_s9 + $0x18e0] sm:$0xff]  ;;  %v2698_v61 = vld [vmem:[%s13980_s9 + $0x18d0] sm:$0xff]  ;;  %v2705_v9 = vld [vmem:[%s13980_s9 + $0x1908] sm:$0xff] }
 0x4b8   :  { %7140 = vmatprep.subr.bf16.mxu1 %v7139_v34  ;;  %v2674_v34 = vld [vmem:[%s13980_s9 + $0x1810] sm:$0xff]  ;;  %v2709_v16 = vld [vmem:[%s13980_s9 + $0x1928] sm:$0xff] }
 0x4b9   :  { %v2702_v13 = vld [vmem:[%s13980_s9 + $0x18f0] sm:$0xff] }
 0x4ba   :  { %6374 = vmatpush1.bf16.msra.mxu0 %v6373_v48  ;;  %v2687_v48 = vld [vmem:[%s13980_s9 + $0x1878] sm:$0xff] }
 0x4bb   :  { %7142 = vmatpush1.bf16.msra.mxu1 %v7141_v51  ;;  %6376 = vmatprep.subr.bf16.mxu0 %v6375_v10  ;;  %v1890_v51 = vmax.f32 %v9414_v37, 0.0  ;;  %v7157_v10 = vpack.c.bf16 %v2678_v18, %v2674_v34  ;;  %v2686_v37 = vld [vmem:[%s13980_s9 + $0x1870] sm:$0xff]  ;;  %v7159_v24 = vpack.c.bf16 %v2687_v48, %v2683_v44  ;;  %v7171_v34 = vpack.c.bf16 %v2711_v30, %v2707_v14  ;;  %v2719_v44 = vld [vmem:[%s13980_s9 + $0x1978] sm:$0xff] }
 0x4bc   :  { %7144 = vmatprep.subr.bf16.mxu1 %v7143_v28  ;;  %v6391_v28 = vpack.c.bf16 %v2685_v39, %v2681_v38  ;;  %v2710_v18 = vld [vmem:[%s13980_s9 + $0x1930] sm:$0xff]  ;;  %v2713_v38 = vld [vmem:[%s13980_s9 + $0x1948] sm:$0xff]  ;;  %v6405_v48 = vpack.c.bf16 %v2708_v23, %v2704_v43 }
 0x4bd   :  { %v2717_v39 = vld [vmem:[%s13980_s9 + $0x1968] sm:$0xff]  ;;  %v2738_v43 = vld [vmem:[%s13980_s9 + $0x1a10] sm:$0xff] }
 0x4be   :  { %6378 = vmatpush1.bf16.msra.mxu0 %v6377_v1  ;;  %v2695_v1 = vld [vmem:[%s13980_s9 + $0x18b8] sm:$0xff] }
 0x4bf   :  { %7146 = vmatpush1.bf16.msra.mxu1 %v7145_v11  ;;  %6380 = vmatprep.subr.bf16.mxu0 %v6379_v15  ;;  %v6393_v11 = vpack.c.bf16 %v2684_v21, %v2680_v0  ;;  %v7161_v15 = vpack.c.bf16 %v2686_v37, %v2682_v36  ;;  %v2712_v0 = vld [vmem:[%s13980_s9 + $0x1940] sm:$0xff]  ;;  %v2714_v36 = vld [vmem:[%s13980_s9 + $0x1950] sm:$0xff] }
 0x4c0   :  { %7148 = vmatprep.subr.bf16.mxu1 %v7147_v2  ;;  %v7163_v2 = vpack.c.bf16 %v2695_v1, %v2691_v46  ;;  %v2716_v21 = vld [vmem:[%s13980_s9 + $0x1960] sm:$0xff]  ;;  %v2718_v37 = vld [vmem:[%s13980_s9 + $0x1970] sm:$0xff] }
 0x4c1   :  { %v6409_v46 = vpack.c.bf16 %v2716_v21, %v2712_v0  ;;  %v7177_v1 = vpack.c.bf16 %v2718_v37, %v2714_v36  ;;  %v2746_v0 = vld [vmem:[%s13980_s9 + $0x1a50] sm:$0xff]  ;;  %v2757_v37 = vld [vmem:[%s13980_s9 + $0x1aa8] sm:$0xff] }
 0x4c2   :  { %6382 = vmatpush1.bf16.msra.mxu0 %v6381_v19  ;;  %v6397_v19 = vpack.c.bf16 %v2692_v32, %v2688_v12  ;;  %v2722_v12 = vld [vmem:[%s13980_s9 + $0x1990] sm:$0xff] }
 0x4c3   :  { %7150 = vmatpush1.bf16.msra.mxu1 %v7149_v62  ;;  %6384 = vmatprep.subr.bf16.mxu0 %v6383_v25  ;;  %v7165_v62 = vpack.c.bf16 %v2694_v8, %v2690_v55  ;;  %v6399_v25 = vpack.c.bf16 %v2701_v22, %v2697_v20  ;;  %v2726_v55 = vld [vmem:[%s13980_s9 + $0x19b0] sm:$0xff]  ;;  %v2733_v8 = vld [vmem:[%s13980_s9 + $0x19e8] sm:$0xff]  ;;  %v2731_v20 = vld [vmem:[%s13980_s9 + $0x19d8] sm:$0xff] }
 0x4c4   :  { %7152 = vmatprep.subr.bf16.mxu1 %v7151_v4  ;;  %v7167_v4 = vpack.c.bf16 %v2703_v50, %v2699_v49  ;;  %v2735_v22 = vld [vmem:[%s13980_s9 + $0x19f8] sm:$0xff]  ;;  %v7181_v50 = vpack.c.bf16 %v2726_v55, %v2722_v12  ;;  %v2750_v36 = vld [vmem:[%s13980_s9 + $0x1a70] sm:$0xff]  ;;  %v2765_v55 = vld [vmem:[%s13980_s9 + $0x1ae8] sm:$0xff] }
 0x4c5   :  { %v2758_v12 = vld [vmem:[%s13980_s9 + $0x1ab0] sm:$0xff] }
 0x4c6   :  { %6386 = vmatpush1.bf16.msra.mxu0 %v6385_v17  ;;  %v6401_v17 = vpack.c.bf16 %v2700_v60, %v2696_v52  ;;  %v2730_v52 = vld [vmem:[%s13980_s9 + $0x19d0] sm:$0xff]  ;;  %v7183_v60 = vpack.c.bf16 %v2735_v22, %v2731_v20 }
 0x4c7   :  { %7154 = vmatpush1.bf16.msra.mxu1 %v7153_v40  ;;  %6388 = vmatprep.subr.bf16.mxu0 %v6387_v27  ;;  %v7169_v40 = vpack.c.bf16 %v2702_v13, %v2698_v61  ;;  %v6403_v27 = vpack.c.bf16 %v2709_v16, %v2705_v9  ;;  %v2734_v61 = vld [vmem:[%s13980_s9 + $0x19f0] sm:$0xff]  ;;  %v2741_v13 = vld [vmem:[%s13980_s9 + $0x1a28] sm:$0xff]  ;;  %v2739_v9 = vld [vmem:[%s13980_s9 + $0x1a18] sm:$0xff] }
 0x4c8   :  { %7156 = vmatprep.subr.bf16.mxu1 %v7155_v45  ;;  %v2706_v45 = vld [vmem:[%s13980_s9 + $0x1910] sm:$0xff]  ;;  %v2743_v16 = vld [vmem:[%s13980_s9 + $0x1a38] sm:$0xff]  ;;  %v7185_v30 = vpack.c.bf16 %v2734_v61, %v2730_v52  ;;  %v2773_v61 = vld [vmem:[%s13980_s9 + $0x1b28] sm:$0xff] }
 0x4c9   :  { %3882 = vmatmul.mubr.f32.vlgmr.msra.gmra.mrb[24].mxu0 %v1890_v51  ;;  %v7187_v23 = vpack.c.bf16 %v2743_v16, %v2739_v9  ;;  %v2766_v52 = vld [vmem:[%s13980_s9 + $0x1af0] sm:$0xff] }
 0x4ca   :  { %4734 = vmatmul.mubr.f32.vlgmr.msra.gmra.mrb[72].mxu1 %v1890_v51  ;;  %6390 = vmatpush1.bf16.msra.mxu0 %v6389_v53  ;;  %v2715_v53 = vld [vmem:[%s13980_s9 + $0x1958] sm:$0xff]  ;;  %v7173_v51 = vpack.c.bf16 %v2710_v18, %v2706_v45  ;;  %v2742_v45 = vld [vmem:[%s13980_s9 + $0x1a30] sm:$0xff]  ;;  %v2749_v18 = vld [vmem:[%s13980_s9 + $0x1a68] sm:$0xff] }
 0x4cb   :  { %3952 = vmatprep.mubr.f32.mxu0 %v1893_v35  ;;  %7158 = vmatpush1.bf16.msra.mxu1 %v7157_v10  ;;  %v6407_v10 = vpack.c.bf16 %v2717_v39, %v2713_v38  ;;  %v2747_v38 = vld [vmem:[%s13980_s9 + $0x1a58] sm:$0xff] }
 0x4cc   :  { %4804 = vmatprep.mubr.f32.mxu1 %v1893_v35  ;;  %6392 = vmatprep.subr.bf16.mxu0 %v6391_v28  ;;  %v7175_v28 = vpack.c.bf16 %v2719_v44, %v2715_v53  ;;  %v2723_v35 = vld [vmem:[%s13980_s9 + $0x1998] sm:$0xff]  ;;  %v7189_v44 = vpack.c.bf16 %v2742_v45, %v2738_v43  ;;  %v2774_v43 = vld [vmem:[%s13980_s9 + $0x1b30] sm:$0xff]  ;;  %v2781_v45 = vld [vmem:[%s13980_s9 + $0x1b68] sm:$0xff] }
 0x4cd   :  { %7160 = vmatprep.subr.bf16.mxu1 %v7159_v24  ;;  %v2727_v24 = vld [vmem:[%s13980_s9 + $0x19b8] sm:$0xff] }
 0x4ce   :  { %6394 = vmatpush1.bf16.msra.mxu0 %v6393_v11  ;;  %v6411_v11 = vpack.c.bf16 %v2725_v7, %v2721_v63  ;;  %v7179_v32 = vpack.c.bf16 %v2727_v24, %v2723_v35  ;;  %v2751_v39 = vld [vmem:[%s13980_s9 + $0x1a78] sm:$0xff]  ;;  %v7193_v24 = vpack.c.bf16 %v2750_v36, %v2746_v0  ;;  %v2782_v0 = vld [vmem:[%s13980_s9 + $0x1b70] sm:$0xff]  ;;  %v2789_v36 = vld [vmem:[%s13980_s9 + $0x1ba8] sm:$0xff] }
 0x4cf   :  { %7162 = vmatpush1.bf16.msra.mxu1 %v7161_v15  ;;  %6396 = vmatprep.subr.bf16.mxu0 %v6395_v41  ;;  %v2720_v15 = vld [vmem:[%s13980_s9 + $0x1980] sm:$0xff]  ;;  %v7191_v21 = vpack.c.bf16 %v2751_v39, %v2747_v38  ;;  %v2755_v63 = vld [vmem:[%s13980_s9 + $0x1a98] sm:$0xff] }
 0x4d0   :  { %7164 = vmatprep.subr.bf16.mxu1 %v7163_v2  ;;  %v2724_v41 = vld [vmem:[%s13980_s9 + $0x19a0] sm:$0xff]  ;;  %v2729_v2 = vld [vmem:[%s13980_s9 + $0x19c8] sm:$0xff]  ;;  %v2759_v7 = vld [vmem:[%s13980_s9 + $0x1ab8] sm:$0xff] }
 0x4d1   :  { %v6413_v49 = vpack.c.bf16 %v2724_v41, %v2720_v15  ;;  %v2754_v15 = vld [vmem:[%s13980_s9 + $0x1a90] sm:$0xff]  ;;  %v7195_v41 = vpack.c.bf16 %v2759_v7, %v2755_v63 }
 0x4d2   :  { %6398 = vmatpush1.bf16.msra.mxu0 %v6397_v19  ;;  %v6415_v19 = vpack.c.bf16 %v2733_v8, %v2729_v2  ;;  %v2763_v2 = vld [vmem:[%s13980_s9 + $0x1ad8] sm:$0xff]  ;;  %v7197_v22 = vpack.c.bf16 %v2758_v12, %v2754_v15  ;;  %v2790_v15 = vld [vmem:[%s13980_s9 + $0x1bb0] sm:$0xff]  ;;  %v2797_v12 = vld [vmem:[%s13980_s9 + $0x1be8] sm:$0xff] }
 0x4d3   :  { %7166 = vmatpush1.bf16.msra.mxu1 %v7165_v62  ;;  %6400 = vmatprep.subr.bf16.mxu0 %v6399_v25  ;;  %v2728_v62 = vld [vmem:[%s13980_s9 + $0x19c0] sm:$0xff]  ;;  %v2767_v8 = vld [vmem:[%s13980_s9 + $0x1af8] sm:$0xff] }
 0x4d4   :  { %7168 = vmatprep.subr.bf16.mxu1 %v7167_v4  ;;  %v2732_v25 = vld [vmem:[%s13980_s9 + $0x19e0] sm:$0xff]  ;;  %v2737_v4 = vld [vmem:[%s13980_s9 + $0x1a08] sm:$0xff] }
 0x4d5   :  { %v6417_v14 = vpack.c.bf16 %v2732_v25, %v2728_v62  ;;  %v2762_v62 = vld [vmem:[%s13980_s9 + $0x1ad0] sm:$0xff]  ;;  %v7199_v25 = vpack.c.bf16 %v2767_v8, %v2763_v2 }
 0x4d6   :  { %6402 = vmatpush1.bf16.msra.mxu0 %v6401_v17  ;;  %v6419_v17 = vpack.c.bf16 %v2741_v13, %v2737_v4  ;;  %v2771_v4 = vld [vmem:[%s13980_s9 + $0x1b18] sm:$0xff]  ;;  %v7201_v16 = vpack.c.bf16 %v2766_v52, %v2762_v62  ;;  %v2798_v62 = vld [vmem:[%s13980_s9 + $0x1bf0] sm:$0xff]  ;;  %v2805_v52 = vld [vmem:[%s13980_s9 + $0x1c28] sm:$0xff] }
 0x4d7   :  { %7170 = vmatpush1.bf16.msra.mxu1 %v7169_v40  ;;  %6404 = vmatprep.subr.bf16.mxu0 %v6403_v27  ;;  %v2736_v40 = vld [vmem:[%s13980_s9 + $0x1a00] sm:$0xff]  ;;  %v2775_v13 = vld [vmem:[%s13980_s9 + $0x1b38] sm:$0xff] }
 0x4d8   :  { %7172 = vmatprep.subr.bf16.mxu1 %v7171_v34  ;;  %v2740_v27 = vld [vmem:[%s13980_s9 + $0x1a20] sm:$0xff]  ;;  %v2745_v34 = vld [vmem:[%s13980_s9 + $0x1a48] sm:$0xff] }
 0x4d9   :  { %v6421_v53 = vpack.c.bf16 %v2740_v27, %v2736_v40  ;;  %v2770_v40 = vld [vmem:[%s13980_s9 + $0x1b10] sm:$0xff]  ;;  %v7203_v27 = vpack.c.bf16 %v2775_v13, %v2771_v4 }
 0x4da   :  { %6406 = vmatpush1.bf16.msra.mxu0 %v6405_v48  ;;  %v6423_v48 = vpack.c.bf16 %v2749_v18, %v2745_v34  ;;  %v2779_v34 = vld [vmem:[%s13980_s9 + $0x1b58] sm:$0xff]  ;;  %v7205_v39 = vpack.c.bf16 %v2774_v43, %v2770_v40  ;;  %v2806_v40 = vld [vmem:[%s13980_s9 + $0x1c30] sm:$0xff]  ;;  %v2813_v43 = vld [vmem:[%s13980_s9 + $0x1c68] sm:$0xff] }
 0x4db   :  { %7174 = vmatpush1.bf16.msra.mxu1 %v7173_v51  ;;  %6408 = vmatprep.subr.bf16.mxu0 %v6407_v10  ;;  %v2744_v51 = vld [vmem:[%s13980_s9 + $0x1a40] sm:$0xff]  ;;  %v2783_v18 = vld [vmem:[%s13980_s9 + $0x1b78] sm:$0xff] }
 0x4dc   :  { %7176 = vmatprep.subr.bf16.mxu1 %v7175_v28  ;;  %v2748_v10 = vld [vmem:[%s13980_s9 + $0x1a60] sm:$0xff]  ;;  %v2753_v28 = vld [vmem:[%s13980_s9 + $0x1a88] sm:$0xff] }
 0x4dd   :  { %v6425_v35 = vpack.c.bf16 %v2748_v10, %v2744_v51  ;;  %v2778_v51 = vld [vmem:[%s13980_s9 + $0x1b50] sm:$0xff]  ;;  %v7207_v10 = vpack.c.bf16 %v2783_v18, %v2779_v34  ;;  %v2815_v34 = vld [vmem:[%s13980_s9 + $0x1c78] sm:$0xff]  ;;  %v1892_v18 = vmax.f32 %v9444_v54, 0.0 }
 0x4de   :  { %6410 = vmatpush1.bf16.msra.mxu0 %v6409_v46  ;;  %v6427_v46 = vpack.c.bf16 %v2757_v37, %v2753_v28  ;;  %v2787_v28 = vld [vmem:[%s13980_s9 + $0x1b98] sm:$0xff]  ;;  %v7209_v7 = vpack.c.bf16 %v2782_v0, %v2778_v51  ;;  %v2814_v54 = vld [vmem:[%s13980_s9 + $0x1c70] sm:$0xff]  ;;  %v2817_v51 = vld [vmem:[%s13980_s9 + $0x1c88] sm:$0xff]  ;;  %v1895_v0 = vmax.f32 %v9486_v42, 0.0 }
 0x4df   :  { %7178 = vmatpush1.bf16.msra.mxu1 %v7177_v1  ;;  %6412 = vmatprep.subr.bf16.mxu0 %v6411_v11  ;;  %v2752_v1 = vld [vmem:[%s13980_s9 + $0x1a80] sm:$0xff]  ;;  %v2791_v37 = vld [vmem:[%s13980_s9 + $0x1bb8] sm:$0xff] }
 0x4e0   :  { %7180 = vmatprep.subr.bf16.mxu1 %v7179_v32  ;;  %v2756_v11 = vld [vmem:[%s13980_s9 + $0x1aa0] sm:$0xff]  ;;  %v2761_v32 = vld [vmem:[%s13980_s9 + $0x1ac8] sm:$0xff] }
 0x4e1   :  { %v6429_v20 = vpack.c.bf16 %v2756_v11, %v2752_v1  ;;  %v2786_v1 = vld [vmem:[%s13980_s9 + $0x1b90] sm:$0xff]  ;;  %v7211_v11 = vpack.c.bf16 %v2791_v37, %v2787_v28  ;;  %v2823_v28 = vld [vmem:[%s13980_s9 + $0x1cb8] sm:$0xff]  ;;  %v2816_v42 = vld [vmem:[%s13980_s9 + $0x1c80] sm:$0xff] }
 0x4e2   :  { %6414 = vmatpush1.bf16.msra.mxu0 %v6413_v49  ;;  %v6431_v49 = vpack.c.bf16 %v2765_v55, %v2761_v32  ;;  %v2795_v32 = vld [vmem:[%s13980_s9 + $0x1bd8] sm:$0xff]  ;;  %v7213_v8 = vpack.c.bf16 %v2790_v15, %v2786_v1  ;;  %v2822_v1 = vld [vmem:[%s13980_s9 + $0x1cb0] sm:$0xff]  ;;  %v2829_v15 = vld [vmem:[%s13980_s9 + $0x1ce8] sm:$0xff] }
 0x4e3   :  { %7182 = vmatpush1.bf16.msra.mxu1 %v7181_v50  ;;  %6416 = vmatprep.subr.bf16.mxu0 %v6415_v19  ;;  %v2760_v50 = vld [vmem:[%s13980_s9 + $0x1ac0] sm:$0xff]  ;;  %v2799_v55 = vld [vmem:[%s13980_s9 + $0x1bf8] sm:$0xff] }
 0x4e4   :  { %7184 = vmatprep.subr.bf16.mxu1 %v7183_v60  ;;  %v2764_v19 = vld [vmem:[%s13980_s9 + $0x1ae0] sm:$0xff]  ;;  %v2769_v60 = vld [vmem:[%s13980_s9 + $0x1b08] sm:$0xff] }
 0x4e5   :  { %v6433_v9 = vpack.c.bf16 %v2764_v19, %v2760_v50  ;;  %v2794_v50 = vld [vmem:[%s13980_s9 + $0x1bd0] sm:$0xff]  ;;  %v7215_v19 = vpack.c.bf16 %v2799_v55, %v2795_v32 }
 0x4e6   :  { %6418 = vmatpush1.bf16.msra.mxu0 %v6417_v14  ;;  %v6435_v14 = vpack.c.bf16 %v2773_v61, %v2769_v60  ;;  %v2803_v60 = vld [vmem:[%s13980_s9 + $0x1c18] sm:$0xff]  ;;  %v7217_v13 = vpack.c.bf16 %v2798_v62, %v2794_v50  ;;  %v2830_v50 = vld [vmem:[%s13980_s9 + $0x1cf0] sm:$0xff]  ;;  %v2837_v62 = vld [vmem:[%s13980_s9 + $0x1d28] sm:$0xff] }
 0x4e7   :  { %7186 = vmatpush1.bf16.msra.mxu1 %v7185_v30  ;;  %6420 = vmatprep.subr.bf16.mxu0 %v6419_v17  ;;  %v2768_v30 = vld [vmem:[%s13980_s9 + $0x1b00] sm:$0xff]  ;;  %v2807_v61 = vld [vmem:[%s13980_s9 + $0x1c38] sm:$0xff] }
 0x4e8   :  { %7188 = vmatprep.subr.bf16.mxu1 %v7187_v23  ;;  %v2772_v17 = vld [vmem:[%s13980_s9 + $0x1b20] sm:$0xff]  ;;  %v2777_v23 = vld [vmem:[%s13980_s9 + $0x1b48] sm:$0xff] }
 0x4e9   :  { %v6437_v38 = vpack.c.bf16 %v2772_v17, %v2768_v30  ;;  %v7219_v30 = vpack.c.bf16 %v2807_v61, %v2803_v60  ;;  %v2802_v17 = vld [vmem:[%s13980_s9 + $0x1c10] sm:$0xff] }
 0x4ea   :  { %6422 = vmatpush1.bf16.msra.mxu0 %v6421_v53  ;;  %v6439_v53 = vpack.c.bf16 %v2781_v45, %v2777_v23  ;;  %v2811_v45 = vld [vmem:[%s13980_s9 + $0x1c58] sm:$0xff] }
 0x4eb   :  { %7190 = vmatpush1.bf16.msra.mxu1 %v7189_v44  ;;  %6424 = vmatprep.subr.bf16.mxu0 %v6423_v48  ;;  %v2776_v44 = vld [vmem:[%s13980_s9 + $0x1b40] sm:$0xff] }
 0x4ec   :  { %7192 = vmatprep.subr.bf16.mxu1 %v7191_v21  ;;  %v2780_v48 = vld [vmem:[%s13980_s9 + $0x1b60] sm:$0xff]  ;;  %v2785_v21 = vld [vmem:[%s13980_s9 + $0x1b88] sm:$0xff] }
 0x4ed   :  { %v6441_v63 = vpack.c.bf16 %v2780_v48, %v2776_v44  ;;  %v2810_v44 = vld [vmem:[%s13980_s9 + $0x1c50] sm:$0xff] }
 0x4ee   :  { %6426 = vmatpush1.bf16.msra.mxu0 %v6425_v35  ;;  %v6443_v35 = vpack.c.bf16 %v2789_v36, %v2785_v21  ;;  %v7223_v21 = vpack.c.bf16 %v2815_v34, %v2811_v45  ;;  %v2819_v36 = vld [vmem:[%s13980_s9 + $0x1c98] sm:$0xff] }
 0x4ef   :  { %7194 = vmatpush1.bf16.msra.mxu1 %v7193_v24  ;;  %6428 = vmatprep.subr.bf16.mxu0 %v6427_v46  ;;  %v2784_v24 = vld [vmem:[%s13980_s9 + $0x1b80] sm:$0xff] }
 0x4f0   :  { %7196 = vmatprep.subr.bf16.mxu1 %v7195_v41  ;;  %v2788_v46 = vld [vmem:[%s13980_s9 + $0x1ba0] sm:$0xff]  ;;  %v2793_v41 = vld [vmem:[%s13980_s9 + $0x1bc8] sm:$0xff] }
 0x4f1   :  { %v6445_v2 = vpack.c.bf16 %v2788_v46, %v2784_v24  ;;  %v2818_v24 = vld [vmem:[%s13980_s9 + $0x1c90] sm:$0xff]  ;;  %v7227_v46 = vpack.c.bf16 %v2823_v28, %v2819_v36  ;;  %v2848_v28 = vld [vmem:[%s13980_s9 + $0x1d80] sm:$0xff] }
 0x4f2   :  { %6430 = vmatpush1.bf16.msra.mxu0 %v6429_v20  ;;  %v6447_v20 = vpack.c.bf16 %v2797_v12, %v2793_v41  ;;  %v2827_v41 = vld [vmem:[%s13980_s9 + $0x1cd8] sm:$0xff]  ;;  %v7229_v55 = vpack.c.bf16 %v2822_v1, %v2818_v24  ;;  %v2861_v24 = vld [vmem:[%s13980_s9 + $0x1de8] sm:$0xff] }
 0x4f3   :  { %7198 = vmatpush1.bf16.msra.mxu1 %v7197_v22  ;;  %6432 = vmatprep.subr.bf16.mxu0 %v6431_v49  ;;  %v2792_v22 = vld [vmem:[%s13980_s9 + $0x1bc0] sm:$0xff]  ;;  %v2831_v12 = vld [vmem:[%s13980_s9 + $0x1cf8] sm:$0xff] }
 0x4f4   :  { %7200 = vmatprep.subr.bf16.mxu1 %v7199_v25  ;;  %v2796_v49 = vld [vmem:[%s13980_s9 + $0x1be0] sm:$0xff]  ;;  %v2801_v25 = vld [vmem:[%s13980_s9 + $0x1c08] sm:$0xff]  ;;  %v2863_v1 = vld [vmem:[%s13980_s9 + $0x1df8] sm:$0xff] }
 0x4f5   :  { %v6449_v4 = vpack.c.bf16 %v2796_v49, %v2792_v22  ;;  %v2826_v22 = vld [vmem:[%s13980_s9 + $0x1cd0] sm:$0xff]  ;;  %v7231_v49 = vpack.c.bf16 %v2831_v12, %v2827_v41  ;;  %v2856_v12 = vld [vmem:[%s13980_s9 + $0x1dc0] sm:$0xff] }
 0x4f6   :  { %6434 = vmatpush1.bf16.msra.mxu0 %v6433_v9  ;;  %v6451_v9 = vpack.c.bf16 %v2805_v52, %v2801_v25  ;;  %v2835_v25 = vld [vmem:[%s13980_s9 + $0x1d18] sm:$0xff]  ;;  %v7233_v61 = vpack.c.bf16 %v2830_v50, %v2826_v22  ;;  %v2869_v22 = vld [vmem:[%s13980_s9 + $0x1e28] sm:$0xff] }
 0x4f7   :  { %7202 = vmatpush1.bf16.msra.mxu1 %v7201_v16  ;;  %6436 = vmatprep.subr.bf16.mxu0 %v6435_v14  ;;  %v2800_v16 = vld [vmem:[%s13980_s9 + $0x1c00] sm:$0xff]  ;;  %v2839_v52 = vld [vmem:[%s13980_s9 + $0x1d38] sm:$0xff] }
 0x4f8   :  { %7204 = vmatprep.subr.bf16.mxu1 %v7203_v27  ;;  %v2804_v14 = vld [vmem:[%s13980_s9 + $0x1c20] sm:$0xff]  ;;  %v2809_v27 = vld [vmem:[%s13980_s9 + $0x1c48] sm:$0xff]  ;;  %v2871_v50 = vld [vmem:[%s13980_s9 + $0x1e38] sm:$0xff] }
 0x4f9   :  { %v6453_v23 = vpack.c.bf16 %v2804_v14, %v2800_v16  ;;  %v6455_v48 = vpack.c.bf16 %v2813_v43, %v2809_v27  ;;  %v2834_v16 = vld [vmem:[%s13980_s9 + $0x1d10] sm:$0xff]  ;;  %v7235_v14 = vpack.c.bf16 %v2839_v52, %v2835_v25  ;;  %v2843_v27 = vld [vmem:[%s13980_s9 + $0x1d58] sm:$0xff]  ;;  %v2864_v52 = vld [vmem:[%s13980_s9 + $0x1e00] sm:$0xff] }
 0x4fa   :  { %6438 = vmatpush1.bf16.msra.mxu0 %v6437_v38  ;;  %v7221_v38 = vpack.c.bf16 %v2806_v40, %v2802_v17  ;;  %v2841_v17 = vld [vmem:[%s13980_s9 + $0x1d48] sm:$0xff]  ;;  %v2847_v43 = vld [vmem:[%s13980_s9 + $0x1d78] sm:$0xff] }
 0x4fb   :  { %7206 = vmatpush1.bf16.msra.mxu1 %v7205_v39  ;;  %6440 = vmatprep.subr.bf16.mxu0 %v6439_v53  ;;  %v2808_v39 = vld [vmem:[%s13980_s9 + $0x1c40] sm:$0xff]  ;;  %v2845_v40 = vld [vmem:[%s13980_s9 + $0x1d68] sm:$0xff] }
 0x4fc   :  { %7208 = vmatprep.subr.bf16.mxu1 %v7207_v10  ;;  %v2812_v53 = vld [vmem:[%s13980_s9 + $0x1c60] sm:$0xff]  ;;  %v2821_v10 = vld [vmem:[%s13980_s9 + $0x1ca8] sm:$0xff]  ;;  %v6471_v34 = vpack.c.bf16 %v2845_v40, %v2841_v17 }
 0x4fd   :  { %v6457_v37 = vpack.c.bf16 %v2812_v53, %v2808_v39  ;;  %v2842_v39 = vld [vmem:[%s13980_s9 + $0x1d50] sm:$0xff]  ;;  %v7239_v53 = vpack.c.bf16 %v2847_v43, %v2843_v27  ;;  %v2872_v43 = vld [vmem:[%s13980_s9 + $0x1e40] sm:$0xff] }
 0x4fe   :  { %6442 = vmatpush1.bf16.msra.mxu0 %v6441_v63  ;;  %v7225_v63 = vpack.c.bf16 %v2814_v54, %v2810_v44  ;;  %v2846_v44 = vld [vmem:[%s13980_s9 + $0x1d70] sm:$0xff]  ;;  %v2853_v54 = vld [vmem:[%s13980_s9 + $0x1da8] sm:$0xff] }
 0x4ff   :  { %7210 = vmatpush1.bf16.msra.mxu1 %v7209_v7  ;;  %6444 = vmatprep.subr.bf16.mxu0 %v6443_v35  ;;  %v6459_v7 = vpack.c.bf16 %v2821_v10, %v2817_v51  ;;  %v2820_v35 = vld [vmem:[%s13980_s9 + $0x1ca0] sm:$0xff]  ;;  %v2851_v51 = vld [vmem:[%s13980_s9 + $0x1d98] sm:$0xff] }
 0x500   :  { %7212 = vmatprep.subr.bf16.mxu1 %v7211_v11  ;;  %v2825_v11 = vld [vmem:[%s13980_s9 + $0x1cc8] sm:$0xff]  ;;  %v6461_v32 = vpack.c.bf16 %v2820_v35, %v2816_v42  ;;  %v2855_v10 = vld [vmem:[%s13980_s9 + $0x1db8] sm:$0xff]  ;;  %v2854_v42 = vld [vmem:[%s13980_s9 + $0x1db0] sm:$0xff] }
 0x501   :  { %v2857_v35 = vld [vmem:[%s13980_s9 + $0x1dc8] sm:$0xff] }
 0x502   :  { %6446 = vmatpush1.bf16.msra.mxu0 %v6445_v2  ;;  %v6463_v2 = vpack.c.bf16 %v2829_v15, %v2825_v11  ;;  %v6479_v41 = vpack.c.bf16 %v2861_v24, %v2857_v35 }
 0x503   :  { %7214 = vmatpush1.bf16.msra.mxu1 %v7213_v8  ;;  %6448 = vmatprep.subr.bf16.mxu0 %v6447_v20  ;;  %v2824_v8 = vld [vmem:[%s13980_s9 + $0x1cc0] sm:$0xff] }
 0x504   :  { %7216 = vmatprep.subr.bf16.mxu1 %v7215_v19  ;;  %v2828_v20 = vld [vmem:[%s13980_s9 + $0x1ce0] sm:$0xff]  ;;  %v2833_v19 = vld [vmem:[%s13980_s9 + $0x1d08] sm:$0xff] }
 0x505   :  { %v6465_v60 = vpack.c.bf16 %v2828_v20, %v2824_v8  ;;  %v2862_v8 = vld [vmem:[%s13980_s9 + $0x1df0] sm:$0xff]  ;;  %v2865_v20 = vld [vmem:[%s13980_s9 + $0x1e08] sm:$0xff] }
 0x506   :  { %6450 = vmatpush1.bf16.msra.mxu0 %v6449_v4  ;;  %v6467_v4 = vpack.c.bf16 %v2837_v62, %v2833_v19  ;;  %v6483_v25 = vpack.c.bf16 %v2869_v22, %v2865_v20 }
 0x507   :  { %7218 = vmatpush1.bf16.msra.mxu1 %v7217_v13  ;;  %6452 = vmatprep.subr.bf16.mxu0 %v6451_v9  ;;  %v2832_v13 = vld [vmem:[%s13980_s9 + $0x1d00] sm:$0xff] }
 0x508   :  { %7220 = vmatprep.subr.bf16.mxu1 %v7219_v30  ;;  %v2836_v9 = vld [vmem:[%s13980_s9 + $0x1d20] sm:$0xff]  ;;  %v2838_v30 = vld [vmem:[%s13980_s9 + $0x1d30] sm:$0xff] }
 0x509   :  { %3953 = vmatmul.mubr.f32.vlgmr.msra.gmra.mrb[24].mxu0 %v1892_v18  ;;  %v7237_v45 = vpack.c.bf16 %v2838_v30, %v2834_v16  ;;  %v2877_v16 = vld [vmem:[%s13980_s9 + $0x1e68] sm:$0xff]  ;;  %v2879_v30 = vld [vmem:[%s13980_s9 + $0x1e78] sm:$0xff] }
 0x50a   :  { %4805 = vmatmul.mubr.f32.vlgmr.msra.gmra.mrb[72].mxu1 %v1892_v18  ;;  %6454 = vmatpush1.bf16.msra.mxu0 %v6453_v23  ;;  %v6469_v23 = vpack.c.bf16 %v2836_v9, %v2832_v13  ;;  %v2840_v18 = vld [vmem:[%s13980_s9 + $0x1d40] sm:$0xff]  ;;  %v2870_v13 = vld [vmem:[%s13980_s9 + $0x1e30] sm:$0xff]  ;;  %v2873_v9 = vld [vmem:[%s13980_s9 + $0x1e48] sm:$0xff] }
 0x50b   :  { %4023 = vmatprep.mubr.f32.mxu0 %v1895_v0  ;;  %7222 = vmatpush1.bf16.msra.mxu1 %v7221_v38  ;;  %v2844_v38 = vld [vmem:[%s13980_s9 + $0x1d60] sm:$0xff]  ;;  %v6487_v27 = vpack.c.bf16 %v2877_v16, %v2873_v9 }
 0x50c   :  { %4875 = vmatprep.mubr.f32.mxu1 %v1895_v0  ;;  %6456 = vmatprep.subr.bf16.mxu0 %v6455_v48  ;;  %v2849_v48 = vld [vmem:[%s13980_s9 + $0x1d88] sm:$0xff]  ;;  %v6473_v0 = vpack.c.bf16 %v2844_v38, %v2840_v18  ;;  %v2878_v18 = vld [vmem:[%s13980_s9 + $0x1e70] sm:$0xff] }
 0x50d   :  { %7224 = vmatprep.subr.bf16.mxu1 %v7223_v21  ;;  %v7241_v21 = vpack.c.bf16 %v2846_v44, %v2842_v39  ;;  %v6475_v36 = vpack.c.bf16 %v2853_v54, %v2849_v48  ;;  %v2881_v38 = vld [vmem:[%s13980_s9 + $0x1e88] sm:$0xff]  ;;  %v2887_v44 = vld [vmem:[%s13980_s9 + $0x1eb8] sm:$0xff] }
 0x50e   :  { %6458 = vmatpush1.bf16.msra.mxu0 %v6457_v37  ;;  %v2852_v37 = vld [vmem:[%s13980_s9 + $0x1da0] sm:$0xff]  ;;  %v2885_v39 = vld [vmem:[%s13980_s9 + $0x1ea8] sm:$0xff] }
 0x50f   :  { %7226 = vmatpush1.bf16.msra.mxu1 %v7225_v63  ;;  %6460 = vmatprep.subr.bf16.mxu0 %v6459_v7  ;;  %v2850_v63 = vld [vmem:[%s13980_s9 + $0x1d90] sm:$0xff]  ;;  %v7243_v7 = vpack.c.bf16 %v2855_v10, %v2851_v51  ;;  %v6477_v11 = vpack.c.bf16 %v2852_v37, %v2848_v28  ;;  %v6491_v51 = vpack.c.bf16 %v2885_v39, %v2881_v38  ;;  %v2880_v10 = vld [vmem:[%s13980_s9 + $0x1e80] sm:$0xff]  ;;  %v2889_v37 = vld [vmem:[%s13980_s9 + $0x1ec8] sm:$0xff] }
 0x510   :  { %7228 = vmatprep.subr.bf16.mxu1 %v7227_v46  ;;  %v2859_v46 = vld [vmem:[%s13980_s9 + $0x1dd8] sm:$0xff]  ;;  %v7245_v15 = vpack.c.bf16 %v2854_v42, %v2850_v63  ;;  %v2886_v28 = vld [vmem:[%s13980_s9 + $0x1eb0] sm:$0xff]  ;;  %v2893_v63 = vld [vmem:[%s13980_s9 + $0x1ee8] sm:$0xff] }
 0x511   :  { %v2895_v42 = vld [vmem:[%s13980_s9 + $0x1ef8] sm:$0xff] }
 0x512   :  { %6462 = vmatpush1.bf16.msra.mxu0 %v6461_v32  ;;  %v2860_v32 = vld [vmem:[%s13980_s9 + $0x1de0] sm:$0xff] }
 0x513   :  { %7230 = vmatpush1.bf16.msra.mxu1 %v7229_v55  ;;  %6464 = vmatprep.subr.bf16.mxu0 %v6463_v2  ;;  %v2858_v55 = vld [vmem:[%s13980_s9 + $0x1dd0] sm:$0xff]  ;;  %v7247_v2 = vpack.c.bf16 %v2863_v1, %v2859_v46  ;;  %v6481_v19 = vpack.c.bf16 %v2860_v32, %v2856_v12  ;;  %v6495_v46 = vpack.c.bf16 %v2893_v63, %v2889_v37  ;;  %v2888_v1 = vld [vmem:[%s13980_s9 + $0x1ec0] sm:$0xff]  ;;  %v2897_v32 = vld [vmem:[%s13980_s9 + $0x1f08] sm:$0xff] }
 0x514   :  { %7232 = vmatprep.subr.bf16.mxu1 %v7231_v49  ;;  %v2867_v49 = vld [vmem:[%s13980_s9 + $0x1e18] sm:$0xff]  ;;  %v7249_v62 = vpack.c.bf16 %v2862_v8, %v2858_v55  ;;  %v2894_v12 = vld [vmem:[%s13980_s9 + $0x1ef0] sm:$0xff]  ;;  %v2901_v55 = vld [vmem:[%s13980_s9 + $0x1f28] sm:$0xff] }
 0x515   :  { %v2903_v8 = vld [vmem:[%s13980_s9 + $0x1f38] sm:$0xff] }
 0x516   :  { %6466 = vmatpush1.bf16.msra.mxu0 %v6465_v60  ;;  %v2868_v60 = vld [vmem:[%s13980_s9 + $0x1e20] sm:$0xff] }
 0x517   :  { %7234 = vmatpush1.bf16.msra.mxu1 %v7233_v61  ;;  %6468 = vmatprep.subr.bf16.mxu0 %v6467_v4  ;;  %v2866_v61 = vld [vmem:[%s13980_s9 + $0x1e10] sm:$0xff]  ;;  %v7251_v4 = vpack.c.bf16 %v2871_v50, %v2867_v49  ;;  %v6485_v17 = vpack.c.bf16 %v2868_v60, %v2864_v52  ;;  %v6499_v49 = vpack.c.bf16 %v2901_v55, %v2897_v32  ;;  %v2896_v50 = vld [vmem:[%s13980_s9 + $0x1f00] sm:$0xff]  ;;  %v2905_v60 = vld [vmem:[%s13980_s9 + $0x1f48] sm:$0xff] }
 0x518   :  { %7236 = vmatprep.subr.bf16.mxu1 %v7235_v14  ;;  %v2875_v14 = vld [vmem:[%s13980_s9 + $0x1e58] sm:$0xff]  ;;  %v7253_v40 = vpack.c.bf16 %v2870_v13, %v2866_v61  ;;  %v2902_v52 = vld [vmem:[%s13980_s9 + $0x1f30] sm:$0xff]  ;;  %v2909_v61 = vld [vmem:[%s13980_s9 + $0x1f68] sm:$0xff] }
 0x519   :  { %v2911_v13 = vld [vmem:[%s13980_s9 + $0x1f78] sm:$0xff] }
 0x51a   :  { %6470 = vmatpush1.bf16.msra.mxu0 %v6469_v23  ;;  %v2876_v23 = vld [vmem:[%s13980_s9 + $0x1e60] sm:$0xff] }
 0x51b   :  { %7238 = vmatpush1.bf16.msra.mxu1 %v7237_v45  ;;  %6472 = vmatprep.subr.bf16.mxu0 %v6471_v34  ;;  %v2874_v45 = vld [vmem:[%s13980_s9 + $0x1e50] sm:$0xff]  ;;  %v7255_v34 = vpack.c.bf16 %v2879_v30, %v2875_v14  ;;  %v6489_v48 = vpack.c.bf16 %v2876_v23, %v2872_v43  ;;  %v6503_v14 = vpack.c.bf16 %v2909_v61, %v2905_v60  ;;  %v2904_v30 = vld [vmem:[%s13980_s9 + $0x1f40] sm:$0xff]  ;;  %v2913_v23 = vld [vmem:[%s13980_s9 + $0x1f88] sm:$0xff]  ;;  %v1894_v61 = vmax.f32 %v9474_v5, 0.0 }
 0x51c   :  { %7240 = vmatprep.subr.bf16.mxu1 %v7239_v53  ;;  %v2883_v53 = vld [vmem:[%s13980_s9 + $0x1e98] sm:$0xff]  ;;  %v7257_v54 = vpack.c.bf16 %v2878_v18, %v2874_v45  ;;  %v2910_v43 = vld [vmem:[%s13980_s9 + $0x1f70] sm:$0xff]  ;;  %v2917_v45 = vld [vmem:[%s13980_s9 + $0x1fa8] sm:$0xff] }
 0x51d   :  { %v2919_v18 = vld [vmem:[%s13980_s9 + $0x1fb8] sm:$0xff]  ;;  %v2942_v5 = vld [vmem:[%s13980_s9 + $0x2070] sm:$0xff] }
 0x51e   :  { %6474 = vmatpush1.bf16.msra.mxu0 %v6473_v0  ;;  %v2884_v0 = vld [vmem:[%s13980_s9 + $0x1ea0] sm:$0xff]  ;;  %v2943_v60 = vld [vmem:[%s13980_s9 + $0x2078] sm:$0xff] }
 0x51f   :  { %7242 = vmatpush1.bf16.msra.mxu1 %v7241_v21  ;;  %6476 = vmatprep.subr.bf16.mxu0 %v6475_v36  ;;  %v2882_v21 = vld [vmem:[%s13980_s9 + $0x1e90] sm:$0xff]  ;;  %v7259_v36 = vpack.c.bf16 %v2887_v44, %v2883_v53  ;;  %v6493_v35 = vpack.c.bf16 %v2884_v0, %v2880_v10  ;;  %v6507_v53 = vpack.c.bf16 %v2917_v45, %v2913_v23  ;;  %v2912_v44 = vld [vmem:[%s13980_s9 + $0x1f80] sm:$0xff]  ;;  %v2921_v0 = vld [vmem:[%s13980_s9 + $0x1fc8] sm:$0xff] }
 0x520   :  { %7244 = vmatprep.subr.bf16.mxu1 %v7243_v7  ;;  %v2891_v7 = vld [vmem:[%s13980_s9 + $0x1ed8] sm:$0xff]  ;;  %v7261_v24 = vpack.c.bf16 %v2886_v28, %v2882_v21  ;;  %v2918_v10 = vld [vmem:[%s13980_s9 + $0x1fb0] sm:$0xff]  ;;  %v2925_v21 = vld [vmem:[%s13980_s9 + $0x1fe8] sm:$0xff] }
 0x521   :  { %v2927_v28 = vld [vmem:[%s13980_s9 + $0x1ff8] sm:$0xff] }
 0x522   :  { %6478 = vmatpush1.bf16.msra.mxu0 %v6477_v11  ;;  %v2892_v11 = vld [vmem:[%s13980_s9 + $0x1ee0] sm:$0xff]  ;;  %v2951_v23 = vld [vmem:[%s13980_s9 + $0x20b8] sm:$0xff] }
 0x523   :  { %7246 = vmatpush1.bf16.msra.mxu1 %v7245_v15  ;;  %6480 = vmatprep.subr.bf16.mxu0 %v6479_v41  ;;  %v2890_v15 = vld [vmem:[%s13980_s9 + $0x1ed0] sm:$0xff]  ;;  %v7263_v41 = vpack.c.bf16 %v2895_v42, %v2891_v7  ;;  %v6497_v20 = vpack.c.bf16 %v2892_v11, %v2888_v1  ;;  %v6511_v7 = vpack.c.bf16 %v2925_v21, %v2921_v0  ;;  %v2920_v42 = vld [vmem:[%s13980_s9 + $0x1fc0] sm:$0xff]  ;;  %v2929_v11 = vld [vmem:[%s13980_s9 + $0x2008] sm:$0xff] }
 0x524   :  { %7248 = vmatprep.subr.bf16.mxu1 %v7247_v2  ;;  %v2899_v2 = vld [vmem:[%s13980_s9 + $0x1f18] sm:$0xff]  ;;  %v7265_v22 = vpack.c.bf16 %v2894_v12, %v2890_v15  ;;  %v2926_v1 = vld [vmem:[%s13980_s9 + $0x1ff0] sm:$0xff]  ;;  %v2933_v15 = vld [vmem:[%s13980_s9 + $0x2028] sm:$0xff] }
 0x525   :  { %v2935_v12 = vld [vmem:[%s13980_s9 + $0x2038] sm:$0xff] }
 0x526   :  { %6482 = vmatpush1.bf16.msra.mxu0 %v6481_v19  ;;  %v2900_v19 = vld [vmem:[%s13980_s9 + $0x1f20] sm:$0xff] }
 0x527   :  { %7250 = vmatpush1.bf16.msra.mxu1 %v7249_v62  ;;  %6484 = vmatprep.subr.bf16.mxu0 %v6483_v25  ;;  %v2898_v62 = vld [vmem:[%s13980_s9 + $0x1f10] sm:$0xff]  ;;  %v7267_v25 = vpack.c.bf16 %v2903_v8, %v2899_v2  ;;  %v6501_v9 = vpack.c.bf16 %v2900_v19, %v2896_v50  ;;  %v6515_v2 = vpack.c.bf16 %v2933_v15, %v2929_v11  ;;  %v2928_v8 = vld [vmem:[%s13980_s9 + $0x2000] sm:$0xff]  ;;  %v2937_v19 = vld [vmem:[%s13980_s9 + $0x2048] sm:$0xff] }
 0x528   :  { %7252 = vmatprep.subr.bf16.mxu1 %v7251_v4  ;;  %v2907_v4 = vld [vmem:[%s13980_s9 + $0x1f58] sm:$0xff]  ;;  %v7269_v16 = vpack.c.bf16 %v2902_v52, %v2898_v62  ;;  %v2934_v50 = vld [vmem:[%s13980_s9 + $0x2030] sm:$0xff]  ;;  %v2941_v62 = vld [vmem:[%s13980_s9 + $0x2068] sm:$0xff] }
 0x529   :  { %v2939_v52 = vld [vmem:[%s13980_s9 + $0x2058] sm:$0xff] }
 0x52a   :  { %6486 = vmatpush1.bf16.msra.mxu0 %v6485_v17  ;;  %v2908_v17 = vld [vmem:[%s13980_s9 + $0x1f60] sm:$0xff] }
 0x52b   :  { %7254 = vmatpush1.bf16.msra.mxu1 %v7253_v40  ;;  %6488 = vmatprep.subr.bf16.mxu0 %v6487_v27  ;;  %v2906_v40 = vld [vmem:[%s13980_s9 + $0x1f50] sm:$0xff]  ;;  %v7271_v27 = vpack.c.bf16 %v2911_v13, %v2907_v4  ;;  %v6505_v38 = vpack.c.bf16 %v2908_v17, %v2904_v30  ;;  %v2936_v13 = vld [vmem:[%s13980_s9 + $0x2040] sm:$0xff]  ;;  %v2945_v30 = vld [vmem:[%s13980_s9 + $0x2088] sm:$0xff] }
 0x52c   :  { %7256 = vmatprep.subr.bf16.mxu1 %v7255_v34  ;;  %v2915_v34 = vld [vmem:[%s13980_s9 + $0x1f98] sm:$0xff]  ;;  %v7273_v39 = vpack.c.bf16 %v2910_v43, %v2906_v40  ;;  %v2949_v17 = vld [vmem:[%s13980_s9 + $0x20a8] sm:$0xff]  ;;  %v1897_v40 = vmax.f32 %v9516_v47, 0.0  ;;  %v2944_v47 = vld [vmem:[%s13980_s9 + $0x2080] sm:$0xff] }
 0x52d   :  { %v2947_v43 = vld [vmem:[%s13980_s9 + $0x2098] sm:$0xff] }
 0x52e   :  { %6490 = vmatpush1.bf16.msra.mxu0 %v6489_v48  ;;  %v2916_v48 = vld [vmem:[%s13980_s9 + $0x1fa0] sm:$0xff] }
 0x52f   :  { %7258 = vmatpush1.bf16.msra.mxu1 %v7257_v54  ;;  %6492 = vmatprep.subr.bf16.mxu0 %v6491_v51  ;;  %v2914_v54 = vld [vmem:[%s13980_s9 + $0x1f90] sm:$0xff]  ;;  %v7275_v51 = vpack.c.bf16 %v2919_v18, %v2915_v34  ;;  %v6509_v37 = vpack.c.bf16 %v2916_v48, %v2912_v44  ;;  %v6523_v18 = vpack.c.bf16 %v2949_v17, %v2945_v30  ;;  %v2953_v48 = vld [vmem:[%s13980_s9 + $0x20c8] sm:$0xff] }
 0x530   :  { %7260 = vmatprep.subr.bf16.mxu1 %v7259_v36  ;;  %v2923_v36 = vld [vmem:[%s13980_s9 + $0x1fd8] sm:$0xff]  ;;  %v7277_v63 = vpack.c.bf16 %v2918_v10, %v2914_v54  ;;  %v2950_v44 = vld [vmem:[%s13980_s9 + $0x20b0] sm:$0xff]  ;;  %v2957_v54 = vld [vmem:[%s13980_s9 + $0x20e8] sm:$0xff] }
 0x531   :  { %v2959_v10 = vld [vmem:[%s13980_s9 + $0x20f8] sm:$0xff] }
 0x532   :  { %6494 = vmatpush1.bf16.msra.mxu0 %v6493_v35  ;;  %v2924_v35 = vld [vmem:[%s13980_s9 + $0x1fe0] sm:$0xff] }
 0x533   :  { %7262 = vmatpush1.bf16.msra.mxu1 %v7261_v24  ;;  %6496 = vmatprep.subr.bf16.mxu0 %v6495_v46  ;;  %v2922_v24 = vld [vmem:[%s13980_s9 + $0x1fd0] sm:$0xff]  ;;  %v7279_v46 = vpack.c.bf16 %v2927_v28, %v2923_v36  ;;  %v6513_v32 = vpack.c.bf16 %v2924_v35, %v2920_v42  ;;  %v6527_v36 = vpack.c.bf16 %v2957_v54, %v2953_v48  ;;  %v2952_v28 = vld [vmem:[%s13980_s9 + $0x20c0] sm:$0xff]  ;;  %v2961_v35 = vld [vmem:[%s13980_s9 + $0x2108] sm:$0xff] }
 0x534   :  { %7264 = vmatprep.subr.bf16.mxu1 %v7263_v41  ;;  %v2931_v41 = vld [vmem:[%s13980_s9 + $0x2018] sm:$0xff]  ;;  %v7281_v55 = vpack.c.bf16 %v2926_v1, %v2922_v24  ;;  %v2958_v42 = vld [vmem:[%s13980_s9 + $0x20f0] sm:$0xff]  ;;  %v2965_v24 = vld [vmem:[%s13980_s9 + $0x2128] sm:$0xff] }
 0x535   :  { %v2967_v1 = vld [vmem:[%s13980_s9 + $0x2138] sm:$0xff]  ;;  %v2984_v54 = vld [vmem:[%s13980_s9 + $0x21c0] sm:$0xff] }
 0x536   :  { %6498 = vmatpush1.bf16.msra.mxu0 %v6497_v20  ;;  %v2932_v20 = vld [vmem:[%s13980_s9 + $0x2020] sm:$0xff] }
 0x537   :  { %7266 = vmatpush1.bf16.msra.mxu1 %v7265_v22  ;;  %6500 = vmatprep.subr.bf16.mxu0 %v6499_v49  ;;  %v7283_v22 = vpack.c.bf16 %v2935_v12, %v2931_v41  ;;  %v2930_v49 = vld [vmem:[%s13980_s9 + $0x2010] sm:$0xff]  ;;  %v6531_v41 = vpack.c.bf16 %v2965_v24, %v2961_v35  ;;  %v2960_v12 = vld [vmem:[%s13980_s9 + $0x2100] sm:$0xff] }
 0x538   :  { %7268 = vmatprep.subr.bf16.mxu1 %v7267_v25  ;;  %v6517_v25 = vpack.c.bf16 %v2932_v20, %v2928_v8  ;;  %v7285_v4 = vpack.c.bf16 %v2934_v50, %v2930_v49  ;;  %v2966_v8 = vld [vmem:[%s13980_s9 + $0x2130] sm:$0xff]  ;;  %v2969_v20 = vld [vmem:[%s13980_s9 + $0x2148] sm:$0xff]  ;;  %v2971_v49 = vld [vmem:[%s13980_s9 + $0x2158] sm:$0xff] }
 0x539   :  { %v2975_v50 = vld [vmem:[%s13980_s9 + $0x2178] sm:$0xff]  ;;  %v2992_v24 = vld [vmem:[%s13980_s9 + $0x2200] sm:$0xff] }
 0x53a   :  { %6502 = vmatpush1.bf16.msra.mxu0 %v6501_v9  ;;  %v2940_v9 = vld [vmem:[%s13980_s9 + $0x2060] sm:$0xff] }
 0x53b   :  { %7270 = vmatpush1.bf16.msra.mxu1 %v7269_v16  ;;  %6504 = vmatprep.subr.bf16.mxu0 %v6503_v14  ;;  %v2938_v16 = vld [vmem:[%s13980_s9 + $0x2050] sm:$0xff]  ;;  %v6519_v14 = vpack.c.bf16 %v2941_v62, %v2937_v19  ;;  %v6521_v45 = vpack.c.bf16 %v2940_v9, %v2936_v13  ;;  %v2977_v9 = vld [vmem:[%s13980_s9 + $0x2188] sm:$0xff] }
 0x53c   :  { %7272 = vmatprep.subr.bf16.mxu1 %v7271_v27  ;;  %v7287_v27 = vpack.c.bf16 %v2943_v60, %v2939_v52  ;;  %v7289_v34 = vpack.c.bf16 %v2942_v5, %v2938_v16  ;;  %v2968_v52 = vld [vmem:[%s13980_s9 + $0x2140] sm:$0xff]  ;;  %v2974_v13 = vld [vmem:[%s13980_s9 + $0x2170] sm:$0xff]  ;;  %v2981_v16 = vld [vmem:[%s13980_s9 + $0x21a8] sm:$0xff] }
 0x53d   :  { %v2972_v60 = vld [vmem:[%s13980_s9 + $0x2160] sm:$0xff]  ;;  %v2983_v5 = vld [vmem:[%s13980_s9 + $0x21b8] sm:$0xff] }
 0x53e   :  { %6506 = vmatpush1.bf16.msra.mxu0 %v6505_v38  ;;  %v2948_v38 = vld [vmem:[%s13980_s9 + $0x20a0] sm:$0xff]  ;;  %v6537_v30 = vpack.c.bf16 %v2972_v60, %v2968_v52  ;;  %v3013_v52 = vld [vmem:[%s13980_s9 + $0x22a8] sm:$0xff]  ;;  %v3011_v60 = vld [vmem:[%s13980_s9 + $0x2298] sm:$0xff] }
 0x53f   :  { %7274 = vmatpush1.bf16.msra.mxu1 %v7273_v39  ;;  %6508 = vmatprep.subr.bf16.mxu0 %v6507_v53  ;;  %v2946_v39 = vld [vmem:[%s13980_s9 + $0x2090] sm:$0xff]  ;;  %v7291_v53 = vpack.c.bf16 %v2951_v23, %v2947_v43  ;;  %v6525_v0 = vpack.c.bf16 %v2948_v38, %v2944_v47  ;;  %v2980_v43 = vld [vmem:[%s13980_s9 + $0x21a0] sm:$0xff]  ;;  %v2989_v47 = vld [vmem:[%s13980_s9 + $0x21e8] sm:$0xff] }
 0x540   :  { %7276 = vmatprep.subr.bf16.mxu1 %v7275_v51  ;;  %v2955_v51 = vld [vmem:[%s13980_s9 + $0x20d8] sm:$0xff]  ;;  %v7293_v21 = vpack.c.bf16 %v2950_v44, %v2946_v39  ;;  %v2978_v23 = vld [vmem:[%s13980_s9 + $0x2190] sm:$0xff] }
 0x541   :  { %v2987_v38 = vld [vmem:[%s13980_s9 + $0x21d8] sm:$0xff] }
 0x542   :  { %6510 = vmatpush1.bf16.msra.mxu0 %v6509_v37  ;;  %v2956_v37 = vld [vmem:[%s13980_s9 + $0x20e0] sm:$0xff]  ;;  %v2991_v39 = vld [vmem:[%s13980_s9 + $0x21f8] sm:$0xff] }
 0x543   :  { %7278 = vmatpush1.bf16.msra.mxu1 %v7277_v63  ;;  %6512 = vmatprep.subr.bf16.mxu0 %v6511_v7  ;;  %v2954_v63 = vld [vmem:[%s13980_s9 + $0x20d0] sm:$0xff]  ;;  %v7295_v7 = vpack.c.bf16 %v2959_v10, %v2955_v51  ;;  %v6529_v11 = vpack.c.bf16 %v2956_v37, %v2952_v28  ;;  %v2988_v51 = vld [vmem:[%s13980_s9 + $0x21e0] sm:$0xff]  ;;  %v2997_v28 = vld [vmem:[%s13980_s9 + $0x2228] sm:$0xff] }
 0x544   :  { %7280 = vmatprep.subr.bf16.mxu1 %v7279_v46  ;;  %v2963_v46 = vld [vmem:[%s13980_s9 + $0x2118] sm:$0xff]  ;;  %v7297_v15 = vpack.c.bf16 %v2958_v42, %v2954_v63  ;;  %v2986_v10 = vld [vmem:[%s13980_s9 + $0x21d0] sm:$0xff] }
 0x545   :  { %v2995_v37 = vld [vmem:[%s13980_s9 + $0x2218] sm:$0xff] }
 0x546   :  { %6514 = vmatpush1.bf16.msra.mxu0 %v6513_v32  ;;  %v2964_v32 = vld [vmem:[%s13980_s9 + $0x2120] sm:$0xff]  ;;  %v2999_v63 = vld [vmem:[%s13980_s9 + $0x2238] sm:$0xff] }
 0x547   :  { %7282 = vmatpush1.bf16.msra.mxu1 %v7281_v55  ;;  %6516 = vmatprep.subr.bf16.mxu0 %v6515_v2  ;;  %v2962_v55 = vld [vmem:[%s13980_s9 + $0x2110] sm:$0xff]  ;;  %v7299_v2 = vpack.c.bf16 %v2967_v1, %v2963_v46  ;;  %v6533_v19 = vpack.c.bf16 %v2964_v32, %v2960_v12  ;;  %v2996_v46 = vld [vmem:[%s13980_s9 + $0x2220] sm:$0xff]  ;;  %v3005_v12 = vld [vmem:[%s13980_s9 + $0x2268] sm:$0xff] }
 0x548   :  { %7284 = vmatprep.subr.bf16.mxu1 %v7283_v22  ;;  %v2973_v22 = vld [vmem:[%s13980_s9 + $0x2168] sm:$0xff]  ;;  %v7301_v62 = vpack.c.bf16 %v2966_v8, %v2962_v55  ;;  %v2994_v1 = vld [vmem:[%s13980_s9 + $0x2210] sm:$0xff]  ;;  %v3003_v32 = vld [vmem:[%s13980_s9 + $0x2258] sm:$0xff] }
 0x549   :  { %4024 = vmatmul.mubr.f32.vlgmr.msra.gmra.mrb[24].mxu0 %v1894_v61  ;;  %v3007_v55 = vld [vmem:[%s13980_s9 + $0x2278] sm:$0xff] }
 0x54a   :  { %4876 = vmatmul.mubr.f32.vlgmr.msra.gmra.mrb[72].mxu1 %v1894_v61  ;;  %6518 = vmatpush1.bf16.msra.mxu0 %v6517_v25  ;;  %v6535_v25 = vpack.c.bf16 %v2973_v22, %v2969_v20  ;;  %v2970_v61 = vld [vmem:[%s13980_s9 + $0x2150] sm:$0xff]  ;;  %v3000_v22 = vld [vmem:[%s13980_s9 + $0x2240] sm:$0xff] }
 0x54b   :  { %4094 = vmatprep.mubr.f32.mxu0 %v1897_v40  ;;  %7286 = vmatpush1.bf16.msra.mxu1 %v7285_v4  ;;  %v7303_v4 = vpack.c.bf16 %v2975_v50, %v2971_v49  ;;  %v7305_v17 = vpack.c.bf16 %v2974_v13, %v2970_v61  ;;  %v3004_v49 = vld [vmem:[%s13980_s9 + $0x2260] sm:$0xff]  ;;  %v3002_v50 = vld [vmem:[%s13980_s9 + $0x2250] sm:$0xff]  ;;  %v3015_v61 = vld [vmem:[%s13980_s9 + $0x22b8] sm:$0xff] }
 0x54c   :  { %4946 = vmatprep.mubr.f32.mxu1 %v1897_v40  ;;  %6520 = vmatprep.subr.bf16.mxu0 %v6519_v14  ;;  %v2979_v14 = vld [vmem:[%s13980_s9 + $0x2198] sm:$0xff]  ;;  %v6539_v40 = vpack.c.bf16 %v2981_v16, %v2977_v9  ;;  %v3008_v16 = vld [vmem:[%s13980_s9 + $0x2280] sm:$0xff] }
 0x54d   :  { %7288 = vmatprep.subr.bf16.mxu1 %v7287_v27  ;;  %v2976_v27 = vld [vmem:[%s13980_s9 + $0x2180] sm:$0xff] }
 0x54e   :  { %6522 = vmatpush1.bf16.msra.mxu0 %v6521_v45  ;;  %v7307_v45 = vpack.c.bf16 %v2983_v5, %v2979_v14  ;;  %v3012_v14 = vld [vmem:[%s13980_s9 + $0x22a0] sm:$0xff]  ;;  %v3010_v5 = vld [vmem:[%s13980_s9 + $0x2290] sm:$0xff] }
 0x54f   :  { %7290 = vmatpush1.bf16.msra.mxu1 %v7289_v34  ;;  %6524 = vmatprep.subr.bf16.mxu0 %v6523_v18  ;;  %v2982_v34 = vld [vmem:[%s13980_s9 + $0x21b0] sm:$0xff]  ;;  %v2985_v18 = vld [vmem:[%s13980_s9 + $0x21c8] sm:$0xff] }
 0x550   :  { %7292 = vmatprep.subr.bf16.mxu1 %v7291_v53  ;;  %v6541_v53 = vpack.c.bf16 %v2980_v43, %v2976_v27  ;;  %v7309_v44 = vpack.c.bf16 %v2982_v34, %v2978_v23  ;;  %v6543_v48 = vpack.c.bf16 %v2989_v47, %v2985_v18  ;;  %v3021_v27 = vld [vmem:[%s13980_s9 + $0x22e8] sm:$0xff]  ;;  %v3019_v43 = vld [vmem:[%s13980_s9 + $0x22d8] sm:$0xff]  ;;  %v3016_v47 = vld [vmem:[%s13980_s9 + $0x22c0] sm:$0xff] }
 0x551   :  { %v3023_v23 = vld [vmem:[%s13980_s9 + $0x22f8] sm:$0xff] }
 0x552   :  { %6526 = vmatpush1.bf16.msra.mxu0 %v6525_v0  ;;  %v7311_v0 = vpack.c.bf16 %v2991_v39, %v2987_v38  ;;  %v3020_v38 = vld [vmem:[%s13980_s9 + $0x22e0] sm:$0xff]  ;;  %v3018_v39 = vld [vmem:[%s13980_s9 + $0x22d0] sm:$0xff] }
 0x553   :  { %7294 = vmatpush1.bf16.msra.mxu1 %v7293_v21  ;;  %6528 = vmatprep.subr.bf16.mxu0 %v6527_v36  ;;  %v2990_v21 = vld [vmem:[%s13980_s9 + $0x21f0] sm:$0xff]  ;;  %v2993_v36 = vld [vmem:[%s13980_s9 + $0x2208] sm:$0xff] }
 0x554   :  { %7296 = vmatprep.subr.bf16.mxu1 %v7295_v7  ;;  %v6545_v7 = vpack.c.bf16 %v2988_v51, %v2984_v54  ;;  %v7313_v42 = vpack.c.bf16 %v2990_v21, %v2986_v10  ;;  %v6547_v35 = vpack.c.bf16 %v2997_v28, %v2993_v36  ;;  %v3029_v54 = vld [vmem:[%s13980_s9 + $0x2328] sm:$0xff]  ;;  %v3027_v51 = vld [vmem:[%s13980_s9 + $0x2318] sm:$0xff]  ;;  %v3024_v28 = vld [vmem:[%s13980_s9 + $0x2300] sm:$0xff] }
 0x555   :  { %v3031_v10 = vld [vmem:[%s13980_s9 + $0x2338] sm:$0xff] }
 0x556   :  { %6530 = vmatpush1.bf16.msra.mxu0 %v6529_v11  ;;  %v7315_v11 = vpack.c.bf16 %v2999_v63, %v2995_v37  ;;  %v3028_v37 = vld [vmem:[%s13980_s9 + $0x2320] sm:$0xff]  ;;  %v3026_v63 = vld [vmem:[%s13980_s9 + $0x2310] sm:$0xff] }
 0x557   :  { %7298 = vmatpush1.bf16.msra.mxu1 %v7297_v15  ;;  %6532 = vmatprep.subr.bf16.mxu0 %v6531_v41  ;;  %v2998_v15 = vld [vmem:[%s13980_s9 + $0x2230] sm:$0xff]  ;;  %v3001_v41 = vld [vmem:[%s13980_s9 + $0x2248] sm:$0xff] }
 0x558   :  { %7300 = vmatprep.subr.bf16.mxu1 %v7299_v2  ;;  %v6549_v2 = vpack.c.bf16 %v2996_v46, %v2992_v24  ;;  %v7317_v8 = vpack.c.bf16 %v2998_v15, %v2994_v1  ;;  %v6551_v20 = vpack.c.bf16 %v3005_v12, %v3001_v41  ;;  %v3037_v24 = vld [vmem:[%s13980_s9 + $0x2368] sm:$0xff]  ;;  %v3035_v46 = vld [vmem:[%s13980_s9 + $0x2358] sm:$0xff]  ;;  %v3032_v12 = vld [vmem:[%s13980_s9 + $0x2340] sm:$0xff] }
 0x559   :  { %v3039_v1 = vld [vmem:[%s13980_s9 + $0x2378] sm:$0xff] }
 0x55a   :  { %6534 = vmatpush1.bf16.msra.mxu0 %v6533_v19  ;;  %v7319_v19 = vpack.c.bf16 %v3007_v55, %v3003_v32  ;;  %v3036_v32 = vld [vmem:[%s13980_s9 + $0x2360] sm:$0xff]  ;;  %v3034_v55 = vld [vmem:[%s13980_s9 + $0x2350] sm:$0xff] }
 0x55b   :  { %7302 = vmatpush1.bf16.msra.mxu1 %v7301_v62  ;;  %6536 = vmatprep.subr.bf16.mxu0 %v6535_v25  ;;  %v3006_v62 = vld [vmem:[%s13980_s9 + $0x2270] sm:$0xff]  ;;  %v3009_v25 = vld [vmem:[%s13980_s9 + $0x2288] sm:$0xff] }
 0x55c   :  { %7304 = vmatprep.subr.bf16.mxu1 %v7303_v4  ;;  %v6553_v4 = vpack.c.bf16 %v3004_v49, %v3000_v22  ;;  %v7321_v13 = vpack.c.bf16 %v3006_v62, %v3002_v50  ;;  %v6555_v9 = vpack.c.bf16 %v3013_v52, %v3009_v25  ;;  %v3045_v22 = vld [vmem:[%s13980_s9 + $0x23a8] sm:$0xff]  ;;  %v3043_v49 = vld [vmem:[%s13980_s9 + $0x2398] sm:$0xff]  ;;  %v3040_v52 = vld [vmem:[%s13980_s9 + $0x2380] sm:$0xff] }
 0x55d   :  { %v3047_v50 = vld [vmem:[%s13980_s9 + $0x23b8] sm:$0xff] }
 0x55e   :  { %6538 = vmatpush1.bf16.msra.mxu0 %v6537_v30  ;;  %v7323_v30 = vpack.c.bf16 %v3015_v61, %v3011_v60  ;;  %v3044_v60 = vld [vmem:[%s13980_s9 + $0x23a0] sm:$0xff]  ;;  %v3042_v61 = vld [vmem:[%s13980_s9 + $0x2390] sm:$0xff] }
 0x55f   :  { %7306 = vmatpush1.bf16.msra.mxu1 %v7305_v17  ;;  %6540 = vmatprep.subr.bf16.mxu0 %v6539_v40  ;;  %v3014_v17 = vld [vmem:[%s13980_s9 + $0x22b0] sm:$0xff]  ;;  %v3017_v40 = vld [vmem:[%s13980_s9 + $0x22c8] sm:$0xff] }
 0x560   :  { %7308 = vmatprep.subr.bf16.mxu1 %v7307_v45  ;;  %v6557_v45 = vpack.c.bf16 %v3012_v14, %v3008_v16  ;;  %v7325_v34 = vpack.c.bf16 %v3014_v17, %v3010_v5  ;;  %v6559_v18 = vpack.c.bf16 %v3021_v27, %v3017_v40  ;;  %v3053_v16 = vld [vmem:[%s13980_s9 + $0x23e8] sm:$0xff]  ;;  %v3051_v14 = vld [vmem:[%s13980_s9 + $0x23d8] sm:$0xff]  ;;  %v3048_v27 = vld [vmem:[%s13980_s9 + $0x23c0] sm:$0xff] }
 0x561   :  { %v3055_v5 = vld [vmem:[%s13980_s9 + $0x23f8] sm:$0xff] }
 0x562   :  { %6542 = vmatpush1.bf16.msra.mxu0 %v6541_v53  ;;  %v7327_v53 = vpack.c.bf16 %v3023_v23, %v3019_v43  ;;  %v3052_v43 = vld [vmem:[%s13980_s9 + $0x23e0] sm:$0xff]  ;;  %v3050_v23 = vld [vmem:[%s13980_s9 + $0x23d0] sm:$0xff] }
 0x563   :  { %7310 = vmatpush1.bf16.msra.mxu1 %v7309_v44  ;;  %6544 = vmatprep.subr.bf16.mxu0 %v6543_v48  ;;  %v3022_v44 = vld [vmem:[%s13980_s9 + $0x22f0] sm:$0xff]  ;;  %v3025_v48 = vld [vmem:[%s13980_s9 + $0x2308] sm:$0xff] }
 0x564   :  { %7312 = vmatprep.subr.bf16.mxu1 %v7311_v0  ;;  %v6561_v0 = vpack.c.bf16 %v3020_v38, %v3016_v47  ;;  %v7329_v21 = vpack.c.bf16 %v3022_v44, %v3018_v39  ;;  %v6563_v36 = vpack.c.bf16 %v3029_v54, %v3025_v48  ;;  %v3061_v47 = vld [vmem:[%s13980_s9 + $0x2428] sm:$0xff]  ;;  %v3059_v38 = vld [vmem:[%s13980_s9 + $0x2418] sm:$0xff]  ;;  %v3056_v54 = vld [vmem:[%s13980_s9 + $0x2400] sm:$0xff] }
 0x565   :  { %v3063_v39 = vld [vmem:[%s13980_s9 + $0x2438] sm:$0xff] }
 0x566   :  { %6546 = vmatpush1.bf16.msra.mxu0 %v6545_v7  ;;  %v7331_v7 = vpack.c.bf16 %v3031_v10, %v3027_v51  ;;  %v3060_v51 = vld [vmem:[%s13980_s9 + $0x2420] sm:$0xff]  ;;  %v7347_v10 = vpack.c.bf16 %v3063_v39, %v3059_v38  ;;  %v3090_v39 = vld [vmem:[%s13980_s9 + $0x2510] sm:$0xff] }
 0x567   :  { %7314 = vmatpush1.bf16.msra.mxu1 %v7313_v42  ;;  %6548 = vmatprep.subr.bf16.mxu0 %v6547_v35  ;;  %v3030_v42 = vld [vmem:[%s13980_s9 + $0x2330] sm:$0xff]  ;;  %v3033_v35 = vld [vmem:[%s13980_s9 + $0x2348] sm:$0xff]  ;;  %v3092_v38 = vld [vmem:[%s13980_s9 + $0x2520] sm:$0xff] }
 0x568   :  { %7316 = vmatprep.subr.bf16.mxu1 %v7315_v11  ;;  %v6565_v11 = vpack.c.bf16 %v3028_v37, %v3024_v28  ;;  %v7333_v15 = vpack.c.bf16 %v3030_v42, %v3026_v63  ;;  %v6567_v41 = vpack.c.bf16 %v3037_v24, %v3033_v35  ;;  %v3069_v28 = vld [vmem:[%s13980_s9 + $0x2468] sm:$0xff]  ;;  %v6581_v37 = vpack.c.bf16 %v3060_v51, %v3056_v54  ;;  %v3067_v63 = vld [vmem:[%s13980_s9 + $0x2458] sm:$0xff]  ;;  %v3064_v24 = vld [vmem:[%s13980_s9 + $0x2440] sm:$0xff] }
 0x569   :  { %v1896_v42 = vmax.f32 %v9504_v26, 0.0  ;;  %v3070_v26 = vld [vmem:[%s13980_s9 + $0x2470] sm:$0xff]  ;;  %v3101_v54 = vld [vmem:[%s13980_s9 + $0x2568] sm:$0xff]  ;;  %v3099_v51 = vld [vmem:[%s13980_s9 + $0x2558] sm:$0xff] }
 0x56a   :  { %6550 = vmatpush1.bf16.msra.mxu0 %v6549_v2  ;;  %v7335_v2 = vpack.c.bf16 %v3039_v1, %v3035_v46  ;;  %v3068_v46 = vld [vmem:[%s13980_s9 + $0x2460] sm:$0xff]  ;;  %v3066_v1 = vld [vmem:[%s13980_s9 + $0x2450] sm:$0xff] }
 0x56b   :  { %7318 = vmatpush1.bf16.msra.mxu1 %v7317_v8  ;;  %6552 = vmatprep.subr.bf16.mxu0 %v6551_v20  ;;  %v3038_v8 = vld [vmem:[%s13980_s9 + $0x2370] sm:$0xff]  ;;  %v3041_v20 = vld [vmem:[%s13980_s9 + $0x2388] sm:$0xff] }
 0x56c   :  { %7320 = vmatprep.subr.bf16.mxu1 %v7319_v19  ;;  %v6569_v19 = vpack.c.bf16 %v3036_v32, %v3032_v12  ;;  %v7337_v62 = vpack.c.bf16 %v3038_v8, %v3034_v55  ;;  %v6571_v25 = vpack.c.bf16 %v3045_v22, %v3041_v20  ;;  %v1899_v12 = vmax.f32 %v9546_v56, 0.0  ;;  %v3075_v55 = vld [vmem:[%s13980_s9 + $0x2498] sm:$0xff]  ;;  %v3072_v56 = vld [vmem:[%s13980_s9 + $0x2480] sm:$0xff] }
 0x56d   :  { %v6585_v8 = vpack.c.bf16 %v3068_v46, %v3064_v24  ;;  %v7353_v20 = vpack.c.bf16 %v3070_v26, %v3066_v1  ;;  %v3109_v24 = vld [vmem:[%s13980_s9 + $0x25a8] sm:$0xff]  ;;  %v3107_v46 = vld [vmem:[%s13980_s9 + $0x2598] sm:$0xff] }
 0x56e   :  { %6554 = vmatpush1.bf16.msra.mxu0 %v6553_v4  ;;  %v7339_v4 = vpack.c.bf16 %v3047_v50, %v3043_v49  ;;  %v3076_v49 = vld [vmem:[%s13980_s9 + $0x24a0] sm:$0xff]  ;;  %v3074_v50 = vld [vmem:[%s13980_s9 + $0x2490] sm:$0xff]  ;;  %v3111_v1 = vld [vmem:[%s13980_s9 + $0x25b8] sm:$0xff] }
 0x56f   :  { %7322 = vmatpush1.bf16.msra.mxu1 %v7321_v13  ;;  %6556 = vmatprep.subr.bf16.mxu0 %v6555_v9  ;;  %v3046_v13 = vld [vmem:[%s13980_s9 + $0x23b0] sm:$0xff]  ;;  %v3049_v9 = vld [vmem:[%s13980_s9 + $0x23c8] sm:$0xff] }
 0x570   :  { %7324 = vmatprep.subr.bf16.mxu1 %v7323_v30  ;;  %v6573_v30 = vpack.c.bf16 %v3044_v60, %v3040_v52  ;;  %v7341_v17 = vpack.c.bf16 %v3046_v13, %v3042_v61  ;;  %v6575_v40 = vpack.c.bf16 %v3053_v16, %v3049_v9  ;;  %v3085_v52 = vld [vmem:[%s13980_s9 + $0x24e8] sm:$0xff]  ;;  %v3083_v60 = vld [vmem:[%s13980_s9 + $0x24d8] sm:$0xff]  ;;  %v3080_v16 = vld [vmem:[%s13980_s9 + $0x24c0] sm:$0xff] }
 0x571   :  { %v3087_v61 = vld [vmem:[%s13980_s9 + $0x24f8] sm:$0xff] }
 0x572   :  { %6558 = vmatpush1.bf16.msra.mxu0 %v6557_v45  ;;  %v7343_v45 = vpack.c.bf16 %v3055_v5, %v3051_v14  ;;  %v3084_v14 = vld [vmem:[%s13980_s9 + $0x24e0] sm:$0xff]  ;;  %v3082_v5 = vld [vmem:[%s13980_s9 + $0x24d0] sm:$0xff] }
 0x573   :  { %7326 = vmatpush1.bf16.msra.mxu1 %v7325_v34  ;;  %6560 = vmatprep.subr.bf16.mxu0 %v6559_v18  ;;  %v3054_v34 = vld [vmem:[%s13980_s9 + $0x23f0] sm:$0xff]  ;;  %v3057_v18 = vld [vmem:[%s13980_s9 + $0x2408] sm:$0xff] }
 0x574   :  { %7328 = vmatprep.subr.bf16.mxu1 %v7327_v53  ;;  %v6577_v53 = vpack.c.bf16 %v3052_v43, %v3048_v27  ;;  %v7345_v44 = vpack.c.bf16 %v3054_v34, %v3050_v23  ;;  %v6579_v48 = vpack.c.bf16 %v3061_v47, %v3057_v18  ;;  %v3093_v27 = vld [vmem:[%s13980_s9 + $0x2528] sm:$0xff]  ;;  %v3091_v43 = vld [vmem:[%s13980_s9 + $0x2518] sm:$0xff]  ;;  %v3088_v47 = vld [vmem:[%s13980_s9 + $0x2500] sm:$0xff] }
 0x575   :  { %v3095_v23 = vld [vmem:[%s13980_s9 + $0x2538] sm:$0xff] }
 0x576   :  { %6562 = vmatpush1.bf16.msra.mxu0 %v6561_v0  ;;  %v3058_v0 = vld [vmem:[%s13980_s9 + $0x2410] sm:$0xff] }
 0x577   :  { %7330 = vmatpush1.bf16.msra.mxu1 %v7329_v21  ;;  %6564 = vmatprep.subr.bf16.mxu0 %v6563_v36  ;;  %v3062_v21 = vld [vmem:[%s13980_s9 + $0x2430] sm:$0xff]  ;;  %v3065_v36 = vld [vmem:[%s13980_s9 + $0x2448] sm:$0xff] }
 0x578   :  { %7332 = vmatprep.subr.bf16.mxu1 %v7331_v7  ;;  %v3071_v7 = vld [vmem:[%s13980_s9 + $0x2478] sm:$0xff]  ;;  %v7349_v35 = vpack.c.bf16 %v3062_v21, %v3058_v0  ;;  %v6597_v0 = vpack.c.bf16 %v3092_v38, %v3088_v47 }
 0x579   :  { %v7351_v32 = vpack.c.bf16 %v3071_v7, %v3067_v63  ;;  %v3098_v63 = vld [vmem:[%s13980_s9 + $0x2550] sm:$0xff]  ;;  %v3135_v47 = vld [vmem:[%s13980_s9 + $0x2678] sm:$0xff] }
 0x57a   :  { %6566 = vmatpush1.bf16.msra.mxu0 %v6565_v11  ;;  %v6583_v11 = vpack.c.bf16 %v3069_v28, %v3065_v36  ;;  %v3096_v28 = vld [vmem:[%s13980_s9 + $0x2540] sm:$0xff] }
 0x57b   :  { %7334 = vmatpush1.bf16.msra.mxu1 %v7333_v15  ;;  %6568 = vmatprep.subr.bf16.mxu0 %v6567_v41  ;;  %v3073_v15 = vld [vmem:[%s13980_s9 + $0x2488] sm:$0xff] }
 0x57c   :  { %7336 = vmatprep.subr.bf16.mxu1 %v7335_v2  ;;  %v3077_v41 = vld [vmem:[%s13980_s9 + $0x24a8] sm:$0xff]  ;;  %v3079_v2 = vld [vmem:[%s13980_s9 + $0x24b8] sm:$0xff] }
 0x57d   :  { %v6587_v22 = vpack.c.bf16 %v3077_v41, %v3073_v15  ;;  %v3104_v41 = vld [vmem:[%s13980_s9 + $0x2580] sm:$0xff] }
 0x57e   :  { %6570 = vmatpush1.bf16.msra.mxu0 %v6569_v19  ;;  %v7355_v19 = vpack.c.bf16 %v3079_v2, %v3075_v55  ;;  %v7371_v55 = vpack.c.bf16 %v3111_v1, %v3107_v46  ;;  %v3110_v2 = vld [vmem:[%s13980_s9 + $0x25b0] sm:$0xff] }
 0x57f   :  { %7338 = vmatpush1.bf16.msra.mxu1 %v7337_v62  ;;  %6572 = vmatprep.subr.bf16.mxu0 %v6571_v25  ;;  %v3078_v62 = vld [vmem:[%s13980_s9 + $0x24b0] sm:$0xff]  ;;  %v3081_v25 = vld [vmem:[%s13980_s9 + $0x24c8] sm:$0xff] }
 0x580   :  { %7340 = vmatprep.subr.bf16.mxu1 %v7339_v4  ;;  %v6589_v4 = vpack.c.bf16 %v3076_v49, %v3072_v56  ;;  %v7357_v13 = vpack.c.bf16 %v3078_v62, %v3074_v50  ;;  %v6591_v9 = vpack.c.bf16 %v3085_v52, %v3081_v25  ;;  %v3119_v56 = vld [vmem:[%s13980_s9 + $0x25f8] sm:$0xff]  ;;  %v3112_v62 = vld [vmem:[%s13980_s9 + $0x25c0] sm:$0xff]  ;;  %v3114_v52 = vld [vmem:[%s13980_s9 + $0x25d0] sm:$0xff] }
 0x581   :  { %v3116_v25 = vld [vmem:[%s13980_s9 + $0x25e0] sm:$0xff]  ;;  %v3142_v1 = vld [vmem:[%s13980_s9 + $0x26b0] sm:$0xff] }
 0x582   :  { %6574 = vmatpush1.bf16.msra.mxu0 %v6573_v30  ;;  %v7359_v30 = vpack.c.bf16 %v3087_v61, %v3083_v60  ;;  %v3118_v61 = vld [vmem:[%s13980_s9 + $0x25f0] sm:$0xff] }
 0x583   :  { %7342 = vmatpush1.bf16.msra.mxu1 %v7341_v17  ;;  %6576 = vmatprep.subr.bf16.mxu0 %v6575_v40  ;;  %v3086_v17 = vld [vmem:[%s13980_s9 + $0x24f0] sm:$0xff]  ;;  %v3089_v40 = vld [vmem:[%s13980_s9 + $0x2508] sm:$0xff] }
 0x584   :  { %7344 = vmatprep.subr.bf16.mxu1 %v7343_v45  ;;  %v6593_v45 = vpack.c.bf16 %v3084_v14, %v3080_v16  ;;  %v7361_v34 = vpack.c.bf16 %v3086_v17, %v3082_v5  ;;  %v6595_v18 = vpack.c.bf16 %v3093_v27, %v3089_v40  ;;  %v3127_v16 = vld [vmem:[%s13980_s9 + $0x2638] sm:$0xff]  ;;  %v6609_v14 = vpack.c.bf16 %v3116_v25, %v3112_v62  ;;  %v3120_v17 = vld [vmem:[%s13980_s9 + $0x2600] sm:$0xff]  ;;  %v3122_v27 = vld [vmem:[%s13980_s9 + $0x2610] sm:$0xff] }
 0x585   :  { %v7377_v5 = vpack.c.bf16 %v3118_v61, %v3114_v52  ;;  %v3124_v40 = vld [vmem:[%s13980_s9 + $0x2620] sm:$0xff]  ;;  %v3159_v62 = vld [vmem:[%s13980_s9 + $0x2738] sm:$0xff] }
 0x586   :  { %6578 = vmatpush1.bf16.msra.mxu0 %v6577_v53  ;;  %v7363_v53 = vpack.c.bf16 %v3095_v23, %v3091_v43  ;;  %v3126_v23 = vld [vmem:[%s13980_s9 + $0x2630] sm:$0xff]  ;;  %v6613_v38 = vpack.c.bf16 %v3124_v40, %v3120_v17  ;;  %v3152_v61 = vld [vmem:[%s13980_s9 + $0x2700] sm:$0xff]  ;;  %v3167_v17 = vld [vmem:[%s13980_s9 + $0x2778] sm:$0xff] }
 0x587   :  { %7346 = vmatpush1.bf16.msra.mxu1 %v7345_v44  ;;  %6580 = vmatprep.subr.bf16.mxu0 %v6579_v48  ;;  %v3094_v44 = vld [vmem:[%s13980_s9 + $0x2530] sm:$0xff]  ;;  %v3097_v48 = vld [vmem:[%s13980_s9 + $0x2548] sm:$0xff] }
 0x588   :  { %7348 = vmatprep.subr.bf16.mxu1 %v7347_v10  ;;  %v3103_v10 = vld [vmem:[%s13980_s9 + $0x2578] sm:$0xff]  ;;  %v7365_v21 = vpack.c.bf16 %v3094_v44, %v3090_v39  ;;  %v6599_v36 = vpack.c.bf16 %v3101_v54, %v3097_v48  ;;  %v7381_v39 = vpack.c.bf16 %v3126_v23, %v3122_v27  ;;  %v3128_v44 = vld [vmem:[%s13980_s9 + $0x2640] sm:$0xff]  ;;  %v3130_v54 = vld [vmem:[%s13980_s9 + $0x2650] sm:$0xff] }
 0x589   :  { %4095 = vmatmul.mubr.f32.vlgmr.msra.gmra.mrb[24].mxu0 %v1896_v42  ;;  %v7367_v7 = vpack.c.bf16 %v3103_v10, %v3099_v51  ;;  %v3132_v48 = vld [vmem:[%s13980_s9 + $0x2660] sm:$0xff]  ;;  %v3134_v10 = vld [vmem:[%s13980_s9 + $0x2670] sm:$0xff] }
 0x58a   :  { %4947 = vmatmul.mubr.f32.vlgmr.msra.gmra.mrb[72].mxu1 %v1896_v42  ;;  %6582 = vmatpush1.bf16.msra.mxu0 %v6581_v37  ;;  %v3100_v37 = vld [vmem:[%s13980_s9 + $0x2560] sm:$0xff]  ;;  %v3102_v42 = vld [vmem:[%s13980_s9 + $0x2570] sm:$0xff] }
 0x58b   :  { %4165 = vmatprep.mubr.f32.mxu0 %v1899_v12  ;;  %7350 = vmatpush1.bf16.msra.mxu1 %v7349_v35  ;;  %v3105_v35 = vld [vmem:[%s13980_s9 + $0x2588] sm:$0xff]  ;;  %v7369_v26 = vpack.c.bf16 %v3102_v42, %v3098_v63  ;;  %v7385_v63 = vpack.c.bf16 %v3134_v10, %v3130_v54  ;;  %v3136_v42 = vld [vmem:[%s13980_s9 + $0x2680] sm:$0xff] }
 0x58c   :  { %5017 = vmatprep.mubr.f32.mxu1 %v1899_v12  ;;  %6584 = vmatprep.subr.bf16.mxu0 %v6583_v11  ;;  %v6601_v11 = vpack.c.bf16 %v3100_v37, %v3096_v28  ;;  %v6603_v15 = vpack.c.bf16 %v3109_v24, %v3105_v35  ;;  %v3108_v12 = vld [vmem:[%s13980_s9 + $0x25a0] sm:$0xff]  ;;  %v3143_v28 = vld [vmem:[%s13980_s9 + $0x26b8] sm:$0xff]  ;;  %v6617_v37 = vpack.c.bf16 %v3132_v48, %v3128_v44  ;;  %v3138_v24 = vld [vmem:[%s13980_s9 + $0x2690] sm:$0xff] }
 0x58d   :  { %7352 = vmatprep.subr.bf16.mxu1 %v7351_v32  ;;  %v3106_v32 = vld [vmem:[%s13980_s9 + $0x2590] sm:$0xff]  ;;  %v6605_v49 = vpack.c.bf16 %v3108_v12, %v3104_v41  ;;  %v3140_v35 = vld [vmem:[%s13980_s9 + $0x26a0] sm:$0xff]  ;;  %v3151_v41 = vld [vmem:[%s13980_s9 + $0x26f8] sm:$0xff] }
 0x58e   :  { %6586 = vmatpush1.bf16.msra.mxu0 %v6585_v8  ;;  %v3113_v8 = vld [vmem:[%s13980_s9 + $0x25c8] sm:$0xff]  ;;  %v7373_v50 = vpack.c.bf16 %v3110_v2, %v3106_v32  ;;  %v6621_v12 = vpack.c.bf16 %v3140_v35, %v3136_v42  ;;  %v7389_v32 = vpack.c.bf16 %v3142_v1, %v3138_v24  ;;  %v3144_v2 = vld [vmem:[%s13980_s9 + $0x26c0] sm:$0xff]  ;;  %v3175_v44 = vld [vmem:[%s13980_s9 + $0x27b8] sm:$0xff] }
 0x58f   :  { %7354 = vmatpush1.bf16.msra.mxu1 %v7353_v20  ;;  %6588 = vmatprep.subr.bf16.mxu0 %v6587_v22  ;;  %v3117_v20 = vld [vmem:[%s13980_s9 + $0x25e8] sm:$0xff]  ;;  %v3115_v22 = vld [vmem:[%s13980_s9 + $0x25d8] sm:$0xff]  ;;  %v3160_v23 = vld [vmem:[%s13980_s9 + $0x2740] sm:$0xff] }
 0x590   :  { %7356 = vmatprep.subr.bf16.mxu1 %v7355_v19  ;;  %v6607_v19 = vpack.c.bf16 %v3117_v20, %v3113_v8  ;;  %v7375_v60 = vpack.c.bf16 %v3119_v56, %v3115_v22  ;;  %v3148_v8 = vld [vmem:[%s13980_s9 + $0x26e0] sm:$0xff]  ;;  %v3146_v20 = vld [vmem:[%s13980_s9 + $0x26d0] sm:$0xff]  ;;  %v3183_v42 = vld [vmem:[%s13980_s9 + $0x27f8] sm:$0xff] }
 0x591   :  { %v3150_v56 = vld [vmem:[%s13980_s9 + $0x26f0] sm:$0xff]  ;;  %v6625_v25 = vpack.c.bf16 %v3148_v8, %v3144_v2  ;;  %v3168_v10 = vld [vmem:[%s13980_s9 + $0x2780] sm:$0xff]  ;;  %v3191_v2 = vld [vmem:[%s13980_s9 + $0x2838] sm:$0xff] }
 0x592   :  { %6590 = vmatpush1.bf16.msra.mxu0 %v6589_v4  ;;  %v3121_v4 = vld [vmem:[%s13980_s9 + $0x2608] sm:$0xff]  ;;  %v7393_v52 = vpack.c.bf16 %v3150_v56, %v3146_v20  ;;  %v3176_v1 = vld [vmem:[%s13980_s9 + $0x27c0] sm:$0xff] }
 0x593   :  { %7358 = vmatpush1.bf16.msra.mxu1 %v7357_v13  ;;  %6592 = vmatprep.subr.bf16.mxu0 %v6591_v9  ;;  %v3125_v13 = vld [vmem:[%s13980_s9 + $0x2628] sm:$0xff]  ;;  %v3123_v9 = vld [vmem:[%s13980_s9 + $0x2618] sm:$0xff]  ;;  %v3184_v56 = vld [vmem:[%s13980_s9 + $0x2800] sm:$0xff] }
 0x594   :  { %7360 = vmatprep.subr.bf16.mxu1 %v7359_v30  ;;  %v6611_v30 = vpack.c.bf16 %v3125_v13, %v3121_v4  ;;  %v7379_v43 = vpack.c.bf16 %v3127_v16, %v3123_v9  ;;  %v3156_v4 = vld [vmem:[%s13980_s9 + $0x2720] sm:$0xff]  ;;  %v3154_v13 = vld [vmem:[%s13980_s9 + $0x2710] sm:$0xff] }
 0x595   :  { %v3158_v16 = vld [vmem:[%s13980_s9 + $0x2730] sm:$0xff]  ;;  %v6629_v40 = vpack.c.bf16 %v3156_v4, %v3152_v61  ;;  %v3195_v61 = vld [vmem:[%s13980_s9 + $0x2858] sm:$0xff] }
 0x596   :  { %6594 = vmatpush1.bf16.msra.mxu0 %v6593_v45  ;;  %v3129_v45 = vld [vmem:[%s13980_s9 + $0x2648] sm:$0xff]  ;;  %v7397_v27 = vpack.c.bf16 %v3158_v16, %v3154_v13  ;;  %v3199_v4 = vld [vmem:[%s13980_s9 + $0x2878] sm:$0xff]  ;;  %v1898_v13 = vmax.f32 %v9534_v58, 0.0  ;;  %v3192_v16 = vld [vmem:[%s13980_s9 + $0x2840] sm:$0xff] }
 0x597   :  { %7362 = vmatpush1.bf16.msra.mxu1 %v7361_v34  ;;  %6596 = vmatprep.subr.bf16.mxu0 %v6595_v18  ;;  %v3133_v34 = vld [vmem:[%s13980_s9 + $0x2668] sm:$0xff]  ;;  %v3131_v18 = vld [vmem:[%s13980_s9 + $0x2658] sm:$0xff]  ;;  %v3198_v58 = vld [vmem:[%s13980_s9 + $0x2870] sm:$0xff] }
 0x598   :  { %7364 = vmatprep.subr.bf16.mxu1 %v7363_v53  ;;  %v6615_v53 = vpack.c.bf16 %v3133_v34, %v3129_v45  ;;  %v7383_v51 = vpack.c.bf16 %v3135_v47, %v3131_v18  ;;  %v3164_v45 = vld [vmem:[%s13980_s9 + $0x2760] sm:$0xff]  ;;  %v3162_v34 = vld [vmem:[%s13980_s9 + $0x2750] sm:$0xff] }
 0x599   :  { %v3166_v47 = vld [vmem:[%s13980_s9 + $0x2770] sm:$0xff]  ;;  %v6633_v48 = vpack.c.bf16 %v3164_v45, %v3160_v23  ;;  %v3203_v23 = vld [vmem:[%s13980_s9 + $0x2898] sm:$0xff] }
 0x59a   :  { %6598 = vmatpush1.bf16.msra.mxu0 %v6597_v0  ;;  %v3137_v0 = vld [vmem:[%s13980_s9 + $0x2688] sm:$0xff]  ;;  %v7401_v54 = vpack.c.bf16 %v3166_v47, %v3162_v34  ;;  %v3207_v45 = vld [vmem:[%s13980_s9 + $0x28b8] sm:$0xff] }
 0x59b   :  { %7366 = vmatpush1.bf16.msra.mxu1 %v7365_v21  ;;  %6600 = vmatprep.subr.bf16.mxu0 %v6599_v36  ;;  %v3141_v21 = vld [vmem:[%s13980_s9 + $0x26a8] sm:$0xff]  ;;  %v3139_v36 = vld [vmem:[%s13980_s9 + $0x2698] sm:$0xff] }
 0x59c   :  { %7368 = vmatprep.subr.bf16.mxu1 %v7367_v7  ;;  %v6619_v7 = vpack.c.bf16 %v3141_v21, %v3137_v0  ;;  %v7387_v46 = vpack.c.bf16 %v3143_v28, %v3139_v36  ;;  %v3172_v0 = vld [vmem:[%s13980_s9 + $0x27a0] sm:$0xff]  ;;  %v3170_v21 = vld [vmem:[%s13980_s9 + $0x2790] sm:$0xff] }
 0x59d   :  { %v3174_v28 = vld [vmem:[%s13980_s9 + $0x27b0] sm:$0xff]  ;;  %v6637_v35 = vpack.c.bf16 %v3172_v0, %v3168_v10  ;;  %v3215_v10 = vld [vmem:[%s13980_s9 + $0x28f8] sm:$0xff] }
 0x59e   :  { %6602 = vmatpush1.bf16.msra.mxu0 %v6601_v11  ;;  %v3145_v11 = vld [vmem:[%s13980_s9 + $0x26c8] sm:$0xff]  ;;  %v7405_v24 = vpack.c.bf16 %v3174_v28, %v3170_v21  ;;  %v3208_v28 = vld [vmem:[%s13980_s9 + $0x28c0] sm:$0xff] }
 0x59f   :  { %7370 = vmatpush1.bf16.msra.mxu1 %v7369_v26  ;;  %6604 = vmatprep.subr.bf16.mxu0 %v6603_v15  ;;  %v3149_v26 = vld [vmem:[%s13980_s9 + $0x26e8] sm:$0xff]  ;;  %v3147_v15 = vld [vmem:[%s13980_s9 + $0x26d8] sm:$0xff] }
 0x5a0   :  { %7372 = vmatprep.subr.bf16.mxu1 %v7371_v55  ;;  %v6623_v55 = vpack.c.bf16 %v3149_v26, %v3145_v11  ;;  %v7391_v22 = vpack.c.bf16 %v3151_v41, %v3147_v15  ;;  %v3180_v11 = vld [vmem:[%s13980_s9 + $0x27e0] sm:$0xff]  ;;  %v3178_v26 = vld [vmem:[%s13980_s9 + $0x27d0] sm:$0xff] }
 0x5a1   :  { %v3182_v41 = vld [vmem:[%s13980_s9 + $0x27f0] sm:$0xff]  ;;  %v6641_v8 = vpack.c.bf16 %v3180_v11, %v3176_v1  ;;  %v3223_v1 = vld [vmem:[%s13980_s9 + $0x2938] sm:$0xff] }
 0x5a2   :  { %6606 = vmatpush1.bf16.msra.mxu0 %v6605_v49  ;;  %v3153_v49 = vld [vmem:[%s13980_s9 + $0x2708] sm:$0xff]  ;;  %v7409_v20 = vpack.c.bf16 %v3182_v41, %v3178_v26  ;;  %v3216_v41 = vld [vmem:[%s13980_s9 + $0x2900] sm:$0xff] }
 0x5a3   :  { %7374 = vmatpush1.bf16.msra.mxu1 %v7373_v50  ;;  %6608 = vmatprep.subr.bf16.mxu0 %v6607_v19  ;;  %v3157_v50 = vld [vmem:[%s13980_s9 + $0x2728] sm:$0xff]  ;;  %v3155_v19 = vld [vmem:[%s13980_s9 + $0x2718] sm:$0xff] }
 0x5a4   :  { %7376 = vmatprep.subr.bf16.mxu1 %v7375_v60  ;;  %v6627_v60 = vpack.c.bf16 %v3157_v50, %v3153_v49  ;;  %v7395_v9 = vpack.c.bf16 %v3159_v62, %v3155_v19  ;;  %v3188_v49 = vld [vmem:[%s13980_s9 + $0x2820] sm:$0xff]  ;;  %v3186_v19 = vld [vmem:[%s13980_s9 + $0x2810] sm:$0xff] }
 0x5a5   :  { %v3190_v62 = vld [vmem:[%s13980_s9 + $0x2830] sm:$0xff] }
 0x5a6   :  { %6610 = vmatpush1.bf16.msra.mxu0 %v6609_v14  ;;  %v3161_v14 = vld [vmem:[%s13980_s9 + $0x2748] sm:$0xff] }
 0x5a7   :  { %7378 = vmatpush1.bf16.msra.mxu1 %v7377_v5  ;;  %6612 = vmatprep.subr.bf16.mxu0 %v6611_v30  ;;  %v3165_v5 = vld [vmem:[%s13980_s9 + $0x2768] sm:$0xff]  ;;  %v3163_v30 = vld [vmem:[%s13980_s9 + $0x2758] sm:$0xff] }
 0x5a8   :  { %7380 = vmatprep.subr.bf16.mxu1 %v7379_v43  ;;  %v6631_v43 = vpack.c.bf16 %v3165_v5, %v3161_v14  ;;  %v7399_v18 = vpack.c.bf16 %v3167_v17, %v3163_v30  ;;  %v3196_v14 = vld [vmem:[%s13980_s9 + $0x2860] sm:$0xff]  ;;  %v3194_v5 = vld [vmem:[%s13980_s9 + $0x2850] sm:$0xff]  ;;  %v3201_v17 = vld [vmem:[%s13980_s9 + $0x2888] sm:$0xff] }
 0x5a9   :  { %v6649_v34 = vpack.c.bf16 %v3196_v14, %v3192_v16  ;;  %v3239_v16 = vld [vmem:[%s13980_s9 + $0x29b8] sm:$0xff] }
 0x5aa   :  { %6614 = vmatpush1.bf16.msra.mxu0 %v6613_v38  ;;  %v3169_v38 = vld [vmem:[%s13980_s9 + $0x2788] sm:$0xff] }
 0x5ab   :  { %7382 = vmatpush1.bf16.msra.mxu1 %v7381_v39  ;;  %6616 = vmatprep.subr.bf16.mxu0 %v6615_v53  ;;  %v3173_v39 = vld [vmem:[%s13980_s9 + $0x27a8] sm:$0xff]  ;;  %v3171_v53 = vld [vmem:[%s13980_s9 + $0x2798] sm:$0xff] }
 0x5ac   :  { %7384 = vmatprep.subr.bf16.mxu1 %v7383_v51  ;;  %v6635_v51 = vpack.c.bf16 %v3173_v39, %v3169_v38  ;;  %v7403_v36 = vpack.c.bf16 %v3175_v44, %v3171_v53  ;;  %v3204_v38 = vld [vmem:[%s13980_s9 + $0x28a0] sm:$0xff]  ;;  %v3202_v39 = vld [vmem:[%s13980_s9 + $0x2890] sm:$0xff]  ;;  %v7419_v53 = vpack.c.bf16 %v3207_v45, %v3203_v23  ;;  %v3241_v23 = vld [vmem:[%s13980_s9 + $0x29c8] sm:$0xff] }
 0x5ad   :  { %v3206_v44 = vld [vmem:[%s13980_s9 + $0x28b0] sm:$0xff]  ;;  %v3245_v45 = vld [vmem:[%s13980_s9 + $0x29e8] sm:$0xff] }
 0x5ae   :  { %6618 = vmatpush1.bf16.msra.mxu0 %v6617_v37  ;;  %v3177_v37 = vld [vmem:[%s13980_s9 + $0x27c8] sm:$0xff]  ;;  %v7421_v21 = vpack.c.bf16 %v3206_v44, %v3202_v39  ;;  %v3240_v39 = vld [vmem:[%s13980_s9 + $0x29c0] sm:$0xff]  ;;  %v3242_v44 = vld [vmem:[%s13980_s9 + $0x29d0] sm:$0xff] }
 0x5af   :  { %7386 = vmatpush1.bf16.msra.mxu1 %v7385_v63  ;;  %6620 = vmatprep.subr.bf16.mxu0 %v6619_v7  ;;  %v3181_v63 = vld [vmem:[%s13980_s9 + $0x27e8] sm:$0xff]  ;;  %v3179_v7 = vld [vmem:[%s13980_s9 + $0x27d8] sm:$0xff] }
 0x5b0   :  { %7388 = vmatprep.subr.bf16.mxu1 %v7387_v46  ;;  %v6639_v46 = vpack.c.bf16 %v3181_v63, %v3177_v37  ;;  %v7407_v15 = vpack.c.bf16 %v3183_v42, %v3179_v7  ;;  %v3212_v37 = vld [vmem:[%s13980_s9 + $0x28e0] sm:$0xff]  ;;  %v3210_v63 = vld [vmem:[%s13980_s9 + $0x28d0] sm:$0xff] }
 0x5b1   :  { %v3214_v42 = vld [vmem:[%s13980_s9 + $0x28f0] sm:$0xff]  ;;  %v6657_v11 = vpack.c.bf16 %v3212_v37, %v3208_v28 }
 0x5b2   :  { %6622 = vmatpush1.bf16.msra.mxu0 %v6621_v12  ;;  %v3185_v12 = vld [vmem:[%s13980_s9 + $0x2808] sm:$0xff]  ;;  %v7425_v26 = vpack.c.bf16 %v3214_v42, %v3210_v63  ;;  %v3248_v63 = vld [vmem:[%s13980_s9 + $0x2a00] sm:$0xff]  ;;  %v3250_v42 = vld [vmem:[%s13980_s9 + $0x2a10] sm:$0xff] }
 0x5b3   :  { %7390 = vmatpush1.bf16.msra.mxu1 %v7389_v32  ;;  %6624 = vmatprep.subr.bf16.mxu0 %v6623_v55  ;;  %v3189_v32 = vld [vmem:[%s13980_s9 + $0x2828] sm:$0xff]  ;;  %v3187_v55 = vld [vmem:[%s13980_s9 + $0x2818] sm:$0xff] }
 0x5b4   :  { %7392 = vmatprep.subr.bf16.mxu1 %v7391_v22  ;;  %v6643_v22 = vpack.c.bf16 %v3189_v32, %v3185_v12  ;;  %v7411_v50 = vpack.c.bf16 %v3191_v2, %v3187_v55  ;;  %v3220_v12 = vld [vmem:[%s13980_s9 + $0x2920] sm:$0xff]  ;;  %v3218_v32 = vld [vmem:[%s13980_s9 + $0x2910] sm:$0xff] }
 0x5b5   :  { %v3222_v2 = vld [vmem:[%s13980_s9 + $0x2930] sm:$0xff] }
 0x5b6   :  { %6626 = vmatpush1.bf16.msra.mxu0 %v6625_v25  ;;  %v3193_v25 = vld [vmem:[%s13980_s9 + $0x2848] sm:$0xff] }
 0x5b7   :  { %7394 = vmatpush1.bf16.msra.mxu1 %v7393_v52  ;;  %6628 = vmatprep.subr.bf16.mxu0 %v6627_v60  ;;  %v3197_v52 = vld [vmem:[%s13980_s9 + $0x2868] sm:$0xff]  ;;  %v6645_v60 = vpack.c.bf16 %v3188_v49, %v3184_v56  ;;  %v3231_v56 = vld [vmem:[%s13980_s9 + $0x2978] sm:$0xff]  ;;  %v6661_v49 = vpack.c.bf16 %v3220_v12, %v3216_v41 }
 0x5b8   :  { %7396 = vmatprep.subr.bf16.mxu1 %v7395_v9  ;;  %v7413_v9 = vpack.c.bf16 %v3190_v62, %v3186_v19  ;;  %v6647_v30 = vpack.c.bf16 %v3197_v52, %v3193_v25  ;;  %v3224_v62 = vld [vmem:[%s13980_s9 + $0x2940] sm:$0xff]  ;;  %v3226_v52 = vld [vmem:[%s13980_s9 + $0x2950] sm:$0xff] }
 0x5b9   :  { %v3228_v25 = vld [vmem:[%s13980_s9 + $0x2960] sm:$0xff] }
 0x5ba   :  { %6630 = vmatpush1.bf16.msra.mxu0 %v6629_v40  ;;  %v3205_v40 = vld [vmem:[%s13980_s9 + $0x28a8] sm:$0xff]  ;;  %v6665_v14 = vpack.c.bf16 %v3228_v25, %v3224_v62 }
 0x5bb   :  { %7398 = vmatpush1.bf16.msra.mxu1 %v7397_v27  ;;  %6632 = vmatprep.subr.bf16.mxu0 %v6631_v43  ;;  %v1901_v27 = vmax.f32 %v9576_v29, 0.0  ;;  %v7415_v43 = vpack.c.bf16 %v3199_v4, %v3195_v61  ;;  %v6651_v47 = vpack.c.bf16 %v3205_v40, %v3201_v17  ;;  %v3200_v29 = vld [vmem:[%s13980_s9 + $0x2880] sm:$0xff]  ;;  %v3230_v61 = vld [vmem:[%s13980_s9 + $0x2970] sm:$0xff]  ;;  %v3233_v4 = vld [vmem:[%s13980_s9 + $0x2988] sm:$0xff] }
 0x5bc   :  { %7400 = vmatprep.subr.bf16.mxu1 %v7399_v18  ;;  %v7417_v18 = vpack.c.bf16 %v3198_v58, %v3194_v5  ;;  %v6653_v0 = vpack.c.bf16 %v3204_v38, %v3200_v29  ;;  %v7433_v5 = vpack.c.bf16 %v3230_v61, %v3226_v52  ;;  %v3232_v58 = vld [vmem:[%s13980_s9 + $0x2980] sm:$0xff]  ;;  %v3234_v40 = vld [vmem:[%s13980_s9 + $0x2990] sm:$0xff]  ;;  %v6671_v38 = vpack.c.bf16 %v3245_v45, %v3241_v23 }
 0x5bd   :  { %v3236_v17 = vld [vmem:[%s13980_s9 + $0x29a0] sm:$0xff]  ;;  %v3266_v61 = vld [vmem:[%s13980_s9 + $0x2a90] sm:$0xff] }
 0x5be   :  { %6634 = vmatpush1.bf16.msra.mxu0 %v6633_v48  ;;  %v3209_v48 = vld [vmem:[%s13980_s9 + $0x28c8] sm:$0xff]  ;;  %v3264_v52 = vld [vmem:[%s13980_s9 + $0x2a80] sm:$0xff]  ;;  %v3278_v45 = vld [vmem:[%s13980_s9 + $0x2af0] sm:$0xff] }
 0x5bf   :  { %7402 = vmatpush1.bf16.msra.mxu1 %v7401_v54  ;;  %6636 = vmatprep.subr.bf16.mxu0 %v6635_v51  ;;  %v3213_v54 = vld [vmem:[%s13980_s9 + $0x28e8] sm:$0xff]  ;;  %v3211_v51 = vld [vmem:[%s13980_s9 + $0x28d8] sm:$0xff] }
 0x5c0   :  { %7404 = vmatprep.subr.bf16.mxu1 %v7403_v36  ;;  %v6655_v36 = vpack.c.bf16 %v3213_v54, %v3209_v48  ;;  %v7423_v7 = vpack.c.bf16 %v3215_v10, %v3211_v51  ;;  %v3246_v54 = vld [vmem:[%s13980_s9 + $0x29f0] sm:$0xff]  ;;  %v3249_v51 = vld [vmem:[%s13980_s9 + $0x2a08] sm:$0xff] }
 0x5c1   :  { %v3253_v10 = vld [vmem:[%s13980_s9 + $0x2a28] sm:$0xff]  ;;  %v7441_v28 = vpack.c.bf16 %v3246_v54, %v3242_v44  ;;  %v3280_v44 = vld [vmem:[%s13980_s9 + $0x2b00] sm:$0xff]  ;;  %v3282_v54 = vld [vmem:[%s13980_s9 + $0x2b10] sm:$0xff] }
 0x5c2   :  { %6638 = vmatpush1.bf16.msra.mxu0 %v6637_v35  ;;  %v3217_v35 = vld [vmem:[%s13980_s9 + $0x2908] sm:$0xff]  ;;  %v6675_v37 = vpack.c.bf16 %v3253_v10, %v3249_v51  ;;  %v3286_v10 = vld [vmem:[%s13980_s9 + $0x2b30] sm:$0xff] }
 0x5c3   :  { %7406 = vmatpush1.bf16.msra.mxu1 %v7405_v24  ;;  %6640 = vmatprep.subr.bf16.mxu0 %v6639_v46  ;;  %v3221_v24 = vld [vmem:[%s13980_s9 + $0x2928] sm:$0xff]  ;;  %v3219_v46 = vld [vmem:[%s13980_s9 + $0x2918] sm:$0xff] }
 0x5c4   :  { %7408 = vmatprep.subr.bf16.mxu1 %v7407_v15  ;;  %v6659_v15 = vpack.c.bf16 %v3221_v24, %v3217_v35  ;;  %v7427_v55 = vpack.c.bf16 %v3223_v1, %v3219_v46  ;;  %v3254_v24 = vld [vmem:[%s13980_s9 + $0x2a30] sm:$0xff]  ;;  %v3257_v46 = vld [vmem:[%s13980_s9 + $0x2a48] sm:$0xff] }
 0x5c5   :  { %v3261_v1 = vld [vmem:[%s13980_s9 + $0x2a68] sm:$0xff]  ;;  %v7445_v41 = vpack.c.bf16 %v3254_v24, %v3250_v42  ;;  %v3288_v42 = vld [vmem:[%s13980_s9 + $0x2b40] sm:$0xff]  ;;  %v3290_v24 = vld [vmem:[%s13980_s9 + $0x2b50] sm:$0xff] }
 0x5c6   :  { %6642 = vmatpush1.bf16.msra.mxu0 %v6641_v8  ;;  %v3225_v8 = vld [vmem:[%s13980_s9 + $0x2948] sm:$0xff]  ;;  %v6679_v12 = vpack.c.bf16 %v3261_v1, %v3257_v46  ;;  %v3294_v1 = vld [vmem:[%s13980_s9 + $0x2b70] sm:$0xff] }
 0x5c7   :  { %7410 = vmatpush1.bf16.msra.mxu1 %v7409_v20  ;;  %6644 = vmatprep.subr.bf16.mxu0 %v6643_v22  ;;  %v3229_v20 = vld [vmem:[%s13980_s9 + $0x2968] sm:$0xff]  ;;  %v3227_v22 = vld [vmem:[%s13980_s9 + $0x2958] sm:$0xff] }
 0x5c8   :  { %7412 = vmatprep.subr.bf16.mxu1 %v7411_v50  ;;  %v7429_v50 = vpack.c.bf16 %v3222_v2, %v3218_v32  ;;  %v6663_v19 = vpack.c.bf16 %v3229_v20, %v3225_v8  ;;  %v3256_v32 = vld [vmem:[%s13980_s9 + $0x2a40] sm:$0xff]  ;;  %v3258_v2 = vld [vmem:[%s13980_s9 + $0x2a50] sm:$0xff] }
 0x5c9   :  { %4166 = vmatmul.mubr.f32.vlgmr.msra.gmra.mrb[24].mxu0 %v1898_v13  ;;  %v3262_v20 = vld [vmem:[%s13980_s9 + $0x2a70] sm:$0xff] }
 0x5ca   :  { %5018 = vmatmul.mubr.f32.vlgmr.msra.gmra.mrb[72].mxu1 %v1898_v13  ;;  %6646 = vmatpush1.bf16.msra.mxu0 %v6645_v60  ;;  %v7431_v60 = vpack.c.bf16 %v3231_v56, %v3227_v22  ;;  %v3237_v13 = vld [vmem:[%s13980_s9 + $0x29a8] sm:$0xff]  ;;  %v7449_v62 = vpack.c.bf16 %v3262_v20, %v3258_v2  ;;  %v3296_v2 = vld [vmem:[%s13980_s9 + $0x2b80] sm:$0xff]  ;;  %v3298_v20 = vld [vmem:[%s13980_s9 + $0x2b90] sm:$0xff] }
 0x5cb   :  { %4236 = vmatprep.mubr.f32.mxu0 %v1901_v27  ;;  %7414 = vmatpush1.bf16.msra.mxu1 %v7413_v9  ;;  %v3235_v9 = vld [vmem:[%s13980_s9 + $0x2998] sm:$0xff]  ;;  %v3265_v22 = vld [vmem:[%s13980_s9 + $0x2a88] sm:$0xff] }
 0x5cc   :  { %5088 = vmatprep.mubr.f32.mxu1 %v1901_v27  ;;  %6648 = vmatprep.subr.bf16.mxu0 %v6647_v30  ;;  %v6667_v30 = vpack.c.bf16 %v3237_v13, %v3233_v4  ;;  %v7435_v27 = vpack.c.bf16 %v3239_v16, %v3235_v9  ;;  %v3269_v56 = vld [vmem:[%s13980_s9 + $0x2aa8] sm:$0xff]  ;;  %v3270_v13 = vld [vmem:[%s13980_s9 + $0x2ab0] sm:$0xff] }
 0x5cd   :  { %7416 = vmatprep.subr.bf16.mxu1 %v7415_v43  ;;  %v3238_v43 = vld [vmem:[%s13980_s9 + $0x29b0] sm:$0xff]  ;;  %v6683_v25 = vpack.c.bf16 %v3269_v56, %v3265_v22  ;;  %v3273_v9 = vld [vmem:[%s13980_s9 + $0x2ac8] sm:$0xff] }
 0x5ce   :  { %6650 = vmatpush1.bf16.msra.mxu0 %v6649_v34  ;;  %v3243_v34 = vld [vmem:[%s13980_s9 + $0x29d8] sm:$0xff]  ;;  %v7437_v29 = vpack.c.bf16 %v3238_v43, %v3234_v40  ;;  %v3277_v16 = vld [vmem:[%s13980_s9 + $0x2ae8] sm:$0xff]  ;;  %v3272_v40 = vld [vmem:[%s13980_s9 + $0x2ac0] sm:$0xff] }
 0x5cf   :  { %7418 = vmatpush1.bf16.msra.mxu1 %v7417_v18  ;;  %6652 = vmatprep.subr.bf16.mxu0 %v6651_v47  ;;  %v3247_v18 = vld [vmem:[%s13980_s9 + $0x29f8] sm:$0xff]  ;;  %v6669_v47 = vpack.c.bf16 %v3236_v17, %v3232_v58  ;;  %v7453_v58 = vpack.c.bf16 %v3270_v13, %v3266_v61  ;;  %v6687_v17 = vpack.c.bf16 %v3277_v16, %v3273_v9  ;;  %v3274_v43 = vld [vmem:[%s13980_s9 + $0x2ad0] sm:$0xff]  ;;  %v3304_v61 = vld [vmem:[%s13980_s9 + $0x2bc0] sm:$0xff] }
 0x5d0   :  { %7420 = vmatprep.subr.bf16.mxu1 %v7419_v53  ;;  %v3244_v53 = vld [vmem:[%s13980_s9 + $0x29e0] sm:$0xff]  ;;  %v7439_v48 = vpack.c.bf16 %v3247_v18, %v3243_v34  ;;  %v3281_v34 = vld [vmem:[%s13980_s9 + $0x2b08] sm:$0xff]  ;;  %v3302_v56 = vld [vmem:[%s13980_s9 + $0x2bb0] sm:$0xff] }
 0x5d1   :  { %v3285_v18 = vld [vmem:[%s13980_s9 + $0x2b28] sm:$0xff]  ;;  %v3306_v13 = vld [vmem:[%s13980_s9 + $0x2bd0] sm:$0xff] }
 0x5d2   :  { %6654 = vmatpush1.bf16.msra.mxu0 %v6653_v0  ;;  %v3251_v0 = vld [vmem:[%s13980_s9 + $0x2a18] sm:$0xff]  ;;  %v3310_v16 = vld [vmem:[%s13980_s9 + $0x2bf0] sm:$0xff] }
 0x5d3   :  { %7422 = vmatpush1.bf16.msra.mxu1 %v7421_v21  ;;  %6656 = vmatprep.subr.bf16.mxu0 %v6655_v36  ;;  %v3255_v21 = vld [vmem:[%s13980_s9 + $0x2a38] sm:$0xff]  ;;  %v6673_v36 = vpack.c.bf16 %v3244_v53, %v3240_v39  ;;  %v7457_v39 = vpack.c.bf16 %v3278_v45, %v3274_v43  ;;  %v6691_v53 = vpack.c.bf16 %v3285_v18, %v3281_v34  ;;  %v3312_v43 = vld [vmem:[%s13980_s9 + $0x2c00] sm:$0xff]  ;;  %v3314_v34 = vld [vmem:[%s13980_s9 + $0x2c10] sm:$0xff] }
 0x5d4   :  { %7424 = vmatprep.subr.bf16.mxu1 %v7423_v7  ;;  %v3252_v7 = vld [vmem:[%s13980_s9 + $0x2a20] sm:$0xff]  ;;  %v7443_v35 = vpack.c.bf16 %v3255_v21, %v3251_v0  ;;  %v3289_v0 = vld [vmem:[%s13980_s9 + $0x2b48] sm:$0xff]  ;;  %v3318_v18 = vld [vmem:[%s13980_s9 + $0x2c30] sm:$0xff] }
 0x5d5   :  { %v3293_v21 = vld [vmem:[%s13980_s9 + $0x2b68] sm:$0xff] }
 0x5d6   :  { %6658 = vmatpush1.bf16.msra.mxu0 %v6657_v11  ;;  %v3259_v11 = vld [vmem:[%s13980_s9 + $0x2a58] sm:$0xff] }
 0x5d7   :  { %7426 = vmatpush1.bf16.msra.mxu1 %v7425_v26  ;;  %6660 = vmatprep.subr.bf16.mxu0 %v6659_v15  ;;  %v3263_v26 = vld [vmem:[%s13980_s9 + $0x2a78] sm:$0xff]  ;;  %v6677_v15 = vpack.c.bf16 %v3252_v7, %v3248_v63  ;;  %v7461_v63 = vpack.c.bf16 %v3286_v10, %v3282_v54  ;;  %v6695_v7 = vpack.c.bf16 %v3293_v21, %v3289_v0  ;;  %v3320_v54 = vld [vmem:[%s13980_s9 + $0x2c40] sm:$0xff]  ;;  %v3322_v10 = vld [vmem:[%s13980_s9 + $0x2c50] sm:$0xff] }
 0x5d8   :  { %7428 = vmatprep.subr.bf16.mxu1 %v7427_v55  ;;  %v3260_v55 = vld [vmem:[%s13980_s9 + $0x2a60] sm:$0xff]  ;;  %v7447_v8 = vpack.c.bf16 %v3263_v26, %v3259_v11  ;;  %v3297_v11 = vld [vmem:[%s13980_s9 + $0x2b88] sm:$0xff] }
 0x5d9   :  { %v3301_v26 = vld [vmem:[%s13980_s9 + $0x2ba8] sm:$0xff] }
 0x5da   :  { %6662 = vmatpush1.bf16.msra.mxu0 %v6661_v49  ;;  %v3267_v49 = vld [vmem:[%s13980_s9 + $0x2a98] sm:$0xff]  ;;  %v3329_v21 = vld [vmem:[%s13980_s9 + $0x2c88] sm:$0xff] }
 0x5db   :  { %7430 = vmatpush1.bf16.msra.mxu1 %v7429_v50  ;;  %6664 = vmatprep.subr.bf16.mxu0 %v6663_v19  ;;  %v3271_v50 = vld [vmem:[%s13980_s9 + $0x2ab8] sm:$0xff]  ;;  %v6681_v19 = vpack.c.bf16 %v3260_v55, %v3256_v32  ;;  %v7465_v32 = vpack.c.bf16 %v3294_v1, %v3290_v24  ;;  %v6699_v55 = vpack.c.bf16 %v3301_v26, %v3297_v11  ;;  %v3330_v1 = vld [vmem:[%s13980_s9 + $0x2c90] sm:$0xff] }
 0x5dc   :  { %7432 = vmatprep.subr.bf16.mxu1 %v7431_v60  ;;  %v3268_v60 = vld [vmem:[%s13980_s9 + $0x2aa0] sm:$0xff]  ;;  %v7451_v4 = vpack.c.bf16 %v3271_v50, %v3267_v49  ;;  %v3305_v49 = vld [vmem:[%s13980_s9 + $0x2bc8] sm:$0xff]  ;;  %v3334_v26 = vld [vmem:[%s13980_s9 + $0x2cb0] sm:$0xff] }
 0x5dd   :  { %v3309_v50 = vld [vmem:[%s13980_s9 + $0x2be8] sm:$0xff] }
 0x5de   :  { %6666 = vmatpush1.bf16.msra.mxu0 %v6665_v14  ;;  %v3275_v14 = vld [vmem:[%s13980_s9 + $0x2ad8] sm:$0xff] }
 0x5df   :  { %7434 = vmatpush1.bf16.msra.mxu1 %v7433_v5  ;;  %6668 = vmatprep.subr.bf16.mxu0 %v6667_v30  ;;  %v3279_v5 = vld [vmem:[%s13980_s9 + $0x2af8] sm:$0xff]  ;;  %v6685_v30 = vpack.c.bf16 %v3268_v60, %v3264_v52  ;;  %v7469_v52 = vpack.c.bf16 %v3302_v56, %v3298_v20  ;;  %v6703_v60 = vpack.c.bf16 %v3309_v50, %v3305_v49  ;;  %v3336_v20 = vld [vmem:[%s13980_s9 + $0x2cc0] sm:$0xff]  ;;  %v3338_v56 = vld [vmem:[%s13980_s9 + $0x2cd0] sm:$0xff] }
 0x5e0   :  { %7436 = vmatprep.subr.bf16.mxu1 %v7435_v27  ;;  %v3276_v27 = vld [vmem:[%s13980_s9 + $0x2ae0] sm:$0xff]  ;;  %v7455_v23 = vpack.c.bf16 %v3279_v5, %v3275_v14  ;;  %v3313_v14 = vld [vmem:[%s13980_s9 + $0x2c08] sm:$0xff]  ;;  %v3342_v50 = vld [vmem:[%s13980_s9 + $0x2cf0] sm:$0xff] }
 0x5e1   :  { %v3317_v5 = vld [vmem:[%s13980_s9 + $0x2c28] sm:$0xff] }
 0x5e2   :  { %6670 = vmatpush1.bf16.msra.mxu0 %v6669_v47  ;;  %v3283_v47 = vld [vmem:[%s13980_s9 + $0x2b18] sm:$0xff] }
 0x5e3   :  { %7438 = vmatpush1.bf16.msra.mxu1 %v7437_v29  ;;  %6672 = vmatprep.subr.bf16.mxu0 %v6671_v38  ;;  %v3287_v29 = vld [vmem:[%s13980_s9 + $0x2b38] sm:$0xff]  ;;  %v6689_v38 = vpack.c.bf16 %v3276_v27, %v3272_v40  ;;  %v7473_v40 = vpack.c.bf16 %v3310_v16, %v3306_v13  ;;  %v6707_v27 = vpack.c.bf16 %v3317_v5, %v3313_v14  ;;  %v3344_v13 = vld [vmem:[%s13980_s9 + $0x2d00] sm:$0xff]  ;;  %v3346_v16 = vld [vmem:[%s13980_s9 + $0x2d10] sm:$0xff] }
 0x5e4   :  { %7440 = vmatprep.subr.bf16.mxu1 %v7439_v48  ;;  %v3284_v48 = vld [vmem:[%s13980_s9 + $0x2b20] sm:$0xff]  ;;  %v7459_v51 = vpack.c.bf16 %v3287_v29, %v3283_v47  ;;  %v3321_v47 = vld [vmem:[%s13980_s9 + $0x2c48] sm:$0xff]  ;;  %v3350_v5 = vld [vmem:[%s13980_s9 + $0x2d30] sm:$0xff] }
 0x5e5   :  { %v3325_v29 = vld [vmem:[%s13980_s9 + $0x2c68] sm:$0xff] }
 0x5e6   :  { %6674 = vmatpush1.bf16.msra.mxu0 %v6673_v36  ;;  %v3291_v36 = vld [vmem:[%s13980_s9 + $0x2b58] sm:$0xff]  ;;  %v6711_v0 = vpack.c.bf16 %v3325_v29, %v3321_v47  ;;  %v3358_v29 = vld [vmem:[%s13980_s9 + $0x2d70] sm:$0xff] }
 0x5e7   :  { %7442 = vmatpush1.bf16.msra.mxu1 %v7441_v28  ;;  %6676 = vmatprep.subr.bf16.mxu0 %v6675_v37  ;;  %v3295_v28 = vld [vmem:[%s13980_s9 + $0x2b78] sm:$0xff]  ;;  %v6693_v37 = vpack.c.bf16 %v3284_v48, %v3280_v44  ;;  %v1900_v44 = vmax.f32 %v9564_v33, 0.0  ;;  %v7477_v48 = vpack.c.bf16 %v3318_v18, %v3314_v34  ;;  %v3326_v33 = vld [vmem:[%s13980_s9 + $0x2c70] sm:$0xff]  ;;  %v3356_v34 = vld [vmem:[%s13980_s9 + $0x2d60] sm:$0xff] }
 0x5e8   :  { %7444 = vmatprep.subr.bf16.mxu1 %v7443_v35  ;;  %v3292_v35 = vld [vmem:[%s13980_s9 + $0x2b60] sm:$0xff]  ;;  %v7463_v46 = vpack.c.bf16 %v3295_v28, %v3291_v36  ;;  %v3333_v36 = vld [vmem:[%s13980_s9 + $0x2ca8] sm:$0xff]  ;;  %v1903_v28 = vmax.f32 %v9606_v6, 0.0  ;;  %v3354_v18 = vld [vmem:[%s13980_s9 + $0x2d50] sm:$0xff] }
 0x5e9   :  { %v6715_v24 = vpack.c.bf16 %v3333_v36, %v3329_v21  ;;  %v3328_v6 = vld [vmem:[%s13980_s9 + $0x2c80] sm:$0xff]  ;;  %v3366_v36 = vld [vmem:[%s13980_s9 + $0x2db0] sm:$0xff] }
 0x5ea   :  { %6678 = vmatpush1.bf16.msra.mxu0 %v6677_v15  ;;  %v3299_v15 = vld [vmem:[%s13980_s9 + $0x2b98] sm:$0xff] }
 0x5eb   :  { %7446 = vmatpush1.bf16.msra.mxu1 %v7445_v41  ;;  %6680 = vmatprep.subr.bf16.mxu0 %v6679_v12  ;;  %v3303_v41 = vld [vmem:[%s13980_s9 + $0x2bb8] sm:$0xff]  ;;  %v6697_v12 = vpack.c.bf16 %v3292_v35, %v3288_v42  ;;  %v7481_v35 = vpack.c.bf16 %v3326_v33, %v3322_v10  ;;  %v3360_v10 = vld [vmem:[%s13980_s9 + $0x2d80] sm:$0xff]  ;;  %v3362_v33 = vld [vmem:[%s13980_s9 + $0x2d90] sm:$0xff] }
 0x5ec   :  { %7448 = vmatprep.subr.bf16.mxu1 %v7447_v8  ;;  %v3300_v8 = vld [vmem:[%s13980_s9 + $0x2ba0] sm:$0xff]  ;;  %v7467_v22 = vpack.c.bf16 %v3303_v41, %v3299_v15  ;;  %v3337_v15 = vld [vmem:[%s13980_s9 + $0x2cc8] sm:$0xff] }
 0x5ed   :  { %v3341_v41 = vld [vmem:[%s13980_s9 + $0x2ce8] sm:$0xff] }
 0x5ee   :  { %6682 = vmatpush1.bf16.msra.mxu0 %v6681_v19  ;;  %v3307_v19 = vld [vmem:[%s13980_s9 + $0x2bd8] sm:$0xff] }
 0x5ef   :  { %7450 = vmatpush1.bf16.msra.mxu1 %v7449_v62  ;;  %6684 = vmatprep.subr.bf16.mxu0 %v6683_v25  ;;  %v3311_v62 = vld [vmem:[%s13980_s9 + $0x2bf8] sm:$0xff]  ;;  %v6701_v25 = vpack.c.bf16 %v3300_v8, %v3296_v2  ;;  %v7485_v2 = vpack.c.bf16 %v3334_v26, %v3330_v1  ;;  %v6719_v8 = vpack.c.bf16 %v3341_v41, %v3337_v15  ;;  %v3370_v1 = vld [vmem:[%s13980_s9 + $0x2dd0] sm:$0xff]  ;;  %v3377_v15 = vld [vmem:[%s13980_s9 + $0x2e08] sm:$0xff] }
 0x5f0   :  { %7452 = vmatprep.subr.bf16.mxu1 %v7451_v4  ;;  %v3308_v4 = vld [vmem:[%s13980_s9 + $0x2be0] sm:$0xff]  ;;  %v7471_v9 = vpack.c.bf16 %v3311_v62, %v3307_v19  ;;  %v3345_v19 = vld [vmem:[%s13980_s9 + $0x2d08] sm:$0xff]  ;;  %v3374_v26 = vld [vmem:[%s13980_s9 + $0x2df0] sm:$0xff] }
 0x5f1   :  { %v3349_v62 = vld [vmem:[%s13980_s9 + $0x2d28] sm:$0xff] }
 0x5f2   :  { %6686 = vmatpush1.bf16.msra.mxu0 %v6685_v30  ;;  %v3315_v30 = vld [vmem:[%s13980_s9 + $0x2c18] sm:$0xff]  ;;  %v3381_v41 = vld [vmem:[%s13980_s9 + $0x2e28] sm:$0xff] }
 0x5f3   :  { %7454 = vmatpush1.bf16.msra.mxu1 %v7453_v58  ;;  %6688 = vmatprep.subr.bf16.mxu0 %v6687_v17  ;;  %v3319_v58 = vld [vmem:[%s13980_s9 + $0x2c38] sm:$0xff]  ;;  %v6705_v17 = vpack.c.bf16 %v3308_v4, %v3304_v61  ;;  %v7489_v61 = vpack.c.bf16 %v3342_v50, %v3338_v56  ;;  %v6723_v4 = vpack.c.bf16 %v3349_v62, %v3345_v19  ;;  %v3378_v56 = vld [vmem:[%s13980_s9 + $0x2e10] sm:$0xff]  ;;  %v3385_v19 = vld [vmem:[%s13980_s9 + $0x2e48] sm:$0xff] }
 0x5f4   :  { %7456 = vmatprep.subr.bf16.mxu1 %v7455_v23  ;;  %v3316_v23 = vld [vmem:[%s13980_s9 + $0x2c20] sm:$0xff]  ;;  %v7475_v45 = vpack.c.bf16 %v3319_v58, %v3315_v30  ;;  %v3353_v30 = vld [vmem:[%s13980_s9 + $0x2d48] sm:$0xff]  ;;  %v3382_v50 = vld [vmem:[%s13980_s9 + $0x2e30] sm:$0xff] }
 0x5f5   :  { %v3357_v58 = vld [vmem:[%s13980_s9 + $0x2d68] sm:$0xff] }
 0x5f6   :  { %6690 = vmatpush1.bf16.msra.mxu0 %v6689_v38  ;;  %v6709_v38 = vpack.c.bf16 %v3316_v23, %v3312_v43  ;;  %v7493_v43 = vpack.c.bf16 %v3350_v5, %v3346_v16  ;;  %v6727_v23 = vpack.c.bf16 %v3357_v58, %v3353_v30  ;;  %v3389_v62 = vld [vmem:[%s13980_s9 + $0x2e68] sm:$0xff]  ;;  %v3386_v16 = vld [vmem:[%s13980_s9 + $0x2e50] sm:$0xff] }
 0x5f7   :  { %7458 = vmatpush1.bf16.msra.mxu1 %v7457_v39  ;;  %6692 = vmatprep.subr.bf16.mxu0 %v6691_v53  ;;  %v3323_v39 = vld [vmem:[%s13980_s9 + $0x2c58] sm:$0xff]  ;;  %v3390_v5 = vld [vmem:[%s13980_s9 + $0x2e70] sm:$0xff]  ;;  %v3393_v30 = vld [vmem:[%s13980_s9 + $0x2e88] sm:$0xff] }
 0x5f8   :  { %7460 = vmatprep.subr.bf16.mxu1 %v7459_v51  ;;  %v3327_v53 = vld [vmem:[%s13980_s9 + $0x2c78] sm:$0xff]  ;;  %v3324_v51 = vld [vmem:[%s13980_s9 + $0x2c60] sm:$0xff]  ;;  %v3397_v58 = vld [vmem:[%s13980_s9 + $0x2ea8] sm:$0xff] }
 0x5f9   :  { %v6713_v42 = vpack.c.bf16 %v3324_v51, %v3320_v54  ;;  %v7497_v54 = vpack.c.bf16 %v3358_v29, %v3354_v18  ;;  %v3394_v18 = vld [vmem:[%s13980_s9 + $0x2e90] sm:$0xff] }
 0x5fa   :  { %6694 = vmatpush1.bf16.msra.mxu0 %v6693_v37  ;;  %v7479_v37 = vpack.c.bf16 %v3327_v53, %v3323_v39  ;;  %v3365_v39 = vld [vmem:[%s13980_s9 + $0x2da8] sm:$0xff]  ;;  %v3363_v53 = vld [vmem:[%s13980_s9 + $0x2d98] sm:$0xff]  ;;  %v3398_v29 = vld [vmem:[%s13980_s9 + $0x2eb0] sm:$0xff] }
 0x5fb   :  { %7462 = vmatpush1.bf16.msra.mxu1 %v7461_v63  ;;  %6696 = vmatprep.subr.bf16.mxu0 %v6695_v7  ;;  %v3331_v63 = vld [vmem:[%s13980_s9 + $0x2c98] sm:$0xff] }
 0x5fc   :  { %7464 = vmatprep.subr.bf16.mxu1 %v7463_v46  ;;  %v3335_v7 = vld [vmem:[%s13980_s9 + $0x2cb8] sm:$0xff]  ;;  %v3332_v46 = vld [vmem:[%s13980_s9 + $0x2ca0] sm:$0xff] }
 0x5fd   :  { %v7483_v11 = vpack.c.bf16 %v3335_v7, %v3331_v63  ;;  %v3371_v63 = vld [vmem:[%s13980_s9 + $0x2dd8] sm:$0xff] }
 0x5fe   :  { %6698 = vmatpush1.bf16.msra.mxu0 %v6697_v12  ;;  %v3339_v12 = vld [vmem:[%s13980_s9 + $0x2cd8] sm:$0xff] }
 0x5ff   :  { %7466 = vmatpush1.bf16.msra.mxu1 %v7465_v32  ;;  %6700 = vmatprep.subr.bf16.mxu0 %v6699_v55  ;;  %v3343_v32 = vld [vmem:[%s13980_s9 + $0x2cf8] sm:$0xff]  ;;  %v6717_v55 = vpack.c.bf16 %v3332_v46, %v3328_v6  ;;  %v3368_v6 = vld [vmem:[%s13980_s9 + $0x2dc0] sm:$0xff] }
 0x600   :  { %7468 = vmatprep.subr.bf16.mxu1 %v7467_v22  ;;  %v3340_v22 = vld [vmem:[%s13980_s9 + $0x2ce0] sm:$0xff]  ;;  %v7487_v49 = vpack.c.bf16 %v3343_v32, %v3339_v12  ;;  %v3375_v7 = vld [vmem:[%s13980_s9 + $0x2df8] sm:$0xff] }
 0x601   :  { %v3372_v46 = vld [vmem:[%s13980_s9 + $0x2de0] sm:$0xff]  ;;  %v3379_v12 = vld [vmem:[%s13980_s9 + $0x2e18] sm:$0xff] }
 0x602   :  { %6702 = vmatpush1.bf16.msra.mxu0 %v6701_v25  ;;  %v3347_v25 = vld [vmem:[%s13980_s9 + $0x2d18] sm:$0xff] }
 0x603   :  { %7470 = vmatpush1.bf16.msra.mxu1 %v7469_v52  ;;  %6704 = vmatprep.subr.bf16.mxu0 %v6703_v60  ;;  %v3351_v52 = vld [vmem:[%s13980_s9 + $0x2d38] sm:$0xff]  ;;  %v6721_v60 = vpack.c.bf16 %v3340_v22, %v3336_v20  ;;  %v3376_v20 = vld [vmem:[%s13980_s9 + $0x2e00] sm:$0xff] }
 0x604   :  { %7472 = vmatprep.subr.bf16.mxu1 %v7471_v9  ;;  %v3348_v9 = vld [vmem:[%s13980_s9 + $0x2d20] sm:$0xff]  ;;  %v7491_v14 = vpack.c.bf16 %v3351_v52, %v3347_v25  ;;  %v3383_v32 = vld [vmem:[%s13980_s9 + $0x2e38] sm:$0xff] }
 0x605   :  { %v3380_v22 = vld [vmem:[%s13980_s9 + $0x2e20] sm:$0xff]  ;;  %v3387_v25 = vld [vmem:[%s13980_s9 + $0x2e58] sm:$0xff] }
 0x606   :  { %6706 = vmatpush1.bf16.msra.mxu0 %v6705_v17  ;;  %v3355_v17 = vld [vmem:[%s13980_s9 + $0x2d58] sm:$0xff] }
 0x607   :  { %7474 = vmatpush1.bf16.msra.mxu1 %v7473_v40  ;;  %6708 = vmatprep.subr.bf16.mxu0 %v6707_v27  ;;  %v3359_v40 = vld [vmem:[%s13980_s9 + $0x2d78] sm:$0xff]  ;;  %v6725_v27 = vpack.c.bf16 %v3348_v9, %v3344_v13  ;;  %v3384_v13 = vld [vmem:[%s13980_s9 + $0x2e40] sm:$0xff] }
 0x608   :  { %7476 = vmatprep.subr.bf16.mxu1 %v7475_v45  ;;  %v3352_v45 = vld [vmem:[%s13980_s9 + $0x2d40] sm:$0xff]  ;;  %v7495_v47 = vpack.c.bf16 %v3359_v40, %v3355_v17  ;;  %v3391_v52 = vld [vmem:[%s13980_s9 + $0x2e78] sm:$0xff] }
 0x609   :  { %4237 = vmatmul.mubr.f32.vlgmr.msra.gmra.mrb[24].mxu0 %v1900_v44  ;;  %v3388_v9 = vld [vmem:[%s13980_s9 + $0x2e60] sm:$0xff]  ;;  %v3395_v17 = vld [vmem:[%s13980_s9 + $0x2e98] sm:$0xff] }
 0x60a   :  { %5089 = vmatmul.mubr.f32.vlgmr.msra.gmra.mrb[72].mxu1 %v1900_v44  ;;  %6710 = vmatpush1.bf16.msra.mxu0 %v6709_v38  ;;  %v3361_v38 = vld [vmem:[%s13980_s9 + $0x2d88] sm:$0xff]  ;;  %v3367_v44 = vld [vmem:[%s13980_s9 + $0x2db8] sm:$0xff] }
 0x60b   :  { %4307 = vmatprep.mubr.f32.mxu0 %v1903_v28  ;;  %7478 = vmatpush1.bf16.msra.mxu1 %v7477_v48  ;;  %v6729_v48 = vpack.c.bf16 %v3356_v34, %v3352_v45  ;;  %v6731_v51 = vpack.c.bf16 %v3365_v39, %v3361_v38  ;;  %v7499_v21 = vpack.c.bf16 %v3367_v44, %v3363_v53  ;;  %v3399_v40 = vld [vmem:[%s13980_s9 + $0x2eb8] sm:$0xff]  ;;  %v3392_v45 = vld [vmem:[%s13980_s9 + $0x2e80] sm:$0xff]  ;;  %v3401_v38 = vld [vmem:[%s13980_s9 + $0x2ec8] sm:$0xff] }
 0x60c   :  { %5159 = vmatprep.mubr.f32.mxu1 %v1903_v28  ;;  %6712 = vmatprep.subr.bf16.mxu0 %v6711_v0  ;;  %v3364_v0 = vld [vmem:[%s13980_s9 + $0x2da0] sm:$0xff]  ;;  %v3369_v28 = vld [vmem:[%s13980_s9 + $0x2dc8] sm:$0xff]  ;;  %v3403_v53 = vld [vmem:[%s13980_s9 + $0x2ed8] sm:$0xff] }
 0x60d   :  { %7480 = vmatprep.subr.bf16.mxu1 %v7479_v37  ;;  %v3373_v37 = vld [vmem:[%s13980_s9 + $0x2de8] sm:$0xff]  ;;  %v3396_v34 = vld [vmem:[%s13980_s9 + $0x2ea0] sm:$0xff]  ;;  %v3407_v44 = vld [vmem:[%s13980_s9 + $0x2ef8] sm:$0xff] }
 0x60e   :  { %6714 = vmatpush1.bf16.msra.mxu0 %v6713_v42  ;;  %v6733_v42 = vpack.c.bf16 %v3364_v0, %v3360_v10  ;;  %v3405_v39 = vld [vmem:[%s13980_s9 + $0x2ee8] sm:$0xff]  ;;  %v3400_v10 = vld [vmem:[%s13980_s9 + $0x2ec0] sm:$0xff] }
 0x60f   :  { %7482 = vmatpush1.bf16.msra.mxu1 %v7481_v35  ;;  %6716 = vmatprep.subr.bf16.mxu0 %v6715_v24  ;;  %v7501_v35 = vpack.c.bf16 %v3366_v36, %v3362_v33  ;;  %v6735_v24 = vpack.c.bf16 %v3373_v37, %v3369_v28  ;;  %v3404_v0 = vld [vmem:[%s13980_s9 + $0x2ee0] sm:$0xff]  ;;  %v3402_v33 = vld [vmem:[%s13980_s9 + $0x2ed0] sm:$0xff]  ;;  %v3409_v28 = vld [vmem:[%s13980_s9 + $0x2f08] sm:$0xff] }
 0x610   :  { %7484 = vmatprep.subr.bf16.mxu1 %v7483_v11  ;;  %v7503_v11 = vpack.c.bf16 %v3375_v7, %v3371_v63  ;;  %v3406_v36 = vld [vmem:[%s13980_s9 + $0x2ef0] sm:$0xff]  ;;  %v3413_v37 = vld [vmem:[%s13980_s9 + $0x2f28] sm:$0xff]  ;;  %v3411_v63 = vld [vmem:[%s13980_s9 + $0x2f18] sm:$0xff] }
 0x611   :  { %v3415_v7 = vld [vmem:[%s13980_s9 + $0x2f38] sm:$0xff] }
 0x612   :  { %6718 = vmatpush1.bf16.msra.mxu0 %v6717_v55  ;;  %v6737_v55 = vpack.c.bf16 %v3372_v46, %v3368_v6  ;;  %v3408_v6 = vld [vmem:[%s13980_s9 + $0x2f00] sm:$0xff] }
 0x613   :  { %7486 = vmatpush1.bf16.msra.mxu1 %v7485_v2  ;;  %6720 = vmatprep.subr.bf16.mxu0 %v6719_v8  ;;  %v7505_v2 = vpack.c.bf16 %v3374_v26, %v3370_v1  ;;  %v6739_v8 = vpack.c.bf16 %v3381_v41, %v3377_v15  ;;  %v3412_v46 = vld [vmem:[%s13980_s9 + $0x2f20] sm:$0xff]  ;;  %v3410_v1 = vld [vmem:[%s13980_s9 + $0x2f10] sm:$0xff]  ;;  %v3417_v15 = vld [vmem:[%s13980_s9 + $0x2f48] sm:$0xff] }
 0x614   :  { %7488 = vmatprep.subr.bf16.mxu1 %v7487_v49  ;;  %v7507_v49 = vpack.c.bf16 %v3383_v32, %v3379_v12  ;;  %v3414_v26 = vld [vmem:[%s13980_s9 + $0x2f30] sm:$0xff]  ;;  %v3421_v41 = vld [vmem:[%s13980_s9 + $0x2f68] sm:$0xff]  ;;  %v3419_v12 = vld [vmem:[%s13980_s9 + $0x2f58] sm:$0xff] }
 0x615   :  { %v3423_v32 = vld [vmem:[%s13980_s9 + $0x2f78] sm:$0xff] }
 0x616   :  { %6722 = vmatpush1.bf16.msra.mxu0 %v6721_v60  ;;  %v6741_v60 = vpack.c.bf16 %v3380_v22, %v3376_v20  ;;  %v3416_v20 = vld [vmem:[%s13980_s9 + $0x2f40] sm:$0xff] }
 0x617   :  { %7490 = vmatpush1.bf16.msra.mxu1 %v7489_v61  ;;  %6724 = vmatprep.subr.bf16.mxu0 %v6723_v4  ;;  %v7509_v61 = vpack.c.bf16 %v3382_v50, %v3378_v56  ;;  %v6743_v4 = vpack.c.bf16 %v3389_v62, %v3385_v19  ;;  %v3420_v22 = vld [vmem:[%s13980_s9 + $0x2f60] sm:$0xff]  ;;  %v3418_v56 = vld [vmem:[%s13980_s9 + $0x2f50] sm:$0xff]  ;;  %v3425_v19 = vld [vmem:[%s13980_s9 + $0x2f88] sm:$0xff] }
 0x618   :  { %7492 = vmatprep.subr.bf16.mxu1 %v7491_v14  ;;  %v7511_v14 = vpack.c.bf16 %v3391_v52, %v3387_v25  ;;  %v3422_v50 = vld [vmem:[%s13980_s9 + $0x2f70] sm:$0xff]  ;;  %v3429_v62 = vld [vmem:[%s13980_s9 + $0x2fa8] sm:$0xff]  ;;  %v3427_v25 = vld [vmem:[%s13980_s9 + $0x2f98] sm:$0xff] }
 0x619   :  { %v3431_v52 = vld [vmem:[%s13980_s9 + $0x2fb8] sm:$0xff] }
 0x61a   :  { %6726 = vmatpush1.bf16.msra.mxu0 %v6725_v27  ;;  %v6745_v27 = vpack.c.bf16 %v3388_v9, %v3384_v13  ;;  %v3424_v13 = vld [vmem:[%s13980_s9 + $0x2f80] sm:$0xff] }
 0x61b   :  { %7494 = vmatpush1.bf16.msra.mxu1 %v7493_v43  ;;  %6728 = vmatprep.subr.bf16.mxu0 %v6727_v23  ;;  %v7513_v43 = vpack.c.bf16 %v3390_v5, %v3386_v16  ;;  %v6747_v23 = vpack.c.bf16 %v3397_v58, %v3393_v30  ;;  %v3428_v9 = vld [vmem:[%s13980_s9 + $0x2fa0] sm:$0xff]  ;;  %v3426_v16 = vld [vmem:[%s13980_s9 + $0x2f90] sm:$0xff]  ;;  %v3433_v30 = vld [vmem:[%s13980_s9 + $0x2fc8] sm:$0xff] }
 0x61c   :  { %7496 = vmatprep.subr.bf16.mxu1 %v7495_v47  ;;  %v7515_v47 = vpack.c.bf16 %v3399_v40, %v3395_v17  ;;  %v3430_v5 = vld [vmem:[%s13980_s9 + $0x2fb0] sm:$0xff]  ;;  %v3437_v58 = vld [vmem:[%s13980_s9 + $0x2fe8] sm:$0xff]  ;;  %v3435_v17 = vld [vmem:[%s13980_s9 + $0x2fd8] sm:$0xff] }
 0x61d   :  { %v3439_v40 = vld [vmem:[%s13980_s9 + $0x2ff8] sm:$0xff] }
 0x61e   :  { %6730 = vmatpush1.bf16.msra.mxu0 %v6729_v48  ;;  %v6749_v48 = vpack.c.bf16 %v3396_v34, %v3392_v45  ;;  %v3432_v45 = vld [vmem:[%s13980_s9 + $0x2fc0] sm:$0xff] }
 0x61f   :  { %7498 = vmatpush1.bf16.msra.mxu1 %v7497_v54  ;;  %6732 = vmatprep.subr.bf16.mxu0 %v6731_v51  ;;  %v7517_v54 = vpack.c.bf16 %v3398_v29, %v3394_v18  ;;  %v6751_v51 = vpack.c.bf16 %v3405_v39, %v3401_v38  ;;  %v3436_v34 = vld [vmem:[%s13980_s9 + $0x2fe0] sm:$0xff]  ;;  %v3434_v18 = vld [vmem:[%s13980_s9 + $0x2fd0] sm:$0xff]  ;;  %v5171_v38 = vld [vmem:[%s13983_s11 + $0x8] sm:$0xff] }
 0x620   :  { %7500 = vmatprep.subr.bf16.mxu1 %v7499_v21  ;;  %v7519_v21 = vpack.c.bf16 %v3407_v44, %v3403_v53  ;;  %v3438_v29 = vld [vmem:[%s13980_s9 + $0x2ff0] sm:$0xff]  ;;  %v5173_v39 = vld [vmem:[%s13983_s11 + $0x18] sm:$0xff]  ;;  %v6769_v53 = vpack.c.bf16 %v3436_v34, %v3432_v45  ;;  %v5207_v45 = vld [vmem:[%s13983_s11 + $0x128] sm:$0xff] }
 0x621   :  { %v7537_v44 = vpack.c.bf16 %v3438_v29, %v3434_v18  ;;  %v5209_v34 = vld [vmem:[%s13983_s11 + $0x138] sm:$0xff]  ;;  %v5206_v29 = vld [vmem:[%s13983_s11 + $0x120] sm:$0xff] }
 0x622   :  { %6734 = vmatpush1.bf16.msra.mxu0 %v6733_v42  ;;  %v6753_v42 = vpack.c.bf16 %v3404_v0, %v3400_v10  ;;  %v5175_v10 = vld [vmem:[%s13983_s11 + $0x28] sm:$0xff]  ;;  %v5177_v0 = vld [vmem:[%s13983_s11 + $0x38] sm:$0xff] }
 0x623   :  { %7502 = vmatpush1.bf16.msra.mxu1 %v7501_v35  ;;  %6736 = vmatprep.subr.bf16.mxu0 %v6735_v24  ;;  %v7521_v35 = vpack.c.bf16 %v3406_v36, %v3402_v33  ;;  %v6755_v24 = vpack.c.bf16 %v3413_v37, %v3409_v28  ;;  %v7543_v36 = vpack.c.bf16 %v5177_v0, %v5175_v10  ;;  %v5174_v28 = vld [vmem:[%s13983_s11 + $0x20] sm:$0xff]  ;;  %v5176_v37 = vld [vmem:[%s13983_s11 + $0x30] sm:$0xff]  ;;  %v5215_v10 = vld [vmem:[%s13983_s11 + $0x168] sm:$0xff] }
 0x624   :  { %7504 = vmatprep.subr.bf16.mxu1 %v7503_v11  ;;  %v7523_v11 = vpack.c.bf16 %v3415_v7, %v3411_v63  ;;  %v5179_v63 = vld [vmem:[%s13983_s11 + $0x48] sm:$0xff]  ;;  %v5181_v7 = vld [vmem:[%s13983_s11 + $0x58] sm:$0xff] }
 0x625   :  { %v5217_v0 = vld [vmem:[%s13983_s11 + $0x178] sm:$0xff] }
 0x626   :  { %6738 = vmatpush1.bf16.msra.mxu0 %v6737_v55  ;;  %v6757_v55 = vpack.c.bf16 %v3412_v46, %v3408_v6  ;;  %v5183_v6 = vld [vmem:[%s13983_s11 + $0x68] sm:$0xff]  ;;  %v5185_v46 = vld [vmem:[%s13983_s11 + $0x78] sm:$0xff] }
 0x627   :  { %7506 = vmatpush1.bf16.msra.mxu1 %v7505_v2  ;;  %6740 = vmatprep.subr.bf16.mxu0 %v6739_v8  ;;  %v7525_v2 = vpack.c.bf16 %v3414_v26, %v3410_v1  ;;  %v6759_v8 = vpack.c.bf16 %v3421_v41, %v3417_v15  ;;  %v5182_v26 = vld [vmem:[%s13983_s11 + $0x60] sm:$0xff]  ;;  %v5184_v15 = vld [vmem:[%s13983_s11 + $0x70] sm:$0xff]  ;;  %v5187_v41 = vld [vmem:[%s13983_s11 + $0x88] sm:$0xff] }
 0x628   :  { %7508 = vmatprep.subr.bf16.mxu1 %v7507_v49  ;;  %v7527_v49 = vpack.c.bf16 %v3423_v32, %v3419_v12  ;;  %v5189_v12 = vld [vmem:[%s13983_s11 + $0x98] sm:$0xff]  ;;  %v7553_v32 = vpack.c.bf16 %v5184_v15, %v5182_v26  ;;  %v5224_v26 = vld [vmem:[%s13983_s11 + $0x1b0] sm:$0xff]  ;;  %v5227_v15 = vld [vmem:[%s13983_s11 + $0x1c8] sm:$0xff] }
 0x62a   :  { %6742 = vmatpush1.bf16.msra.mxu0 %v6741_v60  ;;  %v6761_v60 = vpack.c.bf16 %v3420_v22, %v3416_v20  ;;  %v5191_v20 = vld [vmem:[%s13983_s11 + $0xa8] sm:$0xff]  ;;  %v5193_v22 = vld [vmem:[%s13983_s11 + $0xb8] sm:$0xff] }
 0x62b   :  { %7510 = vmatpush1.bf16.msra.mxu1 %v7509_v61  ;;  %6744 = vmatprep.subr.bf16.mxu0 %v6743_v4  ;;  %v7529_v61 = vpack.c.bf16 %v3422_v50, %v3418_v56  ;;  %v6763_v4 = vpack.c.bf16 %v3429_v62, %v3425_v19  ;;  %v5190_v50 = vld [vmem:[%s13983_s11 + $0xa0] sm:$0xff]  ;;  %v5192_v19 = vld [vmem:[%s13983_s11 + $0xb0] sm:$0xff]  ;;  %v5195_v62 = vld [vmem:[%s13983_s11 + $0xc8] sm:$0xff] }
 0x62c   :  { %7512 = vmatprep.subr.bf16.mxu1 %v7511_v14  ;;  %v7531_v14 = vpack.c.bf16 %v3431_v52, %v3427_v25  ;;  %v5197_v25 = vld [vmem:[%s13983_s11 + $0xd8] sm:$0xff]  ;;  %v7561_v52 = vpack.c.bf16 %v5192_v19, %v5190_v50  ;;  %v5232_v50 = vld [vmem:[%s13983_s11 + $0x1f0] sm:$0xff] }
 0x62e   :  { %6746 = vmatpush1.bf16.msra.mxu0 %v6745_v27  ;;  %v6765_v27 = vpack.c.bf16 %v3428_v9, %v3424_v13  ;;  %v5199_v13 = vld [vmem:[%s13983_s11 + $0xe8] sm:$0xff]  ;;  %v5201_v9 = vld [vmem:[%s13983_s11 + $0xf8] sm:$0xff] }
 0x62f   :  { %7514 = vmatpush1.bf16.msra.mxu1 %v7513_v43  ;;  %6748 = vmatprep.subr.bf16.mxu0 %v6747_v23  ;;  %v7533_v43 = vpack.c.bf16 %v3430_v5, %v3426_v16  ;;  %v6767_v23 = vpack.c.bf16 %v3437_v58, %v3433_v30  ;;  %v5198_v5 = vld [vmem:[%s13983_s11 + $0xe0] sm:$0xff]  ;;  %v5200_v30 = vld [vmem:[%s13983_s11 + $0xf0] sm:$0xff]  ;;  %v5203_v58 = vld [vmem:[%s13983_s11 + $0x108] sm:$0xff] }
 0x630   :  { %7516 = vmatprep.subr.bf16.mxu1 %v7515_v47  ;;  %v7535_v47 = vpack.c.bf16 %v3439_v40, %v3435_v17  ;;  %v5205_v17 = vld [vmem:[%s13983_s11 + $0x118] sm:$0xff]  ;;  %v7569_v40 = vpack.c.bf16 %v5200_v30, %v5198_v5 }
 0x632   :  { %6750 = vmatpush1.bf16.msra.mxu0 %v6749_v48  ;;  %v7539_v48 = vpack.c.bf16 %v5173_v39, %v5171_v38  ;;  %v5208_v38 = vld [vmem:[%s13983_s11 + $0x130] sm:$0xff]  ;;  %v5211_v39 = vld [vmem:[%s13983_s11 + $0x148] sm:$0xff] }
 0x633   :  { %7518 = vmatpush1.bf16.msra.mxu1 %v7517_v54  ;;  %6752 = vmatprep.subr.bf16.mxu0 %v6751_v51  ;;  %v5170_v54 = vld [vmem:[%s13983_s11] sm:$0xff]  ;;  %v5172_v51 = vld [vmem:[%s13983_s11 + $0x10] sm:$0xff] }
 0x634   :  { %7520 = vmatprep.subr.bf16.mxu1 %v7519_v21  ;;  %v7541_v33 = vpack.c.bf16 %v5172_v51, %v5170_v54  ;;  %v1902_v21 = vmax.f32 %v9594_v57, 0.0  ;;  %v7545_v57 = vpack.c.bf16 %v5176_v37, %v5174_v28  ;;  %v5210_v54 = vld [vmem:[%s13983_s11 + $0x140] sm:$0xff]  ;;  %v5212_v51 = vld [vmem:[%s13983_s11 + $0x150] sm:$0xff]  ;;  %v5219_v37 = vld [vmem:[%s13983_s11 + $0x188] sm:$0xff] }
 0x635   :  { %v5216_v28 = vld [vmem:[%s13983_s11 + $0x170] sm:$0xff] }
 0x636   :  { %6754 = vmatpush1.bf16.msra.mxu0 %v6753_v42  ;;  %v7547_v42 = vpack.c.bf16 %v5181_v7, %v5179_v63  ;;  %v5221_v63 = vld [vmem:[%s13983_s11 + $0x198] sm:$0xff] }
 0x637   :  { %7522 = vmatpush1.bf16.msra.mxu1 %v7521_v35  ;;  %6756 = vmatprep.subr.bf16.mxu0 %v6755_v24  ;;  %v5178_v35 = vld [vmem:[%s13983_s11 + $0x40] sm:$0xff]  ;;  %v5180_v24 = vld [vmem:[%s13983_s11 + $0x50] sm:$0xff] }
 0x638   :  { %7524 = vmatprep.subr.bf16.mxu1 %v7523_v11  ;;  %v7549_v1 = vpack.c.bf16 %v5180_v24, %v5178_v35  ;;  %v7551_v11 = vpack.c.bf16 %v5185_v46, %v5183_v6  ;;  %v5220_v35 = vld [vmem:[%s13983_s11 + $0x190] sm:$0xff]  ;;  %v5223_v24 = vld [vmem:[%s13983_s11 + $0x1a8] sm:$0xff]  ;;  %v5225_v6 = vld [vmem:[%s13983_s11 + $0x1b8] sm:$0xff] }
 0x63a   :  { %6758 = vmatpush1.bf16.msra.mxu0 %v6757_v55  ;;  %v7555_v55 = vpack.c.bf16 %v5189_v12, %v5187_v41  ;;  %v5229_v41 = vld [vmem:[%s13983_s11 + $0x1d8] sm:$0xff] }
 0x63b   :  { %7526 = vmatpush1.bf16.msra.mxu1 %v7525_v2  ;;  %6760 = vmatprep.subr.bf16.mxu0 %v6759_v8  ;;  %v5186_v2 = vld [vmem:[%s13983_s11 + $0x80] sm:$0xff]  ;;  %v5188_v8 = vld [vmem:[%s13983_s11 + $0x90] sm:$0xff] }
 0x63c   :  { %7528 = vmatprep.subr.bf16.mxu1 %v7527_v49  ;;  %v7557_v56 = vpack.c.bf16 %v5188_v8, %v5186_v2  ;;  %v7559_v49 = vpack.c.bf16 %v5193_v22, %v5191_v20  ;;  %v5228_v2 = vld [vmem:[%s13983_s11 + $0x1d0] sm:$0xff]  ;;  %v5231_v20 = vld [vmem:[%s13983_s11 + $0x1e8] sm:$0xff]  ;;  %v5233_v22 = vld [vmem:[%s13983_s11 + $0x1f8] sm:$0xff] }
 0x63e   :  { %6762 = vmatpush1.bf16.msra.mxu0 %v6761_v60  ;;  %v7563_v60 = vpack.c.bf16 %v5197_v25, %v5195_v62  ;;  %v5235_v62 = vld [vmem:[%s13983_s11 + $0x208] sm:$0xff]  ;;  %v5237_v25 = vld [vmem:[%s13983_s11 + $0x218] sm:$0xff] }
 0x63f   :  { %7530 = vmatpush1.bf16.msra.mxu1 %v7529_v61  ;;  %6764 = vmatprep.subr.bf16.mxu0 %v6763_v4  ;;  %v5194_v61 = vld [vmem:[%s13983_s11 + $0xc0] sm:$0xff]  ;;  %v5196_v4 = vld [vmem:[%s13983_s11 + $0xd0] sm:$0xff] }
 0x640   :  { %7532 = vmatprep.subr.bf16.mxu1 %v7531_v14  ;;  %v7565_v16 = vpack.c.bf16 %v5196_v4, %v5194_v61  ;;  %v7567_v14 = vpack.c.bf16 %v5201_v9, %v5199_v13  ;;  %v3456_v61 = vsub.s32 3, %v9246_v59 }
 0x642   :  { %6766 = vmatpush1.bf16.msra.mxu0 %v6765_v27  ;;  %v7571_v27 = vpack.c.bf16 %v5205_v17, %v5203_v58  ;;  %v5234_v58 = vld [vmem:[%s13983_s11 + $0x200] sm:$0xff]  ;;  %v5236_v17 = vld [vmem:[%s13983_s11 + $0x210] sm:$0xff] }
 0x643   :  { %7534 = vmatpush1.bf16.msra.mxu1 %v7533_v43  ;;  %6768 = vmatprep.subr.bf16.mxu0 %v6767_v23  ;;  %v5202_v43 = vld [vmem:[%s13983_s11 + $0x100] sm:$0xff]  ;;  %v5204_v23 = vld [vmem:[%s13983_s11 + $0x110] sm:$0xff] }
 0x644   :  { %7536 = vmatprep.subr.bf16.mxu1 %v7535_v47  ;;  %v7573_v18 = vpack.c.bf16 %v5204_v23, %v5202_v43  ;;  %v7575_v47 = vpack.c.bf16 %v5209_v34, %v5207_v45  ;;  %v5239_v43 = vld [vmem:[%s13983_s11 + $0x228] sm:$0xff]  ;;  %v5241_v23 = vld [vmem:[%s13983_s11 + $0x238] sm:$0xff] }
 0x646   :  { %6770 = vmatpush1.bf16.msra.mxu0 %v6769_v53  ;;  %v5213_v53 = vld [vmem:[%s13983_s11 + $0x158] sm:$0xff] }
 0x647   :  { %7538 = vmatpush1.bf16.msra.mxu1 %v7537_v44  ;;  %7540 = vmatprep.subr.bf16.mxu0 %v7539_v48  ;;  %v7577_v44 = vpack.c.bf16 %v5208_v38, %v5206_v29  ;;  %v7579_v48 = vpack.c.bf16 %v5213_v53, %v5211_v39  ;;  %v7607_v29 = vpack.c.bf16 %v5241_v23, %v5239_v43  ;;  %v5238_v38 = vld [vmem:[%s13983_s11 + $0x220] sm:$0xff]  ;;  %v5240_v39 = vld [vmem:[%s13983_s11 + $0x230] sm:$0xff]  ;;  %v5277_v43 = vld [vmem:[%s13983_s11 + $0x358] sm:$0xff] }
 0x649   :  { %4308 = vmatmul.mubr.f32.vlgmr.msra.gmra.mrb[24].mxu0 %v1902_v21 }
 0x64a   :  { %5160 = vmatmul.mubr.f32.vlgmr.msra.gmra.mrb[72].mxu1 %v1902_v21  ;;  %7542 = vmatpush1.bf16.msra.mxu0 %v7541_v33  ;;  %v7581_v33 = vpack.c.bf16 %v5212_v51, %v5210_v54  ;;  %v7583_v21 = vpack.c.bf16 %v5217_v0, %v5215_v10  ;;  %v7609_v54 = vpack.c.bf16 %v5240_v39, %v5238_v38  ;;  %v5242_v10 = vld [vmem:[%s13983_s11 + $0x240] sm:$0xff]  ;;  %v5244_v0 = vld [vmem:[%s13983_s11 + $0x250] sm:$0xff] }
 0x64b   :  { %7544 = vmatprep.subr.bf16.mxu0 %v7543_v36  ;;  %v5214_v36 = vld [vmem:[%s13983_s11 + $0x160] sm:$0xff] }
 0x64c   :  { %v7585_v7 = vpack.c.bf16 %v5216_v28, %v5214_v36  ;;  %v7613_v36 = vpack.c.bf16 %v5244_v0, %v5242_v10  ;;  %v5282_v0 = vld [vmem:[%s13983_s11 + $0x380] sm:$0xff] }
 0x64e   :  { %7546 = vmatpush1.bf16.msra.mxu0 %v7545_v57  ;;  %v7587_v57 = vpack.c.bf16 %v5221_v63, %v5219_v37  ;;  %v5246_v37 = vld [vmem:[%s13983_s11 + $0x260] sm:$0xff]  ;;  %v5248_v63 = vld [vmem:[%s13983_s11 + $0x270] sm:$0xff] }
 0x64f   :  { %7548 = vmatprep.subr.bf16.mxu0 %v7547_v42  ;;  %v5218_v42 = vld [vmem:[%s13983_s11 + $0x180] sm:$0xff] }
 0x650   :  { %v7589_v46 = vpack.c.bf16 %v5220_v35, %v5218_v42  ;;  %v7617_v42 = vpack.c.bf16 %v5248_v63, %v5246_v37  ;;  %v5286_v63 = vld [vmem:[%s13983_s11 + $0x3a0] sm:$0xff] }
 0x652   :  { %7550 = vmatpush1.bf16.msra.mxu0 %v7549_v1  ;;  %v7591_v1 = vpack.c.bf16 %v5225_v6, %v5223_v24  ;;  %v5250_v24 = vld [vmem:[%s13983_s11 + $0x280] sm:$0xff]  ;;  %v5252_v6 = vld [vmem:[%s13983_s11 + $0x290] sm:$0xff] }
 0x653   :  { %7552 = vmatprep.subr.bf16.mxu0 %v7551_v11  ;;  %v5222_v11 = vld [vmem:[%s13983_s11 + $0x1a0] sm:$0xff] }
 0x654   :  { %v7593_v12 = vpack.c.bf16 %v5224_v26, %v5222_v11  ;;  %v7621_v11 = vpack.c.bf16 %v5252_v6, %v5250_v24  ;;  %v3452_v24 = vsub.s32 2, %v9246_v59 }
 0x656   :  { %7554 = vmatpush1.bf16.msra.mxu0 %v7553_v32  ;;  %v7595_v32 = vpack.c.bf16 %v5229_v41, %v5227_v15  ;;  %v5254_v15 = vld [vmem:[%s13983_s11 + $0x2a0] sm:$0xff]  ;;  %v5256_v41 = vld [vmem:[%s13983_s11 + $0x2b0] sm:$0xff] }
 0x657   :  { %7556 = vmatprep.subr.bf16.mxu0 %v7555_v55  ;;  %v5226_v55 = vld [vmem:[%s13983_s11 + $0x1c0] sm:$0xff] }
 0x658   :  { %v7597_v8 = vpack.c.bf16 %v5228_v2, %v5226_v55  ;;  %v7625_v55 = vpack.c.bf16 %v5256_v41, %v5254_v15 }
 0x65a   :  { %7558 = vmatpush1.bf16.msra.mxu0 %v7557_v56  ;;  %v7599_v56 = vpack.c.bf16 %v5233_v22, %v5231_v20  ;;  %v5260_v20 = vld [vmem:[%s13983_s11 + $0x2d0] sm:$0xff]  ;;  %v5263_v22 = vld [vmem:[%s13983_s11 + $0x2e8] sm:$0xff] }
 0x65b   :  { %7560 = vmatprep.subr.bf16.mxu0 %v7559_v49  ;;  %v5230_v49 = vld [vmem:[%s13983_s11 + $0x1e0] sm:$0xff] }
 0x65c   :  { %v7601_v19 = vpack.c.bf16 %v5232_v50, %v5230_v49 }
 0x65e   :  { %7562 = vmatpush1.bf16.msra.mxu0 %v7561_v52  ;;  %v7603_v52 = vpack.c.bf16 %v5237_v25, %v5235_v62  ;;  %v5264_v62 = vld [vmem:[%s13983_s11 + $0x2f0] sm:$0xff]  ;;  %v5267_v25 = vld [vmem:[%s13983_s11 + $0x308] sm:$0xff] }
 0x65f   :  { %7564 = vmatprep.subr.bf16.mxu0 %v7563_v60  ;;  %v13763_v60 = vld [vmem:[%s13984_s10] sm:$0xf] }
 0x660   :  { %v3445_v4 = vrot.slane %v13763_v60, %v9249_v31  ;;  %v3449_v13 = vrot.slane %v13763_v60, %v9255_v3  ;;  %v3457_v9 = vrot.slane %v13763_v60, %v3456_v61  ;;  %v3453_v15 = vrot.slane %v13763_v60, %v3452_v24  ;;  %v5298_v60 = vld [vmem:[%s13985_s12] sm:$0x3] }
 0x662   :  { %7566 = vmatpush1.bf16.msra.mxu0 %v7565_v16 }
 0x663   :  { %7568 = vmatprep.subr.bf16.mxu0 %v7567_v14 }
 0x666   :  { %7570 = vmatpush1.bf16.msra.mxu0 %v7569_v40 }
 0x667   :  { %7572 = vmatprep.subr.bf16.mxu0 %v7571_v27 }
 0x66a   :  { %7574 = vmatpush1.bf16.msra.mxu0 %v7573_v18  ;;  %v7605_v18 = vpack.c.bf16 %v5236_v17, %v5234_v58  ;;  %v5270_v17 = vld [vmem:[%s13983_s11 + $0x320] sm:$0xff] }
 0x66b   :  { %7576 = vmatprep.subr.bf16.mxu0 %v7575_v47 }
 0x66e   :  { %7578 = vmatpush1.bf16.msra.mxu0 %v7577_v44  ;;  %v5243_v44 = vld [vmem:[%s13983_s11 + $0x248] sm:$0xff] }
 0x66f   :  { %7580 = vmatprep.subr.bf16.mxu0 %v7579_v48  ;;  %v5245_v48 = vld [vmem:[%s13983_s11 + $0x258] sm:$0xff] }
 0x670   :  { %v7611_v51 = vpack.c.bf16 %v5245_v48, %v5243_v44  ;;  %v5280_v44 = vld [vmem:[%s13983_s11 + $0x370] sm:$0xff]  ;;  %v5283_v48 = vld [vmem:[%s13983_s11 + $0x388] sm:$0xff] }
 0x672   :  { %7582 = vmatpush1.bf16.msra.mxu0 %v7581_v33  ;;  %v5247_v33 = vld [vmem:[%s13983_s11 + $0x268] sm:$0xff] }
 0x673   :  { %7584 = vmatprep.subr.bf16.mxu0 %v7583_v21  ;;  %v5249_v21 = vld [vmem:[%s13983_s11 + $0x278] sm:$0xff] }
 0x674   :  { %v7615_v28 = vpack.c.bf16 %v5249_v21, %v5247_v33  ;;  %v5284_v33 = vld [vmem:[%s13983_s11 + $0x390] sm:$0xff]  ;;  %v5287_v21 = vld [vmem:[%s13983_s11 + $0x3a8] sm:$0xff] }
 0x676   :  { %7586 = vmatpush1.bf16.msra.mxu0 %v7585_v7  ;;  %v5251_v7 = vld [vmem:[%s13983_s11 + $0x288] sm:$0xff] }
 0x677   :  { %7588 = vmatprep.subr.bf16.mxu0 %v7587_v57  ;;  %v5253_v57 = vld [vmem:[%s13983_s11 + $0x298] sm:$0xff] }
 0x678   :  { %v7619_v35 = vpack.c.bf16 %v5253_v57, %v5251_v7  ;;  %v5288_v7 = vld [vmem:[%s13983_s11 + $0x3b0] sm:$0xff]  ;;  %v5291_v57 = vld [vmem:[%s13983_s11 + $0x3c8] sm:$0xff] }
 0x67a   :  { %7590 = vmatpush1.bf16.msra.mxu0 %v7589_v46  ;;  %v5255_v46 = vld [vmem:[%s13983_s11 + $0x2a8] sm:$0xff] }
 0x67b   :  { %7592 = vmatprep.subr.bf16.mxu0 %v7591_v1  ;;  %v5257_v1 = vld [vmem:[%s13983_s11 + $0x2b8] sm:$0xff] }
 0x67c   :  { %v7623_v26 = vpack.c.bf16 %v5257_v1, %v5255_v46  ;;  %v5290_v46 = vld [vmem:[%s13983_s11 + $0x3c0] sm:$0xff]  ;;  %v5292_v1 = vld [vmem:[%s13983_s11 + $0x3d0] sm:$0xff] }
 0x67d   :  { %v7661_v59 = vpack.c.bf16 %v5292_v1, %v5290_v46 }
 0x67e   :  { %7594 = vmatpush1.bf16.msra.mxu0 %v7593_v12  ;;  %v5259_v12 = vld [vmem:[%s13983_s11 + $0x2c8] sm:$0xff] }
 0x67f   :  { %7596 = vmatprep.subr.bf16.mxu0 %v7595_v32  ;;  %v5261_v32 = vld [vmem:[%s13983_s11 + $0x2d8] sm:$0xff] }
 0x680   :  { %v7627_v2 = vpack.c.bf16 %v5261_v32, %v5259_v12  ;;  %v5294_v12 = vld [vmem:[%s13983_s11 + $0x3e0] sm:$0xff]  ;;  %v5296_v32 = vld [vmem:[%s13983_s11 + $0x3f0] sm:$0xff] }
 0x682   :  { %7598 = vmatpush1.bf16.msra.mxu0 %v7597_v8  ;;  %v5258_v8 = vld [vmem:[%s13983_s11 + $0x2c0] sm:$0xff] }
 0x683   :  { %7600 = vmatprep.subr.bf16.mxu0 %v7599_v56  ;;  %v5265_v56 = vld [vmem:[%s13983_s11 + $0x2f8] sm:$0xff]  ;;  %v7629_v49 = vpack.c.bf16 %v5260_v20, %v5258_v8  ;;  %v5303_v20 = vrot.slane %v5298_v60, %v9249_v31 }
 0x684   :  { %v7631_v50 = vpack.c.bf16 %v5265_v56, %v5263_v22  ;;  %v5307_v22 = vrot.slane %v5298_v60, %v9255_v3 }
 0x686   :  { %7602 = vmatpush1.bf16.msra.mxu0 %v7601_v19  ;;  %v5262_v19 = vld [vmem:[%s13983_s11 + $0x2e0] sm:$0xff] }
 0x687   :  { %7604 = vmatprep.subr.bf16.mxu0 %v7603_v52  ;;  %v5269_v52 = vld [vmem:[%s13983_s11 + $0x318] sm:$0xff]  ;;  %v7633_v61 = vpack.c.bf16 %v5264_v62, %v5262_v19 }
 0x71c   :  { %v4309_v16 = vpop.f32.mrb[24].mxu0 }
 0x71d   :  { %v7715_v14 = vadd.f32 %v4309_v16, %v3445_v4  ;;  %v13771_v5 = vpop.f32.mrb[72].mxu1  ;;  %v4311_v30 = vpop.f32.mrb[25].mxu0  ;;  %v7635_v4 = vpack.c.bf16 %v5269_v52, %v5267_v25  ;;  %v5271_v16 = vld [vmem:[%s13983_s11 + $0x328] sm:$0xff] }
 0x71e   :  { %v7716_v40 = vadd.f32 %v4311_v30, %v3449_v13  ;;  %v5163_v27 = vpop.f32.mrb[73].mxu1  ;;  %v5266_v13 = vld [vmem:[%s13983_s11 + $0x300] sm:$0xff] }
 0x71f   :  { %v7718_v45 = vadd.f32 %v5163_v27, %v3457_v9  ;;  %v5166_v47 = vmax.f32 %v7715_v14, 0.0  ;;  %v5268_v9 = vld [vmem:[%s13983_s11 + $0x310] sm:$0xff]  ;;  %v5273_v14 = vld [vmem:[%s13983_s11 + $0x338] sm:$0xff]  ;;  %v5275_v27 = vld [vmem:[%s13983_s11 + $0x348] sm:$0xff] }
 0x720   :  { %v5167_v34 = vmax.f32 %v7716_v40, 0.0  ;;  %v7637_v30 = vpack.c.bf16 %v5268_v9, %v5266_v13  ;;  %v7639_v58 = vpack.c.bf16 %v5273_v14, %v5271_v16  ;;  %v5272_v40 = vld [vmem:[%s13983_s11 + $0x330] sm:$0xff] }
 0x721   :  { %v5169_v53 = vmax.f32 %v7718_v45, 0.0  ;;  %v7641_v23 = vpack.c.bf16 %v5272_v40, %v5270_v17  ;;  %v7643_v45 = vpack.c.bf16 %v5277_v43, %v5275_v27 }
 0x722   :  { %5374 = vmatprep.mubr.f32.mxu0 %v5167_v34  ;;  %v5274_v34 = vld [vmem:[%s13983_s11 + $0x340] sm:$0xff] }
 0x723   :  { %5375 = vmatmul.mubr.f32.vlgmr.msra.gmra.mrb[26].mxu0 %v5166_v47  ;;  %v5279_v47 = vld [vmem:[%s13983_s11 + $0x368] sm:$0xff] }
 0x724   :  { %7606 = vmatpush1.bf16.msra.mxu0 %v7605_v18  ;;  %5445 = vmatprep.mubr.f32.mxu0 %v5169_v53  ;;  %v5276_v18 = vld [vmem:[%s13983_s11 + $0x350] sm:$0xff]  ;;  %v5278_v53 = vld [vmem:[%s13983_s11 + $0x360] sm:$0xff] }
 0x725   :  { %7608 = vmatprep.subr.bf16.mxu0 %v7607_v29  ;;  %v5281_v29 = vld [vmem:[%s13983_s11 + $0x378] sm:$0xff]  ;;  %v7645_v38 = vpack.c.bf16 %v5276_v18, %v5274_v34 }
 0x726   :  { %v7647_v39 = vpack.c.bf16 %v5281_v29, %v5279_v47 }
 0x728   :  { %7610 = vmatpush1.bf16.msra.mxu0 %v7609_v54  ;;  %v5285_v54 = vld [vmem:[%s13983_s11 + $0x398] sm:$0xff] }
 0x729   :  { %7612 = vmatprep.subr.bf16.mxu0 %v7611_v51  ;;  %v7649_v51 = vpack.c.bf16 %v5280_v44, %v5278_v53  ;;  %v7651_v10 = vpack.c.bf16 %v5285_v54, %v5283_v48 }
 0x72c   :  { %7614 = vmatpush1.bf16.msra.mxu0 %v7613_v36  ;;  %v5289_v36 = vld [vmem:[%s13983_s11 + $0x3b8] sm:$0xff] }
 0x72d   :  { %7616 = vmatprep.subr.bf16.mxu0 %v7615_v28  ;;  %v7653_v28 = vpack.c.bf16 %v5284_v33, %v5282_v0  ;;  %v7655_v37 = vpack.c.bf16 %v5289_v36, %v5287_v21 }
 0x730   :  { %7618 = vmatpush1.bf16.msra.mxu0 %v7617_v42  ;;  %v5293_v42 = vld [vmem:[%s13983_s11 + $0x3d8] sm:$0xff] }
 0x731   :  { %7620 = vmatprep.subr.bf16.mxu0 %v7619_v35  ;;  %v7657_v35 = vpack.c.bf16 %v5288_v7, %v5286_v63  ;;  %v7659_v6 = vpack.c.bf16 %v5293_v42, %v5291_v57 }
 0x734   :  { %7622 = vmatpush1.bf16.msra.mxu0 %v7621_v11  ;;  %v5295_v11 = vld [vmem:[%s13983_s11 + $0x3e8] sm:$0xff] }
 0x735   :  { %7624 = vmatprep.subr.bf16.mxu0 %v7623_v26  ;;  %v5297_v26 = vld [vmem:[%s13983_s11 + $0x3f8] sm:$0xff] }
 0x736   :  { %v7663_v41 = vpack.c.bf16 %v5297_v26, %v5295_v11 }
 0x738   :  { %7626 = vmatpush1.bf16.msra.mxu0 %v7625_v55  ;;  %v7665_v55 = vpack.c.bf16 %v5296_v32, %v5294_v12 }
 0x739   :  { %7628 = vmatprep.subr.bf16.mxu0 %v7627_v2  ;;  %v7717_v2 = vadd.f32 %v13771_v5, %v3453_v15 }
 0x73b   :  { %v5168_v8 = vmax.f32 %v7717_v2, 0.0 }
 0x73c   :  { %7630 = vmatpush1.bf16.msra.mxu0 %v7629_v49 }
 0x73d   :  { %7632 = vmatprep.subr.bf16.mxu0 %v7631_v50 }
 0x740   :  { %7634 = vmatpush1.bf16.msra.mxu0 %v7633_v61 }
 0x741   :  { %7636 = vmatprep.subr.bf16.mxu0 %v7635_v4 }
 0x744   :  { %7638 = vmatpush1.bf16.msra.mxu0 %v7637_v30 }
 0x745   :  { %7640 = vmatprep.subr.bf16.mxu0 %v7639_v58 }
 0x748   :  { %7642 = vmatpush1.bf16.msra.mxu0 %v7641_v23 }
 0x749   :  { %7644 = vmatprep.subr.bf16.mxu0 %v7643_v45 }
 0x74c   :  { %7646 = vmatpush1.bf16.msra.mxu0 %v7645_v38 }
 0x74d   :  { %7648 = vmatprep.subr.bf16.mxu0 %v7647_v39 }
 0x750   :  { %7650 = vmatpush1.bf16.msra.mxu0 %v7649_v51 }
 0x751   :  { %7652 = vmatprep.subr.bf16.mxu0 %v7651_v10 }
 0x754   :  { %7654 = vmatpush1.bf16.msra.mxu0 %v7653_v28 }
 0x755   :  { %7656 = vmatprep.subr.bf16.mxu0 %v7655_v37 }
 0x758   :  { %7658 = vmatpush1.bf16.msra.mxu0 %v7657_v35 }
 0x759   :  { %7660 = vmatprep.subr.bf16.mxu0 %v7659_v6 }
 0x75c   :  { %7662 = vmatpush1.bf16.msra.mxu0 %v7661_v59 }
 0x75d   :  { %7664 = vmatprep.subr.bf16.mxu0 %v7663_v41 }
 0x760   :  { %7666 = vmatpush1.bf16.msra.mxu0 %v7665_v55 }
 0x763   :  { %5446 = vmatmul.mubr.f32.vlgmr.msra.gmra.mrb[26].mxu0 %v5168_v8 }
 0x836   :  { %v5447_v56 = vpop.f32.mrb[26].mxu0 }
 0x837   :  { %v7719_v49 = vadd.f32 %v5447_v56, %v5303_v20  ;;  %v5449_v50 = vpop.f32.mrb[27].mxu0 }
 0x838   :  { %v7720_v19 = vadd.f32 %v5449_v50, %v5307_v22 }
 0x839   :  { %v5452_v62 = vmax.f32 %v7719_v49, 0.0 }
 0x83a   :  { %v5453_v25 = vmax.f32 %v7720_v19, 0.0 }
 0x83b   :  { %5454 = vst [vmem:[%s13986_s13] sm:$0xff] %v5452_v62 }
 0x83c   :  { %5455 = vst [vmem:[%s13986_s13 + $0x8] sm:$0xff] %v5453_v25 }

</bundles_post_ra>
